<compile_context>
chip_gen: v7x
topology: tpu7x:2x2x1
jax: 0.10.0
libtpu: 0.0.40
codegen_flags: <defaults>
</compile_context>

<pallas_src>
import functools

import numpy as np
import jax
import jax.numpy as jnp
from jax.experimental import pallas as pl
from jax.experimental.pallas import tpu as pltpu

_NEG_LARGE = -1e30  # finite "minus infinity" for the softmax mask (avoids NaN on all-pad rows)


# --------------------------------------------------------------------------- kernel

def attn_decoder_qa_kernel(tanh_dtype,
                           p_ref, q_ref, mask_ref, emask_ref,
                           w_ap_ref, b_ap_ref, w_q_ref, b_q_ref,
                           w_a2_ref, b_a2_ref,
                           w_1p_ref, b_1p_ref,
                           w_2_ref, b_2_ref,
                           attn_ref, pred_ref):
    f32, bf16 = jnp.float32, jnp.bfloat16

    Pf = p_ref[...]                      # (TB, T, H) f32 — kept f32 for the context sum
    Pb = Pf.astype(bf16)                 # in-kernel bf16 cast (hides under the DMA)
    Qb = q_ref[...].astype(bf16)         # (TB, H)
    TB, T, H = Pf.shape
    K = w_ap_ref.shape[1]                # H // 2

    # ---- fused Q-side projection: one (TB,H)x(H,2K) MXU matmul, sliced into qh / dq ----
    qproj = jnp.dot(Qb, w_q_ref[...], preferred_element_type=f32) + b_q_ref[...]
    qh = qproj[:, :K]                    # attention Linear_1q(Q) + b
    dq = qproj[:, K:]                    # decoder   linear_1q(Q) + b

    # ---- attention: scores = Linear_2(tanh(Linear_1p(P) + Linear_1q(Q))) ----
    ph = jnp.dot(Pb.reshape(TB * T, H), w_ap_ref[...],
                 preferred_element_type=f32).reshape(TB, T, K) + b_ap_ref[...]
    # tanh in bf16 on v6e/v7x (bf16 EUP), f32 on v5e — chosen statically in the wrapper
    ah = jnp.tanh((ph + qh[:, None, :]).astype(tanh_dtype))                 # (TB, T, K)

    # (K,1) matmul replaced by a fused VPU multiply + lane reduce (f32 accumulation)
    scores = jnp.sum(ah * w_a2_ref[...], axis=-1, dtype=f32) + b_a2_ref[...]  # (TB, T)
    scores = jnp.where(mask_ref[...] == 1, _NEG_LARGE, scores)

    # masked softmax over T; divide goes to the EUP via approx reciprocal
    # (rows sum to 1 only to ~1e-3 relative — fine for inference)
    m = jnp.max(scores, axis=-1, keepdims=True)
    e = jnp.exp(scores - m)
    attn = e * pl.reciprocal(jnp.sum(e, axis=-1, keepdims=True), approx=True)  # (TB, T) f32
    attn_ref[...] = attn

    # ---- context = sum_t attn[b,t] * P[b,t,:] : f32 VPU multiply + sublane reduce ----
    # (M=1 MXU einsum replaced; XLUs are idle here, MXU stays free for the ph matmul)
    context = jnp.sum(Pf * attn[:, :, None], axis=1)                       # (TB, H) f32

    # ---- decode: linear_2(tanh(linear_1p(ctx) + linear_1q(Q))), entity mask ----
    dh = jnp.tanh(
        jnp.dot(context.astype(bf16), w_1p_ref[...], preferred_element_type=f32)
        + b_1p_ref[...] + dq)
    pred = jnp.dot(dh.astype(bf16), w_2_ref[...], preferred_element_type=f32) + b_2_ref[...]
    pred_ref[...] = jnp.where(emask_ref[...] == 0, -jnp.inf, pred)


# --------------------------------------------------------------------------- tiling helpers

def _round_up(x, m):
    return -(-x // m) * m


def _tanh_dtype():
    """bf16 tanh on v6e/v7x (bf16 EUP), f32 on v5e and older / unknown chips."""
    try:
        kind = jax.devices()[0].device_kind.lower()
    except Exception:
        return jnp.float32
    if any(tag in kind for tag in ("v6", "v7", "7x")):
        return jnp.bfloat16
    return jnp.float32


def _vmem_usable_bytes():
    """Generation-aware usable-VMEM ceiling (leaves headroom below physical capacity)."""
    cap = 0
    try:
        cap = int(getattr(pltpu.get_tpu_info(), "vmem_capacity_bytes", 0))
    except Exception:
        cap = 0
    if cap <= 0:
        cap = 64 << 20                       # conservative default (v7x-sized)
    if cap > (64 << 20):                     # v5e / v6e: 128 MiB physical -> ~64 MiB usable
        return min(cap // 2, 64 << 20)
    return (cap * 3) // 4                    # v7x: 64 MiB physical -> ~48 MiB ceiling


def _per_batch_vmem_bytes(T, H, K, O):
    """Per-batch-element VMEM footprint of one grid step (with safety margin)."""
    p_in = 2 * T * H * 4          # double-buffered f32 P tile
    p_bf = T * H * 2              # in-kernel bf16 copy (MXU operand)
    ctx = T * H * 4               # attn * P product before the sublane reduce
    score = 3 * T * K * 4         # ph / ah / score intermediates
    small = 4 * (T + O) * 4       # mask/emask + double-buffered attn/pred blocks
    return int(1.3 * (p_in + p_bf + ctx + score + small))


def _choose_batch_tile(B, per_b_bytes, budget_bytes):
    """Multiple-of-8 batch tile that fits the VMEM budget and leaves >= 2 grid steps."""
    cap = max(8, (budget_bytes // max(per_b_bytes, 1)) // 8 * 8)
    half = max(8, _round_up(-(-B // 2), 8))   # ceil(B/2) rounded up to 8 sublanes
    return int(min(cap, half))


# --------------------------------------------------------------------------- wrapper

def attn_decoder_qa(P, Q, mask, entity_mask, params, *, tb=None):
    f32, bf16 = jnp.float32, jnp.bfloat16
    B, T, H = P.shape
    K = params["w_ap"].shape[1]
    O = params["w_2"].shape[1]

    tanh_dtype = _tanh_dtype()
    usable = _vmem_usable_bytes()

    # lane-dense padding of the output dims (and sublane alignment of T)
    T_pad = _round_up(T, 128)
    O_pad = _round_up(O, 128)

    # bf16 weights for the MXU matmuls; biases f32; Q-side projections fused into (H, 2K).
    w_q = jnp.concatenate([params["w_aq"], params["w_1q"]], axis=1)
    b_q = jnp.concatenate([params["b_aq"], params["b_1q"]], axis=1)
    w_2 = jnp.pad(params["w_2"], ((0, 0), (0, O_pad - O)))
    b_2 = jnp.pad(params["b_2"], ((0, 0), (0, O_pad - O)))
    weights = [
        params["w_ap"].astype(bf16), params["b_ap"].astype(f32),
        w_q.astype(bf16),            b_q.astype(f32),
        params["w_a2"].astype(f32).T, params["b_a2"].astype(f32),   # (1, K) row, VPU operand
        params["w_1p"].astype(bf16), params["b_1p"].astype(f32),
        w_2.astype(bf16),            b_2.astype(f32),
    ]
    w_bytes = sum(int(np.prod(w.shape)) * w.dtype.itemsize for w in weights)

    # batch tiling from the generation-aware VMEM budget; grid always has >= 2 steps
    budget = max(usable - 2 * w_bytes - (2 << 20), 1 << 20)
    if tb is None:
        tb = _choose_batch_tile(B, _per_batch_vmem_bytes(T_pad, H, K, O_pad), budget)
    B_pad = max(2 * tb, _round_up(B, tb))
    assert B_pad % tb == 0 and B_pad // tb >= 2
    # TODO(synk): if the per-batch P tile alone exceeds the budget (very long T on v7x),
    #             tile T as a second "arbitrary" grid axis with an online-softmax accumulator.

    # pad inputs (no-ops when already aligned). P stays f32: bf16 cast happens in-kernel.
    Pp = P.astype(f32)
    if (B_pad, T_pad) != (B, T):
        Pp = jnp.pad(Pp, ((0, B_pad - B), (0, T_pad - T), (0, 0)))
    Qp = Q.astype(f32)
    if B_pad != B:
        Qp = jnp.pad(Qp, ((0, B_pad - B), (0, 0)))
    mask_p = jnp.pad(mask.astype(jnp.int32),
                     ((0, B_pad - B), (0, T_pad - T)), constant_values=1)
    emask_p = jnp.pad(entity_mask.astype(jnp.int32),
                      ((0, B_pad - B), (0, O_pad - O)), constant_values=0)

    batch3 = lambda i: (i, 0, 0)
    batch2 = lambda i: (i, 0)
    const2 = lambda i: (0, 0)

    def build_specs(single_buffer_weights):
        if single_buffer_weights:
            # weights never change across grid steps -> single buffer (frees VMEM on v7x)
            w_spec = lambda w: pl.BlockSpec(w.shape, const2, pipeline_mode=pl.Buffered(1))
        else:
            w_spec = lambda w: pl.BlockSpec(w.shape, const2)
        in_specs = [
            pl.BlockSpec((tb, T_pad, H), batch3),   # P: double-buffered f32 tile
            pl.BlockSpec((tb, H), batch2),          # Q
            pl.BlockSpec((tb, T_pad), batch2),      # mask
            pl.BlockSpec((tb, O_pad), batch2),      # entity_mask
        ] + [w_spec(w) for w in weights]
        out_specs = (pl.BlockSpec((tb, T_pad), batch2),   # attn  (lane-dense)
                     pl.BlockSpec((tb, O_pad), batch2))   # pred  (lane-dense)
        return in_specs, out_specs

    kernel = functools.partial(attn_decoder_qa_kernel, tanh_dtype)

    def run(single_buffer_weights):
        in_specs, out_specs = build_specs(single_buffer_weights)
        return pl.pallas_call(
            kernel,
            out_shape=(jax.ShapeDtypeStruct((B_pad, T_pad), f32),
                       jax.ShapeDtypeStruct((B_pad, O_pad), f32)),
            grid=(B_pad // tb,),
            in_specs=in_specs,
            out_specs=out_specs,
            compiler_params=pltpu.CompilerParams(
                dimension_semantics=("parallel",),    # batch tiles shard across TensorCores
                vmem_limit_bytes=int(usable)),
        )(Pp, Qp, mask_p, emask_p, *weights)

    try:
        attn_full, pred_full = run(True)
    except Exception:
        # TODO(synk): pipeline_mode=pl.Buffered(1) needs a recent JAX; fall back to default buffers.
        attn_full, pred_full = run(False)

    return attn_full[:B, :T], pred_full[:B, :O]


# --------------------------------------------------------------------------- params & references

def init_params(key, H, O):
    """Deterministic nn.Linear-style init: U(-1/sqrt(fan_in), 1/sqrt(fan_in))."""
    K = H // 2

    def lin(k, fan_in, fan_out):
        bound = 1.0 / np.sqrt(fan_in)
        kw, kb = jax.random.split(k)
        w = jax.random.uniform(kw, (fan_in, fan_out), jnp.float32, -bound, bound)
        b = jax.random.uniform(kb, (1, fan_out), jnp.float32, -bound, bound)
        return w, b

    ks = jax.random.split(key, 6)
    w_ap, b_ap = lin(ks[0], H, K)   # attention Linear_1p
    w_aq, b_aq = lin(ks[1], H, K)   # attention Linear_1q
    w_a2, b_a2 = lin(ks[2], K, 1)   # attention Linear_2
    w_1p, b_1p = lin(ks[3], H, K)   # decoder linear_1p
    w_1q, b_1q = lin(ks[4], H, K)   # decoder linear_1q
    w_2,  b_2  = lin(ks[5], K, O)   # decoder linear_2
    return dict(w_ap=w_ap, b_ap=b_ap, w_aq=w_aq, b_aq=b_aq, w_a2=w_a2, b_a2=b_a2,
                w_1p=w_1p, b_1p=b_1p, w_1q=w_1q, b_1q=b_1q, w_2=w_2, b_2=b_2)


def reference_f32(P, Q, mask, emask, p):
    """Pure-f32 pure-JAX mirror of the PyTorch forward (semantic reference)."""
    ph = P @ p["w_ap"] + p["b_ap"]
    qh = Q @ p["w_aq"] + p["b_aq"]
    scores = (jnp.tanh(ph + qh[:, None, :]) @ p["w_a2"])[..., 0] + p["b_a2"][0, 0]
    scores = jnp.where(mask == 1, -jnp.inf, scores)
    attn = jax.nn.softmax(scores, axis=-1)
    ctx = (attn[..., None] * P).sum(1)
    dh = jnp.tanh(ctx @ p["w_1p"] + p["b_1p"] + Q @ p["w_1q"] + p["b_1q"])
    pred = dh @ p["w_2"] + p["b_2"]
    pred = jnp.where(emask == 0, -jnp.inf, pred)
    return attn, pred


def reference_matched(P, Q, mask, emask, p, tanh_dtype):
    """Pure-JAX mirror using the kernel's precision recipe (bf16 MXU operands, f32 accumulate)."""
    bf, f32 = jnp.bfloat16, jnp.float32
    B, T, H = P.shape
    K = p["w_ap"].shape[1]
    Pb, Qb = P.astype(bf), Q.astype(bf)
    w_q = jnp.concatenate([p["w_aq"], p["w_1q"]], axis=1).astype(bf)
    b_q = jnp.concatenate([p["b_aq"], p["b_1q"]], axis=1)
    qproj = jnp.dot(Qb, w_q, preferred_element_type=f32) + b_q
    qh, dq = qproj[:, :K], qproj[:, K:]
    ph = jnp.dot(Pb.reshape(B * T, H), p["w_ap"].astype(bf),
                 preferred_element_type=f32).reshape(B, T, K) + p["b_ap"]
    ah = jnp.tanh((ph + qh[:, None, :]).astype(tanh_dtype))
    scores = jnp.sum(ah.astype(f32) * p["w_a2"].T, axis=-1) + p["b_a2"][0, 0]
    scores = jnp.where(mask == 1, _NEG_LARGE, scores)
    attn = jax.nn.softmax(scores, axis=-1)
    ctx = jnp.sum(P * attn[:, :, None], axis=1)
    dh = jnp.tanh(jnp.dot(ctx.astype(bf), p["w_1p"].astype(bf), preferred_element_type=f32)
                  + p["b_1p"] + dq)
    pred = jnp.dot(dh.astype(bf), p["w_2"].astype(bf), preferred_element_type=f32) + p["b_2"]
    pred = jnp.where(emask == 0, -jnp.inf, pred)
    return attn, pred


# --------------------------------------------------------------------------- demo / test

if __name__ == "__main__":
    B, T, H, O = 16, 12, 32, 6    # deliberately un-aligned T/O to exercise the padding path

    key = jax.random.PRNGKey(0)
    k_p, k_q, k_len, k_em, k_params = jax.random.split(key, 5)

    P = jax.random.normal(k_p, (B, T, H), jnp.float32)
    Q = jax.random.normal(k_q, (B, H), jnp.float32)

    # mask == 1 marks padded tokens; every row has at least one valid token
    lengths = jax.random.randint(k_len, (B,), 1, T + 1)
    mask = (jnp.arange(T, dtype=jnp.int32)[None, :] >= lengths[:, None]).astype(jnp.int32)

    # entity_mask == 1 marks valid candidate entities
    entity_mask = (jax.random.uniform(k_em, (B, O)) > 0.3).astype(jnp.int32)

    params = init_params(k_params, H, O)

    attn, pred = attn_decoder_qa(P, Q, mask, entity_mask, params)
    jax.block_until_ready((attn, pred))
    attn_np, pred_np = np.asarray(attn), np.asarray(pred)
    assert attn_np.shape == (B, T) and pred_np.shape == (B, O)

    # (1) tight check vs. a pure-JAX reference using the same precision recipe as the kernel
    attn_m, pred_m = reference_matched(P, Q, mask, entity_mask, params, _tanh_dtype())
    attn_m, pred_m = np.asarray(attn_m), np.asarray(pred_m)
    finite = np.isfinite(pred_m)
    assert np.array_equal(np.isfinite(pred_np), finite)
    assert np.allclose(attn_np, attn_m, atol=2e-2, rtol=2e-2)
    assert np.allclose(pred_np[finite], pred_m[finite], atol=2e-2, rtol=2e-2)

    # (2) loose check vs. the full-f32 semantic reference (bf16 matmuls => looser tolerance)
    attn_r, pred_r = reference_f32(P, Q, mask, entity_mask, params)
    attn_r, pred_r = np.asarray(attn_r), np.asarray(pred_r)
    fin = np.isfinite(pred_r)
    assert np.array_equal(np.isfinite(pred_np), fin)
    assert np.allclose(attn_np, attn_r, atol=1e-1, rtol=1e-1)
    assert np.allclose(pred_np[fin], pred_r[fin], atol=1e-1, rtol=1e-1)

    print("KERNEL_OK")
</pallas_src>

<mosaic_0001>
module attributes {stable_mosaic.version = 11 : i64} {
  func.func @attn_decoder_qa_kernel(%arg0: i32, %arg1: memref<8x128x32xf32, #tpu.memory_space<vmem>>, %arg2: memref<8x32xf32, #tpu.memory_space<vmem>>, %arg3: memref<8x128xi32, #tpu.memory_space<vmem>>, %arg4: memref<8x128xi32, #tpu.memory_space<vmem>>, %arg5: memref<32x16xbf16, #tpu.memory_space<vmem>>, %arg6: memref<1x16xf32, #tpu.memory_space<vmem>>, %arg7: memref<32x32xbf16, #tpu.memory_space<vmem>>, %arg8: memref<1x32xf32, #tpu.memory_space<vmem>>, %arg9: memref<1x16xf32, #tpu.memory_space<vmem>>, %arg10: memref<1x1xf32, #tpu.memory_space<vmem>>, %arg11: memref<32x16xbf16, #tpu.memory_space<vmem>>, %arg12: memref<1x16xf32, #tpu.memory_space<vmem>>, %arg13: memref<16x128xbf16, #tpu.memory_space<vmem>>, %arg14: memref<1x128xf32, #tpu.memory_space<vmem>>, %arg15: memref<8x128xf32, #tpu.memory_space<vmem>>, %arg16: memref<8x128xf32, #tpu.memory_space<vmem>>) attributes {dimension_semantics = [#tpu.dimension_semantics<parallel>], iteration_bounds = array<i64: 2>, scalar_prefetch = 0 : i64, scratch_operands = 0 : i64, tpu.core_type = #tpu.core_type<tc>, window_params = [{transform_indices = @transform_0, window_bounds = array<i64: 8, 128, 32>}, {transform_indices = @transform_1, window_bounds = array<i64: 8, 32>}, {transform_indices = @transform_2, window_bounds = array<i64: 8, 128>}, {transform_indices = @transform_3, window_bounds = array<i64: 8, 128>}, {pipeline_mode = #tpu.pipeline_mode<synchronous>, transform_indices = @transform_4, window_bounds = array<i64: 32, 16>}, {pipeline_mode = #tpu.pipeline_mode<synchronous>, transform_indices = @transform_5, window_bounds = array<i64: 1, 16>}, {pipeline_mode = #tpu.pipeline_mode<synchronous>, transform_indices = @transform_6, window_bounds = array<i64: 32, 32>}, {pipeline_mode = #tpu.pipeline_mode<synchronous>, transform_indices = @transform_7, window_bounds = array<i64: 1, 32>}, {pipeline_mode = #tpu.pipeline_mode<synchronous>, transform_indices = @transform_8, window_bounds = array<i64: 1, 16>}, {pipeline_mode = #tpu.pipeline_mode<synchronous>, transform_indices = @transform_9, window_bounds = array<i64: 1, 1>}, {pipeline_mode = #tpu.pipeline_mode<synchronous>, transform_indices = @transform_10, window_bounds = array<i64: 32, 16>}, {pipeline_mode = #tpu.pipeline_mode<synchronous>, transform_indices = @transform_11, window_bounds = array<i64: 1, 16>}, {pipeline_mode = #tpu.pipeline_mode<synchronous>, transform_indices = @transform_12, window_bounds = array<i64: 16, 128>}, {pipeline_mode = #tpu.pipeline_mode<synchronous>, transform_indices = @transform_13, window_bounds = array<i64: 1, 128>}, {transform_indices = @transform_14, window_bounds = array<i64: 8, 128>}, {transform_indices = @transform_15, window_bounds = array<i64: 8, 128>}]} {
    %c0 = arith.constant 0 : index
    %c0_0 = arith.constant 0 : index
    %c0_1 = arith.constant 0 : index
    %0 = vector.load %arg1[%c0, %c0_0, %c0_1] : memref<8x128x32xf32, #tpu.memory_space<vmem>>, vector<8x128x32xf32>
    %1 = arith.truncf %0 : vector<8x128x32xf32> to vector<8x128x32xbf16>
    %c0_2 = arith.constant 0 : index
    %c0_3 = arith.constant 0 : index
    %2 = vector.load %arg2[%c0_2, %c0_3] : memref<8x32xf32, #tpu.memory_space<vmem>>, vector<8x32xf32>
    %3 = arith.truncf %2 : vector<8x32xf32> to vector<8x32xbf16>
    %c0_4 = arith.constant 0 : index
    %c0_5 = arith.constant 0 : index
    %4 = vector.load %arg7[%c0_4, %c0_5] : memref<32x32xbf16, #tpu.memory_space<vmem>>, vector<32x32xbf16>
    %cst = arith.constant dense<0.000000e+00> : vector<8x32xf32>
    %5 = tpu.matmul %3, %4, %cst {dimension_numbers = #tpu.dot_dimension_numbers<[1], [0], [0], [1], [0, 0, 1, 1], [], []>} : vector<8x32xbf16>, vector<32x32xbf16>, vector<8x32xf32> -> vector<8x32xf32>
    %c0_6 = arith.constant 0 : index
    %c0_7 = arith.constant 0 : index
    %6 = vector.load %arg8[%c0_6, %c0_7] : memref<1x32xf32, #tpu.memory_space<vmem>>, vector<1x32xf32>
    %7 = vector.broadcast %6 : vector<1x32xf32> to vector<8x32xf32>
    %8 = arith.addf %5, %7 : vector<8x32xf32>
    %9 = vector.extract_strided_slice %8 {offsets = [0, 0], sizes = [8, 16], strides = [1, 1]} : vector<8x32xf32> to vector<8x16xf32>
    %10 = vector.extract_strided_slice %8 {offsets = [0, 16], sizes = [8, 16], strides = [1, 1]} : vector<8x32xf32> to vector<8x16xf32>
    %11 = vector.shape_cast %1 : vector<8x128x32xbf16> to vector<1024x32xbf16>
    %c0_8 = arith.constant 0 : index
    %c0_9 = arith.constant 0 : index
    %12 = vector.load %arg5[%c0_8, %c0_9] : memref<32x16xbf16, #tpu.memory_space<vmem>>, vector<32x16xbf16>
    %cst_10 = arith.constant dense<0.000000e+00> : vector<1024x16xf32>
    %13 = tpu.matmul %11, %12, %cst_10 {dimension_numbers = #tpu.dot_dimension_numbers<[1], [0], [0], [1], [0, 0, 1, 1], [], []>} : vector<1024x32xbf16>, vector<32x16xbf16>, vector<1024x16xf32> -> vector<1024x16xf32>
    %14 = vector.shape_cast %13 : vector<1024x16xf32> to vector<8x128x16xf32>
    %c0_11 = arith.constant 0 : index
    %c0_12 = arith.constant 0 : index
    %15 = vector.load %arg6[%c0_11, %c0_12] : memref<1x16xf32, #tpu.memory_space<vmem>>, vector<1x16xf32>
    %16 = vector.shape_cast %15 : vector<1x16xf32> to vector<1x1x16xf32>
    %17 = vector.broadcast %16 : vector<1x1x16xf32> to vector<8x128x16xf32>
    %18 = arith.addf %14, %17 : vector<8x128x16xf32>
    %19 = vector.shape_cast %9 : vector<8x16xf32> to vector<8x1x16xf32>
    %20 = vector.broadcast %19 : vector<8x1x16xf32> to vector<8x128x16xf32>
    %21 = arith.addf %18, %20 : vector<8x128x16xf32>
    %22 = math.tanh %21 : vector<8x128x16xf32>
    %c0_13 = arith.constant 0 : index
    %c0_14 = arith.constant 0 : index
    %23 = vector.load %arg9[%c0_13, %c0_14] : memref<1x16xf32, #tpu.memory_space<vmem>>, vector<1x16xf32>
    %24 = vector.shape_cast %23 : vector<1x16xf32> to vector<1x1x16xf32>
    %25 = vector.broadcast %24 : vector<1x1x16xf32> to vector<8x128x16xf32>
    %26 = arith.mulf %22, %25 : vector<8x128x16xf32>
    %cst_15 = arith.constant dense<0.000000e+00> : vector<8x128xf32>
    %27 = vector.multi_reduction <add>, %26, %cst_15 [2] : vector<8x128x16xf32> to vector<8x128xf32>
    %c0_16 = arith.constant 0 : index
    %c0_17 = arith.constant 0 : index
    %28 = vector.load %arg10[%c0_16, %c0_17] : memref<1x1xf32, #tpu.memory_space<vmem>>, vector<1x1xf32>
    %29 = vector.broadcast %28 : vector<1x1xf32> to vector<8x128xf32>
    %30 = arith.addf %27, %29 : vector<8x128xf32>
    %c0_18 = arith.constant 0 : index
    %c0_19 = arith.constant 0 : index
    %31 = vector.load %arg3[%c0_18, %c0_19] : memref<8x128xi32, #tpu.memory_space<vmem>>, vector<8x128xi32>
    %c1_i32 = arith.constant 1 : i32
    %32 = vector.broadcast %c1_i32 : i32 to vector<8x128xi32>
    %33 = arith.cmpi eq, %31, %32 : vector<8x128xi32>
    %cst_20 = arith.constant -1.000000e+30 : f32
    %34 = vector.broadcast %cst_20 : f32 to vector<8x128xf32>
    %35 = arith.select %33, %34, %30 : vector<8x128xi1>, vector<8x128xf32>
    %cst_21 = arith.constant dense<0xFF800000> : vector<8xf32>
    %36 = vector.multi_reduction <maximumf>, %35, %cst_21 [1] : vector<8x128xf32> to vector<8xf32>
    %37 = vector.shape_cast %36 : vector<8xf32> to vector<8x1xf32>
    %38 = vector.broadcast %37 : vector<8x1xf32> to vector<8x128xf32>
    %39 = arith.subf %35, %38 : vector<8x128xf32>
    %40 = math.exp %39 : vector<8x128xf32>
    %cst_22 = arith.constant dense<0.000000e+00> : vector<8xf32>
    %41 = vector.multi_reduction <add>, %40, %cst_22 [1] : vector<8x128xf32> to vector<8xf32>
    %42 = vector.shape_cast %41 : vector<8xf32> to vector<8x1xf32>
    %43 = tpu.reciprocal %42 {approx = true} : vector<8x1xf32> -> vector<8x1xf32>
    %44 = vector.broadcast %43 : vector<8x1xf32> to vector<8x128xf32>
    %45 = arith.mulf %40, %44 : vector<8x128xf32>
    %c0_23 = arith.constant 0 : index
    %c0_24 = arith.constant 0 : index
    %46 = vector.load %arg15[%c0_23, %c0_24] : memref<8x128xf32, #tpu.memory_space<vmem>>, vector<8x128xf32>
    tpu.vector_store %arg15[%c0_23, %c0_24], %45 {strides = array<i32>} : memref<8x128xf32, #tpu.memory_space<vmem>>, vector<8x128xf32>,
    %47 = vector.shape_cast %45 : vector<8x128xf32> to vector<8x128x1xf32>
    %48 = vector.broadcast %47 : vector<8x128x1xf32> to vector<8x128x32xf32>
    %49 = arith.mulf %0, %48 : vector<8x128x32xf32>
    %cst_25 = arith.constant dense<0.000000e+00> : vector<8x32xf32>
    %50 = vector.multi_reduction <add>, %49, %cst_25 [1] : vector<8x128x32xf32> to vector<8x32xf32>
    %51 = arith.truncf %50 : vector<8x32xf32> to vector<8x32xbf16>
    %c0_26 = arith.constant 0 : index
    %c0_27 = arith.constant 0 : index
    %52 = vector.load %arg11[%c0_26, %c0_27] : memref<32x16xbf16, #tpu.memory_space<vmem>>, vector<32x16xbf16>
    %cst_28 = arith.constant dense<0.000000e+00> : vector<8x16xf32>
    %53 = tpu.matmul %51, %52, %cst_28 {dimension_numbers = #tpu.dot_dimension_numbers<[1], [0], [0], [1], [0, 0, 1, 1], [], []>} : vector<8x32xbf16>, vector<32x16xbf16>, vector<8x16xf32> -> vector<8x16xf32>
    %c0_29 = arith.constant 0 : index
    %c0_30 = arith.constant 0 : index
    %54 = vector.load %arg12[%c0_29, %c0_30] : memref<1x16xf32, #tpu.memory_space<vmem>>, vector<1x16xf32>
    %55 = vector.broadcast %54 : vector<1x16xf32> to vector<8x16xf32>
    %56 = arith.addf %53, %55 : vector<8x16xf32>
    %57 = arith.addf %56, %10 : vector<8x16xf32>
    %58 = math.tanh %57 : vector<8x16xf32>
    %59 = arith.truncf %58 : vector<8x16xf32> to vector<8x16xbf16>
    %c0_31 = arith.constant 0 : index
    %c0_32 = arith.constant 0 : index
    %60 = vector.load %arg13[%c0_31, %c0_32] : memref<16x128xbf16, #tpu.memory_space<vmem>>, vector<16x128xbf16>
    %cst_33 = arith.constant dense<0.000000e+00> : vector<8x128xf32>
    %61 = tpu.matmul %59, %60, %cst_33 {dimension_numbers = #tpu.dot_dimension_numbers<[1], [0], [0], [1], [0, 0, 1, 1], [], []>} : vector<8x16xbf16>, vector<16x128xbf16>, vector<8x128xf32> -> vector<8x128xf32>
    %c0_34 = arith.constant 0 : index
    %c0_35 = arith.constant 0 : index
    %62 = vector.load %arg14[%c0_34, %c0_35] : memref<1x128xf32, #tpu.memory_space<vmem>>, vector<1x128xf32>
    %63 = vector.broadcast %62 : vector<1x128xf32> to vector<8x128xf32>
    %64 = arith.addf %61, %63 : vector<8x128xf32>
    %c0_36 = arith.constant 0 : index
    %c0_37 = arith.constant 0 : index
    %65 = vector.load %arg4[%c0_36, %c0_37] : memref<8x128xi32, #tpu.memory_space<vmem>>, vector<8x128xi32>
    %c0_i32 = arith.constant 0 : i32
    %66 = vector.broadcast %c0_i32 : i32 to vector<8x128xi32>
    %67 = arith.cmpi eq, %65, %66 : vector<8x128xi32>
    %cst_38 = arith.constant 0xFF800000 : f32
    %68 = vector.broadcast %cst_38 : f32 to vector<8x128xf32>
    %69 = arith.select %67, %68, %64 : vector<8x128xi1>, vector<8x128xf32>
    %c0_39 = arith.constant 0 : index
    %c0_40 = arith.constant 0 : index
    %70 = vector.load %arg16[%c0_39, %c0_40] : memref<8x128xf32, #tpu.memory_space<vmem>>, vector<8x128xf32>
    tpu.vector_store %arg16[%c0_39, %c0_40], %69 {strides = array<i32>} : memref<8x128xf32, #tpu.memory_space<vmem>>, vector<8x128xf32>,
    return
  }
  func.func @transform_0(%arg0: i32) -> (i32, i32, i32) {
    %c0_i32 = arith.constant 0 : i32
    %c0_i32_0 = arith.constant 0 : i32
    %c0_i32_1 = arith.constant 0 : i32
    return %arg0, %c0_i32, %c0_i32_0 : i32, i32, i32
  }
  func.func @transform_1(%arg0: i32) -> (i32, i32) {
    %c0_i32 = arith.constant 0 : i32
    %c0_i32_0 = arith.constant 0 : i32
    return %arg0, %c0_i32 : i32, i32
  }
  func.func @transform_2(%arg0: i32) -> (i32, i32) {
    %c0_i32 = arith.constant 0 : i32
    %c0_i32_0 = arith.constant 0 : i32
    return %arg0, %c0_i32 : i32, i32
  }
  func.func @transform_3(%arg0: i32) -> (i32, i32) {
    %c0_i32 = arith.constant 0 : i32
    %c0_i32_0 = arith.constant 0 : i32
    return %arg0, %c0_i32 : i32, i32
  }
  func.func @transform_4(%arg0: i32) -> (i32, i32) {
    %c0_i32 = arith.constant 0 : i32
    %c0_i32_0 = arith.constant 0 : i32
    %c0_i32_1 = arith.constant 0 : i32
    return %c0_i32, %c0_i32_0 : i32, i32
  }
  func.func @transform_5(%arg0: i32) -> (i32, i32) {
    %c0_i32 = arith.constant 0 : i32
    %c0_i32_0 = arith.constant 0 : i32
    %c0_i32_1 = arith.constant 0 : i32
    return %c0_i32, %c0_i32_0 : i32, i32
  }
  func.func @transform_6(%arg0: i32) -> (i32, i32) {
    %c0_i32 = arith.constant 0 : i32
    %c0_i32_0 = arith.constant 0 : i32
    %c0_i32_1 = arith.constant 0 : i32
    return %c0_i32, %c0_i32_0 : i32, i32
  }
  func.func @transform_7(%arg0: i32) -> (i32, i32) {
    %c0_i32 = arith.constant 0 : i32
    %c0_i32_0 = arith.constant 0 : i32
    %c0_i32_1 = arith.constant 0 : i32
    return %c0_i32, %c0_i32_0 : i32, i32
  }
  func.func @transform_8(%arg0: i32) -> (i32, i32) {
    %c0_i32 = arith.constant 0 : i32
    %c0_i32_0 = arith.constant 0 : i32
    %c0_i32_1 = arith.constant 0 : i32
    return %c0_i32, %c0_i32_0 : i32, i32
  }
  func.func @transform_9(%arg0: i32) -> (i32, i32) {
    %c0_i32 = arith.constant 0 : i32
    %c0_i32_0 = arith.constant 0 : i32
    %c0_i32_1 = arith.constant 0 : i32
    return %c0_i32, %c0_i32_0 : i32, i32
  }
  func.func @transform_10(%arg0: i32) -> (i32, i32) {
    %c0_i32 = arith.constant 0 : i32
    %c0_i32_0 = arith.constant 0 : i32
    %c0_i32_1 = arith.constant 0 : i32
    return %c0_i32, %c0_i32_0 : i32, i32
  }
  func.func @transform_11(%arg0: i32) -> (i32, i32) {
    %c0_i32 = arith.constant 0 : i32
    %c0_i32_0 = arith.constant 0 : i32
    %c0_i32_1 = arith.constant 0 : i32
    return %c0_i32, %c0_i32_0 : i32, i32
  }
  func.func @transform_12(%arg0: i32) -> (i32, i32) {
    %c0_i32 = arith.constant 0 : i32
    %c0_i32_0 = arith.constant 0 : i32
    %c0_i32_1 = arith.constant 0 : i32
    return %c0_i32, %c0_i32_0 : i32, i32
  }
  func.func @transform_13(%arg0: i32) -> (i32, i32) {
    %c0_i32 = arith.constant 0 : i32
    %c0_i32_0 = arith.constant 0 : i32
    %c0_i32_1 = arith.constant 0 : i32
    return %c0_i32, %c0_i32_0 : i32, i32
  }
  func.func @transform_14(%arg0: i32) -> (i32, i32) {
    %c0_i32 = arith.constant 0 : i32
    %c0_i32_0 = arith.constant 0 : i32
    return %arg0, %c0_i32 : i32, i32
  }
  func.func @transform_15(%arg0: i32) -> (i32, i32) {
    %c0_i32 = arith.constant 0 : i32
    %c0_i32_0 = arith.constant 0 : i32
    return %arg0, %c0_i32 : i32, i32
  }
}

module attributes {stable_mosaic.version = 11 : i64} {
  func.func @attn_decoder_qa_kernel(%arg0: i32, %arg1: memref<8x128x32xf32, #tpu.memory_space<vmem>>, %arg2: memref<8x32xf32, #tpu.memory_space<vmem>>, %arg3: memref<8x128xi32, #tpu.memory_space<vmem>>, %arg4: memref<8x128xi32, #tpu.memory_space<vmem>>, %arg5: memref<32x16xbf16, #tpu.memory_space<vmem>>, %arg6: memref<1x16xf32, #tpu.memory_space<vmem>>, %arg7: memref<32x32xbf16, #tpu.memory_space<vmem>>, %arg8: memref<1x32xf32, #tpu.memory_space<vmem>>, %arg9: memref<1x16xf32, #tpu.memory_space<vmem>>, %arg10: memref<1x1xf32, #tpu.memory_space<vmem>>, %arg11: memref<32x16xbf16, #tpu.memory_space<vmem>>, %arg12: memref<1x16xf32, #tpu.memory_space<vmem>>, %arg13: memref<16x128xbf16, #tpu.memory_space<vmem>>, %arg14: memref<1x128xf32, #tpu.memory_space<vmem>>, %arg15: memref<8x128xf32, #tpu.memory_space<vmem>>, %arg16: memref<8x128xf32, #tpu.memory_space<vmem>>) attributes {dimension_semantics = [#tpu.dimension_semantics<parallel>], iteration_bounds = array<i64: 2>, scalar_prefetch = 0 : i64, scratch_operands = 0 : i64, tpu.core_type = #tpu.core_type<tc>, window_params = [{transform_indices = @transform_0, window_bounds = array<i64: 8, 128, 32>}, {transform_indices = @transform_1, window_bounds = array<i64: 8, 32>}, {transform_indices = @transform_2, window_bounds = array<i64: 8, 128>}, {transform_indices = @transform_3, window_bounds = array<i64: 8, 128>}, {pipeline_mode = #tpu.pipeline_mode<synchronous>, transform_indices = @transform_4, window_bounds = array<i64: 32, 16>}, {pipeline_mode = #tpu.pipeline_mode<synchronous>, transform_indices = @transform_5, window_bounds = array<i64: 1, 16>}, {pipeline_mode = #tpu.pipeline_mode<synchronous>, transform_indices = @transform_6, window_bounds = array<i64: 32, 32>}, {pipeline_mode = #tpu.pipeline_mode<synchronous>, transform_indices = @transform_7, window_bounds = array<i64: 1, 32>}, {pipeline_mode = #tpu.pipeline_mode<synchronous>, transform_indices = @transform_8, window_bounds = array<i64: 1, 16>}, {pipeline_mode = #tpu.pipeline_mode<synchronous>, transform_indices = @transform_9, window_bounds = array<i64: 1, 1>}, {pipeline_mode = #tpu.pipeline_mode<synchronous>, transform_indices = @transform_10, window_bounds = array<i64: 32, 16>}, {pipeline_mode = #tpu.pipeline_mode<synchronous>, transform_indices = @transform_11, window_bounds = array<i64: 1, 16>}, {pipeline_mode = #tpu.pipeline_mode<synchronous>, transform_indices = @transform_12, window_bounds = array<i64: 16, 128>}, {pipeline_mode = #tpu.pipeline_mode<synchronous>, transform_indices = @transform_13, window_bounds = array<i64: 1, 128>}, {transform_indices = @transform_14, window_bounds = array<i64: 8, 128>}, {transform_indices = @transform_15, window_bounds = array<i64: 8, 128>}]} {
    %c0 = arith.constant 0 : index
    %c0_0 = arith.constant 0 : index
    %c0_1 = arith.constant 0 : index
    %0 = vector.load %arg1[%c0, %c0_0, %c0_1] : memref<8x128x32xf32, #tpu.memory_space<vmem>>, vector<8x128x32xf32>
    %1 = arith.truncf %0 : vector<8x128x32xf32> to vector<8x128x32xbf16>
    %c0_2 = arith.constant 0 : index
    %c0_3 = arith.constant 0 : index
    %2 = vector.load %arg2[%c0_2, %c0_3] : memref<8x32xf32, #tpu.memory_space<vmem>>, vector<8x32xf32>
    %3 = arith.truncf %2 : vector<8x32xf32> to vector<8x32xbf16>
    %c0_4 = arith.constant 0 : index
    %c0_5 = arith.constant 0 : index
    %4 = vector.load %arg7[%c0_4, %c0_5] : memref<32x32xbf16, #tpu.memory_space<vmem>>, vector<32x32xbf16>
    %cst = arith.constant dense<0.000000e+00> : vector<8x32xf32>
    %5 = tpu.matmul %3, %4, %cst {dimension_numbers = #tpu.dot_dimension_numbers<[1], [0], [0], [1], [0, 0, 1, 1], [], []>} : vector<8x32xbf16>, vector<32x32xbf16>, vector<8x32xf32> -> vector<8x32xf32>
    %c0_6 = arith.constant 0 : index
    %c0_7 = arith.constant 0 : index
    %6 = vector.load %arg8[%c0_6, %c0_7] : memref<1x32xf32, #tpu.memory_space<vmem>>, vector<1x32xf32>
    %7 = vector.broadcast %6 : vector<1x32xf32> to vector<8x32xf32>
    %8 = arith.addf %5, %7 : vector<8x32xf32>
    %9 = vector.extract_strided_slice %8 {offsets = [0, 0], sizes = [8, 16], strides = [1, 1]} : vector<8x32xf32> to vector<8x16xf32>
    %10 = vector.extract_strided_slice %8 {offsets = [0, 16], sizes = [8, 16], strides = [1, 1]} : vector<8x32xf32> to vector<8x16xf32>
    %11 = vector.shape_cast %1 : vector<8x128x32xbf16> to vector<1024x32xbf16>
    %c0_8 = arith.constant 0 : index
    %c0_9 = arith.constant 0 : index
    %12 = vector.load %arg5[%c0_8, %c0_9] : memref<32x16xbf16, #tpu.memory_space<vmem>>, vector<32x16xbf16>
    %cst_10 = arith.constant dense<0.000000e+00> : vector<1024x16xf32>
    %13 = tpu.matmul %11, %12, %cst_10 {dimension_numbers = #tpu.dot_dimension_numbers<[1], [0], [0], [1], [0, 0, 1, 1], [], []>} : vector<1024x32xbf16>, vector<32x16xbf16>, vector<1024x16xf32> -> vector<1024x16xf32>
    %14 = vector.shape_cast %13 : vector<1024x16xf32> to vector<8x128x16xf32>
    %c0_11 = arith.constant 0 : index
    %c0_12 = arith.constant 0 : index
    %15 = vector.load %arg6[%c0_11, %c0_12] : memref<1x16xf32, #tpu.memory_space<vmem>>, vector<1x16xf32>
    %16 = vector.shape_cast %15 : vector<1x16xf32> to vector<1x1x16xf32>
    %17 = vector.broadcast %16 : vector<1x1x16xf32> to vector<8x128x16xf32>
    %18 = arith.addf %14, %17 : vector<8x128x16xf32>
    %19 = vector.shape_cast %9 : vector<8x16xf32> to vector<8x1x16xf32>
    %20 = vector.broadcast %19 : vector<8x1x16xf32> to vector<8x128x16xf32>
    %21 = arith.addf %18, %20 : vector<8x128x16xf32>
    %22 = math.tanh %21 : vector<8x128x16xf32>
    %c0_13 = arith.constant 0 : index
    %c0_14 = arith.constant 0 : index
    %23 = vector.load %arg9[%c0_13, %c0_14] : memref<1x16xf32, #tpu.memory_space<vmem>>, vector<1x16xf32>
    %24 = vector.shape_cast %23 : vector<1x16xf32> to vector<1x1x16xf32>
    %25 = vector.broadcast %24 : vector<1x1x16xf32> to vector<8x128x16xf32>
    %26 = arith.mulf %22, %25 : vector<8x128x16xf32>
    %cst_15 = arith.constant dense<0.000000e+00> : vector<8x128xf32>
    %27 = vector.multi_reduction <add>, %26, %cst_15 [2] : vector<8x128x16xf32> to vector<8x128xf32>
    %c0_16 = arith.constant 0 : index
    %c0_17 = arith.constant 0 : index
    %28 = vector.load %arg10[%c0_16, %c0_17] : memref<1x1xf32, #tpu.memory_space<vmem>>, vector<1x1xf32>
    %29 = vector.broadcast %28 : vector<1x1xf32> to vector<8x128xf32>
    %30 = arith.addf %27, %29 : vector<8x128xf32>
    %c0_18 = arith.constant 0 : index
    %c0_19 = arith.constant 0 : index
    %31 = vector.load %arg3[%c0_18, %c0_19] : memref<8x128xi32, #tpu.memory_space<vmem>>, vector<8x128xi32>
    %c1_i32 = arith.constant 1 : i32
    %32 = vector.broadcast %c1_i32 : i32 to vector<8x128xi32>
    %33 = arith.cmpi eq, %31, %32 : vector<8x128xi32>
    %cst_20 = arith.constant -1.000000e+30 : f32
    %34 = vector.broadcast %cst_20 : f32 to vector<8x128xf32>
    %35 = arith.select %33, %34, %30 : vector<8x128xi1>, vector<8x128xf32>
    %cst_21 = arith.constant dense<0xFF800000> : vector<8xf32>
    %36 = vector.multi_reduction <maximumf>, %35, %cst_21 [1] : vector<8x128xf32> to vector<8xf32>
    %37 = vector.shape_cast %36 : vector<8xf32> to vector<8x1xf32>
    %38 = vector.broadcast %37 : vector<8x1xf32> to vector<8x128xf32>
    %39 = arith.subf %35, %38 : vector<8x128xf32>
    %40 = math.exp %39 : vector<8x128xf32>
    %cst_22 = arith.constant dense<0.000000e+00> : vector<8xf32>
    %41 = vector.multi_reduction <add>, %40, %cst_22 [1] : vector<8x128xf32> to vector<8xf32>
    %42 = vector.shape_cast %41 : vector<8xf32> to vector<8x1xf32>
    %43 = tpu.reciprocal %42 {approx = true} : vector<8x1xf32> -> vector<8x1xf32>
    %44 = vector.broadcast %43 : vector<8x1xf32> to vector<8x128xf32>
    %45 = arith.mulf %40, %44 : vector<8x128xf32>
    %c0_23 = arith.constant 0 : index
    %c0_24 = arith.constant 0 : index
    %46 = vector.load %arg15[%c0_23, %c0_24] : memref<8x128xf32, #tpu.memory_space<vmem>>, vector<8x128xf32>
    tpu.vector_store %arg15[%c0_23, %c0_24], %45 {strides = array<i32>} : memref<8x128xf32, #tpu.memory_space<vmem>>, vector<8x128xf32>,
    %47 = vector.shape_cast %45 : vector<8x128xf32> to vector<8x128x1xf32>
    %48 = vector.broadcast %47 : vector<8x128x1xf32> to vector<8x128x32xf32>
    %49 = arith.mulf %0, %48 : vector<8x128x32xf32>
    %cst_25 = arith.constant dense<0.000000e+00> : vector<8x32xf32>
    %50 = vector.multi_reduction <add>, %49, %cst_25 [1] : vector<8x128x32xf32> to vector<8x32xf32>
    %51 = arith.truncf %50 : vector<8x32xf32> to vector<8x32xbf16>
    %c0_26 = arith.constant 0 : index
    %c0_27 = arith.constant 0 : index
    %52 = vector.load %arg11[%c0_26, %c0_27] : memref<32x16xbf16, #tpu.memory_space<vmem>>, vector<32x16xbf16>
    %cst_28 = arith.constant dense<0.000000e+00> : vector<8x16xf32>
    %53 = tpu.matmul %51, %52, %cst_28 {dimension_numbers = #tpu.dot_dimension_numbers<[1], [0], [0], [1], [0, 0, 1, 1], [], []>} : vector<8x32xbf16>, vector<32x16xbf16>, vector<8x16xf32> -> vector<8x16xf32>
    %c0_29 = arith.constant 0 : index
    %c0_30 = arith.constant 0 : index
    %54 = vector.load %arg12[%c0_29, %c0_30] : memref<1x16xf32, #tpu.memory_space<vmem>>, vector<1x16xf32>
    %55 = vector.broadcast %54 : vector<1x16xf32> to vector<8x16xf32>
    %56 = arith.addf %53, %55 : vector<8x16xf32>
    %57 = arith.addf %56, %10 : vector<8x16xf32>
    %58 = math.tanh %57 : vector<8x16xf32>
    %59 = arith.truncf %58 : vector<8x16xf32> to vector<8x16xbf16>
    %c0_31 = arith.constant 0 : index
    %c0_32 = arith.constant 0 : index
    %60 = vector.load %arg13[%c0_31, %c0_32] : memref<16x128xbf16, #tpu.memory_space<vmem>>, vector<16x128xbf16>
    %cst_33 = arith.constant dense<0.000000e+00> : vector<8x128xf32>
    %61 = tpu.matmul %59, %60, %cst_33 {dimension_numbers = #tpu.dot_dimension_numbers<[1], [0], [0], [1], [0, 0, 1, 1], [], []>} : vector<8x16xbf16>, vector<16x128xbf16>, vector<8x128xf32> -> vector<8x128xf32>
    %c0_34 = arith.constant 0 : index
    %c0_35 = arith.constant 0 : index
    %62 = vector.load %arg14[%c0_34, %c0_35] : memref<1x128xf32, #tpu.memory_space<vmem>>, vector<1x128xf32>
    %63 = vector.broadcast %62 : vector<1x128xf32> to vector<8x128xf32>
    %64 = arith.addf %61, %63 : vector<8x128xf32>
    %c0_36 = arith.constant 0 : index
    %c0_37 = arith.constant 0 : index
    %65 = vector.load %arg4[%c0_36, %c0_37] : memref<8x128xi32, #tpu.memory_space<vmem>>, vector<8x128xi32>
    %c0_i32 = arith.constant 0 : i32
    %66 = vector.broadcast %c0_i32 : i32 to vector<8x128xi32>
    %67 = arith.cmpi eq, %65, %66 : vector<8x128xi32>
    %cst_38 = arith.constant 0xFF800000 : f32
    %68 = vector.broadcast %cst_38 : f32 to vector<8x128xf32>
    %69 = arith.select %67, %68, %64 : vector<8x128xi1>, vector<8x128xf32>
    %c0_39 = arith.constant 0 : index
    %c0_40 = arith.constant 0 : index
    %70 = vector.load %arg16[%c0_39, %c0_40] : memref<8x128xf32, #tpu.memory_space<vmem>>, vector<8x128xf32>
    tpu.vector_store %arg16[%c0_39, %c0_40], %69 {strides = array<i32>} : memref<8x128xf32, #tpu.memory_space<vmem>>, vector<8x128xf32>,
    return
  }
  func.func @transform_0(%arg0: i32) -> (i32, i32, i32) {
    %c0_i32 = arith.constant 0 : i32
    %c0_i32_0 = arith.constant 0 : i32
    %c0_i32_1 = arith.constant 0 : i32
    return %arg0, %c0_i32, %c0_i32_0 : i32, i32, i32
  }
  func.func @transform_1(%arg0: i32) -> (i32, i32) {
    %c0_i32 = arith.constant 0 : i32
    %c0_i32_0 = arith.constant 0 : i32
    return %arg0, %c0_i32 : i32, i32
  }
  func.func @transform_2(%arg0: i32) -> (i32, i32) {
    %c0_i32 = arith.constant 0 : i32
    %c0_i32_0 = arith.constant 0 : i32
    return %arg0, %c0_i32 : i32, i32
  }
  func.func @transform_3(%arg0: i32) -> (i32, i32) {
    %c0_i32 = arith.constant 0 : i32
    %c0_i32_0 = arith.constant 0 : i32
    return %arg0, %c0_i32 : i32, i32
  }
  func.func @transform_4(%arg0: i32) -> (i32, i32) {
    %c0_i32 = arith.constant 0 : i32
    %c0_i32_0 = arith.constant 0 : i32
    %c0_i32_1 = arith.constant 0 : i32
    return %c0_i32, %c0_i32_0 : i32, i32
  }
  func.func @transform_5(%arg0: i32) -> (i32, i32) {
    %c0_i32 = arith.constant 0 : i32
    %c0_i32_0 = arith.constant 0 : i32
    %c0_i32_1 = arith.constant 0 : i32
    return %c0_i32, %c0_i32_0 : i32, i32
  }
  func.func @transform_6(%arg0: i32) -> (i32, i32) {
    %c0_i32 = arith.constant 0 : i32
    %c0_i32_0 = arith.constant 0 : i32
    %c0_i32_1 = arith.constant 0 : i32
    return %c0_i32, %c0_i32_0 : i32, i32
  }
  func.func @transform_7(%arg0: i32) -> (i32, i32) {
    %c0_i32 = arith.constant 0 : i32
    %c0_i32_0 = arith.constant 0 : i32
    %c0_i32_1 = arith.constant 0 : i32
    return %c0_i32, %c0_i32_0 : i32, i32
  }
  func.func @transform_8(%arg0: i32) -> (i32, i32) {
    %c0_i32 = arith.constant 0 : i32
    %c0_i32_0 = arith.constant 0 : i32
    %c0_i32_1 = arith.constant 0 : i32
    return %c0_i32, %c0_i32_0 : i32, i32
  }
  func.func @transform_9(%arg0: i32) -> (i32, i32) {
    %c0_i32 = arith.constant 0 : i32
    %c0_i32_0 = arith.constant 0 : i32
    %c0_i32_1 = arith.constant 0 : i32
    return %c0_i32, %c0_i32_0 : i32, i32
  }
  func.func @transform_10(%arg0: i32) -> (i32, i32) {
    %c0_i32 = arith.constant 0 : i32
    %c0_i32_0 = arith.constant 0 : i32
    %c0_i32_1 = arith.constant 0 : i32
    return %c0_i32, %c0_i32_0 : i32, i32
  }
  func.func @transform_11(%arg0: i32) -> (i32, i32) {
    %c0_i32 = arith.constant 0 : i32
    %c0_i32_0 = arith.constant 0 : i32
    %c0_i32_1 = arith.constant 0 : i32
    return %c0_i32, %c0_i32_0 : i32, i32
  }
  func.func @transform_12(%arg0: i32) -> (i32, i32) {
    %c0_i32 = arith.constant 0 : i32
    %c0_i32_0 = arith.constant 0 : i32
    %c0_i32_1 = arith.constant 0 : i32
    return %c0_i32, %c0_i32_0 : i32, i32
  }
  func.func @transform_13(%arg0: i32) -> (i32, i32) {
    %c0_i32 = arith.constant 0 : i32
    %c0_i32_0 = arith.constant 0 : i32
    %c0_i32_1 = arith.constant 0 : i32
    return %c0_i32, %c0_i32_0 : i32, i32
  }
  func.func @transform_14(%arg0: i32) -> (i32, i32) {
    %c0_i32 = arith.constant 0 : i32
    %c0_i32_0 = arith.constant 0 : i32
    return %arg0, %c0_i32 : i32, i32
  }
  func.func @transform_15(%arg0: i32) -> (i32, i32) {
    %c0_i32 = arith.constant 0 : i32
    %c0_i32_0 = arith.constant 0 : i32
    return %arg0, %c0_i32 : i32, i32
  }
}

</mosaic_0001>

<bundles_post_ra>
// kernel: tpu_custom_call.1
= control target key start
LH: loop header
LB: loop body
LE: loop exit
PB: predicated region body
PF: predicated region fallthrough
CT: control target
= control target key end

     0   :  { %s8518_s0 = inlined_call_operand.vmem [shape: f32[16,128,32], index: 0, kind: input, shape index: {}]   ;;  %s8519_s1 = inlined_call_operand.vmem [shape: f32[16,32], index: 1, kind: input, shape index: {}]   ;;  %s8520_s2 = inlined_call_operand.vmem [shape: s32[16,128], index: 2, kind: input, shape index: {}]   ;;  %s8521_s3 = inlined_call_operand.vmem [shape: s32[16,128], index: 3, kind: input, shape index: {}]   ;;  %s8522_s4 = inlined_call_operand.vmem [shape: bf16[32,16], index: 4, kind: input, shape index: {}]   ;;  %s8523_s5 = inlined_call_operand.vmem [shape: f32[1,16], index: 5, kind: input, shape index: {}]   ;;  %s8524_s6 = inlined_call_operand.vmem [shape: bf16[32,32], index: 6, kind: input, shape index: {}]   ;;  %s8525_s7 = inlined_call_operand.vmem [shape: f32[1,32], index: 7, kind: input, shape index: {}]   ;;  %s8526_s8 = inlined_call_operand.vmem [shape: f32[1,16], index: 8, kind: input, shape index: {}]   ;;  %s8527_s9 = inlined_call_operand.<no memory space> [shape: f32[1,1], index: 9, kind: input, shape index: {}]   ;;  %s8528_s10 = inlined_call_operand.vmem [shape: bf16[32,16], index: 10, kind: input, shape index: {}]   ;;  %s8529_s11 = inlined_call_operand.vmem [shape: f32[1,16], index: 11, kind: input, shape index: {}]   ;;  %s8530_s12 = inlined_call_operand.vmem [shape: bf16[16,128], index: 12, kind: input, shape index: {}]   ;;  %s8531_s13 = inlined_call_operand.vmem [shape: f32[1,128], index: 13, kind: input, shape index: {}]   ;;  %s8532_s14 = inlined_call_operand.hbm [shape: f32[16,128], index: 14, kind: output, shape index: {0}]   ;;  %s8533_s15 = inlined_call_operand.hbm [shape: f32[16,128], index: 15, kind: output, shape index: {1}]  }
   0x1   :  { %8554 = sst [smem:[#allocation54_spill]] %s8518_s0  ;;  %v21_v0 = vstv %s8527_s9 }
   0x2   :  { %8555 = sst [smem:[#allocation55_spill]] %s8519_s1  ;;  %22 = vst [vmem:[#allocation2] sm:$0x1] %v21_v0 }
   0x3   :  { %8556 = sst [smem:[#allocation56_spill]] %s8520_s2 }
   0x4   :  { %8557 = sst [smem:[#allocation57_spill]] %s8522_s4 }
   0x5   :  { %8558 = sst [smem:[#allocation58_spill]] %s8523_s5 }
   0x6   :  { %8559 = sst [smem:[#allocation59_spill]] %s8524_s6 }
   0x7   :  { %23 = vsyncpa [#allocation4], 0 }
   0x8   :  { %25 = vsyncpa [#allocation4 + $0x1], 0 }
   0x9   :  { %26 = vsyncpa [#allocation6], 0 }
   0xa   :  { %28 = vsyncpa [#allocation6 + $0x1], 0  ;;  %s5789_s20 = smov 0   ;;  %s5791_s21 = smov 0  }
   0xb   :  { %s5793_s22 = smov 0   ;;  %s5795_s23 = smov 0  }
   0xc LB: > { %s5810_s9 = sadd.s32 4294967295, %s5697_s23   ;;  %s4821_s24 = sadd.s32 4294967294, %s5697_s23   ;;  %s5697_s23 = sphi %s5795_s23, %s8846_s23   ;;  %s5693_s22 = sphi %s5793_s22, %s8845_s22   ;;  %s5689_s21 = sphi %s5791_s21, %s8844_s21   ;;  %s5685_s20 = sphi %s5789_s20, %s8843_s20  }
   0xd   : > { %s5814_s25 = sadd.s32 1, %s5697_s23   ;;  %s355_s26 = sadd.s32 1, %s5693_s22 }
   0xe   : > { %s352_s27 = ssub.s32 %s5697_s23, %s5814_s25  ;;  %p365_p0 = scmp.ne.s32.totalorder %s5693_s22, %s5689_s21 }
   0xf   : > { %p353_p1 = scmp.eq.s32.totalorder %s352_s27, 0  ;;  %p366_p2 = scmp.eq.s32.totalorder %s5810_s9, 1 }
  0x10   : > { %p371_p3 = scmp.ne.s32.totalorder %s5689_s21, %s5685_s20  ;;  %p372_p4 = scmp.eq.s32.totalorder %s4821_s24, 1 }
  0x11   : > { %s5825_s28 = scalar_select %p353_p1, %s5693_s22, %s355_s26  }
  0x12   : > { %p5827_p5 = por %p366_p2, %p365_p0  ;;  %p5831_p6 = por %p372_p4, %p371_p3 }
  0x13   : > { %p4824_p7 = scmp.ge.s32.totalorder %s5697_s23, 1  ;;  %p477_p8 = scmp.lt.s32.totalorder %s5697_s23, 3 }
  0x15   : > { %p478_p9 = pnand %p4824_p7, %p477_p8 }
  0x17   : > { %481 = sbr.rel (%p478_p9) target bundleno = 1872 (0x750), region = 76 }
  0x1e   : > { %s8562_s6 = sld [smem:[#allocation59_spill]]  ;;  %v8534_v2 = vmov 0.0   ;;  %s8563_s4 = sld [smem:[#allocation57_spill]]  ;;  %vm8543_vm0 = vmmov 0   ;;  %vm8544_vm1 = vcmask 261120   ;;  %v5701_v40 = vmov 0  }
  0x1f   : > { %4994 = vmatprep.subr.bf16.mxu0 %v8534_v2  ;;  %4998 = vmatprep.mubr.msk.bf16.mxu0 %vm8543_vm0, %v8534_v2  ;;  %p550_p10 = scmp.lt.s32.totalorder %s5810_s9, 1  ;;  %s4827_s18 = sshll.u32 %s5810_s9, 3  ;;  %vm8548_vm2 = vcmask 130048   ;;  %vm2857_vm3 = vcmask 130112   ;;  %vm2864_vm4 = vcmask 195712   ;;  %vm2871_vm5 = vcmask 261312  }
  0x20   : > { %p544_p11 = scmp.lt.s32.totalorder %s4827_s18, 15  ;;  %s8564_s1 = sld [smem:[#allocation55_spill]]  ;;  %5201 = vset.pattern.permute.xlu1 %v5701_v40  ;;  %5202 = vset.pattern.permute.xlu0 %v5701_v40  ;;  %vm2878_vm6 = vcmask 326912   ;;  %vm2885_vm7 = vcmask 392512   ;;  %vm2892_vm8 = vcmask 458112   ;;  %vm2899_vm9 = vcmask 523712  }
  0x21   : > { %s551_s17 = scalar_select %p550_p10, %s5810_s9, 1  ;;  %vm2906_vm10 = vcmask 589312   ;;  %vm2913_vm11 = vcmask 654912   ;;  %vm8549_vm12 = vcmask 720512   ;;  %vm8550_vm13 = vcmask 786112  }
  0x22   : > { %s8848_s18 = smov (!%p544_p11, %s4827_s18), 15  ;;  %s8565_s0 = sld [smem:[#allocation54_spill]]  ;;  %vm8551_vm14 = vcmask 851712   ;;  %vm2941_vm15 = vcmask 917312  }
  0x23   : > { %s5856_s19 = sshll.u32 %s551_s17, 3  ;;  %s4919_s27 = sshll.u32 %s8848_s18, 7 }
  0x24   : > { %v5203_v1 = vld [vmem:[%s8562_s6] sm:$0xff]   ;;  %v5205_v4 = vld [vmem:[%s8562_s6 + $0x8] sm:$0xff]   ;;  %s8569_s5 = sld [smem:[#allocation58_spill]]  ;;  %s8718_s2 = sld [smem:[#allocation56_spill]] }
  0x25   : > { %v5204_v3 = vld [vmem:[%s8563_s4] sm:$0xff]   ;;  %4995 = vmatpush3.bf16.msra.mxu0 %v5203_v1  ;;  %v5206_v5 = vld [vmem:[%s8563_s4 + $0x8] sm:$0xff]   ;;  %s5703_s26 = smov 112  }
  0x26   : > { %5148 = vmatprep.subr.bf16.mxu1 %v5204_v3  ;;  %4996 = vmatprep.subr.bf16.mxu0 %v8534_v2  ;;  %s553_s6 = scalar_lea.vmem %s8564_s1, %s5856_s19  ;;  %s5704_s1 = smov [#allocation3]  }
  0x27   : > { %5150 = vmatpush3.bf16.msra.mxu1 %v5204_v3  ;;  %v755_v6 = vld [vmem:[%s553_s6] sm:$0xff]  ;;  %s7821_s6 = sand.u32 1, %s5689_s21  }
  0x28   : > { %5149 = vmatprep.subr.bf16.mxu1 %v5206_v5  ;;  %v756_v7 = vpack.c.bf16 %v755_v6, %v755_v6  ;;  %s5866_s17 = scalar_lea.vmem %s8565_s0, %s4919_s27  ;;  %s8552_s18 = sshll.u32 %s7821_s6, 3 }
  0x29   : > { %4997 = vmatpush3.bf16.msra.mxu0 %v5205_v4  ;;  %v619_v8 = vld [vmem:[%s5866_s17 + $0x1c0] sm:$0xff]  ;;  %v620_v9 = vld [vmem:[%s5866_s17 + $0x1c8] sm:$0xff]  ;;  %v621_v10 = vld [vmem:[%s5866_s17 + $0x1d0] sm:$0xff]  ;;  %s7830_s24 = scalar_lea.vmem [#allocation3], %s8552_s18  ;;  %s4663_s18 = scalar_lea.sflag [#allocation4], %s7821_s6 }
  0x2a   : > { %5002 = vmatprep.subr.bf16.mxu0 %v5204_v3  ;;  %v719_v11 = vpack.c.bf16 %v620_v9, %v619_v8  ;;  %v622_v12 = vld [vmem:[%s5866_s17 + $0x1d8] sm:$0xff]  ;;  %v563_v13 = vld [vmem:[%s5866_s17] sm:$0xff]  ;;  %v564_v14 = vld [vmem:[%s5866_s17 + $0x8] sm:$0xff]  ;;  %s557_s4 = scalar_lea.vmem %s8718_s2, %s5856_s19  ;;  %s5607_s2 = sshll.u32 %s5704_s1, 4  ;;  %s5608_s2 = int_to_ptr.vmem [resolvable:$false] %s5607_s2 }
  0x2b   : > { %5151 = vmatpush3.bf16.msra.mxu1 %v5206_v5  ;;  %v720_v15 = vpack.c.bf16 %v622_v12, %v621_v10  ;;  %v691_v16 = vpack.c.bf16 %v564_v14, %v563_v13  ;;  %v565_v17 = vld [vmem:[%s5866_s17 + $0x10] sm:$0xff]  ;;  %v566_v18 = vld [vmem:[%s5866_s17 + $0x18] sm:$0xff]  ;;  %v623_v19 = vld [vmem:[%s5866_s17 + $0x1e0] sm:$0xff] }
  0x2c   : > { %4999 = vmatmul.mubr.msk.bf16.vlgmr.msra.gmra.mrb[0].mxu0 %vm8544_vm1, %v756_v7  ;;  %5062 = vmatprep.mubr.msk.bf16.mxu1 %vm8544_vm1, %v719_v11  ;;  %v692_v20 = vpack.c.bf16 %v566_v18, %v565_v17  ;;  %v624_v21 = vld [vmem:[%s5866_s17 + $0x1e8] sm:$0xff]  ;;  %v567_v23 = vld [vmem:[%s5866_s17 + $0x20] sm:$0xff]  ;;  %v625_v25 = vld [vmem:[%s5866_s17 + $0x1f0] sm:$0xff] }
  0x2d   : > { %5003 = vmatpush3.bf16.msra.mxu0 %v5204_v3  ;;  %v721_v22 = vpack.c.bf16 %v624_v21, %v623_v19  ;;  %v568_v24 = vld [vmem:[%s5866_s17 + $0x28] sm:$0xff]  ;;  %5006 = vmatprep.mubr.msk.bf16.mxu0 %vm8544_vm1, %v691_v16  ;;  %v626_v26 = vld [vmem:[%s5866_s17 + $0x1f8] sm:$0xff]  ;;  %v627_v28 = vld [vmem:[%s5866_s17 + $0x200] sm:$0xff] }
  0x2e   : > { %5004 = vmatprep.subr.bf16.mxu0 %v5206_v5  ;;  %5063 = vmatmul.mubr.msk.bf16.vlgmr.msra.gmra.mrb[0].mxu1 %vm8544_vm1, %v720_v15  ;;  %v693_v27 = vpack.c.bf16 %v568_v24, %v567_v23  ;;  %v628_v29 = vld [vmem:[%s5866_s17 + $0x208] sm:$0xff]  ;;  %v722_v30 = vpack.c.bf16 %v626_v26, %v625_v25  ;;  %v569_v31 = vld [vmem:[%s5866_s17 + $0x30] sm:$0xff]  ;;  %v570_v32 = vld [vmem:[%s5866_s17 + $0x38] sm:$0xff] }
  0x2f   : > { %5066 = vmatprep.mubr.msk.bf16.mxu1 %vm8544_vm1, %v721_v22  ;;  %v723_v33 = vpack.c.bf16 %v628_v29, %v627_v28  ;;  %v571_v34 = vld [vmem:[%s5866_s17 + $0x40] sm:$0xff]  ;;  %v572_v35 = vld [vmem:[%s5866_s17 + $0x48] sm:$0xff]  ;;  %v694_v36 = vpack.c.bf16 %v570_v32, %v569_v31  ;;  %v629_v38 = vld [vmem:[%s5866_s17 + $0x210] sm:$0xff] }
  0x30   : > { %v695_v37 = vpack.c.bf16 %v572_v35, %v571_v34  ;;  %v630_v39 = vld [vmem:[%s5866_s17 + $0x218] sm:$0xff]  ;;  %v631_v41 = vld [vmem:[%s5866_s17 + $0x220] sm:$0xff]  ;;  %v632_v42 = vld [vmem:[%s5866_s17 + $0x228] sm:$0xff] }
  0x31   : > { %5005 = vmatpush3.bf16.msra.mxu0 %v5206_v5  ;;  %v724_v43 = vpack.c.bf16 %v630_v39, %v629_v38  ;;  %v573_v44 = vld [vmem:[%s5866_s17 + $0x50] sm:$0xff]  ;;  %v574_v45 = vld [vmem:[%s5866_s17 + $0x58] sm:$0xff]  ;;  %v725_v46 = vpack.c.bf16 %v632_v42, %v631_v41  ;;  %v575_v47 = vld [vmem:[%s5866_s17 + $0x60] sm:$0xff] }
  0x32   : > { %5134 = vmatprep.subr.bf16.mxu0 %v8534_v2  ;;  %v576_v48 = vld [vmem:[%s5866_s17 + $0x68] sm:$0xff]  ;;  %v696_v49 = vpack.c.bf16 %v574_v45, %v573_v44  ;;  %v633_v51 = vld [vmem:[%s5866_s17 + $0x230] sm:$0xff]  ;;  %v634_v52 = vld [vmem:[%s5866_s17 + $0x238] sm:$0xff] }
  0x33   : > { %v697_v50 = vpack.c.bf16 %v576_v48, %v575_v47  ;;  %v635_v53 = vld [vmem:[%s5866_s17 + $0x240] sm:$0xff]  ;;  %v636_v54 = vld [vmem:[%s5866_s17 + $0x248] sm:$0xff]  ;;  %v726_v55 = vpack.c.bf16 %v634_v52, %v633_v51  ;;  %v577_v56 = vld [vmem:[%s5866_s17 + $0x70] sm:$0xff] }
  0x34   : > { %5007 = vmatmul.mubr.msk.bf16.vlgmr.msra.gmra.mrb[4].mxu0 %vm8544_vm1, %v692_v20  ;;  %v578_v57 = vld [vmem:[%s5866_s17 + $0x78] sm:$0xff]  ;;  %v727_v58 = vpack.c.bf16 %v636_v54, %v635_v53  ;;  %v579_v59 = vld [vmem:[%s5866_s17 + $0x80] sm:$0xff]  ;;  %v580_v60 = vld [vmem:[%s5866_s17 + $0x88] sm:$0xff] }
  0x35   : > { %5010 = vmatprep.mubr.msk.bf16.mxu0 %vm8544_vm1, %v693_v27  ;;  %v698_v61 = vpack.c.bf16 %v578_v57, %v577_v56  ;;  %v699_v62 = vpack.c.bf16 %v580_v60, %v579_v59  ;;  %v637_v63 = vld [vmem:[%s5866_s17 + $0x250] sm:$0xff]  ;;  %v638_v0 = vld [vmem:[%s5866_s17 + $0x258] sm:$0xff]  ;;  %v639_v1 = vld [vmem:[%s5866_s17 + $0x260] sm:$0xff] }
  0x36   : > { %5067 = vmatmul.mubr.msk.bf16.gmra.mrb[4].mxu1 %vm8544_vm1, %v722_v30  ;;  %v640_v3 = vld [vmem:[%s5866_s17 + $0x268] sm:$0xff]  ;;  %v728_v4 = vpack.c.bf16 %v638_v0, %v637_v63  ;;  %v581_v5 = vld [vmem:[%s5866_s17 + $0x90] sm:$0xff]  ;;  %v582_v6 = vld [vmem:[%s5866_s17 + $0x98] sm:$0xff] }
  0x37   : > { %5070 = vmatprep.mubr.msk.bf16.mxu1 %vm8544_vm1, %v723_v33  ;;  %v729_v7 = vpack.c.bf16 %v640_v3, %v639_v1  ;;  %v583_v8 = vld [vmem:[%s5866_s17 + $0xa0] sm:$0xff]  ;;  %v584_v9 = vld [vmem:[%s5866_s17 + $0xa8] sm:$0xff]  ;;  %v700_v10 = vpack.c.bf16 %v582_v6, %v581_v5  ;;  %v641_v12 = vld [vmem:[%s5866_s17 + $0x270] sm:$0xff] }
  0x38   : > { %v701_v11 = vpack.c.bf16 %v584_v9, %v583_v8  ;;  %v642_v13 = vld [vmem:[%s5866_s17 + $0x278] sm:$0xff]  ;;  %v643_v14 = vld [vmem:[%s5866_s17 + $0x280] sm:$0xff]  ;;  %v644_v15 = vld [vmem:[%s5866_s17 + $0x288] sm:$0xff] }
  0x39   : > { %v730_v16 = vpack.c.bf16 %v642_v13, %v641_v12  ;;  %v585_v17 = vld [vmem:[%s5866_s17 + $0xb0] sm:$0xff]  ;;  %v586_v18 = vld [vmem:[%s5866_s17 + $0xb8] sm:$0xff]  ;;  %v731_v19 = vpack.c.bf16 %v644_v15, %v643_v14  ;;  %v587_v20 = vld [vmem:[%s5866_s17 + $0xc0] sm:$0xff] }
  0x3a   : > { %v588_v21 = vld [vmem:[%s5866_s17 + $0xc8] sm:$0xff]  ;;  %v4905_v22 = vld [vmem:[#allocation2] ss:$0 sm:$0xff]  ;;  %v702_v23 = vpack.c.bf16 %v586_v18, %v585_v17  ;;  %v645_v25 = vld [vmem:[%s5866_s17 + $0x290] sm:$0xff] }
  0x3b   : > { %2585 = vperm.xlu1 %5201, %v4905_v22   ;;  %v703_v24 = vpack.c.bf16 %v588_v21, %v587_v20  ;;  %v646_v26 = vld [vmem:[%s5866_s17 + $0x298] sm:$0xff]  ;;  %v647_v27 = vld [vmem:[%s5866_s17 + $0x2a0] sm:$0xff]  ;;  %v648_v28 = vld [vmem:[%s5866_s17 + $0x2a8] sm:$0xff] }
  0x3c   : > { %5011 = vmatmul.mubr.msk.bf16.gmra.mrb[8].mxu0 %vm8544_vm1, %v694_v36  ;;  %v732_v29 = vpack.c.bf16 %v646_v26, %v645_v25  ;;  %v589_v30 = vld [vmem:[%s5866_s17 + $0xd0] sm:$0xff]  ;;  %v590_v31 = vld [vmem:[%s5866_s17 + $0xd8] sm:$0xff]  ;;  %v733_v32 = vpack.c.bf16 %v648_v28, %v647_v27  ;;  %v591_v33 = vld [vmem:[%s5866_s17 + $0xe0] sm:$0xff] }
  0x3d   : > { %5014 = vmatprep.mubr.msk.bf16.mxu0 %vm8544_vm1, %v695_v37  ;;  %v592_v34 = vld [vmem:[%s5866_s17 + $0xe8] sm:$0xff]  ;;  %v704_v35 = vpack.c.bf16 %v590_v31, %v589_v30  ;;  %v649_v37 = vld [vmem:[%s5866_s17 + $0x2b0] sm:$0xff]  ;;  %v650_v38 = vld [vmem:[%s5866_s17 + $0x2b8] sm:$0xff] }
  0x3e   : > { %5071 = vmatmul.mubr.msk.bf16.gmra.mrb[8].mxu1 %vm8544_vm1, %v724_v43  ;;  %v705_v36 = vpack.c.bf16 %v592_v34, %v591_v33  ;;  %v651_v39 = vld [vmem:[%s5866_s17 + $0x2c0] sm:$0xff]  ;;  %v652_v40 = vld [vmem:[%s5866_s17 + $0x2c8] sm:$0xff]  ;;  %v734_v41 = vpack.c.bf16 %v650_v38, %v649_v37  ;;  %v593_v42 = vld [vmem:[%s5866_s17 + $0xf0] sm:$0xff] }
  0x3f   : > { %5074 = vmatprep.mubr.msk.bf16.mxu1 %vm8544_vm1, %v725_v46  ;;  %v594_v43 = vld [vmem:[%s5866_s17 + $0xf8] sm:$0xff]  ;;  %v735_v44 = vpack.c.bf16 %v652_v40, %v651_v39  ;;  %v595_v45 = vld [vmem:[%s5866_s17 + $0x100] sm:$0xff]  ;;  %v596_v46 = vld [vmem:[%s5866_s17 + $0x108] sm:$0xff] }
  0x40   : > { %v706_v47 = vpack.c.bf16 %v594_v43, %v593_v42  ;;  %v707_v48 = vpack.c.bf16 %v596_v46, %v595_v45  ;;  %v655_v51 = vld [vmem:[%s5866_s17 + $0x2e0] sm:$0xff]  ;;  %v656_v52 = vld [vmem:[%s5866_s17 + $0x2e8] sm:$0xff]  ;;  %v597_v54 = vld [vmem:[%s5866_s17 + $0x110] sm:$0xff] }
  0x41   : > { %v737_v56 = vpack.c.bf16 %v656_v52, %v655_v51  ;;  %v599_v57 = vld [vmem:[%s5866_s17 + $0x120] sm:$0xff]  ;;  %v660_v0 = vld [vmem:[%s5866_s17 + $0x308] sm:$0xff]  ;;  %v601_v3 = vld [vmem:[%s5866_s17 + $0x130] sm:$0xff] }
  0x42   : > { %v659_v63 = vld [vmem:[%s5866_s17 + $0x300] sm:$0xff]  ;;  %v664_v13 = vld [vmem:[%s5866_s17 + $0x328] sm:$0xff]  ;;  %v605_v15 = vld [vmem:[%s5866_s17 + $0x150] sm:$0xff] }
  0x43   : > { %v739_v5 = vpack.c.bf16 %v660_v0, %v659_v63  ;;  %v603_v6 = vld [vmem:[%s5866_s17 + $0x140] sm:$0xff]  ;;  %v665_v22 = vld [vmem:[%s5866_s17 + $0x330] sm:$0xff]  ;;  %v668_v25 = vld [vmem:[%s5866_s17 + $0x348] sm:$0xff] }
  0x44   : > { %5015 = vmatmul.mubr.msk.bf16.gmra.mrb[12].mxu0 %vm8544_vm1, %v696_v49  ;;  %v653_v49 = vld [vmem:[%s5866_s17 + $0x2d0] sm:$0xff]  ;;  %v663_v12 = vld [vmem:[%s5866_s17 + $0x320] sm:$0xff]  ;;  %v610_v28 = vld [vmem:[%s5866_s17 + $0x178] sm:$0xff] }
  0x45   : > { %5018 = vmatprep.mubr.msk.bf16.mxu0 %vm8544_vm1, %v697_v50  ;;  %v654_v50 = vld [vmem:[%s5866_s17 + $0x2d8] sm:$0xff]  ;;  %v741_v17 = vpack.c.bf16 %v664_v13, %v663_v12  ;;  %v607_v18 = vld [vmem:[%s5866_s17 + $0x160] sm:$0xff]  ;;  %v609_v27 = vld [vmem:[%s5866_s17 + $0x170] sm:$0xff]  ;;  %v5702_v13 = vmov 1966171168  }
  0x46   : > { %5075 = vmatmul.mubr.msk.bf16.gmra.mrb[12].mxu1 %vm8544_vm1, %v726_v55  ;;  %v736_v53 = vpack.c.bf16 %v654_v50, %v653_v49  ;;  %v598_v55 = vld [vmem:[%s5866_s17 + $0x118] sm:$0xff]  ;;  %v611_v30 = vld [vmem:[%s5866_s17 + $0x180] sm:$0xff]  ;;  %v612_v31 = vld [vmem:[%s5866_s17 + $0x188] sm:$0xff] }
  0x47   : > { %5078 = vmatprep.mubr.msk.bf16.mxu1 %vm8544_vm1, %v727_v58  ;;  %v600_v58 = vld [vmem:[%s5866_s17 + $0x128] sm:$0xff]  ;;  %v708_v59 = vpack.c.bf16 %v598_v55, %v597_v54  ;;  %v715_v33 = vpack.c.bf16 %v612_v31, %v611_v30  ;;  %v669_v34 = vld [vmem:[%s5866_s17 + $0x350] sm:$0xff]  ;;  %v614_v40 = vld [vmem:[%s5866_s17 + $0x198] sm:$0xff] }
  0x48   : > { %v709_v60 = vpack.c.bf16 %v600_v58, %v599_v57  ;;  %v672_v37 = vld [vmem:[%s5866_s17 + $0x368] sm:$0xff]  ;;  %v613_v39 = vld [vmem:[%s5866_s17 + $0x190] sm:$0xff]  ;;  %v615_v42 = vld [vmem:[%s5866_s17 + $0x1a0] sm:$0xff] }
  0x49   : > { %v616_v43 = vld [vmem:[%s5866_s17 + $0x1a8] sm:$0xff]  ;;  %v673_v46 = vld [vmem:[%s5866_s17 + $0x370] sm:$0xff]  ;;  %v618_v52 = vld [vmem:[%s5866_s17 + $0x1b8] sm:$0xff] }
  0x4a   : > { %v717_v45 = vpack.c.bf16 %v616_v43, %v615_v42  ;;  %v676_v49 = vld [vmem:[%s5866_s17 + $0x388] sm:$0xff]  ;;  %v617_v51 = vld [vmem:[%s5866_s17 + $0x1b0] sm:$0xff]  ;;  %v679_v57 = vld [vmem:[%s5866_s17 + $0x3a0] sm:$0xff] }
  0x4b   : > { %v718_v54 = vpack.c.bf16 %v618_v52, %v617_v51  ;;  %v677_v55 = vld [vmem:[%s5866_s17 + $0x390] sm:$0xff]  ;;  %v680_v58 = vld [vmem:[%s5866_s17 + $0x3a8] sm:$0xff]  ;;  %v683_v63 = vld [vmem:[%s5866_s17 + $0x3c0] sm:$0xff] }
  0x4c   : > { %5019 = vmatmul.mubr.msk.bf16.gmra.mrb[16].mxu0 %vm8544_vm1, %v698_v61  ;;  %v657_v61 = vld [vmem:[%s5866_s17 + $0x2f0] sm:$0xff]  ;;  %v684_v0 = vld [vmem:[%s5866_s17 + $0x3c8] sm:$0xff] }
  0x4d   : > { %5022 = vmatprep.mubr.msk.bf16.mxu0 %vm8544_vm1, %v699_v62  ;;  %v658_v62 = vld [vmem:[%s5866_s17 + $0x2f8] sm:$0xff] }
  0x4e   : > { %5079 = vmatmul.mubr.msk.bf16.gmra.mrb[16].mxu1 %vm8544_vm1, %v728_v4  ;;  %v738_v1 = vpack.c.bf16 %v658_v62, %v657_v61  ;;  %v602_v4 = vld [vmem:[%s5866_s17 + $0x138] sm:$0xff]  ;;  %v681_v61 = vld [vmem:[%s5866_s17 + $0x3b0] sm:$0xff] }
  0x4f   : > { %5082 = vmatprep.mubr.msk.bf16.mxu1 %vm8544_vm1, %v729_v7  ;;  %v604_v7 = vld [vmem:[%s5866_s17 + $0x148] sm:$0xff]  ;;  %v710_v8 = vpack.c.bf16 %v602_v4, %v601_v3  ;;  %v682_v62 = vld [vmem:[%s5866_s17 + $0x3b8] sm:$0xff]  ;;  %v751_v3 = vpack.c.bf16 %v684_v0, %v683_v63  ;;  %v685_v4 = vld [vmem:[%s5866_s17 + $0x3d0] sm:$0xff] }
  0x50   : > { %v711_v9 = vpack.c.bf16 %v604_v7, %v603_v6  ;;  %v687_v6 = vld [vmem:[%s5866_s17 + $0x3e0] sm:$0xff]  ;;  %v688_v7 = vld [vmem:[%s5866_s17 + $0x3e8] sm:$0xff] }
  0x54   : > { %5023 = vmatmul.mubr.msk.bf16.gmra.mrb[20].mxu0 %vm8544_vm1, %v700_v10  ;;  %v661_v10 = vld [vmem:[%s5866_s17 + $0x310] sm:$0xff] }
  0x55   : > { %5026 = vmatprep.mubr.msk.bf16.mxu0 %vm8544_vm1, %v701_v11  ;;  %v662_v11 = vld [vmem:[%s5866_s17 + $0x318] sm:$0xff] }
  0x56   : > { %5083 = vmatmul.mubr.msk.bf16.gmra.mrb[20].mxu1 %vm8544_vm1, %v730_v16  ;;  %v740_v14 = vpack.c.bf16 %v662_v11, %v661_v10  ;;  %v606_v16 = vld [vmem:[%s5866_s17 + $0x158] sm:$0xff]  ;;  %v689_v10 = vld [vmem:[%s5866_s17 + $0x3f0] sm:$0xff] }
  0x57   : > { %5086 = vmatprep.mubr.msk.bf16.mxu1 %vm8544_vm1, %v731_v19  ;;  %v608_v19 = vld [vmem:[%s5866_s17 + $0x168] sm:$0xff]  ;;  %v712_v20 = vpack.c.bf16 %v606_v16, %v605_v15  ;;  %v690_v11 = vld [vmem:[%s5866_s17 + $0x3f8] sm:$0xff]  ;;  %v8536_v15 = vlaneseq }
  0x58   : > { %v713_v21 = vpack.c.bf16 %v608_v19, %v607_v18  ;;  %v754_v12 = vpack.c.bf16 %v690_v11, %v689_v10  ;;  %v4833_v18 = vld [vmem:[%s8525_s7] ss:$0 sm:$0xff] }
  0x5c   : > { %5027 = vmatmul.mubr.msk.bf16.gmra.mrb[24].mxu0 %vm8544_vm1, %v702_v23  ;;  %v666_v23 = vld [vmem:[%s5866_s17 + $0x338] sm:$0xff] }
  0x5d   : > { %5030 = vmatprep.mubr.msk.bf16.mxu0 %vm8544_vm1, %v703_v24  ;;  %v667_v24 = vld [vmem:[%s5866_s17 + $0x340] sm:$0xff]  ;;  %v742_v26 = vpack.c.bf16 %v666_v23, %v665_v22 }
  0x5e   : > { %5087 = vmatmul.mubr.msk.bf16.gmra.mrb[24].mxu1 %vm8544_vm1, %v732_v29  ;;  %v743_v29 = vpack.c.bf16 %v668_v25, %v667_v24 }
  0x5f   : > { %5090 = vmatprep.mubr.msk.bf16.mxu1 %vm8544_vm1, %v733_v32  ;;  %v714_v32 = vpack.c.bf16 %v610_v28, %v609_v27 }
  0x64   : > { %5031 = vmatmul.mubr.msk.bf16.gmra.mrb[28].mxu0 %vm8544_vm1, %v704_v35  ;;  %v670_v35 = vld [vmem:[%s5866_s17 + $0x358] sm:$0xff] }
  0x65   : > { %5034 = vmatprep.mubr.msk.bf16.mxu0 %vm8544_vm1, %v705_v36  ;;  %v671_v36 = vld [vmem:[%s5866_s17 + $0x360] sm:$0xff]  ;;  %v744_v38 = vpack.c.bf16 %v670_v35, %v669_v34 }
  0x66   : > { %5091 = vmatmul.mubr.msk.bf16.gmra.mrb[28].mxu1 %vm8544_vm1, %v734_v41  ;;  %v745_v41 = vpack.c.bf16 %v672_v37, %v671_v36  ;;  %v6085_v35 = vld [vmem:[%s8569_s5] ss:$0 sm:$0xff] }
  0x67   : > { %5094 = vmatprep.mubr.msk.bf16.mxu1 %vm8544_vm1, %v735_v44  ;;  %v716_v44 = vpack.c.bf16 %v614_v40, %v613_v39 }
  0x6c   : > { %5035 = vmatmul.mubr.msk.bf16.gmra.mrb[32].mxu0 %vm8544_vm1, %v706_v47  ;;  %v674_v47 = vld [vmem:[%s5866_s17 + $0x378] sm:$0xff] }
  0x6d   : > { %5038 = vmatprep.mubr.msk.bf16.mxu0 %vm8544_vm1, %v707_v48  ;;  %v675_v48 = vld [vmem:[%s5866_s17 + $0x380] sm:$0xff]  ;;  %v746_v50 = vpack.c.bf16 %v674_v47, %v673_v46 }
  0x6e   : > { %5095 = vmatmul.mubr.msk.bf16.gmra.mrb[32].mxu1 %vm8544_vm1, %v736_v53  ;;  %v747_v53 = vpack.c.bf16 %v676_v49, %v675_v48 }
  0x6f   : > { %5098 = vmatprep.mubr.msk.bf16.mxu1 %vm8544_vm1, %v737_v56  ;;  %v678_v56 = vld [vmem:[%s5866_s17 + $0x398] sm:$0xff] }
  0x74   : > { %5039 = vmatmul.mubr.msk.bf16.gmra.mrb[36].mxu0 %vm8544_vm1, %v708_v59  ;;  %v748_v59 = vpack.c.bf16 %v678_v56, %v677_v55 }
  0x75   : > { %5042 = vmatprep.mubr.msk.bf16.mxu0 %vm8544_vm1, %v709_v60  ;;  %v749_v60 = vpack.c.bf16 %v680_v58, %v679_v57 }
  0x76   : > { %5099 = vmatmul.mubr.msk.bf16.gmra.mrb[36].mxu1 %vm8544_vm1, %v738_v1  ;;  %v750_v1 = vpack.c.bf16 %v682_v62, %v681_v61 }
  0x77   : > { %5102 = vmatprep.mubr.msk.bf16.mxu1 %vm8544_vm1, %v739_v5  ;;  %v686_v5 = vld [vmem:[%s5866_s17 + $0x3d8] sm:$0xff] }
  0x7c   : > { %5043 = vmatmul.mubr.msk.bf16.gmra.mrb[40].mxu0 %vm8544_vm1, %v710_v8  ;;  %v752_v8 = vpack.c.bf16 %v686_v5, %v685_v4 }
  0x7d   : > { %5046 = vmatprep.mubr.msk.bf16.mxu0 %vm8544_vm1, %v711_v9  ;;  %v753_v9 = vpack.c.bf16 %v688_v7, %v687_v6 }
  0x7e   : > { %5103 = vmatmul.mubr.msk.bf16.gmra.mrb[40].mxu1 %vm8544_vm1, %v740_v14  ;;  %v1715_v14 = vunpack.c.l.s4 %v5702_v13  ;;  %v6130_v13 = vld [vmem:[%s8526_s8] ss:$0 sm:$0xff] }
  0x7f   : > { %5106 = vmatprep.mubr.msk.bf16.mxu1 %vm8544_vm1, %v741_v17  ;;  %v6064_v17 = vshrl.u32 %v8536_v15, 7 }
  0x80   : > { %v1716_v16 = vunpack.c.0.s8 %v1715_v14 }
  0x81   : > { %8566 = vst [vmem:[#allocation9_spill] sm:$0xff] %v6064_v17  ;;  %v6078_v31 = vsub.s32 0, %v6064_v17 }
  0x82   : > { %v1719_v19 = vsub.s32 %v1716_v16, %v6064_v17 }
  0x83   : > { %8568 = vst [vmem:[#allocation11_spill] sm:$0xff] %v6078_v31 }
  0x84   : > { %5047 = vmatmul.mubr.msk.bf16.gmra.mrb[44].mxu0 %vm8544_vm1, %v712_v20 }
  0x85   : > { %5050 = vmatprep.mubr.msk.bf16.mxu0 %vm8544_vm1, %v713_v21 }
  0x86   : > { %5107 = vmatmul.mubr.msk.bf16.gmra.mrb[44].mxu1 %vm8544_vm1, %v742_v26 }
  0x87   : > { %5110 = vmatprep.mubr.msk.bf16.mxu1 %vm8544_vm1, %v743_v29 }
  0x8c   : > { %5051 = vmatmul.mubr.msk.bf16.gmra.mrb[48].mxu0 %vm8544_vm1, %v714_v32 }
  0x8d   : > { %5054 = vmatprep.mubr.msk.bf16.mxu0 %vm8544_vm1, %v715_v33 }
  0x8e   : > { %5111 = vmatmul.mubr.msk.bf16.gmra.mrb[48].mxu1 %vm8544_vm1, %v744_v38 }
  0x8f   : > { %5114 = vmatprep.mubr.msk.bf16.mxu1 %vm8544_vm1, %v745_v41 }
  0x94   : > { %5055 = vmatmul.mubr.msk.bf16.gmra.mrb[52].mxu0 %vm8544_vm1, %v716_v44 }
  0x95   : > { %5058 = vmatprep.mubr.msk.bf16.mxu0 %vm8544_vm1, %v717_v45 }
  0x96   : > { %5115 = vmatmul.mubr.msk.bf16.gmra.mrb[52].mxu1 %vm8544_vm1, %v746_v50 }
  0x97   : > { %5118 = vmatprep.mubr.msk.bf16.mxu1 %vm8544_vm1, %v747_v53 }
  0x9c   : > { %5059 = vmatmul.mubr.msk.bf16.gmra.mrb[56].mxu0 %vm8544_vm1, %v718_v54 }
  0x9d   : > { %5138 = vmatprep.mubr.msk.bf16.mxu0 %vm8543_vm0, %v8534_v2  ;;  %vm2948_vm0 = vcmask 982912  }
  0x9e   : > { %5119 = vmatmul.mubr.msk.bf16.gmra.mrb[56].mxu1 %vm8544_vm1, %v748_v59 }
  0x9f   : > { %5122 = vmatprep.mubr.msk.bf16.mxu1 %vm8544_vm1, %v749_v60 }
  0xa6   : > { %5123 = vmatmul.mubr.msk.bf16.gmra.mrb[60].mxu1 %vm8544_vm1, %v750_v1 }
  0xa7   : > { %5126 = vmatprep.mubr.msk.bf16.mxu1 %vm8544_vm1, %v751_v3 }
  0xae   : > { %5127 = vmatmul.mubr.msk.bf16.gmra.mrb[64].mxu1 %vm8544_vm1, %v752_v8 }
  0xaf   : > { %5130 = vmatprep.mubr.msk.bf16.mxu1 %vm8544_vm1, %v753_v9 }
  0xb6   : > { %5131 = vmatmul.mubr.msk.bf16.gmra.mrb[68].mxu1 %vm8544_vm1, %v754_v12  ;;  %vm2955_vm1 = vcmask 1048512  }
  0xff   : > { %v818_v20 = vpop.f32.mrb[0].mxu0 }
 0x100   : > { %v6070_v21 = vadd.f32 %v4833_v18, %v818_v20  ;;  %v5000_v22 = vpop.f32.mrb[1].mxu0 }
 0x101   : > { %v821_v23 = vpop.f32.mrb[2].mxu0  ;;  %v5064_v29 = vpop.f32.mrb[0].mxu1 }
 0x102   : > { %8567 = vst [vmem:[#allocation10_spill] sm:$0xff] %v6070_v21  ;;  %v1713_v24 = vcombine.high %v6070_v21, %v6070_v21  ;;  %v1720_v25 = vrot.slane %v6070_v21, %v1719_v19  ;;  %v5001_v26 = vpop.f32.mrb[3].mxu0  ;;  %v1290_v32 = vpop.f32.mrb[1].mxu1  ;;  %v1642_v7 = vadd.f32 %v5064_v29, %v6085_v35 }
 0x103   : > { %v5065_v36 = vpop.f32.mrb[2].mxu1  ;;  %v1640_v52 = vadd.f32 %v6085_v35, %v1290_v32 }
 0x104   : > { %v1727_v27 = vrot.slane %v1713_v24, %v1719_v19  ;;  %v1728_v28 = vcombine.high %v1720_v25, %v1720_v25  ;;  %v6075_v30 = vrot.slane %v1720_v25, %v1719_v19  ;;  %v1293_v38 = vpop.f32.mrb[3].mxu1  ;;  %v1643_v25 = vadd.f32 %v5065_v36, %v6085_v35 }
 0x105   : > { %v1641_v58 = vadd.f32 %v6085_v35, %v1293_v38 }
 0x106   : > { %v1729_v33 = vcombine.high %v1727_v27, %v1727_v27  ;;  %v6080_v34 = vrot.slane %v1728_v28, %v1719_v19  ;;  %v6091_v41 = vrot.slane %v6075_v30, %v6078_v31  ;;  %v6109_v61 = vrot.slane %v1727_v27, %v1719_v19 }
 0x107   : > { %v5008_v37 = vpop.f32.mrb[4].mxu0 }
 0x108   : > { %v6087_v39 = vrot.slane %v1729_v33, %v1719_v19  ;;  %v1066_v40 = vpop.f32.mrb[5].mxu0  ;;  %v1586_v42 = vadd.f32 %v5008_v37, %v6085_v35  ;;  %v1760_v44 = vcombine.high %v6080_v34, %v6080_v34  ;;  %v6119_v6 = vrot.slane %v6109_v61, %v6078_v31 }
 0x109   : > { %v5009_v43 = vpop.f32.mrb[6].mxu0  ;;  %v1584_v47 = vadd.f32 %v6085_v35, %v1066_v40  ;;  %v5068_v48 = vpop.f32.mrb[4].mxu1  ;;  %v1758_v37 = vcombine.high %v6075_v30, %v6075_v30 }
 0x10a   : > { %v1069_v45 = vpop.f32.mrb[7].mxu0  ;;  %v1804_v46 = vadd.f32 %v6091_v41, %v1586_v42  ;;  %v1587_v49 = vadd.f32 %v5009_v43, %v6085_v35  ;;  %v1306_v50 = vpop.f32.mrb[5].mxu1  ;;  %v6100_v51 = vrot.slane %v1760_v44, %v6078_v31  ;;  %v1646_v38 = vadd.f32 %v5068_v48, %v6085_v35 }
 0x10b   : > { %v1802_v53 = vadd.f32 %v6091_v41, %v1584_v47  ;;  %v5069_v54 = vpop.f32.mrb[6].mxu1  ;;  %v1585_v40 = vadd.f32 %v6085_v35, %v1069_v45  ;;  %v1644_v30 = vadd.f32 %v6085_v35, %v1306_v50  ;;  %v6172_v50 = vrot.slane %v6080_v34, %v6078_v31 }
 0x10c   : > { %5210 = vtanh.f32 %v1804_v46  ;;  %8570 = vst [vmem:[#allocation12_spill] sm:$0xff] %v6100_v51  ;;  %v1647_v55 = vadd.f32 %v5069_v54, %v6085_v35  ;;  %v1309_v56 = vpop.f32.mrb[7].mxu1  ;;  %v1805_v59 = vadd.f32 %v6091_v41, %v1587_v49  ;;  %v1858_v63 = vadd.f32 %v6100_v51, %v1640_v52 }
 0x10d   : > { %5212 = vtanh.f32 %v1802_v53  ;;  %v1859_v4 = vadd.f32 %v6100_v51, %v1641_v58  ;;  %v1860_v22 = vadd.f32 %v6100_v51, %v1642_v7  ;;  %v1861_v49 = vadd.f32 %v6100_v51, %v1643_v25 }
 0x10e   : > { %v1865_v3 = vadd.f32 %v6100_v51, %v1647_v55  ;;  %5214 = vtanh.f32 %v1805_v59  ;;  %v1645_v52 = vadd.f32 %v6085_v35, %v1309_v56 }
 0x10f   : > { %v6105_v57 = vpop.f32.mrb[8].mxu0  ;;  %5216 = vtanh.f32 %v1858_v63  ;;  %v1864_v63 = vadd.f32 %v6100_v51, %v1646_v38 }
 0x110   : > { %v1082_v60 = vpop.f32.mrb[9].mxu0  ;;  %5218 = vtanh.f32 %v1865_v3  ;;  %v1590_v56 = vadd.f32 %v6105_v57, %v6085_v35  ;;  %v6184_v3 = vrot.slane %v6087_v39, %v6078_v31  ;;  %v1862_v57 = vadd.f32 %v6100_v51, %v1644_v30 }
 0x111   : > { %v6111_v62 = vpop.f32.mrb[10].mxu0  ;;  %v1588_v0 = vadd.f32 %v6085_v35, %v1082_v60  ;;  %v5072_v5 = vpop.f32.mrb[8].mxu1  ;;  %5220 = vtanh.f32 %v1859_v4  ;;  %v6175_v60 = vrot.slane %v1758_v37, %v6078_v31  ;;  %v1803_v4 = vadd.f32 %v6091_v41, %v1585_v40 }
 0x112   : > { %v1085_v1 = vpop.f32.mrb[11].mxu0  ;;  %v1650_v8 = vadd.f32 %v5072_v5, %v6085_v35  ;;  %v1322_v9 = vpop.f32.mrb[9].mxu1  ;;  %v1591_v38 = vadd.f32 %v6111_v62, %v6085_v35 }
 0x113   : > { %v1806_v10 = vadd.f32 %v6091_v41, %v1588_v0  ;;  %v1648_v11 = vadd.f32 %v6085_v35, %v1322_v9  ;;  %v6125_v12 = vpop.f32.mrb[10].mxu1  ;;  %v1589_v28 = vadd.f32 %v6085_v35, %v1085_v1 }
 0x114   : > { %v1868_v16 = vadd.f32 %v6119_v6, %v1650_v8  ;;  %v6133_v18 = vpop.f32.mrb[11].mxu1 }
 0x115   : > { %5222 = vtanh.f32 %v1806_v10  ;;  %v1866_v26 = vadd.f32 %v6119_v6, %v1648_v11  ;;  %v1807_v53 = vadd.f32 %v6091_v41, %v1589_v28 }
 0x116   : > { %v5211_v14 = vpop.eup %5210  ;;  %5224 = vtanh.f32 %v1868_v16 }
 0x117   : > { %v6135_v19 = vpop.f32.mrb[12].mxu0  ;;  %v2067_v24 = vmul.f32 %v5211_v14, %v6130_v13  ;;  %v5213_v33 = vpop.eup %5212  ;;  %5226 = vtanh.f32 %v1860_v22  ;;  %v1863_v14 = vadd.f32 %v6100_v51, %v1645_v52 }
 0x118   : > { %v1098_v20 = vpop.f32.mrb[13].mxu0  ;;  %v2065_v46 = vmul.f32 %v5213_v33, %v6130_v13  ;;  %v5215_v47 = vpop.eup %5214  ;;  %5228 = vtanh.f32 %v1866_v26 }
 0x119   : > { %v6138_v23 = vpop.f32.mrb[14].mxu0  ;;  %v2200_v29 = vsel %vm8548_vm2, %v2067_v24, 0.0  ;;  %v5076_v36 = vpop.f32.mrb[12].mxu1  ;;  %v1592_v42 = vadd.f32 %v6085_v35, %v1098_v20  ;;  %v2068_v7 = vmul.f32 %v5215_v47, %v6130_v13  ;;  %5230 = vtanh.f32 %v1861_v49 }
 0x11a   : > { %v1101_v27 = vpop.f32.mrb[15].mxu0  ;;  %2201 = vadd.xlane.f32.xlu0 %v2200_v29  ;;  %v6151_v43 = vpop.f32.mrb[13].mxu1  ;;  %v2194_v55 = vsel %vm8548_vm2, %v2065_v46, 0.0  ;;  %v1654_v9 = vadd.f32 %v5076_v36, %v6085_v35  ;;  %5232 = vtanh.f32 %v1807_v53  ;;  %v1808_v24 = vadd.f32 %v6091_v41, %v1590_v56 }
 0x11b   : > { %v1593_v32 = vadd.f32 %v6085_v35, %v1101_v27  ;;  %v6159_v48 = vpop.f32.mrb[14].mxu1  ;;  %v5217_v59 = vpop.eup %5216  ;;  %v1810_v34 = vadd.f32 %v6091_v41, %v1592_v42  ;;  %v2203_v16 = vsel %vm8548_vm2, %v2068_v7, 0.0  ;;  %5234 = vtanh.f32 %v1864_v63 }
 0x11c   : > { %v6165_v54 = vpop.f32.mrb[15].mxu1  ;;  %v5219_v1 = vpop.eup %5218  ;;  %v2121_v20 = vmul.f32 %v5217_v59, %v6130_v13  ;;  %v1595_v29 = vadd.f32 %v6138_v23, %v6085_v35  ;;  %v1872_v40 = vadd.f32 %v6119_v6, %v1654_v9  ;;  %v1651_v23 = vadd.f32 %v6125_v12, %v6085_v35 }
 0x11d   : > { %v6154_v44 = vadd.f32 %v6091_v41, %v1593_v32  ;;  %v5221_v8 = vpop.eup %5220  ;;  %v2128_v10 = vmul.f32 %v5219_v1, %v6130_v13  ;;  %5236 = vtanh.f32 %v1810_v34  ;;  %v1649_v53 = vadd.f32 %v6085_v35, %v6133_v18 }
 0x11e   : > { %2195 = vadd.xlane.f32.xlu0 %v2194_v55  ;;  %v2122_v37 = vmul.f32 %v5221_v8, %v6130_v13  ;;  %5238 = vtanh.f32 %v1862_v57  ;;  %v2362_v30 = vsel %vm8548_vm2, %v2121_v20, 0.0  ;;  %v1594_v55 = vadd.f32 %v6135_v19, %v6085_v35 }
 0x11f   : > { %v6168_v58 = vpop.f32.mrb[16].mxu0  ;;  %v5223_v22 = vpop.eup %5222  ;;  %v2383_v25 = vsel %vm8548_vm2, %v2128_v10, 0.0  ;;  %5240 = vtanh.f32 %v1803_v4  ;;  %v1813_v12 = vadd.f32 %v6091_v41, %v1595_v29  ;;  %v1653_v18 = vadd.f32 %v6085_v35, %v6165_v54 }
 0x120   : > { %v6180_v0 = vpop.f32.mrb[17].mxu0  ;;  %v5225_v28 = vpop.eup %5224  ;;  %2384 = vadd.xlane.f32.xlu1 %v2383_v25  ;;  %v2069_v33 = vmul.f32 %v5223_v22, %v6130_v13  ;;  %5242 = vtanh.f32 %v1863_v14  ;;  %v2365_v34 = vsel %vm8548_vm2, %v2122_v37, 0.0  ;;  %v6259_v37 = vadd.f32 %v6119_v6, %v1649_v53 }
 0x121   : > { %v6188_v5 = vpop.f32.mrb[18].mxu0  ;;  %v6199_v26 = vpop.f32.mrb[16].mxu1  ;;  %v2131_v59 = vmul.f32 %v5225_v28, %v6130_v13  ;;  %5244 = vtanh.f32 %v1872_v40  ;;  %v1598_v28 = vadd.f32 %v6168_v58, %v6085_v35  ;;  %v1871_v40 = vadd.f32 %v6119_v6, %v1653_v18 }
 0x122   : > { %v1117_v11 = vpop.f32.mrb[19].mxu0  ;;  %2204 = vadd.xlane.f32.xlu0 %v2203_v16  ;;  %v6204_v32 = vpop.f32.mrb[17].mxu1  ;;  %v2206_v49 = vsel %vm8548_vm2, %v2069_v33, 0.0  ;;  %5246 = vtanh.f32 %v1808_v24  ;;  %v1809_v16 = vadd.f32 %v6091_v41, %v1591_v38  ;;  %v6262_v38 = vadd.f32 %v6091_v41, %v1594_v55 }
 0x123   : > { %v1597_v27 = vadd.f32 %v6085_v35, %v1117_v11  ;;  %v6211_v36 = vpop.f32.mrb[18].mxu1  ;;  %v5227_v46 = vpop.eup %5226  ;;  %v2392_v54 = vsel %vm8548_vm2, %v2131_v59, 0.0  ;;  %5248 = vtanh.f32 %v1813_v12  ;;  %v1816_v18 = vadd.f32 %v6091_v41, %v1598_v28 }
 0x124   : > { %v6218_v47 = vpop.f32.mrb[19].mxu1  ;;  %v5229_v62 = vpop.eup %5228  ;;  %2207 = vadd.xlane.f32.xlu1 %v2206_v49  ;;  %v2123_v8 = vmul.f32 %v5227_v46, %v6130_v13  ;;  %5250 = vtanh.f32 %v1871_v40  ;;  %v1658_v40 = vadd.f32 %v6199_v26, %v6085_v35 }
 0x125   : > { %v6214_v42 = vadd.f32 %v6091_v41, %v1597_v27  ;;  %v2129_v11 = vmul.f32 %v5229_v62, %v6130_v13  ;;  %v5231_v14 = vpop.eup %5230  ;;  %v6251_v27 = vadd.f32 %v6119_v6, %v1651_v23  ;;  %5252 = vtanh.f32 %v1809_v16 }
 0x126   : > { %2363 = vadd.xlane.f32.xlu0 %v2362_v30  ;;  %v5233_v25 = vpop.eup %5232  ;;  %v2368_v62 = vsel %vm8548_vm2, %v2123_v8, 0.0  ;;  %v2124_v53 = vmul.f32 %v5231_v14, %v6130_v13  ;;  %5254 = vtanh.f32 %v1816_v18 }
 0x127   : > { %v5024_v52 = vpop.f32.mrb[20].mxu0  ;;  %v5235_v33 = vpop.eup %5234 }
 0x128   : > { %v1130_v63 = vpop.f32.mrb[21].mxu0  ;;  %v1602_v56 = vadd.f32 %v5024_v52, %v6085_v35  ;;  %2393 = vadd.xlane.f32.xlu1 %v2392_v54  ;;  %v5237_v49 = vpop.eup %5236  ;;  %v2386_v52 = vsel %vm8548_vm2, %v2129_v11, 0.0 }
 0x129   : > { %v1600_v1 = vadd.f32 %v6085_v35, %v1130_v63  ;;  %v5025_v4 = vpop.f32.mrb[22].mxu0  ;;  %v6245_v20 = vpop.f32.mrb[20].mxu1 }
 0x12a   : > { %v1603_v19 = vadd.f32 %v5025_v4, %v6085_v35  ;;  %v1133_v7 = vpop.f32.mrb[23].mxu0  ;;  %v6236_v57 = vadd.f32 %v6172_v50, %v1602_v56  ;;  %2366 = vadd.xlane.f32.xlu0 %v2365_v34  ;;  %v1370_v24 = vpop.f32.mrb[21].mxu1  ;;  %v2070_v56 = vmul.f32 %v5233_v25, %v6130_v13 }
 0x12b   : > { %v6239_v9 = vadd.f32 %v6172_v50, %v1600_v1  ;;  %v1601_v10 = vadd.f32 %v6085_v35, %v1133_v7  ;;  %v1660_v46 = vadd.f32 %v6085_v35, %v1370_v24  ;;  %v5085_v23 = vpop.f32.mrb[22].mxu1  ;;  %v5239_v63 = vpop.eup %5238 }
 0x12c   : > { %v6248_v22 = vadd.f32 %v6172_v50, %v1603_v19  ;;  %v1663_v58 = vadd.f32 %v5085_v23, %v6085_v35  ;;  %v1373_v30 = vpop.f32.mrb[23].mxu1  ;;  %v6276_v34 = vpop.eup %5240  ;;  %v1596_v19 = vadd.f32 %v6085_v35, %v6180_v0  ;;  %2387 = vadd.xlane.f32.xlu1 %v2386_v52  ;;  %v2073_v0 = vmul.f32 %v5237_v49, %v6130_v13 }
 0x12d   : > { %v6256_v29 = vadd.f32 %v6172_v50, %v1601_v10  ;;  %v6271_v55 = vadd.f32 %v6119_v6, %v1660_v46  ;;  %v1661_v12 = vadd.f32 %v6085_v35, %v1373_v30  ;;  %v6285_v11 = vpop.eup %5242  ;;  %v2371_v46 = vsel %vm8548_vm2, %v2124_v53, 0.0 }
 0x12e   : > { %2369 = vadd.xlane.f32.xlu0 %v2368_v62  ;;  %v6282_v7 = vadd.f32 %v6119_v6, %v1663_v58  ;;  %v5245_v58 = vpop.eup %5244  ;;  %v2209_v30 = vsel %vm8548_vm2, %v2070_v56, 0.0  ;;  %v6315_v56 = vadd.f32 %v6085_v35, %v6151_v43  ;;  %v2218_v26 = vsel %vm8548_vm2, %v2073_v0, 0.0 }
 0x12f   : > { %v5028_v59 = vpop.f32.mrb[24].mxu0  ;;  %v6288_v14 = vadd.f32 %v6119_v6, %v1661_v12  ;;  %v6311_v16 = vpop.eup %5246  ;;  %v2127_v43 = vmul.f32 %v5235_v33, %v6130_v13  ;;  %v2135_v0 = vmul.f32 %v5245_v58, %v6130_v13 }
 0x130   : > { %v1606_v1 = vadd.f32 %v5028_v59, %v6085_v35  ;;  %v1146_v4 = vpop.f32.mrb[25].mxu0  ;;  %v2125_v59 = vmul.f32 %v5239_v63, %v6130_v13  ;;  %2210 = vadd.xlane.f32.xlu1 %v2209_v30  ;;  %v5249_v18 = vpop.eup %5248 }
 0x131   : > { %v1604_v8 = vadd.f32 %v6085_v35, %v1146_v4  ;;  %v5029_v10 = vpop.f32.mrb[26].mxu0  ;;  %v5088_v52 = vpop.f32.mrb[24].mxu1 }
 0x132   : > { %v6291_v54 = vadd.f32 %v6172_v50, %v1606_v1  ;;  %v1607_v25 = vadd.f32 %v5029_v10, %v6085_v35  ;;  %v1149_v28 = vpop.f32.mrb[27].mxu0  ;;  %2372 = vadd.xlane.f32.xlu0 %v2371_v46  ;;  %v1666_v49 = vadd.f32 %v5088_v52, %v6085_v35  ;;  %v1386_v53 = vpop.f32.mrb[25].mxu1  ;;  %v1814_v1 = vadd.f32 %v6091_v41, %v1596_v19 }
 0x133   : > { %v6296_v24 = vadd.f32 %v6172_v50, %v1604_v8  ;;  %v1605_v23 = vadd.f32 %v6085_v35, %v1149_v28  ;;  %v1664_v63 = vadd.f32 %v6085_v35, %v1386_v53  ;;  %v5089_v4 = vpop.f32.mrb[26].mxu1  ;;  %v2374_v28 = vsel %vm8548_vm2, %v2125_v59, 0.0 }
 0x134   : > { %v6302_v62 = vadd.f32 %v6172_v50, %v1607_v25  ;;  %v6321_v8 = vadd.f32 %v6184_v3, %v1666_v49  ;;  %v1667_v10 = vadd.f32 %v5089_v4, %v6085_v35  ;;  %v1389_v25 = vpop.f32.mrb[27].mxu1  ;;  %v1876_v49 = vadd.f32 %v6119_v6, %v1658_v40  ;;  %2219 = vadd.xlane.f32.xlu1 %v2218_v26 }
 0x135   : > { %v6309_v12 = vadd.f32 %v6172_v50, %v1605_v23  ;;  %v6327_v23 = vadd.f32 %v6184_v3, %v1664_v63  ;;  %v1665_v19 = vadd.f32 %v6085_v35, %v1389_v25  ;;  %v1656_v53 = vadd.f32 %v6085_v35, %v6204_v32 }
 0x136   : > { %2375 = vadd.xlane.f32.xlu0 %v2374_v28  ;;  %v6336_v59 = vadd.f32 %v6184_v3, %v1667_v10  ;;  %v2076_v40 = vmul.f32 %v5249_v18, %v6130_v13  ;;  %5256 = vtanh.f32 %v1814_v1  ;;  %v2380_v26 = vsel %vm8548_vm2, %v2127_v43, 0.0  ;;  %v5251_v1 = vpop.eup %5250 }
 0x137   : > { %v5032_v46 = vpop.f32.mrb[28].mxu0  ;;  %v6340_v4 = vadd.f32 %v6184_v3, %v1665_v19  ;;  %5258 = vtanh.f32 %v6251_v27  ;;  %v2066_v18 = vmul.f32 %v6276_v34, %v6130_v13 }
 0x138   : > { %v1610_v30 = vadd.f32 %v5032_v46, %v6085_v35  ;;  %v1162_v52 = vpop.f32.mrb[29].mxu0  ;;  %v2404_v46 = vsel %vm8548_vm2, %v2135_v0, 0.0  ;;  %5260 = vtanh.f32 %v1876_v49  ;;  %v5253_v0 = vpop.eup %5252  ;;  %v2227_v49 = vsel %vm8548_vm2, %v2076_v40, 0.0 }
 0x139   : > { %v1608_v33 = vadd.f32 %v6085_v35, %v1162_v52  ;;  %v5033_v63 = vpop.f32.mrb[30].mxu0  ;;  %v5092_v19 = vpop.f32.mrb[28].mxu1  ;;  %v1599_v52 = vadd.f32 %v6188_v5, %v6085_v35  ;;  %2405 = vadd.xlane.f32.xlu1 %v2404_v46  ;;  %5262 = vtanh.f32 %v6259_v37  ;;  %v2126_v37 = vmul.f32 %v6285_v11, %v6130_v13 }
 0x13a   : > { %v6343_v58 = vadd.f32 %v6172_v50, %v1610_v30  ;;  %v1611_v25 = vadd.f32 %v5033_v63, %v6085_v35  ;;  %v1165_v28 = vpop.f32.mrb[31].mxu0  ;;  %2381 = vadd.xlane.f32.xlu0 %v2380_v26  ;;  %v1670_v43 = vadd.f32 %v5092_v19, %v6085_v35  ;;  %v1874_v63 = vadd.f32 %v6119_v6, %v1656_v53 }
 0x13b   : > { %v6348_v32 = vadd.f32 %v6172_v50, %v1608_v33  ;;  %v1609_v10 = vadd.f32 %v6085_v35, %v1165_v28  ;;  %v1402_v33 = vpop.f32.mrb[29].mxu1  ;;  %v5255_v28 = vpop.eup %5254  ;;  %v2134_v40 = vmul.f32 %v5251_v1, %v6130_v13 }
 0x13c   : > { %v6355_v30 = vadd.f32 %v6172_v50, %v1611_v25  ;;  %v1668_v25 = vadd.f32 %v6085_v35, %v1402_v33  ;;  %v5093_v34 = vpop.f32.mrb[30].mxu1  ;;  %v6370_v5 = vadd.f32 %v6184_v3, %v1670_v43  ;;  %5264 = vtanh.f32 %v1874_v63 }
 0x13d   : > { %v6363_v27 = vadd.f32 %v6172_v50, %v1609_v10  ;;  %v1671_v26 = vadd.f32 %v5093_v34, %v6085_v35  ;;  %v1405_v46 = vpop.f32.mrb[31].mxu1  ;;  %v2197_v10 = vsel %vm8548_vm2, %v2066_v18, 0.0  ;;  %v1870_v34 = vadd.f32 %v6119_v6, %v6315_v56  ;;  %2228 = vadd.xlane.f32.xlu1 %v2227_v49 }
 0x13e   : > { %v6377_v53 = vadd.f32 %v6184_v3, %v1668_v25  ;;  %v1669_v33 = vadd.f32 %v6085_v35, %v1405_v46  ;;  %2198 = vadd.xlane.f32.xlu0 %v2197_v10  ;;  %v1817_v18 = vadd.f32 %v6091_v41, %v1599_v52  ;;  %v2079_v56 = vmul.f32 %v5255_v28, %v6130_v13 }
 0x13f   : > { %v5036_v19 = vpop.f32.mrb[32].mxu0  ;;  %v6386_v15 = vadd.f32 %v6184_v3, %v1671_v26  ;;  %v2377_v52 = vsel %vm8548_vm2, %v2126_v37, 0.0  ;;  %5266 = vtanh.f32 %v6262_v38  ;;  %v2401_v49 = vsel %vm8548_vm2, %v2134_v40, 0.0 }
 0x140   : > { %v1614_v43 = vadd.f32 %v5036_v19, %v6085_v35  ;;  %v1178_v2 = vpop.f32.mrb[33].mxu0  ;;  %v6390_v46 = vadd.f32 %v6184_v3, %v1669_v33  ;;  %v2071_v28 = vmul.f32 %v6311_v16, %v6130_v13  ;;  %v5257_v63 = vpop.eup %5256  ;;  %5268 = vtanh.f32 %v1817_v18 }
 0x141   : > { %v1612_v11 = vadd.f32 %v6085_v35, %v1178_v2  ;;  %v5037_v25 = vpop.f32.mrb[34].mxu0  ;;  %v5096_v26 = vpop.f32.mrb[32].mxu1  ;;  %2402 = vadd.xlane.f32.xlu1 %v2401_v49  ;;  %5270 = vtanh.f32 %v1870_v34  ;;  %v2236_v18 = vsel %vm8548_vm2, %v2079_v56, 0.0  ;;  %v2072_v34 = vmul.f32 %v5253_v0, %v6130_v13 }
 0x142   : > { %v6393_v1 = vadd.f32 %v6172_v50, %v1614_v43  ;;  %v1615_v10 = vadd.f32 %v5037_v25, %v6085_v35  ;;  %v1181_v19 = vpop.f32.mrb[35].mxu0  ;;  %2378 = vadd.xlane.f32.xlu0 %v2377_v52  ;;  %v1659_v43 = vadd.f32 %v6211_v36, %v6085_v35  ;;  %v1674_v37 = vadd.f32 %v5096_v26, %v6085_v35  ;;  %v5259_v40 = vpop.eup %5258 }
 0x143   : > { %v6398_v41 = vadd.f32 %v6172_v50, %v1612_v11  ;;  %v1613_v2 = vadd.f32 %v6085_v35, %v1181_v19  ;;  %v1418_v11 = vpop.f32.mrb[33].mxu1  ;;  %v1655_v25 = vadd.f32 %v6159_v48, %v6085_v35  ;;  %v5261_v19 = vpop.eup %5260  ;;  %v2077_v56 = vmul.f32 %v5257_v63, %v6130_v13 }
 0x144   : > { %v6405_v33 = vadd.f32 %v6172_v50, %v1615_v10  ;;  %v1672_v10 = vadd.f32 %v6085_v35, %v1418_v11  ;;  %v5097_v16 = vpop.f32.mrb[34].mxu1  ;;  %v6420_v36 = vadd.f32 %v6184_v3, %v1674_v37  ;;  %v5263_v26 = vpop.eup %5262  ;;  %5272 = vtanh.f32 %v6214_v42 }
 0x145   : > { %v6413_v38 = vadd.f32 %v6172_v50, %v1613_v2  ;;  %v1675_v52 = vadd.f32 %v5097_v16, %v6085_v35  ;;  %v1421_v49 = vpop.f32.mrb[35].mxu1  ;;  %v2212_v50 = vsel %vm8548_vm2, %v2071_v28, 0.0  ;;  %v1877_v16 = vadd.f32 %v6119_v6, %v1659_v43  ;;  %2237 = vadd.xlane.f32.xlu1 %v2236_v18 }
 0x146   : > { %v6426_v48 = vadd.f32 %v6184_v3, %v1672_v10  ;;  %v1673_v11 = vadd.f32 %v6085_v35, %v1421_v49  ;;  %2213 = vadd.xlane.f32.xlu0 %v2212_v50  ;;  %v1657_v28 = vadd.f32 %v6085_v35, %v6218_v47  ;;  %v2139_v43 = vmul.f32 %v5261_v19, %v6130_v13 }
 0x147   : > { %v5040_v2 = vpop.f32.mrb[36].mxu0  ;;  %v6435_v21 = vadd.f32 %v6184_v3, %v1675_v52  ;;  %v2215_v18 = vsel %vm8548_vm2, %v2072_v34, 0.0  ;;  %v1873_v52 = vadd.f32 %v6119_v6, %v1655_v25  ;;  %v2132_v19 = vmul.f32 %v5259_v40, %v6130_v13 }
 0x148   : > { %v1618_v37 = vadd.f32 %v5040_v2, %v6085_v35  ;;  %v1194_v45 = vpop.f32.mrb[37].mxu0  ;;  %v6439_v49 = vadd.f32 %v6184_v3, %v1673_v11  ;;  %v2230_v11 = vsel %vm8548_vm2, %v2077_v56, 0.0  ;;  %5274 = vtanh.f32 %v1877_v16 }
 0x149   : > { %v1616_v0 = vadd.f32 %v6085_v35, %v1194_v45  ;;  %v5041_v10 = vpop.f32.mrb[38].mxu0  ;;  %v1662_v42 = vadd.f32 %v6245_v20, %v6085_v35  ;;  %2231 = vadd.xlane.f32.xlu1 %v2230_v11  ;;  %5276 = vtanh.f32 %v6154_v44  ;;  %v2416_v16 = vsel %vm8548_vm2, %v2139_v43, 0.0 }
 0x14a   : > { %8571 = vst [vmem:[#allocation13_spill] sm:$0xff] %v6439_v49  ;;  %v6442_v63 = vadd.f32 %v6175_v60, %v1618_v37  ;;  %v1619_v50 = vadd.f32 %v5041_v10, %v6085_v35  ;;  %v1197_v2 = vpop.f32.mrb[39].mxu0  ;;  %v5100_v37 = vpop.f32.mrb[36].mxu1  ;;  %2216 = vadd.xlane.f32.xlu0 %v2215_v18  ;;  %5278 = vtanh.f32 %v1873_v52 }
 0x14b   : > { %v6448_v47 = vadd.f32 %v6175_v60, %v1616_v0  ;;  %v1617_v45 = vadd.f32 %v6085_v35, %v1197_v2  ;;  %v5265_v10 = vpop.eup %5264  ;;  %v1678_v34 = vadd.f32 %v5100_v37, %v6085_v35  ;;  %v1434_v0 = vpop.f32.mrb[37].mxu1 }
 0x14c   : > { %8572 = vst [vmem:[#allocation14_spill] sm:$0xff] %v6442_v63  ;;  %v6455_v17 = vadd.f32 %v6175_v60, %v1619_v50  ;;  %v5267_v56 = vpop.eup %5266  ;;  %v1875_v50 = vadd.f32 %v6119_v6, %v1657_v28  ;;  %v1676_v2 = vadd.f32 %v6085_v35, %v1434_v0  ;;  %v5101_v40 = vpop.f32.mrb[38].mxu1  ;;  %v2137_v43 = vmul.f32 %v5265_v10, %v6130_v13 }
 0x14d   : > { %8573 = vst [vmem:[#allocation15_spill] sm:$0xff] %v6448_v47  ;;  %v6462_v25 = vadd.f32 %v6175_v60, %v1617_v45  ;;  %v5269_v18 = vpop.eup %5268  ;;  %v6469_v20 = vadd.f32 %v6184_v3, %v1678_v34  ;;  %v1679_v11 = vadd.f32 %v5101_v40, %v6085_v35  ;;  %v1437_v37 = vpop.f32.mrb[39].mxu1  ;;  %v2395_v45 = vsel %vm8548_vm2, %v2132_v19, 0.0  ;;  %2417 = vadd.xlane.f32.xlu1 %v2416_v16 }
 0x14e   : > { %v2130_v47 = vmul.f32 %v5263_v26, %v6130_v13  ;;  %v5271_v44 = vpop.eup %5270  ;;  %v6475_v28 = vadd.f32 %v6184_v3, %v1676_v2  ;;  %v1677_v0 = vadd.f32 %v6085_v35, %v1437_v37  ;;  %2396 = vadd.xlane.f32.xlu0 %v2395_v45  ;;  %v1880_v40 = vadd.f32 %v6119_v6, %v1662_v42 }
 0x14f   : > { %v5044_v51 = vpop.f32.mrb[40].mxu0  ;;  %v6482_v19 = vadd.f32 %v6184_v3, %v1679_v11  ;;  %v2080_v52 = vmul.f32 %v5269_v18, %v6130_v13  ;;  %5280 = vtanh.f32 %v1875_v50  ;;  %v2410_v16 = vsel %vm8548_vm2, %v2137_v43, 0.0  ;;  %v5273_v45 = vpop.eup %5272 }
 0x150   : > { %v1622_v34 = vadd.f32 %v5044_v51, %v6085_v35  ;;  %v1210_v63 = vpop.f32.mrb[41].mxu0  ;;  %v6486_v2 = vadd.f32 %v6184_v3, %v1677_v0  ;;  %v2389_v42 = vsel %vm8548_vm2, %v2130_v47, 0.0  ;;  %v8574_v50 = vcombine.high %v6109_v61, %v6109_v61 }
 0x151   : > { %v1620_v26 = vadd.f32 %v6085_v35, %v1210_v63  ;;  %v5045_v49 = vpop.f32.mrb[42].mxu0  ;;  %v5104_v3 = vpop.f32.mrb[40].mxu1  ;;  %5282 = vtanh.f32 %v6236_v57  ;;  %2411 = vadd.xlane.f32.xlu1 %v2410_v16 }
 0x152   : > { %v6489_v37 = vadd.f32 %v6175_v60, %v1622_v34  ;;  %v1623_v10 = vadd.f32 %v5045_v49, %v6085_v35  ;;  %v1213_v51 = vpop.f32.mrb[43].mxu0  ;;  %2390 = vadd.xlane.f32.xlu0 %v2389_v42  ;;  %v2075_v49 = vmul.f32 %v5267_v56, %v6130_v13  ;;  %v6507_v18 = vrot.slane %v8574_v50, %v6078_v31  ;;  %v1450_v0 = vpop.f32.mrb[41].mxu1 }
 0x153   : > { %v6494_v6 = vadd.f32 %v6175_v60, %v1620_v26  ;;  %v1621_v63 = vadd.f32 %v6085_v35, %v1213_v51  ;;  %v1682_v47 = vadd.f32 %v5104_v3, %v6085_v35  ;;  %5284 = vtanh.f32 %v1880_v40  ;;  %v5105_v56 = vpop.f32.mrb[42].mxu1 }
 0x154   : > { %v6500_v11 = vadd.f32 %v6175_v60, %v1623_v10  ;;  %v1680_v34 = vadd.f32 %v6085_v35, %v1450_v0  ;;  %v2239_v26 = vsel %vm8548_vm2, %v2080_v52, 0.0  ;;  %v5275_v10 = vpop.eup %5274  ;;  %v1683_v51 = vadd.f32 %v5105_v56, %v6085_v35  ;;  %v1453_v57 = vpop.f32.mrb[43].mxu1 }
 0x155   : > { %v6512_v43 = vadd.f32 %v6175_v60, %v1621_v63  ;;  %v6517_v61 = vadd.f32 %v6507_v18, %v1682_v47  ;;  %v2224_v42 = vsel %vm8548_vm2, %v2075_v49, 0.0  ;;  %v2133_v3 = vmul.f32 %v5271_v44, %v6130_v13  ;;  %v5277_v63 = vpop.eup %5276  ;;  %2240 = vadd.xlane.f32.xlu1 %v2239_v26 }
 0x156   : > { %v6523_v40 = vadd.f32 %v6507_v18, %v1680_v34  ;;  %v1681_v50 = vadd.f32 %v6085_v35, %v1453_v57  ;;  %2225 = vadd.xlane.f32.xlu0 %v2224_v42  ;;  %v2078_v52 = vmul.f32 %v5273_v45, %v6130_v13  ;;  %5286 = vtanh.f32 %v6282_v7 }
 0x157   : > { %8575 = vst [vmem:[#allocation16_spill] sm:$0xff] %v6512_v43  ;;  %8576 = vst [vmem:[#allocation17_spill] sm:$0xff] %v6517_v61  ;;  %v5048_v16 = vpop.f32.mrb[44].mxu0  ;;  %v6530_v56 = vadd.f32 %v6507_v18, %v1683_v51  ;;  %v5279_v43 = vpop.eup %5278  ;;  %5288 = vtanh.f32 %v6239_v9  ;;  %v2398_v26 = vsel %vm8548_vm2, %v2133_v3, 0.0 }
 0x158   : > { %8577 = vst [vmem:[#allocation18_spill] sm:$0xff] %v6523_v40  ;;  %v1626_v47 = vadd.f32 %v5048_v16, %v6085_v35  ;;  %v1226_v0 = vpop.f32.mrb[45].mxu0  ;;  %v6534_v34 = vadd.f32 %v6507_v18, %v1681_v50  ;;  %v2140_v16 = vmul.f32 %v5275_v10, %v6130_v13  ;;  %v2233_v50 = vsel %vm8548_vm2, %v2078_v52, 0.0 }
 0x159   : > { %v1624_v44 = vadd.f32 %v6085_v35, %v1226_v0  ;;  %v5049_v49 = vpop.f32.mrb[46].mxu0  ;;  %v5108_v0 = vpop.f32.mrb[44].mxu1  ;;  %5290 = vtanh.f32 %v6248_v22  ;;  %2234 = vadd.xlane.f32.xlu1 %v2233_v50 }
 0x15a   : > { %v6537_v57 = vadd.f32 %v6175_v60, %v1626_v47  ;;  %v1627_v45 = vadd.f32 %v5049_v49, %v6085_v35  ;;  %v1229_v42 = vpop.f32.mrb[47].mxu0  ;;  %2399 = vadd.xlane.f32.xlu0 %v2398_v26  ;;  %v2074_v49 = vmul.f32 %v5277_v63, %v6130_v13  ;;  %v5281_v10 = vpop.eup %5280  ;;  %v1686_v9 = vadd.f32 %v5108_v0, %v6085_v35 }
 0x15b   : > { %v6543_v7 = vadd.f32 %v6175_v60, %v1624_v44  ;;  %v1625_v51 = vadd.f32 %v6085_v35, %v1229_v42  ;;  %v1466_v44 = vpop.f32.mrb[45].mxu1  ;;  %5292 = vtanh.f32 %v6296_v24  ;;  %v5283_v26 = vpop.eup %5282 }
 0x15c   : > { %v6549_v47 = vadd.f32 %v6175_v60, %v1627_v45  ;;  %v1684_v52 = vadd.f32 %v6085_v35, %v1466_v44  ;;  %v5109_v42 = vpop.f32.mrb[46].mxu1  ;;  %v2419_v45 = vsel %vm8548_vm2, %v2140_v16, 0.0  ;;  %v6561_v63 = vadd.f32 %v6507_v18, %v1686_v9 }
 0x15d   : > { %8578 = vst [vmem:[#allocation19_spill] sm:$0xff] %v6543_v7  ;;  %v6555_v3 = vadd.f32 %v6175_v60, %v1625_v51  ;;  %v1687_v22 = vadd.f32 %v5109_v42, %v6085_v35  ;;  %v1469_v50 = vpop.f32.mrb[47].mxu1  ;;  %v2221_v0 = vsel %vm8548_vm2, %v2074_v49, 0.0  ;;  %v2136_v51 = vmul.f32 %v5279_v43, %v6130_v13  ;;  %2420 = vadd.xlane.f32.xlu1 %v2419_v45 }
 0x15e   : > { %v6567_v24 = vadd.f32 %v6507_v18, %v1684_v52  ;;  %v1685_v44 = vadd.f32 %v6085_v35, %v1469_v50  ;;  %2222 = vadd.xlane.f32.xlu0 %v2221_v0  ;;  %v2138_v16 = vmul.f32 %v5281_v10, %v6130_v13  ;;  %5294 = vtanh.f32 %v6327_v23 }
 0x15f   : > { %8579 = vst [vmem:[#allocation20_spill] sm:$0xff] %v6555_v3  ;;  %v5052_v7 = vpop.f32.mrb[48].mxu0  ;;  %v5285_v3 = vpop.eup %5284  ;;  %v6573_v42 = vadd.f32 %v6507_v18, %v1687_v22  ;;  %5296 = vtanh.f32 %v6271_v55 }
 0x160   : > { %8580 = vst [vmem:[#allocation21_spill] sm:$0xff] %v6567_v24  ;;  %v1630_v9 = vadd.f32 %v5052_v7, %v6085_v35  ;;  %v1242_v40 = vpop.f32.mrb[49].mxu0  ;;  %v6578_v43 = vadd.f32 %v6507_v18, %v1685_v44  ;;  %v5287_v7 = vpop.eup %5286  ;;  %v2413_v23 = vsel %vm8548_vm2, %v2138_v16, 0.0  ;;  %5298 = vtanh.f32 %v6256_v29 }
 0x161   : > { %v1628_v49 = vadd.f32 %v6085_v35, %v1242_v40  ;;  %v5053_v61 = vpop.f32.mrb[50].mxu0  ;;  %v2407_v40 = vsel %vm8548_vm2, %v2136_v51, 0.0  ;;  %v5112_v0 = vpop.f32.mrb[48].mxu1  ;;  %2414 = vadd.xlane.f32.xlu1 %v2413_v23  ;;  %5300 = vtanh.f32 %v6309_v12 }
 0x162   : > { %v6581_v52 = vadd.f32 %v6175_v60, %v1630_v9  ;;  %v1631_v10 = vadd.f32 %v5053_v61, %v6085_v35  ;;  %v1245_v50 = vpop.f32.mrb[51].mxu0  ;;  %2408 = vadd.xlane.f32.xlu0 %v2407_v40  ;;  %v2083_v61 = vmul.f32 %v5283_v26, %v6130_v13  ;;  %v2143_v9 = vmul.f32 %v5285_v3, %v6130_v13  ;;  %v5289_v24 = vpop.eup %5288 }
 0x163   : > { %v6586_v22 = vadd.f32 %v6175_v60, %v1628_v49  ;;  %v1629_v45 = vadd.f32 %v6085_v35, %v1245_v50  ;;  %v1690_v55 = vadd.f32 %v5112_v0, %v6085_v35  ;;  %v1482_v51 = vpop.f32.mrb[49].mxu1  ;;  %v5291_v50 = vpop.eup %5290  ;;  %v2144_v0 = vmul.f32 %v5287_v7, %v6130_v13 }
 0x164   : > { %v6592_v44 = vadd.f32 %v6175_v60, %v1631_v10  ;;  %v1688_v16 = vadd.f32 %v6085_v35, %v1482_v51  ;;  %v5113_v10 = vpop.f32.mrb[50].mxu1  ;;  %v2428_v29 = vsel %vm8548_vm2, %v2143_v9, 0.0  ;;  %v2248_v51 = vsel %vm8548_vm2, %v2083_v61, 0.0 }
 0x165   : > { %v6599_v49 = vadd.f32 %v6175_v60, %v1629_v45  ;;  %v6604_v26 = vadd.f32 %v6507_v18, %v1690_v55  ;;  %v1691_v3 = vadd.f32 %v5113_v10, %v6085_v35  ;;  %v1485_v40 = vpop.f32.mrb[51].mxu1  ;;  %v5293_v60 = vpop.eup %5292  ;;  %v2081_v55 = vmul.f32 %v5289_v24, %v6130_v13  ;;  %2249 = vadd.xlane.f32.xlu1 %v2248_v51 }
 0x166   : > { %v6612_v45 = vadd.f32 %v6507_v18, %v1688_v16  ;;  %v1689_v12 = vadd.f32 %v6085_v35, %v1485_v40  ;;  %2429 = vadd.xlane.f32.xlu0 %v2428_v29  ;;  %5302 = vtanh.f32 %v6343_v58  ;;  %v2431_v35 = vsel %vm8548_vm2, %v2144_v0, 0.0  ;;  %v6639_v58 = vld [vmem:[%s8569_s5] ss:$0 sm:$0xff]  ;;  %s5609_s5 = scalar_lea.vmem %s5608_s2, 256 }
 0x167   : > { %8581 = vst [vmem:[#allocation22_spill] sm:$0xff] %v6599_v49  ;;  %v6608_v23 = vpop.f32.mrb[52].mxu0  ;;  %v6620_v10 = vadd.f32 %v6507_v18, %v1691_v3  ;;  %5304 = vtanh.f32 %v6288_v14  ;;  %v2242_v61 = vsel %vm8548_vm2, %v2081_v55, 0.0  ;;  %v2084_v3 = vmul.f32 %v5291_v50, %v6130_v13 }
 0x168   : > { %v6617_v49 = vpop.f32.mrb[53].mxu0  ;;  %v6626_v7 = vadd.f32 %v6507_v18, %v1689_v12  ;;  %v5295_v24 = vpop.eup %5294  ;;  %v2085_v29 = vmul.f32 %v5293_v60, %v6130_v13  ;;  %5306 = vtanh.f32 %v6291_v54 }
 0x169   : > { %v6622_v9 = vpop.f32.mrb[54].mxu0  ;;  %v5116_v40 = vpop.f32.mrb[52].mxu1  ;;  %2243 = vadd.xlane.f32.xlu1 %v2242_v61  ;;  %5308 = vtanh.f32 %v6348_v32 }
 0x16a   : > { %8582 = vst [vmem:[#allocation23_spill] sm:$0xff] %v6622_v9  ;;  %8583 = vst [vmem:[#allocation24_spill] sm:$0xff] %v6626_v7  ;;  %v6628_v16 = vpop.f32.mrb[55].mxu0  ;;  %2432 = vadd.xlane.f32.xlu0 %v2431_v35  ;;  %v5297_v51 = vpop.eup %5296  ;;  %v1694_v14 = vadd.f32 %v6639_v58, %v5116_v40  ;;  %v2254_v61 = vsel %vm8548_vm2, %v2085_v29, 0.0  ;;  %v2145_v9 = vmul.f32 %v5295_v24, %v6130_v13  ;;  %5310 = vtanh.f32 %v6370_v5 }
 0x16b   : > { %8584 = vst [vmem:[#allocation25_spill] sm:$0xff] %v6628_v16  ;;  %v1498_v0 = vpop.f32.mrb[53].mxu1  ;;  %v5299_v50 = vpop.eup %5298  ;;  %v1761_v29 = vcombine.high %v6087_v39, %v6087_v39  ;;  %5312 = vtanh.f32 %v6321_v8 }
 0x16c   : > { %v1692_v12 = vadd.f32 %v6639_v58, %v1498_v0  ;;  %v5117_v55 = vpop.f32.mrb[54].mxu1  ;;  %v6645_v60 = vadd.f32 %v6507_v18, %v1694_v14  ;;  %v5301_v40 = vpop.eup %5300  ;;  %v2251_v0 = vsel %vm8548_vm2, %v2084_v3, 0.0  ;;  %v2141_v14 = vmul.f32 %v5297_v51, %v6130_v13 }
 0x16d   : > { %v1695_v54 = vadd.f32 %v6639_v58, %v5117_v55  ;;  %v1501_v35 = vpop.f32.mrb[55].mxu1  ;;  %2252 = vadd.xlane.f32.xlu1 %v2251_v0  ;;  %v2434_v13 = vsel %vm8548_vm2, %v2145_v9, 0.0  ;;  %5314 = vtanh.f32 %v6302_v62 }
 0x16e   : > { %8585 = vst [vmem:[#allocation26_spill] sm:$0xff] %v6645_v60  ;;  %v6653_v7 = vadd.f32 %v6507_v18, %v1692_v12  ;;  %v1693_v32 = vadd.f32 %v6639_v58, %v1501_v35  ;;  %2255 = vadd.xlane.f32.xlu0 %v2254_v61  ;;  %v2422_v39 = vsel %vm8548_vm2, %v2141_v14, 0.0  ;;  %5316 = vtanh.f32 %v6377_v53 }
 0x16f   : > { %v6649_v16 = vpop.f32.mrb[56].mxu0  ;;  %v6663_v55 = vadd.f32 %v6507_v18, %v1695_v54  ;;  %v6679_v54 = vld [vmem:[%s8526_s8] ss:$0 sm:$0xff]  ;;  %5318 = vtanh.f32 %v6355_v30 }
 0x170   : > { %v6658_v60 = vpop.f32.mrb[57].mxu0  ;;  %v6669_v12 = vadd.f32 %v6507_v18, %v1693_v32  ;;  %v5303_v51 = vpop.eup %5302  ;;  %v2082_v5 = vmul.f32 %v6679_v54, %v5299_v50  ;;  %v2086_v18 = vmul.f32 %v6679_v54, %v5301_v40  ;;  %v6684_v32 = vrot.slane %v1761_v29, %v6078_v31 }
 0x171   : > { %v6665_v24 = vpop.f32.mrb[58].mxu0  ;;  %v5120_v35 = vpop.f32.mrb[56].mxu1  ;;  %2423 = vadd.xlane.f32.xlu1 %v2422_v39  ;;  %v2091_v62 = vmul.f32 %v6679_v54, %v5303_v51  ;;  %5320 = vtanh.f32 %v6336_v59 }
 0x172   : > { %8586 = vst [vmem:[#allocation27_spill] sm:$0xff] %v6665_v24  ;;  %v6671_v3 = vpop.f32.mrb[59].mxu0  ;;  %2435 = vadd.xlane.f32.xlu0 %v2434_v13  ;;  %v5305_v61 = vpop.eup %5304  ;;  %v1698_v8 = vadd.f32 %v6639_v58, %v5120_v35  ;;  %v2257_v29 = vsel %vm8548_vm2, %v2086_v18, 0.0  ;;  %5322 = vtanh.f32 %v6340_v4 }
 0x173   : > { %v1514_v9 = vpop.f32.mrb[57].mxu1  ;;  %v5307_v13 = vpop.eup %5306  ;;  %v2142_v31 = vmul.f32 %v6679_v54, %v5305_v61  ;;  %v2272_v51 = vsel %vm8548_vm2, %v2091_v62, 0.0  ;;  %5324 = vtanh.f32 %v6363_v27 }
 0x174   : > { %v1696_v0 = vadd.f32 %v6639_v58, %v1514_v9  ;;  %v5121_v14 = vpop.f32.mrb[58].mxu1  ;;  %v6691_v50 = vadd.f32 %v6684_v32, %v1698_v8  ;;  %v5309_v39 = vpop.eup %5308  ;;  %v2245_v9 = vsel %vm8548_vm2, %v2082_v5, 0.0  ;;  %v2087_v61 = vmul.f32 %v6679_v54, %v5307_v13 }
 0x175   : > { %v1699_v40 = vadd.f32 %v6639_v58, %v5121_v14  ;;  %v1517_v24 = vpop.f32.mrb[59].mxu1  ;;  %2246 = vadd.xlane.f32.xlu1 %v2245_v9  ;;  %v2425_v5 = vsel %vm8548_vm2, %v2142_v31, 0.0  ;;  %5326 = vtanh.f32 %v6386_v15 }
 0x176   : > { %v6697_v35 = vadd.f32 %v6684_v32, %v1696_v0  ;;  %v1697_v53 = vadd.f32 %v6639_v58, %v1517_v24  ;;  %2258 = vadd.xlane.f32.xlu0 %v2257_v29  ;;  %v2089_v24 = vmul.f32 %v6679_v54, %v5309_v39  ;;  %v5311_v0 = vpop.eup %5310  ;;  %5328 = vtanh.f32 %v6469_v20 }
 0x177   : > { %v6703_v8 = vadd.f32 %v6684_v32, %v1699_v40  ;;  %v5313_v40 = vpop.eup %5312  ;;  %v2151_v4 = vmul.f32 %v6679_v54, %v5311_v0  ;;  %5330 = vtanh.f32 %v6390_v46 }
 0x178   : > { %v6707_v18 = vadd.f32 %v6684_v32, %v1697_v53  ;;  %v5315_v39 = vpop.eup %5314  ;;  %v2266_v13 = vsel %vm8548_vm2, %v2089_v24, 0.0  ;;  %5332 = vtanh.f32 %v6455_v17 }
 0x179   : > { %v5124_v14 = vpop.f32.mrb[60].mxu1  ;;  %2426 = vadd.xlane.f32.xlu1 %v2425_v5  ;;  %v2452_v0 = vsel %vm8548_vm2, %v2151_v4, 0.0  ;;  %5334 = vtanh.f32 %v6393_v1 }
 0x17a   : > { %2273 = vadd.xlane.f32.xlu0 %v2272_v51  ;;  %v1702_v30 = vadd.f32 %v6639_v58, %v5124_v14  ;;  %v1530_v29 = vpop.f32.mrb[61].mxu1  ;;  %v5317_v51 = vpop.eup %5316  ;;  %v2260_v14 = vsel %vm8548_vm2, %v2087_v61, 0.0  ;;  %5336 = vtanh.f32 %v6462_v25 }
 0x17b   : > { %v1700_v59 = vadd.f32 %v6639_v58, %v1530_v29  ;;  %v5125_v62 = vpop.f32.mrb[62].mxu1  ;;  %v2147_v29 = vmul.f32 %v6679_v54, %v5313_v40  ;;  %v2088_v40 = vmul.f32 %v6679_v54, %v5315_v39  ;;  %5338 = vtanh.f32 %v6398_v41 }
 0x17c   : > { %v6719_v53 = vadd.f32 %v6684_v32, %v1702_v30  ;;  %v1703_v31 = vadd.f32 %v6639_v58, %v5125_v62  ;;  %v1533_v9 = vpop.f32.mrb[63].mxu1  ;;  %v5319_v62 = vpop.eup %5318  ;;  %5340 = vtanh.f32 %v6486_v2 }
 0x17d   : > { %v6725_v5 = vadd.f32 %v6684_v32, %v1700_v59  ;;  %v1701_v27 = vadd.f32 %v6639_v58, %v1533_v9  ;;  %2261 = vadd.xlane.f32.xlu1 %v2260_v14  ;;  %v2149_v59 = vmul.f32 %v6679_v54, %v5317_v51  ;;  %v2440_v61 = vsel %vm8548_vm2, %v2147_v29, 0.0 }
 0x17e   : > { %2267 = vadd.xlane.f32.xlu0 %v2266_v13  ;;  %v6731_v30 = vadd.f32 %v6684_v32, %v1703_v31  ;;  %v5321_v31 = vpop.eup %5320  ;;  %v2092_v46 = vmul.f32 %v6679_v54, %v5319_v62  ;;  %5342 = vtanh.f32 %v6420_v36 }
 0x17f   : > { %v6735_v24 = vadd.f32 %v6684_v32, %v1701_v27  ;;  %v5323_v51 = vpop.eup %5322  ;;  %v2446_v39 = vsel %vm8548_vm2, %v2149_v59, 0.0  ;;  %5344 = vtanh.f32 %v6494_v6 }
 0x180   : > { %v2275_v62 = vsel %vm8548_vm2, %v2092_v46, 0.0  ;;  %5346 = vtanh.f32 %v6426_v48 }
 0x181   : > { %v5128_v9 = vpop.f32.mrb[64].mxu1  ;;  %2441 = vadd.xlane.f32.xlu1 %v2440_v61  ;;  %5348 = vtanh.f32 %v6500_v11 }
 0x182   : > { %2453 = vadd.xlane.f32.xlu0 %v2452_v0  ;;  %v1706_v15 = vadd.f32 %v6639_v58, %v5128_v9  ;;  %v1546_v13 = vpop.f32.mrb[65].mxu1  ;;  %v5325_v0 = vpop.eup %5324  ;;  %v2263_v9 = vsel %vm8548_vm2, %v2088_v40, 0.0  ;;  %5350 = vtanh.f32 %v6405_v33 }
 0x183   : > { %v1704_v20 = vadd.f32 %v6639_v58, %v1546_v13  ;;  %v5129_v4 = vpop.f32.mrb[66].mxu1  ;;  %v2148_v13 = vmul.f32 %v6679_v54, %v5321_v31  ;;  %v2146_v31 = vmul.f32 %v6679_v54, %v5323_v51  ;;  %5352 = vtanh.f32 %v6530_v56 }
 0x184   : > { %v6747_v27 = vadd.f32 %v6684_v32, %v1706_v15  ;;  %v1707_v14 = vadd.f32 %v6639_v58, %v5129_v4  ;;  %v1549_v29 = vpop.f32.mrb[67].mxu1  ;;  %v5327_v4 = vpop.eup %5326  ;;  %5354 = vtanh.f32 %v6413_v38 }
 0x185   : > { %v6753_v61 = vadd.f32 %v6684_v32, %v1704_v20  ;;  %v1705_v17 = vadd.f32 %v6639_v58, %v1549_v29  ;;  %2264 = vadd.xlane.f32.xlu1 %v2263_v9  ;;  %v2090_v20 = vmul.f32 %v6679_v54, %v5325_v0  ;;  %v2443_v40 = vsel %vm8548_vm2, %v2148_v13, 0.0 }
 0x186   : > { %2447 = vadd.xlane.f32.xlu0 %v2446_v39  ;;  %v6759_v15 = vadd.f32 %v6684_v32, %v1707_v14  ;;  %v5329_v14 = vpop.eup %5328  ;;  %v2152_v41 = vmul.f32 %v6679_v54, %v5327_v4  ;;  %5356 = vtanh.f32 %v6534_v34 }
 0x187   : > { %8587 = vst [vmem:[#allocation28_spill] sm:$0xff] %v6753_v61  ;;  %v6763_v59 = vadd.f32 %v6684_v32, %v1705_v17  ;;  %v5331_v0 = vpop.eup %5330  ;;  %v2269_v51 = vsel %vm8548_vm2, %v2090_v20, 0.0  ;;  %5358 = vtanh.f32 %v6435_v21 }
 0x188   : > { %v2455_v4 = vsel %vm8548_vm2, %v2152_v41, 0.0  ;;  %5360 = vtanh.f32 %v6537_v57 }
 0x189   : > { %8588 = vst [vmem:[#allocation29_spill] sm:$0xff] %v6763_v59  ;;  %v5132_v29 = vpop.f32.mrb[68].mxu1  ;;  %2444 = vadd.xlane.f32.xlu1 %v2443_v40 }
 0x18a   : > { %2276 = vadd.xlane.f32.xlu0 %v2275_v62  ;;  %v1710_v1 = vadd.f32 %v6639_v58, %v5132_v29  ;;  %v1562_v39 = vpop.f32.mrb[69].mxu1  ;;  %v5333_v62 = vpop.eup %5332  ;;  %v2437_v29 = vsel %vm8548_vm2, %v2146_v31, 0.0 }
 0x18b   : > { %v1708_v25 = vadd.f32 %v6639_v58, %v1562_v39  ;;  %v5133_v46 = vpop.f32.mrb[70].mxu1  ;;  %v2159_v39 = vmul.f32 %v6679_v54, %v5329_v14  ;;  %v2100_v14 = vmul.f32 %v6679_v54, %v5333_v62 }
 0x18c   : > { %v6775_v17 = vadd.f32 %v6684_v32, %v1710_v1  ;;  %v1711_v9 = vadd.f32 %v6639_v58, %v5133_v46  ;;  %v1565_v13 = vpop.f32.mrb[71].mxu1  ;;  %v5335_v46 = vpop.eup %5334 }
 0x18d   : > { %v6781_v40 = vadd.f32 %v6684_v32, %v1708_v25  ;;  %v1709_v2 = vadd.f32 %v6639_v58, %v1565_v13  ;;  %2438 = vadd.xlane.f32.xlu1 %v2437_v29  ;;  %v2150_v25 = vmul.f32 %v6679_v54, %v5331_v0  ;;  %v2476_v31 = vsel %vm8548_vm2, %v2159_v39, 0.0 }
 0x18e   : > { %8589 = vst [vmem:[#allocation30_spill] sm:$0xff] %v6775_v17  ;;  %2270 = vadd.xlane.f32.xlu0 %v2269_v51  ;;  %v6787_v1 = vadd.f32 %v6684_v32, %v1711_v9  ;;  %v5337_v9 = vpop.eup %5336  ;;  %v2095_v6 = vmul.f32 %v6679_v54, %v5335_v46  ;;  %v2299_v0 = vsel %vm8548_vm2, %v2100_v14, 0.0 }
 0x18f   : > { %v6791_v20 = vadd.f32 %v6684_v32, %v1709_v2  ;;  %v5339_v36 = vpop.eup %5338  ;;  %v2449_v32 = vsel %vm8548_vm2, %v2150_v25, 0.0  ;;  %v2098_v51 = vmul.f32 %v6679_v54, %v5337_v9 }
 0x190   : > { %v5341_v13 = vpop.eup %5340  ;;  %v2284_v48 = vsel %vm8548_vm2, %v2095_v6, 0.0  ;;  %v2093_v41 = vmul.f32 %v6679_v54, %v5339_v36 }
 0x191   : > { %8590 = vst [vmem:[#allocation31_spill] sm:$0xff] %v6791_v20  ;;  %2477 = vadd.xlane.f32.xlu1 %v2476_v31  ;;  %v5343_v11 = vpop.eup %5342  ;;  %v2293_v62 = vsel %vm8548_vm2, %v2098_v51, 0.0  ;;  %v2158_v2 = vmul.f32 %v6679_v54, %v5341_v13 }
 0x192   : > { %2456 = vadd.xlane.f32.xlu0 %v2455_v4  ;;  %v5345_v29 = vpop.eup %5344  ;;  %v2278_v33 = vsel %vm8548_vm2, %v2093_v41, 0.0  ;;  %v2155_v56 = vmul.f32 %v6679_v54, %v5343_v11  ;;  %v8592_v41 = vld [vmem:[#allocation14_spill] sm:$0xff] }
 0x193   : > { %v5347_v39 = vpop.eup %5346  ;;  %v2473_v4 = vsel %vm8548_vm2, %v2158_v2, 0.0  ;;  %v2101_v25 = vmul.f32 %v6679_v54, %v5345_v29 }
 0x194   : > { %v5349_v46 = vpop.eup %5348  ;;  %v2464_v38 = vsel %vm8548_vm2, %v2155_v56, 0.0  ;;  %v2153_v34 = vmul.f32 %v6679_v54, %v5347_v39  ;;  %v8593_v39 = vld [vmem:[#allocation15_spill] sm:$0xff] }
 0x195   : > { %2300 = vadd.xlane.f32.xlu1 %v2299_v0  ;;  %v5351_v31 = vpop.eup %5350  ;;  %v2302_v14 = vsel %vm8548_vm2, %v2101_v25, 0.0  ;;  %v2104_v9 = vmul.f32 %v6679_v54, %v5349_v46 }
 0x196   : > { %2450 = vadd.xlane.f32.xlu0 %v2449_v32  ;;  %v5353_v36 = vpop.eup %5352  ;;  %v8591_v32 = vld [vmem:[#allocation13_spill] sm:$0xff]  ;;  %v2458_v21 = vsel %vm8548_vm2, %v2153_v34, 0.0  ;;  %v2096_v57 = vmul.f32 %v6679_v54, %v5351_v31 }
 0x197   : > { %5362 = vtanh.f32 %v8591_v32  ;;  %v5355_v6 = vpop.eup %5354  ;;  %v2311_v13 = vsel %vm8548_vm2, %v2104_v9, 0.0  ;;  %v2164_v0 = vmul.f32 %v6679_v54, %v5353_v36 }
 0x198   : > { %5364 = vtanh.f32 %v6561_v63  ;;  %v5357_v51 = vpop.eup %5356  ;;  %v2287_v63 = vsel %vm8548_vm2, %v2096_v57, 0.0  ;;  %v2094_v11 = vmul.f32 %v6679_v54, %v5355_v6 }
 0x199   : > { %2294 = vadd.xlane.f32.xlu1 %v2293_v62  ;;  %5366 = vtanh.f32 %v8592_v41  ;;  %v5359_v62 = vpop.eup %5358  ;;  %v2491_v2 = vsel %vm8548_vm2, %v2164_v0, 0.0  ;;  %v2162_v29 = vmul.f32 %v6679_v54, %v5357_v51 }
 0x19a   : > { %2285 = vadd.xlane.f32.xlu0 %v2284_v48  ;;  %5368 = vtanh.f32 %v6549_v47  ;;  %v2281_v47 = vsel %vm8548_vm2, %v2094_v11, 0.0  ;;  %v2156_v25 = vmul.f32 %v6679_v54, %v5359_v62 }
 0x19b   : > { %5370 = vtanh.f32 %v8593_v39 }
 0x19c   : > { %5372 = vtanh.f32 %v6573_v42  ;;  %v2467_v42 = vsel %vm8548_vm2, %v2156_v25, 0.0 }
 0x19d   : > { %2474 = vadd.xlane.f32.xlu1 %v2473_v4  ;;  %v6839_v4 = vpop.permute.xlu1 %2585  ;;  %5374 = vtanh.f32 %v6475_v28 }
 0x19e   : > { %2279 = vadd.xlane.f32.xlu0 %v2278_v33  ;;  %v5361_v33 = vpop.eup %5360  ;;  %5376 = vtanh.f32 %v6578_v43 }
 0x19f   : > { %v2107_v34 = vmul.f32 %v6679_v54, %v5361_v33  ;;  %5378 = vtanh.f32 %v6482_v19 }
 0x1a0   : > { %5380 = vtanh.f32 %v6581_v52 }
 0x1a1   : > { %2303 = vadd.xlane.f32.xlu1 %v2302_v14  ;;  %v5363_v46 = vpop.eup %5362  ;;  %5382 = vtanh.f32 %v6489_v37 }
 0x1a2   : > { %2465 = vadd.xlane.f32.xlu0 %v2464_v38  ;;  %v2485_v38 = vsel %vm8548_vm2, %v2162_v29, 0.0  ;;  %v5365_v31 = vpop.eup %5364  ;;  %v2154_v36 = vmul.f32 %v6679_v54, %v5363_v46  ;;  %5384 = vtanh.f32 %v6586_v22  ;;  %v8598_v46 = vld [vmem:[#allocation17_spill] sm:$0xff] }
 0x1a3   : > { %v5367_v32 = vpop.eup %5366  ;;  %v2167_v57 = vmul.f32 %v6679_v54, %v5365_v31  ;;  %5386 = vtanh.f32 %v8598_v46 }
 0x1a4   : > { %v5369_v6 = vpop.eup %5368  ;;  %v2461_v43 = vsel %vm8548_vm2, %v2154_v36, 0.0  ;;  %v2099_v0 = vmul.f32 %v6679_v54, %v5367_v32  ;;  %5388 = vtanh.f32 %v6604_v26  ;;  %v8601_v26 = vld [vmem:[#allocation16_spill] sm:$0xff] }
 0x1a5   : > { %2312 = vadd.xlane.f32.xlu1 %v2311_v13  ;;  %v5371_v51 = vpop.eup %5370  ;;  %v2500_v41 = vsel %vm8548_vm2, %v2167_v57, 0.0  ;;  %5390 = vtanh.f32 %v6612_v45 }
 0x1a6   : > { %2459 = vadd.xlane.f32.xlu0 %v2458_v21  ;;  %v2320_v21 = vsel %vm8548_vm2, %v2107_v34, 0.0  ;;  %v5373_v11 = vpop.eup %5372  ;;  %v2296_v52 = vsel %vm8548_vm2, %v2099_v0, 0.0 }
 0x1a7   : > { %v6828_v48 = vpop.xlane.xlu0 %2201  ;;  %v5375_v29 = vpop.eup %5374  ;;  %v2168_v39 = vmul.f32 %v6679_v54, %v5373_v11 }
 0x1a9   : > { %2492 = vadd.xlane.f32.xlu1 %v2491_v2  ;;  %v2097_v2 = vmul.f32 %v6679_v54, %v5371_v51  ;;  %v2503_v31 = vsel %vm8548_vm2, %v2168_v39, 0.0  ;;  %v1634_v39 = vadd.f32 %v6639_v58, %v6608_v23 }
 0x1aa   : > { %2288 = vadd.xlane.f32.xlu0 %v2287_v63  ;;  %v2108_v63 = vmul.f32 %v6679_v54, %v5369_v6  ;;  %v8602_v6 = vlaneseq }
 0x1ab   : > { %v6836_v56 = vpop.xlane.xlu0 %2195  ;;  %v2290_v22 = vsel %vm8548_vm2, %v2097_v2, 0.0  ;;  %v8604_v2 = vld [vmem:[#allocation21_spill] sm:$0xff] }
 0x1ac   : > { %v2323_v33 = vsel %vm8548_vm2, %v2108_v63, 0.0  ;;  %v8603_v63 = vld [vmem:[#allocation19_spill] sm:$0xff] }
 0x1ad   : > { %2486 = vadd.xlane.f32.xlu1 %v2485_v38  ;;  %v6849_v9 = vpop.xlane.xlu1 %2384  ;;  %v2157_v38 = vmul.f32 %v6679_v54, %v5375_v29 }
 0x1ae   : > { %2282 = vadd.xlane.f32.xlu0 %v2281_v47  ;;  %8594 = vst [vmem:[#allocation13_spill] sm:$0xff] %v6849_v9  ;;  %v5377_v47 = vpop.eup %5376 }
 0x1af   : > { %v6846_v14 = vpop.xlane.xlu0 %2204  ;;  %v5379_v34 = vpop.eup %5378  ;;  %v2470_v0 = vsel %vm8548_vm2, %v2157_v38, 0.0 }
 0x1b0   : > { %v5381_v36 = vpop.eup %5380  ;;  %v2160_v51 = vmul.f32 %v6679_v54, %v5379_v34 }
 0x1b1   : > { %2321 = vadd.xlane.f32.xlu1 %v2320_v21  ;;  %v6859_v28 = vpop.xlane.xlu1 %2207  ;;  %v8600_v21 = vld [vmem:[#allocation18_spill] sm:$0xff]  ;;  %v2111_v11 = vmul.f32 %v6679_v54, %v5381_v36 }
 0x1b2   : > { %2468 = vadd.xlane.f32.xlu0 %v2467_v42  ;;  %v2166_v42 = vmul.f32 %v6679_v54, %v5377_v47  ;;  %5392 = vtanh.f32 %v8600_v21  ;;  %v1632_v47 = vadd.f32 %v6639_v58, %v6617_v49  ;;  %v2479_v38 = vsel %vm8548_vm2, %v2160_v51, 0.0  ;;  %v8607_v21 = vld [vmem:[#allocation22_spill] sm:$0xff]  ;;  %v8610_v51 = vld [vmem:[#allocation12_spill] sm:$0xff] }
 0x1b3   : > { %v6856_v13 = vpop.xlane.xlu0 %2363  ;;  %5394 = vtanh.f32 %v8601_v26 }
 0x1b4   : > { %8595 = vst [vmem:[#allocation14_spill] sm:$0xff] %v6856_v13  ;;  %5396 = vtanh.f32 %v8603_v63  ;;  %v2497_v45 = vsel %vm8548_vm2, %v2166_v42, 0.0  ;;  %v2332_v42 = vsel %vm8548_vm2, %v2111_v11, 0.0  ;;  %v6928_v63 = vadd.f32 %v8610_v51, %v1632_v47 }
 0x1b5   : > { %2501 = vadd.xlane.f32.xlu1 %v2500_v41  ;;  %v6869_v19 = vpop.xlane.xlu1 %2393  ;;  %v5383_v41 = vpop.eup %5382  ;;  %5398 = vtanh.f32 %v8604_v2  ;;  %v2588_v47 = vadd.f32 %v6839_v4, %v6836_v56 }
 0x1b6   : > { %2462 = vadd.xlane.f32.xlu0 %v2461_v43  ;;  %v6894_v43 = vand.u32 127, %v8602_v6  ;;  %v2103_v34 = vmul.f32 %v6679_v54, %v5383_v41  ;;  %v1852_v41 = vadd.f32 %v8610_v51, %v1634_v39 }
 0x1b7   : > { %v6866_v62 = vpop.xlane.xlu0 %2366 }
 0x1b8   : > { %8596 = vst [vmem:[#allocation15_spill] sm:$0xff] %v6866_v62  ;;  %v2852_v49 = vadd.s32 4294967288, %v6894_v43  ;;  %v2873_v26 = vadd.s32 4294967264, %v6894_v43  ;;  %v2880_v6 = vadd.s32 4294967256, %v6894_v43  ;;  %v2887_v17 = vadd.s32 4294967248, %v6894_v43 }
 0x1b9   : > { %2324 = vadd.xlane.f32.xlu1 %v2323_v33  ;;  %v6879_v37 = vpop.xlane.xlu1 %2387  ;;  %v8606_v33 = vld [vmem:[#allocation20_spill] sm:$0xff] }
 0x1ba   : > { %2297 = vadd.xlane.f32.xlu0 %v2296_v52  ;;  %v5385_v52 = vpop.eup %5384  ;;  %5400 = vtanh.f32 %v8606_v33  ;;  %v8612_v33 = vld [vmem:[#allocation9_spill] sm:$0xff] }
 0x1bb   : > { %v6876_v25 = vpop.xlane.xlu0 %2369  ;;  %5402 = vtanh.f32 %v6592_v44  ;;  %v2109_v23 = vmul.f32 %v6679_v54, %v5385_v52  ;;  %v2866_v44 = vadd.s32 4294967272, %v6894_v43  ;;  %v6959_v56 = vsub.s32 %v2880_v6, %v8612_v33 }
 0x1bc   : > { %8597 = vst [vmem:[#allocation32_spill] sm:$0xff] %v6876_v25  ;;  %5404 = vtanh.f32 %v6620_v10  ;;  %v8609_v10 = vld [vmem:[#allocation24_spill] sm:$0xff] }
 0x1bd   : > { %2504 = vadd.xlane.f32.xlu1 %v2503_v31  ;;  %v6890_v57 = vpop.xlane.xlu1 %2210  ;;  %v5387_v31 = vpop.eup %5386  ;;  %5406 = vtanh.f32 %v8607_v21  ;;  %v2308_v21 = vsel %vm8548_vm2, %v2103_v34, 0.0  ;;  %v6953_v34 = vsub.s32 %v2866_v44, %v8612_v33 }
 0x1be   : > { %2291 = vadd.xlane.f32.xlu0 %v2290_v22  ;;  %v2859_v22 = vadd.s32 4294967280, %v6894_v43  ;;  %v5389_v36 = vpop.eup %5388  ;;  %5408 = vtanh.f32 %v8609_v10  ;;  %v2163_v39 = vmul.f32 %v6679_v54, %v5387_v31  ;;  %v6956_v31 = vsub.s32 %v2873_v26, %v8612_v33 }
 0x1bf   : > { %v6887_v32 = vpop.xlane.xlu0 %2372  ;;  %v5391_v2 = vpop.eup %5390  ;;  %v2592_v26 = vadd.f32 %v6839_v4, %v6859_v28  ;;  %v2593_v13 = vadd.f32 %v6839_v4, %v6890_v57  ;;  %5410 = vtanh.f32 %v1852_v41 }
 0x1c0   : > { %8599 = vst [vmem:[#allocation17_spill] sm:$0xff] %v6887_v32  ;;  %v5393_v10 = vpop.eup %5392  ;;  %v2590_v32 = vadd.f32 %v6839_v4, %v6828_v48  ;;  %v2169_v44 = vmul.f32 %v6679_v54, %v5391_v2  ;;  %v2488_v6 = vsel %vm8548_vm2, %v2163_v39, 0.0  ;;  %5412 = vtanh.f32 %v6928_v63 }
 0x1c1   : > { %2498 = vadd.xlane.f32.xlu1 %v2497_v45  ;;  %v6909_v46 = vpop.xlane.xlu1 %2219  ;;  %v8611_v45 = vld [vmem:[#allocation23_spill] sm:$0xff]  ;;  %v2884_v61 = vrot.slane %v2593_v13, %v6959_v56 }
 0x1c2   : > { %2471 = vadd.xlane.f32.xlu0 %v2470_v0  ;;  %v1635_v11 = vadd.f32 %v6639_v58, %v8611_v45  ;;  %v2326_v45 = vsel %vm8548_vm2, %v2109_v23, 0.0 }
 0x1c3   : > { %v6902_v29 = vpop.xlane.xlu0 %2375 }
 0x1c4   : > { %8605 = vst [vmem:[#allocation18_spill] sm:$0xff] %v6902_v29  ;;  %v5395_v29 = vpop.eup %5394 }
 0x1c5   : > { %2333 = vadd.xlane.f32.xlu1 %v2332_v42  ;;  %v6939_v42 = vsub.s32 %v6894_v43, %v8612_v33 }
 0x1c6   : > { %2480 = vadd.xlane.f32.xlu0 %v2479_v38  ;;  %v6932_v52 = vpop.xlane.xlu1 %2405  ;;  %v6935_v38 = vsub.s32 %v2859_v22, %v8612_v33  ;;  %v2171_v22 = vmul.f32 %v6679_v54, %v5389_v36 }
 0x1c7   : > { %v6923_v0 = vpop.xlane.xlu0 %2381 }
 0x1c8   : > { %8608 = vst [vmem:[#allocation16_spill] sm:$0xff] %v6923_v0  ;;  %v6947_v0 = vsub.s32 %v2852_v49, %v8612_v33  ;;  %v2591_v49 = vadd.f32 %v6839_v4, %v6846_v14  ;;  %v2851_v14 = vrot.slane %v2588_v47, %v6939_v42  ;;  %v2512_v2 = vsel %vm8548_vm2, %v2171_v22, 0.0 }
 0x1c9   : > { %2327 = vadd.xlane.f32.xlu1 %v2326_v45  ;;  %v2161_v45 = vmul.f32 %v6679_v54, %v5393_v10  ;;  %v2863_v28 = vrot.slane %v2590_v32, %v6935_v38  ;;  %v2506_v22 = vsel %vm8548_vm2, %v2169_v44, 0.0  ;;  %v2877_v32 = vrot.slane %v2592_v26, %v6956_v31 }
 0x1ca   : > { %2309 = vadd.xlane.f32.xlu0 %v2308_v21  ;;  %v5397_v21 = vpop.eup %5396  ;;  %v6963_v36 = vpop.xlane.xlu1 %2228  ;;  %v2870_v47 = vrot.slane %v2591_v49, %v6953_v34  ;;  %v2894_v44 = vadd.s32 4294967240, %v6894_v43 }
 0x1cb   : > { %v2199_v23 = vpop.xlane.xlu0 %2198  ;;  %v6967_v25 = vpop.eup %5398 }
 0x1cc   : > { %v2589_v48 = vadd.f32 %v6839_v4, %v2199_v23  ;;  %v6973_v62 = vpop.eup %5400 }
 0x1cd   : > { %v5403_v9 = vpop.eup %5402  ;;  %2513 = vadd.xlane.f32.xlu1 %v2512_v2  ;;  %v2482_v2 = vsel %vm8548_vm2, %v2161_v45, 0.0 }
 0x1ce   : > { %v2856_v23 = vrot.slane %v2589_v48, %v6947_v0  ;;  %2489 = vadd.xlane.f32.xlu0 %v2488_v6  ;;  %v5405_v10 = vpop.eup %5404  ;;  %v6986_v20 = vpop.xlane.xlu1 %2402 }
 0x1cf   : > { %v6982_v39 = vpop.xlane.xlu0 %2378  ;;  %v5407_v48 = vpop.eup %5406 }
 0x1d0   : > { %8613 = vst [vmem:[#allocation19_spill] sm:$0xff] %v6982_v39  ;;  %v2858_v57 = vsel %vm2857_vm3, %v2856_v23, %v2851_v14  ;;  %v2102_v39 = vmul.f32 %v6679_v54, %v5395_v29  ;;  %v5409_v59 = vpop.eup %5408  ;;  %v2112_v14 = vmul.f32 %v6679_v54, %v5403_v9  ;;  %v1853_v23 = vadd.f32 %v8610_v51, %v1635_v11 }
 0x1d1   : > { %v2865_v6 = vsel %vm2864_vm4, %v2863_v28, %v2858_v57  ;;  %2507 = vadd.xlane.f32.xlu1 %v2506_v22  ;;  %v7001_v29 = vsub.s32 %v2887_v17, %v8612_v33  ;;  %v2105_v11 = vmul.f32 %v6679_v54, %v5397_v21  ;;  %v7013_v17 = vsub.s32 %v2894_v44, %v8612_v33 }
 0x1d2   : > { %v2872_v49 = vsel %vm2871_vm5, %v2870_v47, %v2865_v6  ;;  %2483 = vadd.xlane.f32.xlu0 %v2482_v2  ;;  %v7003_v13 = vpop.xlane.xlu1 %2237  ;;  %v2901_v47 = vadd.s32 4294967232, %v6894_v43  ;;  %v2305_v41 = vsel %vm8548_vm2, %v2102_v39, 0.0  ;;  %v2335_v63 = vsel %vm8548_vm2, %v2112_v14, 0.0 }
 0x1d3   : > { %v2214_v26 = vpop.xlane.xlu0 %2213  ;;  %v2879_v28 = vsel %vm2878_vm6, %v2877_v32, %v2872_v49  ;;  %v2110_v22 = vmul.f32 %v6679_v54, %v5407_v48  ;;  %v8614_v32 = vld [vmem:[#allocation26_spill] sm:$0xff]  ;;  %v2596_v39 = vadd.f32 %v6839_v4, %v6909_v46  ;;  %v1636_v2 = vadd.f32 %v6639_v58, %v6658_v60 }
 0x1d4   : > { %v2594_v45 = vadd.f32 %v6839_v4, %v2214_v26  ;;  %v2886_v9 = vsel %vm2885_vm7, %v2884_v61, %v2879_v28  ;;  %5414 = vtanh.f32 %v8614_v32  ;;  %v8615_v61 = vld [vmem:[#allocation25_spill] sm:$0xff]  ;;  %v7028_v44 = vsub.s32 %v2901_v47, %v8612_v33 }
 0x1d5   : > { %v1633_v6 = vadd.f32 %v6639_v58, %v8615_v61  ;;  %2336 = vadd.xlane.f32.xlu1 %v2335_v63  ;;  %5416 = vtanh.f32 %v1853_v23  ;;  %v2314_v26 = vsel %vm8548_vm2, %v2105_v11, 0.0  ;;  %v2165_v46 = vmul.f32 %v6679_v54, %v6967_v25  ;;  %v5411_v63 = vpop.eup %5410 }
 0x1d6   : > { %v2891_v57 = vrot.slane %v2594_v45, %v7001_v29  ;;  %2306 = vadd.xlane.f32.xlu0 %v2305_v41  ;;  %v7024_v14 = vpop.xlane.xlu1 %2231  ;;  %v2329_v28 = vsel %vm8548_vm2, %v2110_v22, 0.0  ;;  %v2172_v60 = vmul.f32 %v6679_v54, %v5405_v10  ;;  %v2905_v47 = vrot.slane %v2596_v39, %v7028_v44  ;;  %v5413_v32 = vpop.eup %5412 }
 0x1d7   : > { %v2217_v21 = vpop.xlane.xlu0 %2216  ;;  %v1851_v45 = vadd.f32 %v8610_v51, %v1633_v6  ;;  %5418 = vtanh.f32 %v6653_v7  ;;  %v1854_v25 = vadd.f32 %v8610_v51, %v1636_v2  ;;  %v2494_v10 = vsel %vm8548_vm2, %v2165_v46, 0.0 }
 0x1d8   : > { %v2893_v49 = vsel %vm2892_vm8, %v2891_v57, %v2886_v9  ;;  %v2595_v48 = vadd.f32 %v6839_v4, %v2217_v21  ;;  %v1638_v9 = vadd.f32 %v6639_v58, %v6649_v16  ;;  %5420 = vtanh.f32 %v6663_v55 }
 0x1d9   : > { %2330 = vadd.xlane.f32.xlu1 %v2329_v28  ;;  %v2106_v16 = vmul.f32 %v6679_v54, %v6973_v62  ;;  %v2652_v7 = vadd.f32 %v6839_v4, %v6879_v37  ;;  %v2515_v61 = vsel %vm8548_vm2, %v2172_v60, 0.0  ;;  %v2170_v6 = vmul.f32 %v6679_v54, %v5409_v59  ;;  %v8616_v28 = vld [vmem:[#allocation27_spill] sm:$0xff] }
 0x1da   : > { %v2898_v23 = vrot.slane %v2595_v48, %v7013_v17  ;;  %2315 = vadd.xlane.f32.xlu0 %v2314_v26  ;;  %v7043_v57 = vpop.xlane.xlu1 %2417  ;;  %5422 = vtanh.f32 %v1851_v45  ;;  %v1856_v55 = vadd.f32 %v8610_v51, %v1638_v9  ;;  %v2654_v39 = vadd.f32 %v6839_v4, %v6869_v19 }
 0x1db   : > { %v2397_v41 = vpop.xlane.xlu0 %2396  ;;  %5424 = vtanh.f32 %v6669_v12  ;;  %v1637_v21 = vadd.f32 %v6639_v58, %v6671_v3  ;;  %v2317_v48 = vsel %vm8548_vm2, %v2106_v16, 0.0  ;;  %v2115_v26 = vmul.f32 %v6679_v54, %v5411_v63 }
 0x1dc   : > { %v2900_v11 = vsel %vm2899_vm9, %v2898_v23, %v2893_v49  ;;  %v2655_v37 = vadd.f32 %v6839_v4, %v2397_v41  ;;  %5426 = vtanh.f32 %v1854_v25  ;;  %v3197_v46 = vrot.slane %v2652_v7, %v6939_v42 }
 0x1dd   : > { %v7050_v22 = vsel %vm2906_vm10, %v2905_v47, %v2900_v11  ;;  %2516 = vadd.xlane.f32.xlu1 %v2515_v61  ;;  %v2509_v23 = vsel %vm8548_vm2, %v2170_v6, 0.0  ;;  %v2113_v3 = vmul.f32 %v6679_v54, %v5413_v32  ;;  %5428 = vtanh.f32 %v1856_v55 }
 0x1de   : > { %2495 = vadd.xlane.f32.xlu0 %v2494_v10  ;;  %v7063_v2 = vpop.xlane.xlu1 %2411  ;;  %v5415_v59 = vpop.eup %5414  ;;  %v1639_v60 = vadd.f32 %v6639_v58, %v8616_v28  ;;  %v3206_v45 = vrot.slane %v2654_v39, %v6935_v38  ;;  %5430 = vtanh.f32 %v6697_v35  ;;  %v1855_v47 = vadd.f32 %v8610_v51, %v1637_v21 }
 0x1df   : > { %v2391_v62 = vpop.xlane.xlu0 %2390  ;;  %v5417_v19 = vpop.eup %5416  ;;  %v3211_v41 = vrot.slane %v2655_v37, %v6953_v34  ;;  %v2908_v63 = vadd.s32 4294967224, %v6894_v43  ;;  %v2344_v58 = vsel %vm8548_vm2, %v2115_v26, 0.0  ;;  %v2915_v7 = vadd.s32 4294967216, %v6894_v43 }
 0x1e0   : > { %v2653_v49 = vadd.f32 %v6839_v4, %v2391_v62  ;;  %v2116_v16 = vmul.f32 %v6679_v54, %v5417_v19  ;;  %v2338_v35 = vsel %vm8548_vm2, %v2113_v3, 0.0  ;;  %v2175_v6 = vmul.f32 %v6679_v54, %v5415_v59 }
 0x1e1   : > { %2510 = vadd.xlane.f32.xlu1 %v2509_v23  ;;  %v5419_v32 = vpop.eup %5418  ;;  %5432 = vtanh.f32 %v6691_v50  ;;  %v2922_v39 = vadd.s32 4294967208, %v6894_v43  ;;  %v2657_v62 = vadd.f32 %v6839_v4, %v6986_v20  ;;  %v1857_v37 = vadd.f32 %v8610_v51, %v1639_v60 }
 0x1e2   : > { %v3201_v12 = vrot.slane %v2653_v49, %v6947_v0  ;;  %2318 = vadd.xlane.f32.xlu0 %v2317_v48  ;;  %v7079_v11 = vpop.xlane.xlu1 %2240  ;;  %v5421_v55 = vpop.eup %5420  ;;  %5434 = vtanh.f32 %v1855_v47  ;;  %v2658_v49 = vadd.f32 %v6839_v4, %v6932_v52  ;;  %v7101_v50 = vsub.s32 %v2908_v63, %v8612_v33 }
 0x1e3   : > { %v2226_v9 = vpop.xlane.xlu0 %2225  ;;  %5436 = vtanh.f32 %v6759_v15  ;;  %v2347_v20 = vsel %vm8548_vm2, %v2116_v16, 0.0  ;;  %v2173_v19 = vmul.f32 %v6679_v54, %v5419_v32  ;;  %v7106_v51 = vsub.s32 %v2915_v7, %v8612_v33 }
 0x1e4   : > { %v3202_v25 = vsel %vm2857_vm3, %v3201_v12, %v3197_v46  ;;  %v5423_v26 = vpop.eup %5422  ;;  %v2524_v12 = vsel %vm8548_vm2, %v2175_v6, 0.0  ;;  %v2176_v23 = vmul.f32 %v6679_v54, %v5421_v55  ;;  %v7112_v15 = vsub.s32 %v2922_v39, %v8612_v33 }
 0x1e5   : > { %v3207_v10 = vsel %vm2864_vm4, %v3206_v45, %v3202_v25  ;;  %2339 = vadd.xlane.f32.xlu1 %v2338_v35  ;;  %v5425_v46 = vpop.eup %5424  ;;  %v3221_v28 = vrot.slane %v2657_v62, %v6959_v56  ;;  %v2598_v60 = vadd.f32 %v6839_v4, %v2226_v9  ;;  %v3226_v47 = vrot.slane %v2658_v49, %v7001_v29 }
 0x1e6   : > { %2345 = vadd.xlane.f32.xlu0 %v2344_v58  ;;  %v3212_v61 = vsel %vm2871_vm5, %v3211_v41, %v3207_v10  ;;  %v7096_v48 = vpop.xlane.xlu1 %2234  ;;  %v5427_v3 = vpop.eup %5426  ;;  %v2599_v41 = vadd.f32 %v6839_v4, %v6963_v36  ;;  %v2518_v9 = vsel %vm8548_vm2, %v2173_v19, 0.0  ;;  %v2114_v32 = vmul.f32 %v6679_v54, %v5423_v26 }
 0x1e7   : > { %v2400_v21 = vpop.xlane.xlu0 %2399  ;;  %v5429_v58 = vpop.eup %5428  ;;  %v2527_v6 = vsel %vm8548_vm2, %v2176_v23, 0.0  ;;  %v2919_v55 = vrot.slane %v2598_v60, %v7106_v51  ;;  %5438 = vtanh.f32 %v1857_v37 }
 0x1e8   : > { %v2656_v59 = vadd.f32 %v6839_v4, %v2400_v21  ;;  %v5431_v7 = vpop.eup %5430  ;;  %v2926_v62 = vrot.slane %v2599_v41, %v7112_v15  ;;  %5440 = vtanh.f32 %v6781_v40  ;;  %v2341_v19 = vsel %vm8548_vm2, %v2114_v32, 0.0 }
 0x1e9   : > { %2525 = vadd.xlane.f32.xlu1 %v2524_v12  ;;  %5442 = vtanh.f32 %v6703_v8 }
 0x1ea   : > { %v3216_v52 = vrot.slane %v2656_v59, %v6956_v31  ;;  %2348 = vadd.xlane.f32.xlu0 %v2347_v20  ;;  %v7120_v63 = vpop.xlane.xlu1 %2420  ;;  %5444 = vtanh.f32 %v6787_v1 }
 0x1eb   : > { %v2223_v45 = vpop.xlane.xlu0 %2222  ;;  %v5433_v26 = vpop.eup %5432  ;;  %5446 = vtanh.f32 %v6707_v18  ;;  %v2660_v18 = vadd.f32 %v6839_v4, %v7063_v2 }
 0x1ec   : > { %v3217_v25 = vsel %vm2878_vm6, %v3216_v52, %v3212_v61  ;;  %v2597_v10 = vadd.f32 %v6839_v4, %v2223_v45  ;;  %v2117_v61 = vmul.f32 %v6679_v54, %v5427_v3  ;;  %v2174_v52 = vmul.f32 %v6679_v54, %v5425_v46  ;;  %v5435_v12 = vpop.eup %5434  ;;  %v7147_v3 = vld [vmem:[%s8526_s8] ss:$0 sm:$0xff] }
 0x1ed   : > { %v3222_v16 = vsel %vm2885_vm7, %v3221_v28, %v3217_v25  ;;  %2528 = vadd.xlane.f32.xlu1 %v2527_v6  ;;  %v2177_v40 = vmul.f32 %v7147_v3, %v5431_v7  ;;  %v5437_v28 = vpop.eup %5436  ;;  %v2118_v25 = vmul.f32 %v7147_v3, %v5435_v12  ;;  %v2179_v1 = vmul.f32 %v7147_v3, %v5433_v26 }
 0x1ee   : > { %v2912_v35 = vrot.slane %v2597_v10, %v7101_v50  ;;  %2519 = vadd.xlane.f32.xlu0 %v2518_v9  ;;  %v3227_v36 = vsel %vm2892_vm8, %v3226_v47, %v3222_v16  ;;  %v2415_v49 = vpop.xlane.xlu1 %2414  ;;  %v2521_v45 = vsel %vm8548_vm2, %v2174_v52, 0.0  ;;  %v2119_v47 = vmul.f32 %v7147_v3, %v5429_v58 }
 0x1ef   : > { %v2409_v39 = vpop.xlane.xlu0 %2408  ;;  %v2530_v41 = vsel %vm8548_vm2, %v2177_v40, 0.0  ;;  %v2353_v32 = vsel %vm8548_vm2, %v2118_v25, 0.0  ;;  %v2188_v58 = vmul.f32 %v7147_v3, %v5437_v28  ;;  %5448 = vtanh.f32 %v6719_v53 }
 0x1f0   : > { %v2914_v21 = vsel %vm2913_vm11, %v2912_v35, %v7050_v22  ;;  %v2659_v59 = vadd.f32 %v6839_v4, %v2409_v39  ;;  %v2350_v22 = vsel %vm8548_vm2, %v2117_v61, 0.0  ;;  %v2356_v16 = vsel %vm8548_vm2, %v2119_v47, 0.0 }
 0x1f1   : > { %v2921_v20 = vsel %vm8549_vm12, %v2919_v55, %v2914_v21  ;;  %2351 = vadd.xlane.f32.xlu1 %v2350_v22  ;;  %v5439_v9 = vpop.eup %5438  ;;  %v2563_v39 = vsel %vm8548_vm2, %v2188_v58, 0.0  ;;  %v2661_v53 = vadd.f32 %v6839_v4, %v2415_v49  ;;  %5450 = vtanh.f32 %v6725_v5 }
 0x1f2   : > { %v7140_v37 = vsel %vm8550_vm13, %v2926_v62, %v2921_v20  ;;  %v3231_v23 = vrot.slane %v2659_v59, %v7013_v17  ;;  %2342 = vadd.xlane.f32.xlu0 %v2341_v19  ;;  %v7154_v46 = vpop.xlane.xlu1 %2249  ;;  %v5441_v7 = vpop.eup %5440  ;;  %v2120_v61 = vmul.f32 %v7147_v3, %v5439_v9  ;;  %v3236_v2 = vrot.slane %v2660_v18, %v7028_v44 }
 0x1f3   : > { %v7150_v60 = vpop.xlane.xlu0 %2429  ;;  %v5443_v55 = vpop.eup %5442  ;;  %v2189_v62 = vmul.f32 %v7147_v3, %v5441_v7  ;;  %v2929_v20 = vadd.s32 4294967200, %v6894_v43  ;;  %v2936_v40 = vadd.s32 4294967192, %v6894_v43  ;;  %v3241_v28 = vrot.slane %v2661_v53, %v7101_v50 }
 0x1f4   : > { %v3232_v54 = vsel %vm2899_vm9, %v3231_v23, %v3227_v36  ;;  %v2536_v36 = vsel %vm8548_vm2, %v2179_v1, 0.0  ;;  %v5445_v21 = vpop.eup %5444  ;;  %v2359_v19 = vsel %vm8548_vm2, %v2120_v61, 0.0  ;;  %v2180_v52 = vmul.f32 %v7147_v3, %v5443_v55 }
 0x1f5   : > { %2531 = vadd.xlane.f32.xlu1 %v2530_v41  ;;  %v5447_v12 = vpop.eup %5446  ;;  %v2662_v23 = vadd.f32 %v6839_v4, %v7043_v57  ;;  %v3237_v49 = vsel %vm2906_vm10, %v3236_v2, %v3232_v54  ;;  %v2566_v22 = vsel %vm8548_vm2, %v2189_v62, 0.0  ;;  %v2192_v5 = vmul.f32 %v7147_v3, %v5445_v21 }
 0x1f6   : > { %2522 = vadd.xlane.f32.xlu0 %v2521_v45  ;;  %v7164_v8 = vpop.xlane.xlu1 %2243  ;;  %5452 = vtanh.f32 %v6731_v30  ;;  %v2663_v54 = vadd.f32 %v6839_v4, %v7120_v63  ;;  %v3242_v25 = vsel %vm2913_vm11, %v3241_v28, %v3237_v49  ;;  %v2178_v1 = vmul.f32 %v7147_v3, %v5447_v12 }
 0x1f7   : > { %v7161_v10 = vpop.xlane.xlu0 %2432  ;;  %v7208_v9 = vsub.s32 %v2929_v20, %v8612_v33  ;;  %v3246_v30 = vrot.slane %v2662_v23, %v7106_v51  ;;  %v2575_v58 = vsel %vm8548_vm2, %v2192_v5, 0.0  ;;  %5454 = vtanh.f32 %v6735_v24 }
 0x1f8   : > { %v2950_v63 = vadd.s32 4294967176, %v6894_v43  ;;  %v7216_v7 = vsub.s32 %v2936_v40, %v8612_v33  ;;  %v3251_v24 = vrot.slane %v2663_v54, %v7112_v15  ;;  %v2533_v53 = vsel %vm8548_vm2, %v2178_v1, 0.0  ;;  %v8619_v54 = vld [vmem:[#allocation28_spill] sm:$0xff] }
 0x1f9   : > { %2354 = vadd.xlane.f32.xlu1 %v2353_v32  ;;  %v5449_v57 = vpop.eup %5448  ;;  %v2943_v32 = vadd.s32 4294967184, %v6894_v43  ;;  %v3247_v61 = vsel %vm8549_vm12, %v3246_v30, %v3242_v25  ;;  %v2667_v43 = vadd.f32 %v6839_v4, %v7161_v10  ;;  %5456 = vtanh.f32 %v6747_v27 }
 0x1fa   : > { %2357 = vadd.xlane.f32.xlu0 %v2356_v16  ;;  %v7175_v6 = vpop.xlane.xlu1 %2252  ;;  %v2539_v16 = vsel %vm8548_vm2, %v2180_v52, 0.0  ;;  %v2183_v62 = vmul.f32 %v7147_v3, %v5449_v57  ;;  %v3252_v20 = vsel %vm8550_vm13, %v3251_v24, %v3247_v61  ;;  %5458 = vtanh.f32 %v8619_v54 }
 0x1fb   : > { %v7171_v35 = vpop.xlane.xlu0 %2255  ;;  %v5451_v2 = vpop.eup %5450 }
 0x1fc   : > { %v2181_v5 = vmul.f32 %v7147_v3, %v5451_v2 }
 0x1fd   : > { %2564 = vadd.xlane.f32.xlu1 %v2563_v39 }
 0x1fe   : > { %2537 = vadd.xlane.f32.xlu0 %v2536_v36  ;;  %v2424_v26 = vpop.xlane.xlu1 %2423  ;;  %v2666_v36 = vadd.f32 %v6839_v4, %v7150_v60  ;;  %v7232_v60 = vsub.s32 %v2943_v32, %v8612_v33  ;;  %v2542_v1 = vsel %vm8548_vm2, %v2181_v5, 0.0 }
 0x1ff   : > { %v7182_v59 = vpop.xlane.xlu0 %2435  ;;  %v2664_v47 = vadd.f32 %v6839_v4, %v2424_v26  ;;  %v7235_v26 = vsub.s32 %v2950_v63, %v8612_v33  ;;  %v8622_v63 = vld [vmem:[#allocation29_spill] sm:$0xff] }
 0x200   : > { %v3266_v52 = vrot.slane %v2666_v36, %v7232_v60  ;;  %v5453_v40 = vpop.eup %5452  ;;  %5460 = vtanh.f32 %v8622_v63 }
 0x201   : > { %2567 = vadd.xlane.f32.xlu1 %v2566_v22  ;;  %v3256_v55 = vrot.slane %v2664_v47, %v7208_v9  ;;  %v3271_v23 = vrot.slane %v2667_v43, %v7235_v26  ;;  %v2548_v22 = vsel %vm8548_vm2, %v2183_v62, 0.0  ;;  %v2184_v32 = vmul.f32 %v7147_v3, %v5453_v40  ;;  %v8623_v62 = vld [vmem:[#allocation31_spill] sm:$0xff] }
 0x202   : > { %2360 = vadd.xlane.f32.xlu0 %v2359_v19  ;;  %v7200_v41 = vpop.xlane.xlu1 %2246  ;;  %5462 = vtanh.f32 %v8623_v62 }
 0x203   : > { %v7196_v45 = vpop.xlane.xlu0 %2258  ;;  %v3257_v12 = vsel %vm8551_vm14, %v3256_v55, %v3252_v20  ;;  %v2551_v61 = vsel %vm8548_vm2, %v2184_v32, 0.0  ;;  %v8625_v20 = vld [vmem:[#allocation30_spill] sm:$0xff] }
 0x204   : > { %5464 = vtanh.f32 %v8625_v20 }
 0x205   : > { %2576 = vadd.xlane.f32.xlu1 %v2575_v58 }
 0x206   : > { %2540 = vadd.xlane.f32.xlu0 %v2539_v16  ;;  %v2427_v39 = vpop.xlane.xlu1 %2426  ;;  %v5455_v16 = vpop.eup %5454 }
 0x207   : > { %v7218_v18 = vpop.xlane.xlu0 %2273  ;;  %v2665_v21 = vadd.f32 %v6839_v4, %v2427_v39  ;;  %v5457_v58 = vpop.eup %5456  ;;  %v2182_v55 = vmul.f32 %v7147_v3, %v5455_v16 }
 0x209   : > { %v3261_v19 = vrot.slane %v2665_v21, %v7216_v7  ;;  %v2545_v43 = vsel %vm8548_vm2, %v2182_v55, 0.0  ;;  %v2187_v21 = vmul.f32 %v7147_v3, %v5457_v58 }
 0x20a   : > { %2534 = vadd.xlane.f32.xlu0 %v2533_v53  ;;  %v7243_v27 = vpop.xlane.xlu1 %2261  ;;  %v5459_v53 = vpop.eup %5458 }
 0x20b   : > { %v7239_v10 = vpop.xlane.xlu0 %2267  ;;  %v3262_v49 = vsel %vm2941_vm15, %v3261_v19, %v3257_v12  ;;  %v2185_v12 = vmul.f32 %v7147_v3, %v5459_v53 }
 0x20c   : > { %v3267_v28 = vsel %vm2948_vm0, %v3266_v52, %v3262_v49  ;;  %v2560_v52 = vsel %vm8548_vm2, %v2187_v21, 0.0 }
 0x20d   : > { %v7253_v57 = vsel %vm2955_vm1, %v3271_v23, %v3267_v28  ;;  %v5461_v23 = vpop.eup %5460  ;;  %v2554_v5 = vsel %vm8548_vm2, %v2185_v12, 0.0 }
 0x20e   : > { %2549 = vadd.xlane.f32.xlu0 %v2548_v22  ;;  %8618 = vst [vmem:[#allocation20_spill] sm:$0xff] %v7253_v57  ;;  %v7256_v25 = vpop.xlane.xlu1 %2441  ;;  %v2186_v40 = vmul.f32 %v7147_v3, %v5461_v23  ;;  %v5463_v28 = vpop.eup %5462 }
 0x20f   : > { %v7250_v47 = vpop.xlane.xlu0 %2453  ;;  %8620 = vst [vmem:[#allocation22_spill] sm:$0xff] %v7256_v25  ;;  %v2190_v32 = vmul.f32 %v7147_v3, %v5463_v28  ;;  %v5465_v58 = vpop.eup %5464  ;;  %v8660_v25 = vld [vmem:[#allocation32_spill] sm:$0xff] }
 0x210   : > { %8617 = vst [vmem:[#allocation21_spill] sm:$0xff] %v7250_v47  ;;  %v2191_v62 = vmul.f32 %v7147_v3, %v5465_v58 }
 0x211   : > { %v2569_v55 = vsel %vm8548_vm2, %v2190_v32, 0.0 }
 0x212   : > { %2543 = vadd.xlane.f32.xlu0 %v2542_v1  ;;  %v7263_v36 = vpop.xlane.xlu1 %2264  ;;  %v2557_v1 = vsel %vm8548_vm2, %v2186_v40, 0.0  ;;  %v2572_v53 = vsel %vm8548_vm2, %v2191_v62, 0.0  ;;  %vm3510_vm2 = vcmask 1041409  }
 0x213   : > { %v7260_v30 = vpop.xlane.xlu0 %2447 }
 0x214   : > { %8621 = vst [vmem:[#allocation24_spill] sm:$0xff] %v7260_v30 }
 0x216   : > { %2552 = vadd.xlane.f32.xlu0 %v2551_v61  ;;  %v7270_v24 = vpop.xlane.xlu1 %2444 }
 0x217   : > { %v7267_v39 = vpop.xlane.xlu0 %2276  ;;  %8624 = vst [vmem:[#allocation12_spill] sm:$0xff] %v7270_v24 }
 0x21a   : > { %2546 = vadd.xlane.f32.xlu0 %v2545_v43  ;;  %v7277_v19 = vpop.xlane.xlu1 %2438 }
 0x21b   : > { %v7274_v2 = vpop.xlane.xlu0 %2270  ;;  %8626 = vst [vmem:[#allocation23_spill] sm:$0xff] %v7277_v19 }
 0x21e   : > { %2561 = vadd.xlane.f32.xlu0 %v2560_v52  ;;  %v7283_v22 = vpop.xlane.xlu1 %2477 }
 0x21f   : > { %v7281_v49 = vpop.xlane.xlu0 %2456  ;;  %8628 = vst [vmem:[#allocation25_spill] sm:$0xff] %v7283_v22 }
 0x220   : > { %8627 = vst [vmem:[#allocation26_spill] sm:$0xff] %v7281_v49 }
 0x222   : > { %2555 = vadd.xlane.f32.xlu0 %v2554_v5  ;;  %v2301_v16 = vpop.xlane.xlu1 %2300 }
 0x223   : > { %v7287_v54 = vpop.xlane.xlu0 %2450 }
 0x224   : > { %8629 = vst [vmem:[#allocation27_spill] sm:$0xff] %v7287_v54 }
 0x226   : > { %2558 = vadd.xlane.f32.xlu0 %v2557_v1  ;;  %v2295_v61 = vpop.xlane.xlu1 %2294 }
 0x227   : > { %v7291_v63 = vpop.xlane.xlu0 %2285 }
 0x228   : > { %8630 = vst [vmem:[#allocation28_spill] sm:$0xff] %v7291_v63 }
 0x22a   : > { %2570 = vadd.xlane.f32.xlu0 %v2569_v55  ;;  %v7297_v21 = vpop.xlane.xlu1 %2474 }
 0x22b   : > { %v7295_v43 = vpop.xlane.xlu0 %2279  ;;  %8631 = vst [vmem:[#allocation29_spill] sm:$0xff] %v7297_v21 }
 0x22e   : > { %2573 = vadd.xlane.f32.xlu0 %v2572_v53  ;;  %v2304_v52 = vpop.xlane.xlu1 %2303 }
 0x22f   : > { %v7300_v20 = vpop.xlane.xlu0 %2465 }
 0x230   : > { %8632 = vst [vmem:[#allocation31_spill] sm:$0xff] %v7300_v20 }
 0x232   : > { %v7304_v23 = vpop.xlane.xlu1 %2312 }
 0x233   : > { %v7302_v12 = vpop.xlane.xlu0 %2459 }
 0x234   : > { %8633 = vst [vmem:[#allocation30_spill] sm:$0xff] %v7302_v12 }
 0x236   : > { %v7308_v40 = vpop.xlane.xlu1 %2492 }
 0x237   : > { %v7306_v5 = vpop.xlane.xlu0 %2288  ;;  %8635 = vst [vmem:[#allocation34_spill] sm:$0xff] %v7308_v40 }
 0x238   : > { %8634 = vst [vmem:[#allocation33_spill] sm:$0xff] %v7306_v5 }
 0x23a   : > { %v7312_v28 = vpop.xlane.xlu1 %2486 }
 0x23b   : > { %v7310_v3 = vpop.xlane.xlu0 %2282  ;;  %8636 = vst [vmem:[#allocation35_spill] sm:$0xff] %v7312_v28 }
 0x23e   : > { %v7316_v32 = vpop.xlane.xlu1 %2321 }
 0x23f   : > { %v7314_v1 = vpop.xlane.xlu0 %2468 }
 0x240   : > { %8637 = vst [vmem:[#allocation36_spill] sm:$0xff] %v7314_v1 }
 0x242   : > { %v7320_v55 = vpop.xlane.xlu1 %2501 }
 0x243   : > { %v7318_v58 = vpop.xlane.xlu0 %2462  ;;  %8639 = vst [vmem:[#allocation38_spill] sm:$0xff] %v7320_v55 }
 0x244   : > { %8638 = vst [vmem:[#allocation37_spill] sm:$0xff] %v7318_v58 }
 0x246   : > { %v7322_v53 = vpop.xlane.xlu1 %2324 }
 0x247   : > { %v2298_v62 = vpop.xlane.xlu0 %2297 }
 0x248   : > { %v2622_v5 = vadd.f32 %v6839_v4, %v2298_v62  ;;  %v2606_v62 = vadd.f32 %v6839_v4, %v7154_v46 }
 0x24a   : > { %v7324_v21 = vpop.xlane.xlu1 %2504 }
 0x24b   : > { %v2292_v33 = vpop.xlane.xlu0 %2291  ;;  %8640 = vst [vmem:[#allocation39_spill] sm:$0xff] %v7324_v21 }
 0x24e   : > { %v7328_v20 = vpop.xlane.xlu1 %2498 }
 0x24f   : > { %v7326_v22 = vpop.xlane.xlu0 %2471  ;;  %8642 = vst [vmem:[#allocation41_spill] sm:$0xff] %v7328_v20 }
 0x250   : > { %8641 = vst [vmem:[#allocation40_spill] sm:$0xff] %v7326_v22 }
 0x252   : > { %v7332_v12 = vpop.xlane.xlu1 %2333 }
 0x253   : > { %v7330_v49 = vpop.xlane.xlu0 %2480  ;;  %8644 = vst [vmem:[#allocation43_spill] sm:$0xff] %v7332_v12 }
 0x254   : > { %8643 = vst [vmem:[#allocation42_spill] sm:$0xff] %v7330_v49  ;;  %v2620_v49 = vadd.f32 %v6839_v4, %v2292_v33  ;;  %v8655_v33 = vld [vmem:[#allocation13_spill] sm:$0xff] }
 0x256   : > { %v7334_v57 = vpop.xlane.xlu1 %2327 }
 0x257   : > { %v2310_v1 = vpop.xlane.xlu0 %2309  ;;  %8645 = vst [vmem:[#allocation44_spill] sm:$0xff] %v7334_v57  ;;  %v8662_v57 = vld [vmem:[#allocation18_spill] sm:$0xff] }
 0x258   : > { %v7410_v46 = vadd.f32 %v6839_v4, %v8662_v57 }
 0x25a   : > { %v7338_v55 = vpop.xlane.xlu1 %2513 }
 0x25b   : > { %v7336_v58 = vpop.xlane.xlu0 %2489  ;;  %8647 = vst [vmem:[#allocation46_spill] sm:$0xff] %v7338_v55  ;;  %v2605_v55 = vadd.f32 %v6839_v4, %v7200_v41  ;;  %v8658_v41 = vld [vmem:[#allocation15_spill] sm:$0xff] }
 0x25c   : > { %8646 = vst [vmem:[#allocation45_spill] sm:$0xff] %v7336_v58  ;;  %v2621_v58 = vadd.f32 %v6839_v4, %v2295_v61 }
 0x25e   : > { %v7342_v40 = vpop.xlane.xlu1 %2507  ;;  %v3043_v12 = vrot.slane %v2621_v58, %v6947_v0 }
 0x25f   : > { %v7340_v47 = vpop.xlane.xlu0 %2483  ;;  %8649 = vst [vmem:[#allocation48_spill] sm:$0xff] %v7342_v40  ;;  %v3039_v40 = vrot.slane %v2620_v49, %v6939_v42  ;;  %v7376_v49 = vadd.f32 %v6839_v4, %v8658_v41 }
 0x260   : > { %8648 = vst [vmem:[#allocation47_spill] sm:$0xff] %v7340_v47 }
 0x262   : > { %v7344_v54 = vpop.xlane.xlu1 %2336 }
 0x263   : > { %v2307_v21 = vpop.xlane.xlu0 %2306  ;;  %8650 = vst [vmem:[#allocation49_spill] sm:$0xff] %v7344_v54  ;;  %v2604_v54 = vadd.f32 %v6839_v4, %v7164_v8  ;;  %v2964_v8 = vrot.slane %v2605_v55, %v6947_v0  ;;  %v3048_v55 = vrot.slane %v2622_v5, %v6935_v38 }
 0x265   : > { %v2960_v58 = vrot.slane %v2604_v54, %v6939_v42  ;;  %v2624_v54 = vadd.f32 %v6839_v4, %v2304_v52 }
 0x266   : > { %v7348_v20 = vpop.xlane.xlu1 %2330 }
 0x267   : > { %v7346_v22 = vpop.xlane.xlu0 %2315  ;;  %8651 = vst [vmem:[#allocation50_spill] sm:$0xff] %v7348_v20  ;;  %v8661_v20 = vld [vmem:[#allocation17_spill] sm:$0xff] }
 0x268   : > { %v7392_v41 = vadd.f32 %v6839_v4, %v8661_v20  ;;  %v2607_v20 = vadd.f32 %v6839_v4, %v7175_v6  ;;  %v3058_v6 = vrot.slane %v2624_v54, %v6956_v31 }
 0x26a   : > { %v7353_v28 = vpop.xlane.xlu1 %2516  ;;  %v2974_v52 = vrot.slane %v2607_v20, %v6953_v34 }
 0x26b   : > { %v7351_v30 = vpop.xlane.xlu0 %2495  ;;  %8653 = vst [vmem:[#allocation52_spill] sm:$0xff] %v7353_v28  ;;  %v8657_v28 = vld [vmem:[#allocation14_spill] sm:$0xff] }
 0x26c   : > { %8652 = vst [vmem:[#allocation51_spill] sm:$0xff] %v7351_v30  ;;  %v7368_v30 = vadd.f32 %v6839_v4, %v8655_v33  ;;  %v7372_v61 = vadd.f32 %v6839_v4, %v8657_v28  ;;  %8659 = vst [vmem:[#allocation14_spill] sm:$0xff] %v7376_v49  ;;  %v3044_v33 = vsel %vm2857_vm3, %v3043_v12, %v3039_v40 }
 0x26d   : > { %v7388_v28 = vadd.f32 %v6839_v4, %v8660_v25  ;;  %v2625_v25 = vadd.f32 %v6839_v4, %v2307_v21  ;;  %v2965_v40 = vsel %vm2857_vm3, %v2964_v8, %v2960_v58  ;;  %v3049_v5 = vsel %vm2864_vm4, %v3048_v55, %v3044_v33  ;;  %v8664_v8 = vld [vmem:[#allocation19_spill] sm:$0xff] }
 0x26e   : > { %v7364_v24 = vpop.xlane.xlu1 %2510  ;;  %8656 = vst [vmem:[#allocation13_spill] sm:$0xff] %v7368_v30  ;;  %v8663_v30 = vld [vmem:[#allocation16_spill] sm:$0xff]  ;;  %v2969_v12 = vrot.slane %v2606_v62, %v6935_v38  ;;  %v7426_v57 = vadd.f32 %v6839_v4, %v8664_v8  ;;  %v2609_v8 = vadd.f32 %v6839_v4, %v7196_v45 }
 0x26f   : > { %v7359_v47 = vpop.xlane.xlu0 %2318  ;;  %8654 = vst [vmem:[#allocation53_spill] sm:$0xff] %v7364_v24  ;;  %v2623_v24 = vadd.f32 %v6839_v4, %v2301_v16  ;;  %v7414_v16 = vadd.f32 %v6839_v4, %v8663_v30  ;;  %v2600_v30 = vadd.f32 %v6839_v4, %v7024_v14  ;;  %v3063_v55 = vrot.slane %v2625_v25, %v6959_v56 }
 0x270   : > { %v2970_v62 = vsel %vm2864_vm4, %v2969_v12, %v2965_v40  ;;  %v2626_v14 = vadd.f32 %v6839_v4, %v2310_v1  ;;  %v2610_v12 = vadd.f32 %v6839_v4, %v7243_v27  ;;  %v2611_v25 = vadd.f32 %v6839_v4, %v7263_v36 }
 0x271   : > { %v3053_v21 = vrot.slane %v2623_v24, %v6953_v34  ;;  %v2608_v24 = vadd.f32 %v6839_v4, %v7171_v35  ;;  %v7456_v1 = vadd.f32 %v6839_v4, %v7003_v13  ;;  %v2975_v40 = vsel %vm2871_vm5, %v2974_v52, %v2970_v62 }
 0x272   : > { %v2340_v19 = vpop.xlane.xlu1 %2339  ;;  %v2601_v27 = vadd.f32 %v6839_v4, %v7096_v48  ;;  %v2933_v45 = vrot.slane %v2600_v30, %v7208_v9  ;;  %v2984_v13 = vrot.slane %v2609_v8, %v6959_v56  ;;  %v3068_v52 = vrot.slane %v2626_v14, %v7001_v29 }
 0x273   : > { %v7384_v63 = vpop.xlane.xlu0 %2345  ;;  %v3054_v58 = vsel %vm2871_vm5, %v3053_v21, %v3049_v5  ;;  %v2979_v36 = vrot.slane %v2608_v24, %v6956_v31  ;;  %v2627_v21 = vadd.f32 %v6839_v4, %v7304_v23  ;;  %v2989_v48 = vrot.slane %v2610_v12, %v7001_v29 }
 0x274   : > { %v3059_v54 = vsel %vm2878_vm6, %v3058_v6, %v3054_v58  ;;  %v2628_v6 = vadd.f32 %v6839_v4, %v7346_v22  ;;  %v2994_v24 = vrot.slane %v2611_v25, %v7013_v17  ;;  %v2629_v23 = vadd.f32 %v6839_v4, %v7359_v47 }
 0x275   : > { %v3064_v35 = vsel %vm2885_vm7, %v3063_v55, %v3059_v54  ;;  %v2980_v62 = vsel %vm2878_vm6, %v2979_v36, %v2975_v40  ;;  %v2613_v30 = vadd.f32 %v6839_v4, %v7274_v2  ;;  %v2636_v8 = vadd.f32 %v6839_v4, %v2340_v19 }
 0x276   : > { %v7430_v33 = vpop.xlane.xlu1 %2525  ;;  %v3069_v55 = vsel %vm2892_vm8, %v3068_v52, %v3064_v35  ;;  %v2940_v40 = vrot.slane %v2601_v27, %v7216_v7  ;;  %v2935_v12 = vsel %vm8551_vm14, %v2933_v45, %v7140_v37  ;;  %v2612_v25 = vadd.f32 %v6839_v4, %v7239_v10 }
 0x277   : > { %v7418_v49 = vpop.xlane.xlu0 %2348  ;;  %8665 = vst [vmem:[#allocation15_spill] sm:$0xff] %v7430_v33  ;;  %v3177_v33 = vrot.slane %v7410_v46, %v7208_v9  ;;  %v3073_v47 = vrot.slane %v2627_v21, %v7013_v17  ;;  %v2985_v54 = vsel %vm2885_vm7, %v2984_v13, %v2980_v62  ;;  %v2614_v2 = vadd.f32 %v6839_v4, %v7218_v18 }
 0x278   : > { %v3078_v19 = vrot.slane %v2628_v6, %v7028_v44  ;;  %v2990_v36 = vsel %vm2892_vm8, %v2989_v48, %v2985_v54  ;;  %v3083_v37 = vrot.slane %v2629_v23, %v7101_v50  ;;  %v2638_v10 = vadd.f32 %v6839_v4, %v7384_v63 }
 0x279   : > { %v3074_v27 = vsel %vm2899_vm9, %v3073_v47, %v3069_v55  ;;  %v2995_v21 = vsel %vm2899_vm9, %v2994_v24, %v2990_v36  ;;  %v3004_v13 = vrot.slane %v2613_v30, %v7101_v50  ;;  %v2630_v18 = vadd.f32 %v6839_v4, %v7316_v32 }
 0x27a   : > { %v7460_v5 = vpop.xlane.xlu1 %2528  ;;  %v3118_v52 = vrot.slane %v2636_v8, %v6939_v42  ;;  %v2947_v62 = vrot.slane %v7456_v1, %v7232_v60  ;;  %v7512_v48 = vadd.f32 %v6839_v4, %v7079_v11  ;;  %v2942_v63 = vsel %vm2941_vm15, %v2940_v40, %v2935_v12 }
 0x27b   : > { %v7450_v20 = vpop.xlane.xlu0 %2519  ;;  %v2999_v24 = vrot.slane %v2612_v25, %v7028_v44  ;;  %v7518_v23 = vadd.f32 %v6839_v4, %v7182_v59  ;;  %v3079_v32 = vsel %vm2906_vm10, %v3078_v19, %v3074_v27  ;;  %v2631_v11 = vadd.f32 %v6839_v4, %v7322_v53 }
 0x27c   : > { %v3084_v55 = vsel %vm2913_vm11, %v3083_v37, %v3079_v32  ;;  %v3127_v8 = vrot.slane %v2638_v10, %v6935_v38  ;;  %v3009_v59 = vrot.slane %v2614_v2, %v7106_v51  ;;  %v2615_v40 = vadd.f32 %v6839_v4, %v7267_v39  ;;  %v8668_v32 = vld [vmem:[#allocation50_spill] sm:$0xff] }
 0x27d   : > { %v3000_v1 = vsel %vm2906_vm10, %v2999_v24, %v2995_v21  ;;  %v2616_v47 = vadd.f32 %v6839_v4, %v7295_v43  ;;  %v2617_v53 = vadd.f32 %v6839_v4, %v7310_v3  ;;  %v2954_v37 = vrot.slane %v7512_v48, %v7235_v26 }
 0x27e   : > { %v2352_v14 = vpop.xlane.xlu1 %2351  ;;  %v3005_v12 = vsel %vm2913_vm11, %v3004_v13, %v3000_v1  ;;  %v2949_v43 = vsel %vm2948_vm0, %v2947_v62, %v2942_v63  ;;  %v3093_v3 = vrot.slane %v2631_v11, %v7112_v15  ;;  %v3276_v21 = vrot.slane %v7518_v23, %v6939_v42  ;;  %v8667_v13 = vld [vmem:[#allocation23_spill] sm:$0xff] }
 0x27f   : > { %v2343_v58 = vpop.xlane.xlu0 %2342  ;;  %v2640_v54 = vadd.f32 %v6839_v4, %v2352_v14  ;;  %v3019_v48 = vrot.slane %v2616_v47, %v7208_v9  ;;  %v2633_v62 = vadd.f32 %v6839_v4, %v8668_v32  ;;  %v3024_v23 = vrot.slane %v2617_v53, %v7216_v7 }
 0x280   : > { %v2637_v22 = vadd.f32 %v6839_v4, %v2343_v58  ;;  %v2639_v58 = vadd.f32 %v6839_v4, %v7418_v49  ;;  %v3088_v49 = vrot.slane %v2630_v18, %v7106_v51  ;;  %v2669_v18 = vadd.f32 %v6839_v4, %v8667_v13 }
 0x282   : > { %v3122_v35 = vrot.slane %v2637_v22, %v6947_v0  ;;  %v7506_v6 = vpop.xlane.xlu1 %2531  ;;  %v3089_v39 = vsel %vm8549_vm12, %v3088_v49, %v3084_v55  ;;  %v3132_v36 = vrot.slane %v2639_v58, %v6953_v34  ;;  %v3137_v58 = vrot.slane %v2640_v54, %v6956_v31  ;;  %v8669_v55 = vld [vmem:[#allocation22_spill] sm:$0xff] }
 0x283   : > { %v7499_v45 = vpop.xlane.xlu0 %2522  ;;  %v3094_v63 = vsel %vm8550_vm13, %v3093_v3, %v3089_v39  ;;  %v3280_v39 = vrot.slane %v2669_v18, %v6947_v0  ;;  %v8673_v3 = vld [vmem:[#allocation33_spill] sm:$0xff] }
 0x284   : > { %v3123_v30 = vsel %vm2857_vm3, %v3122_v35, %v3118_v52  ;;  %v8666_v35 = vld [vmem:[#allocation44_spill] sm:$0xff]  ;;  %v3010_v52 = vsel %vm8549_vm12, %v3009_v59, %v3005_v12 }
 0x285   : > { %v3128_v19 = vsel %vm2864_vm4, %v3127_v8, %v3123_v30  ;;  %v2632_v2 = vadd.f32 %v6839_v4, %v8666_v35  ;;  %v3014_v30 = vrot.slane %v2615_v40, %v7112_v15  ;;  %v2670_v8 = vadd.f32 %v6839_v4, %v8669_v55  ;;  %v8671_v40 = vld [vmem:[#allocation43_spill] sm:$0xff]  ;;  %v8672_v35 = vld [vmem:[#allocation12_spill] sm:$0xff] }
 0x286   : > { %v2355_v25 = vpop.xlane.xlu1 %2354  ;;  %v3133_v24 = vsel %vm2871_vm5, %v3132_v36, %v3128_v19  ;;  %v2634_v53 = vadd.f32 %v6839_v4, %v8671_v40  ;;  %v8678_v40 = vld [vmem:[#allocation14_spill] sm:$0xff] }
 0x287   : > { %v2358_v22 = vpop.xlane.xlu0 %2357  ;;  %v2641_v27 = vadd.f32 %v6839_v4, %v2355_v25  ;;  %v3098_v1 = vrot.slane %v2632_v2, %v7208_v9  ;;  %v3138_v12 = vsel %vm2878_vm6, %v3137_v58, %v3133_v24  ;;  %v3015_v47 = vsel %vm8550_vm13, %v3014_v30, %v3010_v52 }
 0x288   : > { %v2642_v14 = vadd.f32 %v6839_v4, %v2358_v22  ;;  %v8670_v22 = vld [vmem:[#allocation28_spill] sm:$0xff]  ;;  %v2671_v2 = vadd.f32 %v6839_v4, %v8672_v35  ;;  %v3020_v36 = vsel %vm8551_vm14, %v3019_v48, %v3015_v47 }
 0x289   : > { %v3142_v11 = vrot.slane %v2641_v27, %v6959_v56  ;;  %v2618_v59 = vadd.f32 %v6839_v4, %v8670_v22  ;;  %v3099_v54 = vsel %vm8551_vm14, %v3098_v1, %v3094_v63  ;;  %v3103_v27 = vrot.slane %v2633_v62, %v7216_v7  ;;  %v8674_v63 = vld [vmem:[#allocation49_spill] sm:$0xff] }
 0x28a   : > { %v3147_v49 = vrot.slane %v2642_v14, %v7001_v29  ;;  %v2619_v14 = vadd.f32 %v6839_v4, %v8673_v3  ;;  %v3025_v13 = vsel %vm2941_vm15, %v3024_v23, %v3020_v36  ;;  %v2635_v58 = vadd.f32 %v6839_v4, %v8674_v63  ;;  %v8675_v23 = vld [vmem:[#allocation47_spill] sm:$0xff] }
 0x28b   : > { %v7550_v10 = vpop.xlane.xlu0 %2537  ;;  %v3143_v52 = vsel %vm2885_vm7, %v3142_v11, %v3138_v12  ;;  %v3029_v32 = vrot.slane %v2618_v59, %v7232_v60  ;;  %v3104_v18 = vsel %vm2941_vm15, %v3103_v27, %v3099_v54  ;;  %v2956_v62 = vsel %vm2955_vm1, %v2954_v37, %v2949_v43  ;;  %v8677_v43 = vld [vmem:[#allocation35_spill] sm:$0xff] }
 0x28c   : > { %v3148_v48 = vsel %vm2892_vm8, %v3147_v49, %v3143_v52  ;;  %v3108_v1 = vrot.slane %v2634_v53, %v7232_v60  ;;  %v2684_v11 = vadd.f32 %v6839_v4, %v8675_v23  ;;  %v3285_v22 = vrot.slane %v2670_v8, %v6935_v38 }
 0x28d   : > { %v3281_v59 = vsel %vm2857_vm3, %v3280_v39, %v3276_v21  ;;  %v3030_v12 = vsel %vm2948_vm0, %v3029_v32, %v3025_v13  ;;  %v8676_v49 = vrot.slane %v7372_v61, %v7028_v44  ;;  %v3034_v37 = vrot.slane %v2619_v14, %v7235_v26  ;;  %v8680_v21 = vld [vmem:[#allocation24_spill] sm:$0xff] }
 0x28e   : > { %v2685_v47 = vadd.f32 %v6839_v4, %v8677_v43  ;;  %v8679_v53 = vrot.slane %v8678_v40, %v7101_v50  ;;  %v3109_v8 = vsel %vm2948_vm0, %v3108_v1, %v3104_v18  ;;  %v3290_v35 = vrot.slane %v2671_v2, %v6953_v34  ;;  %v8683_v2 = vld [vmem:[#allocation45_spill] sm:$0xff] }
 0x28f   : > { %v2361_v25 = vpop.xlane.xlu0 %2360  ;;  %v3113_v61 = vrot.slane %v2635_v58, %v7235_v26  ;;  %v8681_v39 = vrot.slane %v7388_v28, %v7106_v51  ;;  %v3286_v3 = vsel %vm2864_vm4, %v3285_v22, %v3281_v59  ;;  %v3035_v14 = vsel %vm2955_vm1, %v3034_v37, %v3030_v12  ;;  %v8684_v58 = vld [vmem:[#allocation27_spill] sm:$0xff]  ;;  %v8688_v59 = vld [vmem:[#allocation34_spill] sm:$0xff]  ;;  %v8691_v43 = vld [vmem:[#allocation21_spill] sm:$0xff] }
 0x290   : > { %v2643_v19 = vadd.f32 %v6839_v4, %v2361_v25  ;;  %v3355_v13 = vrot.slane %v2684_v11, %v6939_v42  ;;  %v8682_v52 = vrot.slane %v7392_v41, %v7112_v15  ;;  %v2686_v32 = vadd.f32 %v6839_v4, %v8683_v2  ;;  %v8686_v11 = vld [vmem:[#allocation51_spill] sm:$0xff] }
 0x291   : > { %v3114_v63 = vsel %vm2955_vm1, %v3113_v61, %v3109_v8  ;;  %v2673_v18 = vadd.f32 %v6839_v4, %v8684_v58  ;;  %v8685_v41 = vrot.slane %v7426_v57, %v7216_v7  ;;  %v3511_v23 = vsel %vm3510_vm2, %v3035_v14, %v2956_v62  ;;  %v8692_v8 = vld [vmem:[#allocation20_spill] sm:$0xff] }
 0x292   : > { %v3152_v24 = vrot.slane %v2643_v19, %v7013_v17  ;;  %v2672_v19 = vadd.f32 %v6839_v4, %v8680_v21  ;;  %v2688_v46 = vadd.f32 %v6839_v4, %v8686_v11  ;;  %v2687_v12 = vadd.f32 %v6839_v4, %v8688_v59 }
 0x293   : > { %v7593_v30 = vpop.xlane.xlu0 %2540  ;;  %v2700_v58 = vadd.f32 %v6839_v4, %v7506_v6 }
 0x294   : > { %v3153_v55 = vsel %vm2899_vm9, %v3152_v24, %v3148_v48  ;;  %v3359_v48 = vrot.slane %v2685_v47, %v6947_v0  ;;  %v2674_v47 = vadd.f32 %v6839_v4, %v8691_v43  ;;  %v3295_v61 = vrot.slane %v2672_v19, %v6956_v31 }
 0x295   : > { %v3158_v25 = vsel %vm2906_vm10, %v8676_v49, %v3153_v55  ;;  %v8687_v55 = vrot.slane %v7414_v16, %v7232_v60  ;;  %v8689_v49 = vld [vmem:[#allocation13_spill] sm:$0xff]  ;;  %v3364_v16 = vrot.slane %v2686_v32, %v6935_v38  ;;  %v3434_v43 = vrot.slane %v2700_v58, %v6939_v42 }
 0x296   : > { %v3163_v54 = vsel %vm2913_vm11, %v8679_v53, %v3158_v25  ;;  %v3360_v57 = vsel %vm2857_vm3, %v3359_v48, %v3355_v13  ;;  %v8690_v25 = vrot.slane %v8689_v49, %v7235_v26  ;;  %v3291_v53 = vsel %vm2871_vm5, %v3290_v35, %v3286_v3  ;;  %v8703_v58 = vld [vmem:[#allocation53_spill] sm:$0xff] }
 0x297   : > { %v3168_v36 = vsel %vm8549_vm12, %v8681_v39, %v3163_v54  ;;  %v2535_v27 = vpop.xlane.xlu0 %2534  ;;  %vm3512_vm12 = vcmask 1042434   ;;  %v3300_v54 = vrot.slane %v2673_v18, %v6959_v56  ;;  %v3365_v39 = vsel %vm2864_vm4, %v3364_v16, %v3360_v57  ;;  %v8695_v18 = vld [vmem:[#allocation26_spill] sm:$0xff] }
 0x298   : > { %v3173_v24 = vsel %vm8550_vm13, %v8682_v52, %v3168_v36  ;;  %vm3514_vm13 = vcmask 1043459   ;;  %v3513_v37 = vsel %vm3512_vm12, %v3114_v63, %v3511_v23  ;;  %v3374_v36 = vrot.slane %v2688_v46, %v6956_v31  ;;  %v8693_v52 = vld [vmem:[#allocation41_spill] sm:$0xff] }
 0x299   : > { %v3178_v28 = vsel %vm8551_vm14, %v3177_v33, %v3173_v24  ;;  %vm3516_vm14 = vcmask 1044484   ;;  %v3369_v13 = vrot.slane %v2687_v12, %v6953_v34  ;;  %v2689_v24 = vadd.f32 %v6839_v4, %v8693_v52  ;;  %v8698_v12 = vld [vmem:[#allocation31_spill] sm:$0xff] }
 0x29a   : > { %v3183_v1 = vsel %vm2941_vm15, %v8685_v41, %v3178_v28  ;;  %v2701_v35 = vadd.f32 %v6839_v4, %v2535_v27  ;;  %v3305_v3 = vrot.slane %v2674_v47, %v7001_v29  ;;  %v3296_v2 = vsel %vm2878_vm6, %v3295_v61, %v3291_v53  ;;  %v8694_v28 = vld [vmem:[#allocation30_spill] sm:$0xff] }
 0x29b   : > { %v7647_v33 = vpop.xlane.xlu0 %2549  ;;  %v3188_v22 = vsel %vm2948_vm0, %v8687_v55, %v3183_v1  ;;  %v3301_v32 = vsel %vm2885_vm7, %v3300_v54, %v3296_v2  ;;  %v2676_v19 = vadd.f32 %v6839_v4, %v8694_v28  ;;  %v3370_v63 = vsel %vm2871_vm5, %v3369_v13, %v3365_v39  ;;  %v8696_v41 = vld [vmem:[#allocation38_spill] sm:$0xff]  ;;  %v8697_v1 = vld [vmem:[#allocation37_spill] sm:$0xff]  ;;  %v8700_v39 = vld [vmem:[#allocation48_spill] sm:$0xff] }
 0x29c   : > { %v3193_v62 = vsel %vm2955_vm1, %v8690_v25, %v3188_v22  ;;  %v2675_v48 = vadd.f32 %v6839_v4, %v8695_v18  ;;  %v2690_v27 = vadd.f32 %v6839_v4, %v8696_v41  ;;  %v2677_v23 = vadd.f32 %v6839_v4, %v8697_v1  ;;  %v8699_v25 = vld [vmem:[#allocation39_spill] sm:$0xff]  ;;  %v8704_v1 = vld [vmem:[#allocation25_spill] sm:$0xff] }
 0x29d   : > { %v3515_v40 = vsel %vm3514_vm13, %v3193_v62, %v3513_v37  ;;  %v3375_v11 = vsel %vm2878_vm6, %v3374_v36, %v3370_v63  ;;  %v3379_v55 = vrot.slane %v2689_v24, %v6959_v56  ;;  %v3438_v22 = vrot.slane %v2701_v35, %v6947_v0 }
 0x29e   : > { %v7669_v21 = vsel %vm3516_vm14, %v8692_v8, %v3515_v40  ;;  %v3306_v59 = vsel %vm2892_vm8, %v3305_v3, %v3301_v32  ;;  %v2678_v6 = vadd.f32 %v6839_v4, %v8698_v12  ;;  %v2702_v57 = vadd.f32 %v6839_v4, %v7550_v10  ;;  %v8702_v3 = vld [vmem:[#allocation36_spill] sm:$0xff] }
 0x29f   : > { %v2544_v14 = vpop.xlane.xlu0 %2543  ;;  %v3315_v49 = vrot.slane %v2676_v19, %v7028_v44  ;;  %v2691_v62 = vadd.f32 %v6839_v4, %v8699_v25  ;;  %v3380_v37 = vsel %vm2885_vm7, %v3379_v55, %v3375_v11  ;;  %v3310_v47 = vrot.slane %v2675_v48, %v7013_v17  ;;  %v2565_v48 = vpop.xlane.xlu1 %2564 }
 0x2a0   : > { %v3384_v0 = vrot.slane %v2690_v27, %v7001_v29  ;;  %v3320_v16 = vrot.slane %v2677_v23, %v7101_v50  ;;  %v2704_v40 = vadd.f32 %v6839_v4, %v2544_v14  ;;  %v2703_v10 = vadd.f32 %v6839_v4, %v7593_v30  ;;  %v8701_v30 = vld [vmem:[#allocation40_spill] sm:$0xff] }
 0x2a1   : > { %v3439_v54 = vsel %vm2857_vm3, %v3438_v22, %v3434_v43  ;;  %v3311_v61 = vsel %vm2899_vm9, %v3310_v47, %v3306_v59  ;;  %v2692_v42 = vadd.f32 %v6839_v4, %v8700_v39  ;;  %v3443_v13 = vrot.slane %v2702_v57, %v6935_v38 }
 0x2a2   : > { %v3385_v36 = vsel %vm2892_vm8, %v3384_v0, %v3380_v37  ;;  %v3325_v52 = vrot.slane %v2678_v6, %v7106_v51  ;;  %v3316_v14 = vsel %vm2906_vm10, %v3315_v49, %v3311_v61  ;;  %v3389_v24 = vrot.slane %v2691_v62, %v7013_v17 }
 0x2a3   : > { %v2553_v46 = vpop.xlane.xlu0 %2552  ;;  %v2680_v35 = vadd.f32 %v6839_v4, %v8701_v30  ;;  %v2679_v2 = vadd.f32 %v6839_v4, %v8702_v3  ;;  %v3321_v32 = vsel %vm2913_vm11, %v3320_v16, %v3316_v14  ;;  %v3444_v28 = vsel %vm2864_vm4, %v3443_v13, %v3439_v54  ;;  %v8709_v16 = vld [vmem:[#allocation52_spill] sm:$0xff]  ;;  %v2568_v39 = vpop.xlane.xlu1 %2567 }
 0x2a4   : > { %v3453_v19 = vrot.slane %v2704_v40, %v6956_v31  ;;  %v3390_v38 = vsel %vm2899_vm9, %v3389_v24, %v3385_v36  ;;  %v2693_v18 = vadd.f32 %v6839_v4, %v8703_v58  ;;  %v3448_v41 = vrot.slane %v2703_v10, %v6953_v34  ;;  %v8705_v31 = vld [vmem:[#allocation29_spill] sm:$0xff] }
 0x2a5   : > { %v2682_v23 = vadd.f32 %v6839_v4, %v8704_v1  ;;  %v3394_v11 = vrot.slane %v2692_v42, %v7028_v44  ;;  %v2706_v55 = vadd.f32 %v6839_v4, %v7647_v33  ;;  %v2681_v22 = vadd.f32 %v6839_v4, %v8705_v31 }
 0x2a6   : > { %vm8706_vm3 = vcmask 720512   ;;  %v3335_v12 = vrot.slane %v2680_v35, %v7208_v9  ;;  %v3449_v6 = vsel %vm2871_vm5, %v3448_v41, %v3444_v28  ;;  %v3330_v34 = vrot.slane %v2679_v2, %v7112_v15 }
 0x2a7   : > { %v2547_v53 = vpop.xlane.xlu0 %2546  ;;  %v3326_v59 = vsel %vm8706_vm3, %v3325_v52, %v3321_v32  ;;  %v3395_v49 = vsel %vm2906_vm10, %v3394_v11, %v3390_v38  ;;  %v3454_v25 = vsel %vm2878_vm6, %v3453_v19, %v3449_v6  ;;  %v3399_v33 = vrot.slane %v2693_v18, %v7101_v50  ;;  %vm8712_vm6 = vmmov %vm8706_vm3  ;;  %v8713_v38 = vld [vmem:[#allocation15_spill] sm:$0xff]  ;;  %v2577_v11 = vpop.xlane.xlu1 %2576 }
 0x2a8   : > { %v2705_v8 = vadd.f32 %v6839_v4, %v2547_v53  ;;  %v2707_v37 = vadd.f32 %v6839_v4, %v2553_v46  ;;  %vm8708_vm4 = vcmask 786112   ;;  %v2695_v40 = vadd.f32 %v6839_v4, %v8709_v16 }
 0x2a9   : > { %v3331_v0 = vsel %vm8708_vm4, %v3330_v34, %v3326_v59  ;;  %v2696_v53 = vadd.f32 %v6839_v4, %v7450_v20  ;;  %v3463_v10 = vrot.slane %v2706_v55, %v7001_v29  ;;  %v3340_v54 = vrot.slane %v2681_v22, %v7216_v7  ;;  %v8711_v29 = vld [vmem:[#allocation42_spill] sm:$0xff] }
 0x2aa   : > { %v3458_v27 = vrot.slane %v2705_v8, %v6959_v56  ;;  %v8707_v56 = vld [vmem:[#allocation46_spill] sm:$0xff]  ;;  %vm8710_vm5 = vcmask 851712   ;;  %v3400_v46 = vsel %vm2913_vm11, %v3399_v33, %v3395_v49  ;;  %v2697_v61 = vadd.f32 %v6839_v4, %v7499_v45 }
 0x2ab   : > { %v2562_v63 = vpop.xlane.xlu0 %2561  ;;  %v2694_v57 = vadd.f32 %v6839_v4, %v8707_v56  ;;  %v3336_v8 = vsel %vm8710_vm5, %v3335_v12, %v3331_v0  ;;  %v2683_v14 = vadd.f32 %v6839_v4, %v8711_v29  ;;  %v2711_v24 = vadd.f32 %v6839_v4, %v2565_v48 }
 0x2ac   : > { %v3459_v43 = vsel %vm2885_vm7, %v3458_v27, %v3454_v25  ;;  %v2710_v13 = vadd.f32 %v6839_v4, %v2562_v63  ;;  %v3468_v30 = vrot.slane %v2707_v37, %v7013_v17  ;;  %v3341_v45 = vsel %vm2941_vm15, %v3340_v54, %v3336_v8  ;;  %vm8714_vm7 = vmmov %vm8708_vm4 }
 0x2ad   : > { %v3404_v42 = vrot.slane %v2694_v57, %v7106_v51  ;;  %v3464_v36 = vsel %vm2892_vm8, %v3463_v10, %v3459_v43  ;;  %v3409_v3 = vrot.slane %v2695_v40, %v7112_v15  ;;  %v3414_v32 = vrot.slane %v2696_v53, %v7208_v9  ;;  %vm8715_vm8 = vmmov %vm8710_vm5 }
 0x2ae   : > { %v2712_v28 = vadd.f32 %v6839_v4, %v2568_v39  ;;  %v3469_v19 = vsel %vm2899_vm9, %v3468_v30, %v3464_v36  ;;  %v3345_v17 = vrot.slane %v2682_v23, %v7232_v60  ;;  %v2698_v58 = vadd.f32 %v6839_v4, %v8713_v38  ;;  %vm8716_vm9 = vmmov %vm8706_vm3 }
 0x2af   : > { %v2556_v62 = vpop.xlane.xlu0 %2555  ;;  %v3405_v2 = vsel %vm8712_vm6, %v3404_v42, %v3400_v46  ;;  %v3483_v18 = vrot.slane %v2710_v13, %v7106_v51  ;;  %v3488_v1 = vrot.slane %v2711_v24, %v7112_v15  ;;  %v3350_v31 = vrot.slane %v2683_v14, %v7235_v26  ;;  %vm8719_vm3 = vmmov %vm8710_vm5  ;;  %v8720_v42 = vld [vmem:[#allocation9_spill] sm:$0xff]  ;;  %v8721_v13 = vld [vmem:[#allocation11_spill] sm:$0xff] }
 0x2b0   : > { %v2708_v47 = vadd.f32 %v6839_v4, %v2556_v62  ;;  %v3410_v27 = vsel %vm8714_vm7, %v3409_v3, %v3405_v2  ;;  %v3346_v23 = vsel %vm2948_vm0, %v3345_v17, %v3341_v45  ;;  %v2699_v59 = vadd.f32 %v6839_v4, %v7460_v5  ;;  %v2716_v62 = vld [vmem:[%s557_s4] sm:$0xff]  ;;  %s4681_s4 = sshll.u32 %s7830_s24, 4  ;;  %s4682_s4 = int_to_ptr.vmem [resolvable:$true] %s4681_s4 }
 0x2b1   : > { %v3415_v22 = vsel %vm8715_vm8, %v3414_v32, %v3410_v27  ;;  %v3493_v15 = vrot.slane %v2712_v28, %v7208_v9  ;;  %v3424_v34 = vrot.slane %v2698_v58, %v7232_v60  ;;  %v2715_v56 = vadd.f32 %v6839_v4, %v2577_v11  ;;  %s5603_s0 = scalar_lea.vmem %s4682_s4, 128  ;;  %p5610_p1 = scmp.lt.s32.totalorder %s4682_s4, %s5608_s2 }
 0x2b2   : > { %v3473_v20 = vrot.slane %v2708_v47, %v7028_v44  ;;  %v3419_v44 = vrot.slane %v2697_v61, %v7216_v7  ;;  %v3351_v9 = vsel %vm2955_vm1, %v3350_v31, %v3346_v23  ;;  %v3429_v37 = vrot.slane %v2699_v59, %v7235_v26  ;;  %p5604_p12 = scmp.ne.s32.totalorder %s4682_s4, %s5603_s0  ;;  %p5611_p2 = scmp.lt.s32.totalorder %s5609_s5, %s5603_s0 }
 0x2b3   : > { %v2559_v52 = vpop.xlane.xlu0 %2558  ;;  %vm3522_vm5 = vcmask 1047559   ;;  %vm2717_vm6 = vcmp.eq.s32.totalorder %v2716_v62, 1  ;;  %v3605_v36 = vsub.s32 1, %v8720_v42  ;;  %v3739_v24 = vsub.s32 3, %v8720_v42 }
 0x2b4   : > { %v2709_v35 = vadd.f32 %v6839_v4, %v2559_v52  ;;  %v3474_v48 = vsel %vm2906_vm10, %v3473_v20, %v3469_v19  ;;  %v3420_v12 = vsel %vm2941_vm15, %v3419_v44, %v3415_v22  ;;  %vm8717_vm10 = vmmov %vm8708_vm4  ;;  %vm3520_vm4 = vcmask 1046534   ;;  %p5605_p13 = pnand %p5604_p12, %p5827_p5  ;;  %p5612_p3 = por %p5611_p2, %p5610_p1 }
 0x2b5   : > { %v3425_v33 = vsel %vm2948_vm0, %v3424_v34, %v3420_v12  ;;  %v3672_v52 = vsub.s32 2, %v8720_v42  ;;  %v3806_v30 = vsub.s32 4, %v8720_v42  ;;  %v3873_v3 = vsub.s32 5, %v8720_v42 }
 0x2b6   : > { %v3478_v63 = vrot.slane %v2709_v35, %v7101_v50  ;;  %v3940_v32 = vsub.s32 6, %v8720_v42  ;;  %v4007_v28 = vsub.s32 7, %v8720_v42  ;;  %p5606_p0 = pneg %p5605_p13 }
 0x2b7   : > { %v2571_v41 = vpop.xlane.xlu0 %2570 }
 0x2b8   : > { %v3479_v55 = vsel %vm2913_vm11, %v3478_v63, %v3474_v48  ;;  %v2713_v50 = vadd.f32 %v6839_v4, %v2571_v41  ;;  %vm3518_vm11 = vcmask 1045509   ;;  %p5613_p4 = pnand %p5612_p3, %p5606_p0 }
 0x2b9   : > { %v3484_v51 = vsel %vm8716_vm9, %v3483_v18, %v3479_v55  ;;  %v3519_v47 = vsel %vm3518_vm11, %v3351_v9, %v7669_v21 }
 0x2ba   : > { %v3489_v6 = vsel %vm8717_vm10, %v3488_v1, %v3484_v51  ;;  %v3498_v57 = vrot.slane %v2713_v50, %v7216_v7  ;;  %v3508_v7 = vrot.slane %v2715_v56, %v7235_v26 }
 0x2bb   : > { %v2574_v49 = vpop.xlane.xlu0 %2573  ;;  %v3494_v5 = vsel %vm8719_vm3, %v3493_v15, %v3489_v6 }
 0x2bc   : > { %v2714_v25 = vadd.f32 %v6839_v4, %v2574_v49  ;;  %v3499_v0 = vsel %vm2941_vm15, %v3498_v57, %v3494_v5  ;;  %v3430_v4 = vsel %vm2955_vm1, %v3429_v37, %v3425_v33  ;;  %v5207_v57 = vld [vmem:[%s8528_s10] sm:$0xff]  }
 0x2bd   : > { %v3521_v53 = vsel %vm3520_vm4, %v3430_v4, %v3519_v47  ;;  %5135 = vmatpush3.bf16.msra.mxu0 %v5207_v57  ;;  %v5477_v4 = vld [vmem:[%s5866_s17 + $0x80] sm:$0xff]  ;;  %v5486_v57 = vld [vmem:[%s5866_s17 + $0x208] sm:$0xff] }
 0x2be   : > { %v3503_v43 = vrot.slane %v2714_v25, %v7232_v60  ;;  %v8722_v25 = vmov 0.0  }
 0x2bf   : > { %5136 = vmatprep.subr.bf16.mxu0 %v8722_v25 }
 0x2c0   : > { %v3504_v16 = vsel %vm2948_vm0, %v3503_v43, %v3499_v0  ;;  %v5475_v43 = vld [vmem:[%s5866_s17 + $0x8] sm:$0xff]  ;;  %vm8723_vm0 = vcmask 261120  }
 0x2c1   : > { %v3509_v40 = vsel %vm2955_vm1, %v3508_v7, %v3504_v16  ;;  %v5476_v7 = vld [vmem:[%s5866_s17] sm:$0xff]  ;;  %vm8724_vm1 = vmmov %vm8723_vm0 }
 0x2c2   : > { %v3523_v60 = vsel %vm3522_vm5, %v3509_v40, %v3521_v53  ;;  %v5478_v40 = vld [vmem:[%s5866_s17 + $0x88] sm:$0xff]  ;;  %vm8725_vm15 = vmmov %vm8723_vm0 }
 0x2c3   : > { %v3525_v10 = vsel %vm2717_vm6, -1e+30, %v3523_v60  ;;  %vm8726_vm7 = vmmov %vm8723_vm0 }
 0x2c4   : > { %3526 = vmax.xlane.f32.xlu0 %v3525_v10  ;;  %vm8727_vm8 = vmmov %vm8723_vm0 }
 0x2c5   : > { %vm8728_vm9 = vmmov %vm8723_vm0 }
 0x2c6   : > { %vm8729_vm10 = vmmov %vm8723_vm0 }
 0x2c7   : > { %vm8730_vm3 = vmmov %vm8723_vm0 }
 0x2c8   : > { %vm8731_vm6 = vmmov %vm8723_vm0 }
 0x351   : > { %v3527_v21 = vpop.xlane.xlu0 %3526 }
 0x352   : > { %v3528_v54 = vsub.f32 %v3525_v10, %v3527_v21 }
 0x354   : > { %v3529_v26 = vmul.f32 1.442695, %v3528_v54 }
 0x356   : > { %5466 = vpow2.f32 %v3529_v26  ;;  %v5479_v26 = vld [vmem:[%s5866_s17 + $0x100] sm:$0xff] }
 0x360   : > { %v5467_v8 = vpop.eup %5466 }
 0x361   : > { %3531 = vadd.xlane.f32.xlu1 %v5467_v8 }
 0x3ee   : > { %v3532_v46 = vpop.xlane.xlu1 %3531 }
 0x3ef   : > { %5468 = vrcp.f32 %v3532_v46  ;;  %v5480_v46 = vld [vmem:[%s5866_s17 + $0x108] sm:$0xff] }
 0x3f9   : > { %v5469_v61 = vpop.eup %5468 }
 0x3fa   : > { %v3534_v39 = vmul.f32 %v5469_v61, %v5467_v8 }
 0x3fc   : > { %v7826_v20 = vrot.slane %v3534_v39, %v8721_v13  ;;  %3535 = vst [vmem:[%s7830_s24] sm:$0xff] %v3534_v39  ;;  %v7836_v29 = vrot.slane %v3534_v39, %v3605_v36  ;;  %v7840_v14 = vrot.slane %v3534_v39, %v3672_v52  ;;  %v7848_v35 = vrot.slane %v3534_v39, %v3739_v24  ;;  %v5481_v36 = vld [vmem:[%s5866_s17 + $0x10] sm:$0xff] }
 0x3fd   : > { %v7852_v45 = vrot.slane %v3534_v39, %v3806_v30  ;;  %v7861_v2 = vrot.slane %v3534_v39, %v3873_v3  ;;  %v7868_v44 = vrot.slane %v3534_v39, %v3940_v32  ;;  %v7877_v19 = vrot.slane %v3534_v39, %v4007_v28  ;;  %v5482_v52 = vld [vmem:[%s5866_s17 + $0x90] sm:$0xff]  ;;  %v5483_v32 = vld [vmem:[%s5866_s17 + $0x180] sm:$0xff] }
 0x3fe   : > { %3545 = vbcast.lane.b32.xlu1 %v7826_v20, 264  ;;  %3541 = vbcast.lane.b32.xlu0 %v7826_v20, 256 }
 0x402   : > { %3608 = vbcast.lane.b32.xlu1 %v7836_v29, 256  ;;  %3612 = vbcast.lane.b32.xlu0 %v7836_v29, 264 }
 0x406   : > { %3675 = vbcast.lane.b32.xlu1 %v7840_v14, 256  ;;  %3679 = vbcast.lane.b32.xlu0 %v7840_v14, 264 }
 0x40a   : > { %3549 = vbcast.lane.b32.xlu1 %v7826_v20, 272  ;;  %3616 = vbcast.lane.b32.xlu0 %v7836_v29, 272 }
 0x40e   : > { %3742 = vbcast.lane.b32.xlu1 %v7848_v35, 256  ;;  %3746 = vbcast.lane.b32.xlu0 %v7848_v35, 264 }
 0x412   : > { %3683 = vbcast.lane.b32.xlu1 %v7840_v14, 272  ;;  %3809 = vbcast.lane.b32.xlu0 %v7852_v45, 256 }
 0x416   : > { %3813 = vbcast.lane.b32.xlu1 %v7852_v45, 264  ;;  %3553 = vbcast.lane.b32.xlu0 %v7826_v20, 280 }
 0x41a   : > { %3620 = vbcast.lane.b32.xlu1 %v7836_v29, 280  ;;  %3750 = vbcast.lane.b32.xlu0 %v7848_v35, 272 }
 0x41e   : > { %3876 = vbcast.lane.b32.xlu1 %v7861_v2, 256  ;;  %3880 = vbcast.lane.b32.xlu0 %v7861_v2, 264 }
 0x422   : > { %3687 = vbcast.lane.b32.xlu1 %v7840_v14, 280  ;;  %3817 = vbcast.lane.b32.xlu0 %v7852_v45, 272 }
 0x426   : > { %3943 = vbcast.lane.b32.xlu1 %v7868_v44, 256  ;;  %3947 = vbcast.lane.b32.xlu0 %v7868_v44, 264 }
 0x42a   : > { %3557 = vbcast.lane.b32.xlu1 %v7826_v20, 288  ;;  %3624 = vbcast.lane.b32.xlu0 %v7836_v29, 288 }
 0x42e   : > { %3754 = vbcast.lane.b32.xlu1 %v7848_v35, 280  ;;  %3884 = vbcast.lane.b32.xlu0 %v7861_v2, 272 }
 0x432   : > { %4010 = vbcast.lane.b32.xlu1 %v7877_v19, 256  ;;  %4014 = vbcast.lane.b32.xlu0 %v7877_v19, 264 }
 0x436   : > { %3691 = vbcast.lane.b32.xlu1 %v7840_v14, 288  ;;  %3821 = vbcast.lane.b32.xlu0 %v7852_v45, 280 }
 0x43a   : > { %3951 = vbcast.lane.b32.xlu1 %v7868_v44, 272  ;;  %3561 = vbcast.lane.b32.xlu0 %v7826_v20, 296 }
 0x43e   : > { %3628 = vbcast.lane.b32.xlu1 %v7836_v29, 296  ;;  %3758 = vbcast.lane.b32.xlu0 %v7848_v35, 288 }
 0x442   : > { %3888 = vbcast.lane.b32.xlu1 %v7861_v2, 280  ;;  %4018 = vbcast.lane.b32.xlu0 %v7877_v19, 272 }
 0x446   : > { %3695 = vbcast.lane.b32.xlu1 %v7840_v14, 296  ;;  %3825 = vbcast.lane.b32.xlu0 %v7852_v45, 288 }
 0x44a   : > { %3955 = vbcast.lane.b32.xlu1 %v7868_v44, 280  ;;  %3565 = vbcast.lane.b32.xlu0 %v7826_v20, 304 }
 0x44e   : > { %3632 = vbcast.lane.b32.xlu1 %v7836_v29, 304  ;;  %3762 = vbcast.lane.b32.xlu0 %v7848_v35, 296 }
 0x452   : > { %3892 = vbcast.lane.b32.xlu1 %v7861_v2, 288  ;;  %4022 = vbcast.lane.b32.xlu0 %v7877_v19, 280 }
 0x456   : > { %3699 = vbcast.lane.b32.xlu1 %v7840_v14, 304  ;;  %3829 = vbcast.lane.b32.xlu0 %v7852_v45, 296 }
 0x45a   : > { %3959 = vbcast.lane.b32.xlu1 %v7868_v44, 288  ;;  %3569 = vbcast.lane.b32.xlu0 %v7826_v20, 312 }
 0x45e   : > { %3636 = vbcast.lane.b32.xlu1 %v7836_v29, 312  ;;  %3766 = vbcast.lane.b32.xlu0 %v7848_v35, 304 }
 0x462   : > { %3896 = vbcast.lane.b32.xlu1 %v7861_v2, 296  ;;  %4026 = vbcast.lane.b32.xlu0 %v7877_v19, 288 }
 0x466   : > { %3703 = vbcast.lane.b32.xlu1 %v7840_v14, 312  ;;  %3833 = vbcast.lane.b32.xlu0 %v7852_v45, 304 }
 0x46a   : > { %3963 = vbcast.lane.b32.xlu1 %v7868_v44, 296  ;;  %3573 = vbcast.lane.b32.xlu0 %v7826_v20, 320 }
 0x46e   : > { %3640 = vbcast.lane.b32.xlu1 %v7836_v29, 320  ;;  %3770 = vbcast.lane.b32.xlu0 %v7848_v35, 312 }
 0x470   : > { %v3546_v63 = vpop.permute.xlu1 %3545  ;;  %v3542_v17 = vpop.permute.xlu0 %3541 }
 0x471   : > { %v4073_v47 = vmul.f32 %v5475_v43, %v3546_v63  ;;  %v4072_v0 = vmul.f32 %v5476_v7, %v3542_v17  ;;  %v5484_v63 = vld [vmem:[%s5866_s17 + $0x188] sm:$0xff] }
 0x472   : > { %3900 = vbcast.lane.b32.xlu1 %v7861_v2, 304  ;;  %4030 = vbcast.lane.b32.xlu0 %v7877_v19, 296 }
 0x473   : > { %v4201_v21 = vsel %vm8723_vm0, %v4073_v47, 0.0  ;;  %v4200_v54 = vsel %vm8724_vm1, %v4072_v0, 0.0  ;;  %vm8732_vm1 = vmmov %vm8723_vm0 }
 0x474   : > { %v3609_v38 = vpop.permute.xlu1 %3608  ;;  %v3613_v58 = vpop.permute.xlu0 %3612 }
 0x475   : > { %v4088_v16 = vmul.f32 %v5477_v4, %v3609_v38  ;;  %v4089_v53 = vmul.f32 %v5478_v40, %v3613_v58  ;;  %v4202_v38 = vadd.f32 %v4201_v21, %v4200_v54 }
 0x476   : > { %3707 = vbcast.lane.b32.xlu1 %v7840_v14, 320  ;;  %3837 = vbcast.lane.b32.xlu0 %v7852_v45, 312 }
 0x477   : > { %v4237_v39 = vsel %vm8725_vm15, %v4088_v16, 0.0  ;;  %v4238_v42 = vsel %vm8726_vm7, %v4089_v53, 0.0  ;;  %v5487_v16 = vld [vmem:[%s5866_s17 + $0x18] sm:$0xff]  ;;  %vm8733_vm15 = vmmov %vm8723_vm0 }
 0x478   : > { %v7915_v18 = vpop.permute.xlu1 %3675  ;;  %v7917_v48 = vpop.permute.xlu0 %3679  ;;  %v4239_v58 = vadd.f32 %v4238_v42, %v4237_v39  ;;  %v5488_v53 = vld [vmem:[%s5866_s17 + $0x98] sm:$0xff]  ;;  %v5492_v39 = vld [vmem:[%s5866_s17 + $0x288] sm:$0xff]  ;;  %vm8734_vm7 = vmmov %vm8723_vm0 }
 0x479   : > { %v4104_v8 = vmul.f32 %v5479_v26, %v7915_v18  ;;  %v4105_v61 = vmul.f32 %v5480_v46, %v7917_v48  ;;  %v5493_v42 = vld [vmem:[%s5866_s17 + $0x118] sm:$0xff] }
 0x47a   : > { %3967 = vbcast.lane.b32.xlu1 %v7868_v44, 304  ;;  %3577 = vbcast.lane.b32.xlu0 %v7826_v20, 328 }
 0x47b   : > { %v4274_v18 = vsel %vm8727_vm8, %v4104_v8, 0.0  ;;  %v4275_v48 = vsel %vm8728_vm9, %v4105_v61, 0.0  ;;  %v5491_v8 = vld [vmem:[%s5866_s17 + $0x280] sm:$0xff]  ;;  %vm8735_vm8 = vmmov %vm8723_vm0 }
 0x47c   : > { %v7921_v41 = vpop.permute.xlu1 %3549  ;;  %v7923_v27 = vpop.permute.xlu0 %3616  ;;  %v4276_v61 = vadd.f32 %v4275_v48, %v4274_v18  ;;  %vm8736_vm9 = vmmov %vm8723_vm0  ;;  %v5496_v48 = vld [vmem:[%s5866_s17 + $0xa0] sm:$0xff] }
 0x47d   : > { %v4074_v13 = vmul.f32 %v5481_v36, %v7921_v41  ;;  %v4090_v24 = vmul.f32 %v5482_v52, %v7923_v27 }
 0x47e   : > { %3644 = vbcast.lane.b32.xlu1 %v7836_v29, 328  ;;  %3774 = vbcast.lane.b32.xlu0 %v7848_v35, 320 }
 0x47f   : > { %v4203_v41 = vsel %vm8729_vm10, %v4074_v13, 0.0  ;;  %v4240_v27 = vsel %vm8730_vm3, %v4090_v24, 0.0  ;;  %vm8737_vm10 = vmmov %vm8723_vm0 }
 0x480   : > { %v7927_v1 = vpop.permute.xlu1 %3742  ;;  %v7929_v11 = vpop.permute.xlu0 %3746  ;;  %v4241_v36 = vadd.f32 %v4240_v27, %v4239_v58  ;;  %vm8738_vm3 = vmmov %vm8723_vm0 }
 0x481   : > { %v4120_v28 = vmul.f32 %v5483_v32, %v7927_v1  ;;  %v4121_v17 = vmul.f32 %v5484_v63, %v7929_v11  ;;  %v5485_v1 = vld [vmem:[%s5866_s17 + $0x110] sm:$0xff]  ;;  %v5495_v63 = vld [vmem:[%s5866_s17 + $0x20] sm:$0xff] }
 0x482   : > { %3904 = vbcast.lane.b32.xlu1 %v7861_v2, 312  ;;  %4034 = vbcast.lane.b32.xlu0 %v7877_v19, 304 }
 0x483   : > { %v4311_v0 = vsel %vm8731_vm6, %v4120_v28, 0.0  ;;  %v4312_v4 = vsel %vm8723_vm0, %v4121_v17, 0.0  ;;  %vm8739_vm6 = vmmov %vm8723_vm0 }
 0x484   : > { %v7933_v55 = vpop.permute.xlu1 %3683  ;;  %v7935_v50 = vpop.permute.xlu0 %3809 }
 0x485   : > { %v4106_v11 = vmul.f32 %v5485_v1, %v7933_v55  ;;  %v5489_v55 = vld [vmem:[%s5866_s17 + $0x200] sm:$0xff]  ;;  %v5497_v1 = vld [vmem:[%s5866_s17 + $0x198] sm:$0xff] }
 0x486   : > { %3711 = vbcast.lane.b32.xlu1 %v7840_v14, 328  ;;  %3841 = vbcast.lane.b32.xlu0 %v7852_v45, 320  ;;  %v4136_v54 = vmul.f32 %v5489_v55, %v7935_v50 }
 0x487   : > { %v4277_v13 = vsel %vm8732_vm1, %v4106_v11, 0.0  ;;  %v5498_v11 = vld [vmem:[%s5866_s17 + $0x28] sm:$0xff]  ;;  %vm8740_vm1 = vmmov %vm8723_vm0 }
 0x488   : > { %v7939_v23 = vpop.permute.xlu1 %3813  ;;  %v7941_v31 = vpop.permute.xlu0 %3553 }
 0x489   : > { %v4137_v43 = vmul.f32 %v5486_v57, %v7939_v23  ;;  %v4075_v40 = vmul.f32 %v5487_v16, %v7941_v31  ;;  %v5490_v23 = vld [vmem:[%s5866_s17 + $0x190] sm:$0xff]  ;;  %v4204_v31 = vadd.f32 %v4203_v41, %v4202_v38  ;;  %v4348_v38 = vsel %vm8736_vm9, %v4136_v54, 0.0  ;;  %vm8744_vm9 = vmmov %vm8723_vm0 }
 0x48a   : > { %3971 = vbcast.lane.b32.xlu1 %v7868_v44, 312  ;;  %3581 = vbcast.lane.b32.xlu0 %v7826_v20, 336 }
 0x48b   : > { %v4205_v32 = vsel %vm8734_vm7, %v4075_v40, 0.0  ;;  %vm8742_vm7 = vmmov %vm8723_vm0 }
 0x48c   : > { %v7945_v22 = vpop.permute.xlu1 %3620  ;;  %v7947_v51 = vpop.permute.xlu0 %3750 }
 0x48d   : > { %v4091_v21 = vmul.f32 %v5488_v53, %v7945_v22  ;;  %v4122_v26 = vmul.f32 %v5490_v23, %v7947_v51  ;;  %v4313_v51 = vadd.f32 %v4312_v4, %v4311_v0  ;;  %v4206_v4 = vadd.f32 %v4205_v32, %v4204_v31 }
 0x48e   : > { %3648 = vbcast.lane.b32.xlu1 %v7836_v29, 336  ;;  %3778 = vbcast.lane.b32.xlu0 %v7848_v35, 328 }
 0x48f   : > { %v4242_v28 = vsel %vm8735_vm8, %v4091_v21, 0.0  ;;  %v4314_v58 = vsel %vm8737_vm10, %v4122_v26, 0.0  ;;  %v5500_v26 = vld [vmem:[%s5866_s17 + $0x300] sm:$0xff]  ;;  %vm8743_vm8 = vmmov %vm8723_vm0 }
 0x490   : > { %v7951_v59 = vpop.permute.xlu1 %3876  ;;  %v7953_v12 = vpop.permute.xlu0 %3880  ;;  %v4315_v53 = vadd.f32 %v4314_v58, %v4313_v51  ;;  %vm8745_vm10 = vmmov %vm8723_vm0 }
 0x491   : > { %v4152_v46 = vmul.f32 %v5491_v8, %v7951_v59  ;;  %v4153_v22 = vmul.f32 %v5492_v39, %v7953_v12  ;;  %v4349_v59 = vsel %vm8733_vm15, %v4137_v43, 0.0  ;;  %v5494_v12 = vld [vmem:[%s5866_s17 + $0x210] sm:$0xff]  ;;  %v4278_v43 = vadd.f32 %v4277_v13, %v4276_v61  ;;  %vm8741_vm15 = vmmov %vm8723_vm0  ;;  %v5501_v39 = vld [vmem:[%s5866_s17 + $0xa8] sm:$0xff] }
 0x492   : > { %3908 = vbcast.lane.b32.xlu1 %v7861_v2, 320  ;;  %4038 = vbcast.lane.b32.xlu0 %v7877_v19, 312  ;;  %v4350_v0 = vadd.f32 %v4349_v59, %v4348_v38  ;;  %v5504_v13 = vld [vmem:[%s5866_s17 + $0x380] sm:$0xff] }
 0x493   : > { %v4385_v18 = vsel %vm8738_vm3, %v4152_v46, 0.0  ;;  %v4386_v27 = vsel %vm8739_vm6, %v4153_v22, 0.0  ;;  %v5502_v22 = vld [vmem:[%s5866_s17 + $0x1a0] sm:$0xff]  ;;  %vm8746_vm3 = vmmov %vm8723_vm0 }
 0x494   : > { %v7957_v15 = vpop.permute.xlu1 %3687  ;;  %v7959_v6 = vpop.permute.xlu0 %3817  ;;  %vm8747_vm6 = vmmov %vm8723_vm0 }
 0x495   : > { %v4107_v50 = vmul.f32 %v5493_v42, %v7957_v15  ;;  %v4138_v15 = vmul.f32 %v5494_v12, %v7959_v6 }
 0x496   : > { %3715 = vbcast.lane.b32.xlu1 %v7840_v14, 336  ;;  %3845 = vbcast.lane.b32.xlu0 %v7852_v45, 328 }
 0x497   : > { %v4279_v6 = vsel %vm8723_vm0, %v4107_v50, 0.0  ;;  %v4351_v21 = vsel %vm8740_vm1, %v4138_v15, 0.0  ;;  %v5505_v15 = vld [vmem:[%s5866_s17 + $0x388] sm:$0xff]  ;;  %vm8748_vm1 = vmmov %vm8723_vm0 }
 0x498   : > { %v7963_v34 = vpop.permute.xlu1 %3943  ;;  %v7965_v56 = vpop.permute.xlu0 %3947  ;;  %v8086_v23 = vadd.f32 %v4279_v6, %v4278_v43  ;;  %v8099_v50 = vadd.f32 %v4351_v21, %v4350_v0 }
 0x499   : > { %v4168_v8 = vmul.f32 %v5500_v26, %v7963_v34  ;;  %v5503_v34 = vld [vmem:[%s5866_s17 + $0x308] sm:$0xff] }
 0x49a   : > { %3975 = vbcast.lane.b32.xlu1 %v7868_v44, 320  ;;  %3585 = vbcast.lane.b32.xlu0 %v7826_v20, 344 }
 0x49c   : > { %v7972_v49 = vpop.permute.xlu1 %3557  ;;  %v7974_v5 = vpop.permute.xlu0 %3624 }
 0x49d   : > { %v4076_v17 = vmul.f32 %v5495_v63, %v7972_v49  ;;  %v4092_v41 = vmul.f32 %v5496_v48, %v7974_v5  ;;  %v4243_v5 = vadd.f32 %v4242_v28, %v4241_v36  ;;  %v8103_v36 = vmul.f32 %v5503_v34, %v7965_v56  ;;  %v5506_v63 = vld [vmem:[%s5866_s17 + $0x30] sm:$0xff] }
 0x49e   : > { %3652 = vbcast.lane.b32.xlu1 %v7836_v29, 344  ;;  %3782 = vbcast.lane.b32.xlu0 %v7848_v35, 336  ;;  %v8114_v56 = vsel %vm8746_vm3, %v4168_v8, 0.0  ;;  %v5513_v8 = vld [vmem:[%s5866_s17 + $0x128] sm:$0xff]  ;;  %vm8754_vm3 = vmmov %vm8723_vm0 }
 0x49f   : > { %v4207_v55 = vsel %vm8741_vm15, %v4076_v17, 0.0  ;;  %v4244_v46 = vsel %vm8742_vm7, %v4092_v41, 0.0  ;;  %v5508_v41 = vld [vmem:[%s5866_s17 + $0x390] sm:$0xff]  ;;  %vm8749_vm15 = vmmov %vm8723_vm0 }
 0x4a0   : > { %v7979_v9 = vpop.permute.xlu1 %3754  ;;  %v7981_v62 = vpop.permute.xlu0 %3884  ;;  %v4208_v51 = vadd.f32 %v4207_v55, %v4206_v4  ;;  %v4245_v12 = vadd.f32 %v4244_v46, %v4243_v5  ;;  %vm8750_vm7 = vmmov %vm8723_vm0  ;;  %v5510_v5 = vld [vmem:[%s5866_s17 + $0x218] sm:$0xff]  ;;  %v5512_v55 = vld [vmem:[%s5866_s17 + $0x1a8] sm:$0xff] }
 0x4a1   : > { %v4123_v49 = vmul.f32 %v5497_v1, %v7979_v9  ;;  %v5499_v9 = vld [vmem:[%s5866_s17 + $0x290] sm:$0xff] }
 0x4a2   : > { %3912 = vbcast.lane.b32.xlu1 %v7861_v2, 328  ;;  %4042 = vbcast.lane.b32.xlu0 %v7877_v19, 320  ;;  %v4154_v54 = vmul.f32 %v5499_v9, %v7981_v62 }
 0x4a3   : > { %v4316_v61 = vsel %vm8743_vm8, %v4123_v49, 0.0  ;;  %vm8751_vm8 = vmmov %vm8723_vm0 }
 0x4a4   : > { %v7985_v33 = vpop.permute.xlu1 %4010  ;;  %v7987_v37 = vpop.permute.xlu0 %4014  ;;  %v4317_v38 = vadd.f32 %v4316_v61, %v4315_v53 }
 0x4a5   : > { %v4184_v59 = vmul.f32 %v5504_v13, %v7985_v33 }
 0x4a6   : > { %3719 = vbcast.lane.b32.xlu1 %v7840_v14, 344  ;;  %3849 = vbcast.lane.b32.xlu0 %v7852_v45, 336 }
 0x4a7   : > { %v4459_v49 = vsel %vm8749_vm15, %v4184_v59, 0.0  ;;  %v5515_v59 = vld [vmem:[%s5866_s17 + $0x310] sm:$0xff]  ;;  %vm8757_vm15 = vmmov %vm8723_vm0 }
 0x4a8   : > { %v7995_v60 = vpop.permute.xlu1 %3691  ;;  %v7997_v10 = vpop.permute.xlu0 %3821 }
 0x4a9   : > { %v4139_v53 = vmul.f32 %v5510_v5, %v7997_v10  ;;  %v5514_v10 = vld [vmem:[%s5866_s17 + $0x220] sm:$0xff] }
 0x4aa   : > { %3979 = vbcast.lane.b32.xlu1 %v7868_v44, 328  ;;  %3589 = vbcast.lane.b32.xlu0 %v7826_v20, 352 }
 0x4ab   : > { %v4353_v13 = vsel %vm8723_vm0, %v4139_v53, 0.0 }
 0x4ac   : > { %v8013_v30 = vpop.permute.xlu1 %3951  ;;  %v8015_v3 = vpop.permute.xlu0 %3561 }
 0x4ad   : > { %v4077_v57 = vmul.f32 %v5498_v11, %v8015_v3  ;;  %v4387_v3 = vadd.f32 %v4386_v27, %v4385_v18  ;;  %v5507_v18 = vld [vmem:[%s5866_s17 + $0x298] sm:$0xff] }
 0x4ae   : > { %3656 = vbcast.lane.b32.xlu1 %v7836_v29, 352  ;;  %3786 = vbcast.lane.b32.xlu0 %v7848_v35, 344 }
 0x4af   : > { %v4209_v31 = vsel %vm8744_vm9, %v4077_v57, 0.0  ;;  %vm8752_vm9 = vmmov %vm8723_vm0 }
 0x4b0   : > { %v8031_v47 = vpop.permute.xlu1 %3628  ;;  %v8033_v7 = vpop.permute.xlu0 %3758  ;;  %v4210_v58 = vadd.f32 %v4209_v31, %v4208_v51 }
 0x4b1   : > { %v4093_v62 = vmul.f32 %v5501_v39, %v8031_v47  ;;  %v4124_v42 = vmul.f32 %v5502_v22, %v8033_v7  ;;  %v4388_v47 = vsel %vm8745_vm10, %v4154_v54, 0.0  ;;  %v4185_v7 = vmul.f32 %v5505_v15, %v7987_v37  ;;  %vm8753_vm10 = vmmov %vm8723_vm0 }
 0x4b2   : > { %3916 = vbcast.lane.b32.xlu1 %v7861_v2, 336  ;;  %4046 = vbcast.lane.b32.xlu0 %v7877_v19, 328  ;;  %v4389_v1 = vadd.f32 %v4388_v47, %v4387_v3  ;;  %v5517_v47 = vld [vmem:[%s5866_s17 + $0x398] sm:$0xff] }
 0x4b3   : > { %v4246_v48 = vsel %vm8747_vm6, %v4093_v62, 0.0  ;;  %v4318_v37 = vsel %vm8723_vm0, %v4124_v42, 0.0  ;;  %v4460_v4 = vsel %vm8750_vm7, %v4185_v7, 0.0  ;;  %vm8755_vm6 = vmmov %vm8723_vm0 }
 0x4b4   : > { %v8055_v52 = vpop.permute.xlu1 %3888  ;;  %v8057_v24 = vpop.permute.xlu0 %4018  ;;  %v4247_v54 = vadd.f32 %v4246_v48, %v4245_v12  ;;  %v4319_v3 = vadd.f32 %v4318_v37, %v4317_v38  ;;  %v4461_v62 = vadd.f32 %v4460_v4, %v4459_v49  ;;  %vm8758_vm7 = vmmov %vm8723_vm0  ;;  %v4354_v37 = vadd.f32 %v4353_v13, %v8099_v50 }
 0x4b5   : > { %v4155_v33 = vmul.f32 %v5507_v18, %v8055_v52  ;;  %v4186_v27 = vmul.f32 %v5508_v41, %v8057_v24  ;;  %v5509_v52 = vld [vmem:[%s5866_s17 + $0x120] sm:$0xff]  ;;  %v5511_v24 = vld [vmem:[%s5866_s17 + $0xb0] sm:$0xff] }
 0x4b6   : > { %3723 = vbcast.lane.b32.xlu1 %v7840_v14, 352  ;;  %3853 = vbcast.lane.b32.xlu0 %v7852_v45, 344  ;;  %v4108_v11 = vmul.f32 %v5509_v52, %v7995_v60  ;;  %v5519_v52 = vld [vmem:[%s5866_s17 + $0x130] sm:$0xff] }
 0x4b7   : > { %v4390_v26 = vsel %vm8751_vm8, %v4155_v33, 0.0  ;;  %v4462_v46 = vsel %vm8752_vm9, %v4186_v27, 0.0  ;;  %vm8759_vm8 = vmmov %vm8723_vm0 }
 0x4b8   : > { %v8078_v16 = vpop.permute.xlu1 %3695  ;;  %v8080_v40 = vpop.permute.xlu0 %3825  ;;  %v4281_v22 = vsel %vm8755_vm6, %v4108_v11, 0.0  ;;  %vm8760_vm9 = vmmov %vm8723_vm0 }
 0x4b9   : > { %v4109_v60 = vmul.f32 %v5513_v8, %v8078_v16  ;;  %v4140_v61 = vmul.f32 %v5514_v10, %v8080_v40  ;;  %v5516_v40 = vld [vmem:[%s5866_s17 + $0x2a0] sm:$0xff]  ;;  %vm8763_vm6 = vmmov %vm8723_vm0 }
 0x4ba   : > { %3983 = vbcast.lane.b32.xlu1 %v7868_v44, 336  ;;  %3593 = vbcast.lane.b32.xlu0 %v7826_v20, 360 }
 0x4bb   : > { %v4283_v38 = vsel %vm8757_vm15, %v4109_v60, 0.0  ;;  %vm8765_vm15 = vmmov %vm8723_vm0 }
 0x4bc   : > { %v8107_v32 = vpop.permute.xlu1 %3955  ;;  %v3566_v28 = vpop.permute.xlu0 %3565 }
 0x4bd   : > { %v4078_v17 = vmul.f32 %v5506_v63, %v3566_v28  ;;  %v4170_v28 = vmul.f32 %v5515_v59, %v8013_v30  ;;  %v4391_v63 = vadd.f32 %v4390_v26, %v4389_v1  ;;  %v5518_v30 = vld [vmem:[%s5866_s17 + $0x318] sm:$0xff] }
 0x4be   : > { %3660 = vbcast.lane.b32.xlu1 %v7836_v29, 360  ;;  %3790 = vbcast.lane.b32.xlu0 %v7848_v35, 352  ;;  %v4171_v18 = vmul.f32 %v5518_v30, %v8107_v32  ;;  %v5522_v26 = vld [vmem:[%s5866_s17 + $0x38] sm:$0xff] }
 0x4bf   : > { %v4211_v6 = vsel %vm8748_vm1, %v4078_v17, 0.0  ;;  %vm8756_vm1 = vmmov %vm8723_vm0  ;;  %v4463_v17 = vadd.f32 %v4462_v46, %v4461_v62 }
 0x4c0   : > { %v8128_v57 = vadd.f32 %v4211_v6, %v4210_v58  ;;  %v3633_v43 = vpop.permute.xlu1 %3632  ;;  %v3763_v0 = vpop.permute.xlu0 %3762  ;;  %v4423_v7 = vsel %vm8756_vm1, %v8103_v36, 0.0  ;;  %v4355_v58 = vsel %vm8758_vm7, %v4140_v61, 0.0  ;;  %v4282_v36 = vadd.f32 %v4281_v22, %v8086_v23  ;;  %vm8764_vm1 = vmmov %vm8723_vm0  ;;  %v5523_v22 = vld [vmem:[%s5866_s17 + $0xb8] sm:$0xff] }
 0x4c1   : > { %v4094_v21 = vmul.f32 %v5511_v24, %v3633_v43  ;;  %v4125_v9 = vmul.f32 %v5512_v55, %v3763_v0  ;;  %v5520_v43 = vld [vmem:[%s5866_s17 + $0x228] sm:$0xff]  ;;  %v4424_v32 = vadd.f32 %v4423_v7, %v8114_v56  ;;  %v4356_v5 = vadd.f32 %v4355_v58, %v4354_v37  ;;  %v5521_v56 = vld [vmem:[%s5866_s17 + $0x320] sm:$0xff]  ;;  %vm8766_vm7 = vmmov %vm8723_vm0 }
 0x4c2   : > { %3920 = vbcast.lane.b32.xlu1 %v7861_v2, 344  ;;  %4050 = vbcast.lane.b32.xlu0 %v7877_v19, 336  ;;  %v4284_v4 = vadd.f32 %v4283_v38, %v4282_v36  ;;  %v5528_v36 = vld [vmem:[%s5866_s17 + $0x230] sm:$0xff] }
 0x4c3   : > { %v4248_v31 = vsel %vm8753_vm10, %v4094_v21, 0.0  ;;  %v4320_v39 = vsel %vm8754_vm3, %v4125_v9, 0.0  ;;  %vm8761_vm10 = vmmov %vm8723_vm0 }
 0x4c4   : > { %v8146_v42 = vadd.f32 %v4248_v31, %v4247_v54  ;;  %v8148_v16 = vadd.f32 %v4320_v39, %v4319_v3  ;;  %v3893_v34 = vpop.permute.xlu1 %3892  ;;  %v4023_v51 = vpop.permute.xlu0 %4022  ;;  %v4425_v49 = vsel %vm8761_vm10, %v4170_v28, 0.0  ;;  %vm8762_vm3 = vmmov %vm8723_vm0 }
 0x4c5   : > { %v4156_v12 = vmul.f32 %v5516_v40, %v3893_v34  ;;  %v4187_v15 = vmul.f32 %v5517_v47, %v4023_v51  ;;  %v4427_v23 = vsel %vm8762_vm3, %v4171_v18, 0.0  ;;  %v4426_v24 = vadd.f32 %v4425_v49, %v4424_v32  ;;  %v5524_v51 = vld [vmem:[%s5866_s17 + $0x1b0] sm:$0xff]  ;;  %vm8769_vm10 = vmmov %vm8723_vm0 }
 0x4c6   : > { %3727 = vbcast.lane.b32.xlu1 %v7840_v14, 360  ;;  %3857 = vbcast.lane.b32.xlu0 %v7852_v45, 352  ;;  %vm8770_vm3 = vmmov %vm8723_vm0 }
 0x4c7   : > { %v4392_v33 = vsel %vm8759_vm8, %v4156_v12, 0.0  ;;  %v4464_v48 = vsel %vm8760_vm9, %v4187_v15, 0.0  ;;  %v4428_v60 = vadd.f32 %v4427_v23, %v4426_v24  ;;  %vm8767_vm8 = vmmov %vm8723_vm0  ;;  %v5525_v15 = vld [vmem:[%s5866_s17 + $0x2a8] sm:$0xff] }
 0x4c8   : > { %v4393_v41 = vadd.f32 %v4392_v33, %v4391_v63  ;;  %v4465_v27 = vadd.f32 %v4464_v48, %v4463_v17  ;;  %v3700_v6 = vpop.permute.xlu1 %3699  ;;  %v3830_v1 = vpop.permute.xlu0 %3829  ;;  %v5526_v63 = vld [vmem:[%s5866_s17 + $0x3a0] sm:$0xff]  ;;  %vm8768_vm9 = vmmov %vm8723_vm0  ;;  %v5527_v33 = vld [vmem:[%s5866_s17 + $0x138] sm:$0xff] }
 0x4c9   : > { %v4110_v11 = vmul.f32 %v5519_v52, %v3700_v6  ;;  %v4141_v0 = vmul.f32 %v5520_v43, %v3830_v1  ;;  %v5208_v24 = vld [vmem:[%s8528_s10 + $0x8] sm:$0xff]  }
 0x4ca   : > { %3987 = vbcast.lane.b32.xlu1 %v7868_v44, 344  ;;  %3597 = vbcast.lane.b32.xlu0 %v7826_v20, 368 }
 0x4cb   : > { %v4285_v50 = vsel %vm8763_vm6, %v4110_v11, 0.0  ;;  %v4357_v53 = vsel %vm8723_vm0, %v4141_v0, 0.0  ;;  %vm8771_vm6 = vmmov %vm8723_vm0  ;;  %v5529_v11 = vld [vmem:[%s5866_s17 + $0x328] sm:$0xff]  ;;  %v5530_v0 = vld [vmem:[%s5866_s17 + $0x40] sm:$0xff]  ;;  %5137 = vmatpush3.bf16.msra.mxu0 %v5208_v24 }
 0x4cc   : > { %v4286_v21 = vadd.f32 %v4285_v50, %v4284_v4  ;;  %v4358_v55 = vadd.f32 %v4357_v53, %v4356_v5  ;;  %v3960_v9 = vpop.permute.xlu1 %3959  ;;  %v3570_v54 = vpop.permute.xlu0 %3569  ;;  %5142 = vmatprep.subr.bf16.mxu0 %v8722_v25 }
 0x4cd   : > { %v4172_v3 = vmul.f32 %v5521_v56, %v3960_v9  ;;  %v4079_v8 = vmul.f32 %v5522_v26, %v3570_v54  ;;  %v5532_v9 = vld [vmem:[%s5866_s17 + $0x1b8] sm:$0xff] }
 0x4ce   : > { %3664 = vbcast.lane.b32.xlu1 %v7836_v29, 368  ;;  %3794 = vbcast.lane.b32.xlu0 %v7848_v35, 360 }
 0x4cf   : > { %v4429_v46 = vsel %vm8764_vm1, %v4172_v3, 0.0  ;;  %v4213_v10 = vsel %vm8765_vm15, %v4079_v8, 0.0  ;;  %vm8772_vm1 = vmmov %vm8723_vm0 }
 0x4d0   : > { %v4430_v61 = vadd.f32 %v4429_v46, %v4428_v60  ;;  %v4214_v31 = vadd.f32 %v4213_v10, %v8128_v57  ;;  %v3637_v39 = vpop.permute.xlu1 %3636  ;;  %v3767_v62 = vpop.permute.xlu0 %3766  ;;  %vm8773_vm15 = vmmov %vm8723_vm0  ;;  %v5533_v46 = vld [vmem:[%s5866_s17 + $0x2b0] sm:$0xff] }
 0x4d1   : > { %v4095_v34 = vmul.f32 %v5523_v22, %v3637_v39  ;;  %v4126_v13 = vmul.f32 %v5524_v51, %v3767_v62 }
 0x4d2   : > { %3924 = vbcast.lane.b32.xlu1 %v7861_v2, 352  ;;  %4054 = vbcast.lane.b32.xlu0 %v7877_v19, 344 }
 0x4d3   : > { %v4250_v59 = vsel %vm8766_vm7, %v4095_v34, 0.0  ;;  %v4322_v28 = vsel %vm8767_vm8, %v4126_v13, 0.0  ;;  %vm8774_vm7 = vmmov %vm8723_vm0 }
 0x4d4   : > { %v4251_v40 = vadd.f32 %v4250_v59, %v8146_v42  ;;  %v4323_v57 = vadd.f32 %v4322_v28, %v8148_v16  ;;  %v3897_v12 = vpop.permute.xlu1 %3896  ;;  %v4027_v47 = vpop.permute.xlu0 %4026  ;;  %vm8775_vm8 = vmmov %vm8723_vm0  ;;  %v5535_v59 = vld [vmem:[%s5866_s17 + $0x140] sm:$0xff] }
 0x4d5   : > { %v4157_v7 = vmul.f32 %v5525_v15, %v3897_v12  ;;  %v4188_v17 = vmul.f32 %v5526_v63, %v4027_v47 }
 0x4d6   : > { %3731 = vbcast.lane.b32.xlu1 %v7840_v14, 368  ;;  %3861 = vbcast.lane.b32.xlu0 %v7852_v45, 360 }
 0x4d7   : > { %v4394_v38 = vsel %vm8768_vm9, %v4157_v7, 0.0  ;;  %v4466_v58 = vsel %vm8769_vm10, %v4188_v17, 0.0  ;;  %vm8776_vm9 = vmmov %vm8723_vm0  ;;  %v5537_v17 = vld [vmem:[%s5866_s17 + $0x330] sm:$0xff] }
 0x4d8   : > { %v4395_v30 = vadd.f32 %v4394_v38, %v4393_v41  ;;  %v4467_v42 = vadd.f32 %v4466_v58, %v4465_v27  ;;  %v3704_v18 = vpop.permute.xlu1 %3703  ;;  %v3834_v16 = vpop.permute.xlu0 %3833  ;;  %vm8777_vm10 = vmmov %vm8723_vm0  ;;  %v5538_v58 = vld [vmem:[%s5866_s17 + $0x48] sm:$0xff] }
 0x4d9   : > { %v4111_v48 = vmul.f32 %v5527_v33, %v3704_v18  ;;  %v4142_v37 = vmul.f32 %v5528_v36, %v3834_v16  ;;  %v5539_v36 = vld [vmem:[%s5866_s17 + $0xc8] sm:$0xff] }
 0x4da   : > { %3991 = vbcast.lane.b32.xlu1 %v7868_v44, 352  ;;  %3601 = vbcast.lane.b32.xlu0 %v7826_v20, 376 }
 0x4db   : > { %v4287_v6 = vsel %vm8770_vm3, %v4111_v48, 0.0  ;;  %v4359_v1 = vsel %vm8771_vm6, %v4142_v37, 0.0  ;;  %vm8778_vm3 = vmmov %vm8723_vm0 }
 0x4dc   : > { %v4288_v49 = vadd.f32 %v4287_v6, %v4286_v21  ;;  %v4360_v52 = vadd.f32 %v4359_v1, %v4358_v55  ;;  %v3964_v41 = vpop.permute.xlu1 %3963  ;;  %v3574_v27 = vpop.permute.xlu0 %3573  ;;  %v5531_v21 = vld [vmem:[%s5866_s17 + $0xc0] sm:$0xff]  ;;  %vm8779_vm6 = vmmov %vm8723_vm0 }
 0x4dd   : > { %v4173_v43 = vmul.f32 %v5529_v11, %v3964_v41  ;;  %v4080_v32 = vmul.f32 %v5530_v0, %v3574_v27  ;;  %v5540_v6 = vld [vmem:[%s5866_s17 + $0x1c0] sm:$0xff]  ;;  %v5541_v0 = vld [vmem:[%s5866_s17 + $0x2b8] sm:$0xff] }
 0x4de   : > { %3668 = vbcast.lane.b32.xlu1 %v7836_v29, 376  ;;  %3798 = vbcast.lane.b32.xlu0 %v7848_v35, 368 }
 0x4df   : > { %v4431_v20 = vsel %vm8723_vm0, %v4173_v43, 0.0  ;;  %v4215_v4 = vsel %vm8772_vm1, %v4080_v32, 0.0  ;;  %vm8780_vm1 = vmmov %vm8723_vm0 }
 0x4e0   : > { %v4432_v5 = vadd.f32 %v4431_v20, %v4430_v61  ;;  %v4216_v23 = vadd.f32 %v4215_v4, %v4214_v31  ;;  %v3641_v50 = vpop.permute.xlu1 %3640  ;;  %v3771_v53 = vpop.permute.xlu0 %3770  ;;  %v5534_v61 = vld [vmem:[%s5866_s17 + $0x3a8] sm:$0xff]  ;;  %v5542_v20 = vld [vmem:[%s5866_s17 + $0x3b0] sm:$0xff] }
 0x4e1   : > { %v4096_v55 = vmul.f32 %v5531_v21, %v3641_v50  ;;  %v4127_v29 = vmul.f32 %v5532_v9, %v3771_v53  ;;  %v5543_v21 = vld [vmem:[%s5866_s17 + $0x148] sm:$0xff]  ;;  %v5544_v9 = vld [vmem:[%s5866_s17 + $0x240] sm:$0xff] }
 0x4e2   : > { %3928 = vbcast.lane.b32.xlu1 %v7861_v2, 360  ;;  %4058 = vbcast.lane.b32.xlu0 %v7877_v19, 352 }
 0x4e3   : > { %v4252_v54 = vsel %vm8773_vm15, %v4096_v55, 0.0  ;;  %v4324_v56 = vsel %vm8774_vm7, %v4127_v29, 0.0  ;;  %vm8781_vm15 = vmmov %vm8723_vm0 }
 0x4e4   : > { %v4253_v3 = vadd.f32 %v4252_v54, %v4251_v40  ;;  %v4325_v26 = vadd.f32 %v4324_v56, %v4323_v57  ;;  %v3901_v8 = vpop.permute.xlu1 %3900  ;;  %v4031_v60 = vpop.permute.xlu0 %4030  ;;  %v5536_v40 = vld [vmem:[%s5866_s17 + $0x238] sm:$0xff]  ;;  %vm8782_vm7 = vmmov %vm8723_vm0 }
 0x4e5   : > { %v4158_v10 = vmul.f32 %v5533_v46, %v3901_v8  ;;  %v4189_v31 = vmul.f32 %v5534_v61, %v4031_v60  ;;  %v5545_v60 = vld [vmem:[%s5866_s17 + $0x338] sm:$0xff] }
 0x4e6   : > { %3735 = vbcast.lane.b32.xlu1 %v7840_v14, 376  ;;  %3865 = vbcast.lane.b32.xlu0 %v7852_v45, 368 }
 0x4e7   : > { %v4396_v39 = vsel %vm8775_vm8, %v4158_v10, 0.0  ;;  %v4468_v62 = vsel %vm8776_vm9, %v4189_v31, 0.0  ;;  %vm8783_vm8 = vmmov %vm8723_vm0  ;;  %v5546_v10 = vld [vmem:[%s5866_s17 + $0x50] sm:$0xff] }
 0x4e8   : > { %v4397_v22 = vadd.f32 %v4396_v39, %v4395_v30  ;;  %v4469_v34 = vadd.f32 %v4468_v62, %v4467_v42  ;;  %v3708_v51 = vpop.permute.xlu1 %3707  ;;  %v3838_v13 = vpop.permute.xlu0 %3837  ;;  %vm8784_vm9 = vmmov %vm8723_vm0  ;;  %v8786_v31 = vld [vmem:[#allocation10_spill] sm:$0xff] }
 0x4e9   : > { %v4112_v28 = vmul.f32 %v5535_v59, %v3708_v51  ;;  %v4143_v57 = vmul.f32 %v5536_v40, %v3838_v13  ;;  %v5547_v51 = vld [vmem:[%s5866_s17 + $0xd0] sm:$0xff]  ;;  %v5548_v59 = vld [vmem:[%s5866_s17 + $0x1c8] sm:$0xff] }
 0x4ea   : > { %3995 = vbcast.lane.b32.xlu1 %v7868_v44, 360  ;;  %3802 = vbcast.lane.b32.xlu0 %v7848_v35, 376 }
 0x4eb   : > { %v4289_v14 = vsel %vm8777_vm10, %v4112_v28, 0.0  ;;  %v4361_v12 = vsel %vm8778_vm3, %v4143_v57, 0.0  ;;  %vm8785_vm10 = vmmov %vm8723_vm0 }
 0x4ec   : > { %v4290_v47 = vadd.f32 %v4289_v14, %v4288_v49  ;;  %v4362_v15 = vadd.f32 %v4361_v12, %v4360_v52  ;;  %v3968_v7 = vpop.permute.xlu1 %3967  ;;  %v3578_v63 = vpop.permute.xlu0 %3577  ;;  %vm8787_vm3 = vmmov %vm8723_vm0 }
 0x4ed   : > { %v4174_v38 = vmul.f32 %v5537_v17, %v3968_v7  ;;  %v4081_v30 = vmul.f32 %v5538_v58, %v3578_v63  ;;  %v5549_v7 = vld [vmem:[%s5866_s17 + $0x2c0] sm:$0xff]  ;;  %v5550_v17 = vld [vmem:[%s5866_s17 + $0x3b8] sm:$0xff] }
 0x4ee   : > { %3932 = vbcast.lane.b32.xlu1 %v7861_v2, 368  ;;  %4062 = vbcast.lane.b32.xlu0 %v7877_v19, 360 }
 0x4ef   : > { %v4433_v35 = vsel %vm8779_vm6, %v4174_v38, 0.0  ;;  %v4217_v42 = vsel %vm8723_vm0, %v4081_v30, 0.0  ;;  %vm8788_vm6 = vmmov %vm8723_vm0 }
 0x4f0   : > { %v4434_v18 = vadd.f32 %v4433_v35, %v4432_v5  ;;  %v4218_v16 = vadd.f32 %v4217_v42, %v4216_v23  ;;  %v3645_v33 = vpop.permute.xlu1 %3644  ;;  %v3775_v48 = vpop.permute.xlu0 %3774 }
 0x4f1   : > { %v4097_v37 = vmul.f32 %v5539_v36, %v3645_v33  ;;  %v4128_v1 = vmul.f32 %v5540_v6, %v3775_v48  ;;  %v5551_v33 = vld [vmem:[%s5866_s17 + $0x150] sm:$0xff]  ;;  %v5552_v36 = vld [vmem:[%s5866_s17 + $0x248] sm:$0xff] }
 0x4f2   : > { %3869 = vbcast.lane.b32.xlu1 %v7852_v45, 376  ;;  %3999 = vbcast.lane.b32.xlu0 %v7868_v44, 368 }
 0x4f3   : > { %v4254_v49 = vsel %vm8780_vm1, %v4097_v37, 0.0  ;;  %v4326_v52 = vsel %vm8781_vm15, %v4128_v1, 0.0  ;;  %vm8789_vm1 = vmmov %vm8723_vm0 }
 0x4f4   : > { %v4255_v41 = vadd.f32 %v4254_v49, %v4253_v3  ;;  %v4327_v27 = vadd.f32 %v4326_v52, %v4325_v26  ;;  %v3905_v11 = vpop.permute.xlu1 %3904  ;;  %v4035_v43 = vpop.permute.xlu0 %4034  ;;  %vm8790_vm15 = vmmov %vm8723_vm0 }
 0x4f5   : > { %v4159_v32 = vmul.f32 %v5541_v0, %v3905_v11  ;;  %v4190_v4 = vmul.f32 %v5542_v20, %v4035_v43  ;;  %v5553_v11 = vld [vmem:[%s5866_s17 + $0x340] sm:$0xff]  ;;  %v5554_v0 = vld [vmem:[%s5866_s17 + $0x58] sm:$0xff] }
 0x4f6   : > { %3936 = vbcast.lane.b32.xlu1 %v7861_v2, 376  ;;  %4066 = vbcast.lane.b32.xlu0 %v7877_v19, 368 }
 0x4f7   : > { %v4398_v45 = vsel %vm8782_vm7, %v4159_v32, 0.0  ;;  %v4470_v5 = vsel %vm8783_vm8, %v4190_v4, 0.0  ;;  %vm8791_vm7 = vmmov %vm8723_vm0 }
 0x4f8   : > { %v4399_v23 = vadd.f32 %v4398_v45, %v4397_v22  ;;  %v4471_v50 = vadd.f32 %v4470_v5, %v4469_v34  ;;  %v3712_v53 = vpop.permute.xlu1 %3711  ;;  %v3842_v24 = vpop.permute.xlu0 %3841  ;;  %vm8792_vm8 = vmmov %vm8723_vm0 }
 0x4f9   : > { %v4113_v55 = vmul.f32 %v5543_v21, %v3712_v53  ;;  %v4144_v29 = vmul.f32 %v5544_v9, %v3842_v24  ;;  %v5555_v53 = vld [vmem:[%s5866_s17 + $0xd8] sm:$0xff]  ;;  %v5556_v21 = vld [vmem:[%s5866_s17 + $0x1d0] sm:$0xff] }
 0x4fa   : > { %4003 = vbcast.lane.b32.xlu1 %v7868_v44, 376  ;;  %4070 = vbcast.lane.b32.xlu0 %v7877_v19, 376 }
 0x4fb   : > { %v4291_v2 = vsel %vm8784_vm9, %v4113_v55, 0.0  ;;  %v4363_v54 = vsel %vm8785_vm10, %v4144_v29, 0.0  ;;  %vm8793_vm9 = vmmov %vm8723_vm0 }
 0x4fc   : > { %v4292_v56 = vadd.f32 %v4291_v2, %v4290_v47  ;;  %v4364_v3 = vadd.f32 %v4363_v54, %v4362_v15  ;;  %v3972_v26 = vpop.permute.xlu1 %3971  ;;  %v3582_v8 = vpop.permute.xlu0 %3581  ;;  %vm8794_vm10 = vmmov %vm8723_vm0 }
 0x4fd   : > { %v4175_v46 = vmul.f32 %v5545_v60, %v3972_v26  ;;  %v4082_v61 = vmul.f32 %v5546_v10, %v3582_v8  ;;  %v5557_v26 = vld [vmem:[%s5866_s17 + $0x2c8] sm:$0xff]  ;;  %v5558_v60 = vld [vmem:[%s5866_s17 + $0x3c0] sm:$0xff] }
 0x4fe   : > { %4594 = vrot.lane.b32.xlu1 %v8786_v31, %s5703_s26  ;;  %s8553_s26 = sshll.u32 %s5810_s9, 7 }
 0x4ff   : > { %v4435_v44 = vsel %vm8787_vm3, %v4175_v46, 0.0  ;;  %v4219_v19 = vsel %vm8788_vm6, %v4082_v61, 0.0  ;;  %vm8795_vm3 = vmmov %vm8723_vm0  ;;  %s8440_s16 = scalar_lea.hbm %s8532_s14, %s8553_s26 }
 0x500   : > { %v4436_v39 = vadd.f32 %v4435_v44, %v4434_v18  ;;  %v4220_v62 = vadd.f32 %v4219_v19, %v4218_v16  ;;  %v3649_v22 = vpop.permute.xlu1 %3648  ;;  %v3779_v34 = vpop.permute.xlu0 %3778  ;;  %vm8796_vm6 = vmmov %vm8723_vm0 }
 0x501   : > { %v4098_v13 = vmul.f32 %v5547_v51, %v3649_v22  ;;  %v4129_v28 = vmul.f32 %v5548_v59, %v3779_v34  ;;  %v5560_v34 = vld [vmem:[%s5866_s17 + $0x250] sm:$0xff] }
 0x503   : > { %v4256_v40 = vsel %vm8723_vm0, %v4098_v13, 0.0  ;;  %v4328_v57 = vsel %vm8789_vm1, %v4129_v28, 0.0  ;;  %vm8797_vm1 = vmmov %vm8723_vm0 }
 0x504   : > { %v4257_v14 = vadd.f32 %v4256_v40, %v4255_v41  ;;  %v4329_v12 = vadd.f32 %v4328_v57, %v4327_v27  ;;  %v3909_v47 = vpop.permute.xlu1 %3908  ;;  %v4039_v15 = vpop.permute.xlu0 %4038 }
 0x505   : > { %v4160_v63 = vmul.f32 %v5549_v7, %v3909_v47  ;;  %v4191_v38 = vmul.f32 %v5550_v17, %v4039_v15  ;;  %v5562_v15 = vld [vmem:[%s5866_s17 + $0x60] sm:$0xff] }
 0x507   : > { %v4400_v58 = vsel %vm8790_vm15, %v4160_v63, 0.0  ;;  %v4472_v30 = vsel %vm8791_vm7, %v4191_v38, 0.0  ;;  %vm8798_vm15 = vmmov %vm8723_vm0 }
 0x508   : > { %v4401_v35 = vadd.f32 %v4400_v58, %v4399_v23  ;;  %v4473_v42 = vadd.f32 %v4472_v30, %v4471_v50  ;;  %v3716_v18 = vpop.permute.xlu1 %3715  ;;  %v3846_v16 = vpop.permute.xlu0 %3845  ;;  %vm8799_vm7 = vmmov %vm8723_vm0 }
 0x509   : > { %v4114_v48 = vmul.f32 %v5551_v33, %v3716_v18  ;;  %v4145_v37 = vmul.f32 %v5552_v36, %v3846_v16  ;;  %v5564_v16 = vld [vmem:[%s5866_s17 + $0x1d8] sm:$0xff] }
 0x50b   : > { %v4293_v6 = vsel %vm8792_vm8, %v4114_v48, 0.0  ;;  %v4365_v1 = vsel %vm8793_vm9, %v4145_v37, 0.0  ;;  %vm8800_vm8 = vmmov %vm8723_vm0 }
 0x50c   : > { %v4294_v49 = vadd.f32 %v4293_v6, %v4292_v56  ;;  %v4366_v52 = vadd.f32 %v4365_v1, %v4364_v3  ;;  %v3976_v41 = vpop.permute.xlu1 %3975  ;;  %v3586_v27 = vpop.permute.xlu0 %3585  ;;  %vm8801_vm9 = vmmov %vm8723_vm0 }
 0x50d   : > { %v4176_v43 = vmul.f32 %v5553_v11, %v3976_v41  ;;  %v4083_v32 = vmul.f32 %v5554_v0, %v3586_v27 }
 0x50f   : > { %v4437_v20 = vsel %vm8794_vm10, %v4176_v43, 0.0  ;;  %v4221_v4 = vsel %vm8795_vm3, %v4083_v32, 0.0  ;;  %vm8802_vm10 = vmmov %vm8723_vm0 }
 0x510   : > { %v4438_v45 = vadd.f32 %v4437_v20, %v4436_v39  ;;  %v4222_v5 = vadd.f32 %v4221_v4, %v4220_v62  ;;  %v3653_v23 = vpop.permute.xlu1 %3652  ;;  %v3783_v50 = vpop.permute.xlu0 %3782  ;;  %v5559_v62 = vld [vmem:[%s5866_s17 + $0x158] sm:$0xff]  ;;  %vm8803_vm3 = vmmov %vm8723_vm0 }
 0x511   : > { %v4099_v24 = vmul.f32 %v5555_v53, %v3653_v23  ;;  %v4130_v55 = vmul.f32 %v5556_v21, %v3783_v50 }
 0x513   : > { %v4258_v9 = vsel %vm8796_vm6, %v4099_v24, 0.0  ;;  %v4330_v29 = vsel %vm8723_vm0, %v4130_v55, 0.0  ;;  %vm8804_vm6 = vmmov %vm8723_vm0  ;;  %v5565_v55 = vld [vmem:[%s5866_s17 + $0x68] sm:$0xff] }
 0x514   : > { %v4259_v2 = vadd.f32 %v4258_v9, %v4257_v14  ;;  %v4331_v54 = vadd.f32 %v4330_v29, %v4329_v12  ;;  %v3913_v56 = vpop.permute.xlu1 %3912  ;;  %v4043_v3 = vpop.permute.xlu0 %4042  ;;  %v5561_v12 = vld [vmem:[%s5866_s17 + $0x348] sm:$0xff]  ;;  %v5566_v29 = vld [vmem:[%s5866_s17 + $0x70] sm:$0xff] }
 0x515   : > { %v4161_v8 = vmul.f32 %v5557_v26, %v3913_v56  ;;  %v4192_v46 = vmul.f32 %v5558_v60, %v4043_v3  ;;  %v5568_v3 = vld [vmem:[%s5866_s17 + $0x3c8] sm:$0xff] }
 0x517   : > { %v4402_v10 = vsel %vm8797_vm1, %v4161_v8, 0.0  ;;  %v4474_v61 = vsel %vm8798_vm15, %v4192_v46, 0.0  ;;  %vm8805_vm1 = vmmov %vm8723_vm0 }
 0x518   : > { %v8284_v31 = vadd.f32 %v4402_v10, %v4401_v35  ;;  %v8286_v44 = vadd.f32 %v4474_v61, %v4473_v42  ;;  %v3720_v19 = vpop.permute.xlu1 %3719  ;;  %v3850_v39 = vpop.permute.xlu0 %3849  ;;  %v5563_v42 = vld [vmem:[%s5866_s17 + $0xe0] sm:$0xff]  ;;  %v5569_v10 = vld [vmem:[%s5866_s17 + $0xe8] sm:$0xff]  ;;  %vm8806_vm15 = vmmov %vm8723_vm0 }
 0x519   : > { %v4115_v22 = vmul.f32 %v5559_v62, %v3720_v19  ;;  %v4146_v51 = vmul.f32 %v5560_v34, %v3850_v39  ;;  %v5570_v39 = vld [vmem:[%s5866_s17 + $0xf0] sm:$0xff] }
 0x51b   : > { %v4295_v13 = vsel %vm8799_vm7, %v4115_v22, 0.0  ;;  %v4367_v59 = vsel %vm8800_vm8, %v4146_v51, 0.0  ;;  %vm8807_vm7 = vmmov %vm8723_vm0  ;;  %v5571_v51 = vld [vmem:[%s5866_s17 + $0x160] sm:$0xff] }
 0x51c   : > { %v8292_v28 = vadd.f32 %v4295_v13, %v4294_v49  ;;  %v8294_v40 = vadd.f32 %v4367_v59, %v4366_v52  ;;  %v3980_v57 = vpop.permute.xlu1 %3979  ;;  %v3590_v14 = vpop.permute.xlu0 %3589  ;;  %vm8808_vm8 = vmmov %vm8723_vm0 }
 0x51d   : > { %v4177_v47 = vmul.f32 %v5561_v12, %v3980_v57  ;;  %v4084_v7 = vmul.f32 %v5562_v15, %v3590_v14  ;;  %v5572_v12 = vld [vmem:[%s5866_s17 + $0x258] sm:$0xff]  ;;  %v5573_v15 = vld [vmem:[%s5866_s17 + $0x350] sm:$0xff] }
 0x51f   : > { %v4439_v63 = vsel %vm8801_vm9, %v4177_v47, 0.0  ;;  %v4223_v17 = vsel %vm8802_vm10, %v4084_v7, 0.0  ;;  %vm8809_vm9 = vmmov %vm8723_vm0 }
 0x520   : > { %v8300_v38 = vadd.f32 %v4439_v63, %v4438_v45  ;;  %v4224_v58 = vadd.f32 %v4223_v17, %v4222_v5  ;;  %v3657_v30 = vpop.permute.xlu1 %3656  ;;  %v3787_v35 = vpop.permute.xlu0 %3786  ;;  %v5574_v17 = vld [vmem:[%s5866_s17 + $0x78] sm:$0xff]  ;;  %vm8810_vm10 = vmmov %vm8723_vm0 }
 0x521   : > { %v4100_v18 = vmul.f32 %v5563_v42, %v3657_v30  ;;  %v4131_v33 = vmul.f32 %v5564_v16, %v3787_v35  ;;  %v5575_v35 = vld [vmem:[%s5866_s17 + $0x1e0] sm:$0xff] }
 0x523   : > { %v4260_v48 = vsel %vm8803_vm3, %v4100_v18, 0.0  ;;  %v4332_v36 = vsel %vm8804_vm6, %v4131_v33, 0.0  ;;  %v5576_v33 = vld [vmem:[%s5866_s17 + $0x2d8] sm:$0xff]  ;;  %vm8811_vm3 = vmmov %vm8723_vm0 }
 0x524   : > { %v4261_v37 = vadd.f32 %v4260_v48, %v4259_v2  ;;  %v8306_v6 = vadd.f32 %v4332_v36, %v4331_v54  ;;  %v3917_v1 = vpop.permute.xlu1 %3916  ;;  %v4047_v49 = vpop.permute.xlu0 %4046  ;;  %v5567_v54 = vld [vmem:[%s5866_s17 + $0x2d0] sm:$0xff]  ;;  %vm8812_vm6 = vmmov %vm8723_vm0 }
 0x525   : > { %v4162_v56 = vmul.f32 %v5567_v54, %v3917_v1  ;;  %v4193_v26 = vmul.f32 %v5568_v3, %v4047_v49 }
 0x527   : > { %v4404_v22 = vsel %vm8806_vm15, %v4162_v56, 0.0  ;;  %v4476_v34 = vsel %vm8807_vm7, %v4193_v26, 0.0  ;;  %vm8814_vm15 = vmmov %vm8723_vm0  ;;  %v5581_v56 = vld [vmem:[%s5866_s17 + $0x170] sm:$0xff] }
 0x528   : > { %v3724_v52 = vpop.permute.xlu1 %3723  ;;  %v3854_v41 = vpop.permute.xlu0 %3853  ;;  %v4405_v16 = vadd.f32 %v4404_v22, %v8284_v31  ;;  %v8343_v1 = vadd.f32 %v4476_v34, %v8286_v44  ;;  %vm8815_vm7 = vmmov %vm8723_vm0 }
 0x529   : > { %v4116_v13 = vmul.f32 %v5571_v51, %v3724_v52  ;;  %v4147_v47 = vmul.f32 %v5572_v12, %v3854_v41  ;;  %v5577_v52 = vld [vmem:[%s5866_s17 + $0x168] sm:$0xff] }
 0x52b   : > { %v4297_v31 = vsel %vm8811_vm3, %v4116_v13, 0.0  ;;  %vm8819_vm3 = vmmov %vm8723_vm0 }
 0x52c   : > { %v3984_v27 = vpop.permute.xlu1 %3983  ;;  %v3594_v11 = vpop.permute.xlu0 %3593  ;;  %v4298_v22 = vadd.f32 %v4297_v31, %v8292_v28 }
 0x52d   : > { %v4085_v9 = vmul.f32 %v5565_v55, %v3594_v11  ;;  %v4178_v7 = vmul.f32 %v5573_v15, %v3984_v27  ;;  %v5579_v55 = vld [vmem:[%s5866_s17 + $0x3d0] sm:$0xff] }
 0x52f   : > { %v4225_v46 = vsel %vm8723_vm0, %v4085_v9, 0.0 }
 0x530   : > { %v3661_v43 = vpop.permute.xlu1 %3660  ;;  %v3791_v0 = vpop.permute.xlu0 %3790  ;;  %v4226_v59 = vadd.f32 %v4225_v46, %v4224_v58 }
 0x531   : > { %v4101_v61 = vmul.f32 %v5569_v10, %v3661_v43  ;;  %v4132_v42 = vmul.f32 %v5575_v35, %v3791_v0  ;;  %v4369_v0 = vsel %vm8812_vm6, %v4147_v47, 0.0  ;;  %v5582_v10 = vld [vmem:[%s5866_s17 + $0x1e8] sm:$0xff]  ;;  %v5583_v47 = vld [vmem:[%s5866_s17 + $0x358] sm:$0xff]  ;;  %vm8820_vm6 = vmmov %vm8723_vm0 }
 0x532   : > { %v5585_v35 = vld [vmem:[%s5866_s17 + $0x2e0] sm:$0xff] }
 0x533   : > { %v4262_v63 = vsel %vm8808_vm8, %v4101_v61, 0.0  ;;  %vm8816_vm8 = vmmov %vm8723_vm0 }
 0x534   : > { %v3921_v32 = vpop.permute.xlu1 %3920  ;;  %v4051_v20 = vpop.permute.xlu0 %4050  ;;  %v4263_v49 = vadd.f32 %v4262_v63, %v4261_v37 }
 0x535   : > { %v4163_v58 = vmul.f32 %v5576_v33, %v3921_v32  ;;  %v4441_v32 = vsel %vm8723_vm0, %v4178_v7, 0.0  ;;  %v4194_v37 = vmul.f32 %v5579_v55, %v4051_v20  ;;  %v5584_v7 = vld [vmem:[%s5866_s17 + $0x1f0] sm:$0xff]  ;;  %v5587_v33 = vld [vmem:[%s5866_s17 + $0x268] sm:$0xff] }
 0x538   : > { %v3728_v4 = vpop.permute.xlu1 %3727  ;;  %v8308_v45 = vpop.permute.xlu0 %3857 }
 0x539   : > { %v4117_v41 = vmul.f32 %v5577_v52, %v3728_v4  ;;  %v4406_v4 = vsel %vm8814_vm15, %v4163_v58, 0.0  ;;  %v5588_v58 = vld [vmem:[%s5866_s17 + $0x178] sm:$0xff]  ;;  %vm8822_vm15 = vmmov %vm8723_vm0 }
 0x53a   : > { %v4407_v51 = vadd.f32 %v4406_v4, %v4405_v16 }
 0x53b   : > { %v4299_v46 = vsel %vm8816_vm8, %v4117_v41, 0.0  ;;  %vm8824_vm8 = vmmov %vm8723_vm0 }
 0x53c   : > { %v8310_v5 = vpop.permute.xlu1 %3987  ;;  %v3598_v23 = vpop.permute.xlu0 %3597 }
 0x53d   : > { %v4086_v2 = vmul.f32 %v5566_v29, %v3598_v23  ;;  %v5578_v23 = vld [vmem:[%s5866_s17 + $0xf8] sm:$0xff]  ;;  %v4179_v28 = vmul.f32 %v5583_v47, %v8310_v5 }
 0x53f   : > { %v4227_v19 = vsel %vm8805_vm1, %v4086_v2, 0.0  ;;  %vm8813_vm1 = vmmov %vm8723_vm0  ;;  %v5580_v2 = vld [vmem:[%s5866_s17 + $0x260] sm:$0xff] }
 0x540   : > { %v3665_v50 = vpop.permute.xlu1 %3664  ;;  %v8312_v53 = vpop.permute.xlu0 %3794  ;;  %v4228_v18 = vadd.f32 %v4227_v19, %v4226_v59  ;;  %v4334_v44 = vsel %vm8813_vm1, %v4132_v42, 0.0  ;;  %v4148_v54 = vmul.f32 %v5580_v2, %v8308_v45  ;;  %v4370_v45 = vadd.f32 %v4369_v0, %v8294_v40  ;;  %vm8821_vm1 = vmmov %vm8723_vm0 }
 0x541   : > { %v4102_v62 = vmul.f32 %v5570_v39, %v3665_v50  ;;  %v4133_v61 = vmul.f32 %v5582_v10, %v8312_v53  ;;  %v4335_v34 = vadd.f32 %v4334_v44, %v8306_v6 }
 0x543   : > { %v4264_v48 = vsel %vm8809_vm9, %v4102_v62, 0.0  ;;  %vm8817_vm9 = vmmov %vm8723_vm0 }
 0x544   : > { %v8314_v24 = vpop.permute.xlu1 %3924  ;;  %v8316_v21 = vpop.permute.xlu0 %4054  ;;  %v4265_v9 = vadd.f32 %v4264_v48, %v4263_v49  ;;  %v4478_v13 = vsel %vm8817_vm9, %v4194_v37, 0.0  ;;  %v5589_v49 = vld [vmem:[%s5866_s17 + $0x360] sm:$0xff]  ;;  %vm8825_vm9 = vmmov %vm8723_vm0 }
 0x545   : > { %v4164_v42 = vmul.f32 %v5585_v35, %v8314_v24  ;;  %v4443_v24 = vsel %vm8723_vm0, %v4179_v28, 0.0 }
 0x548   : > { %v3732_v8 = vpop.permute.xlu1 %3731  ;;  %v8322_v60 = vpop.permute.xlu0 %3861 }
 0x549   : > { %v4118_v3 = vmul.f32 %v5581_v56, %v3732_v8  ;;  %v4442_v8 = vadd.f32 %v4441_v32, %v8300_v38  ;;  %v4336_v38 = vsel %vm8820_vm6, %v4133_v61, 0.0  ;;  %v4149_v5 = vmul.f32 %v5587_v33, %v8322_v60  ;;  %v5591_v56 = vld [vmem:[%s5866_s17 + $0x2e8] sm:$0xff]  ;;  %vm8828_vm6 = vmmov %vm8723_vm0 }
 0x54a   : > { %v5596_v33 = vld [vmem:[%s5866_s17 + $0x3e8] sm:$0xff] }
 0x54b   : > { %v4301_v40 = vsel %vm8819_vm3, %v4118_v3, 0.0  ;;  %vm8827_vm3 = vmmov %vm8723_vm0  ;;  %v4444_v61 = vadd.f32 %v4443_v24, %v4442_v8 }
 0x54c   : > { %v8331_v57 = vpop.permute.xlu1 %3991  ;;  %v3602_v14 = vpop.permute.xlu0 %3601 }
 0x54d   : > { %v4087_v30 = vmul.f32 %v5574_v17, %v3602_v14  ;;  %v4300_v14 = vadd.f32 %v4299_v46, %v4298_v22  ;;  %v4180_v52 = vmul.f32 %v5589_v49, %v8331_v57  ;;  %v4337_v57 = vadd.f32 %v4336_v38, %v4335_v34 }
 0x54f   : > { %v4229_v36 = vsel %vm8810_vm10, %v4087_v30, 0.0  ;;  %vm8818_vm10 = vmmov %vm8723_vm0 }
 0x550   : > { %v4230_v27 = vadd.f32 %v4229_v36, %v4228_v18  ;;  %v3669_v11 = vpop.permute.xlu1 %3668  ;;  %v3799_v43 = vpop.permute.xlu0 %3798  ;;  %v4371_v12 = vsel %vm8818_vm10, %v4148_v54, 0.0  ;;  %v5586_v18 = vld [vmem:[%s5866_s17 + $0x3d8] sm:$0xff]  ;;  %v4302_v36 = vadd.f32 %v4301_v40, %v4300_v14  ;;  %vm8826_vm10 = vmmov %vm8723_vm0 }
 0x551   : > { %v4103_v50 = vmul.f32 %v5578_v23, %v3669_v11  ;;  %v4134_v63 = vmul.f32 %v5584_v7, %v3799_v43  ;;  %v4195_v16 = vmul.f32 %v5586_v18, %v8316_v21  ;;  %v4479_v11 = vadd.f32 %v4478_v13, %v8343_v1  ;;  %v5590_v1 = vld [vmem:[%s5866_s17 + $0x1f8] sm:$0xff] }
 0x552   : > { %v4231_v29 = vrot.slane %v4230_v27, 4  ;;  %v4372_v43 = vadd.f32 %v4371_v12, %v4370_v45 }
 0x553   : > { %v4266_v26 = vsel %vm8815_vm7, %v4103_v50, 0.0  ;;  %v4338_v60 = vsel %vm8822_vm15, %v4134_v63, 0.0  ;;  %vm8823_vm7 = vmmov %vm8723_vm0  ;;  %v4480_v55 = vsel %vm8824_vm8, %v4195_v16, 0.0 }
 0x554   : > { %v4232_v19 = vadd.f32 %v4231_v29, %v4230_v27  ;;  %v4267_v39 = vadd.f32 %v4266_v26, %v4265_v9  ;;  %v3929_v20 = vpop.permute.xlu1 %3928  ;;  %v8360_v62 = vpop.permute.xlu0 %4058  ;;  %v4408_v44 = vsel %vm8823_vm7, %v4164_v42, 0.0  ;;  %v4373_v9 = vsel %vm8825_vm9, %v4149_v5, 0.0  ;;  %v5592_v26 = vld [vmem:[%s5866_s17 + $0x270] sm:$0xff]  ;;  %vm8830_vm15 = vmmov %vm8723_vm0 }
 0x555   : > { %v4445_v29 = vsel %vm8826_vm10, %v4180_v52, 0.0  ;;  %v4339_v54 = vadd.f32 %v4338_v60, %v4337_v57  ;;  %v4165_v3 = vmul.f32 %v5591_v56, %v3929_v20  ;;  %v4409_v13 = vadd.f32 %v4408_v44, %v4407_v51  ;;  %vm8831_vm7 = vmmov %vm8723_vm0 }
 0x556   : > { %v4233_v59 = vrot.slane %v4232_v19, 2  ;;  %v4268_v53 = vrot.slane %v4267_v39, 4  ;;  %v4374_v47 = vadd.f32 %v4373_v9, %v4372_v43  ;;  %v4446_v20 = vadd.f32 %v4445_v29, %v4444_v61  ;;  %vm8832_vm8 = vmmov %vm8723_vm0 }
 0x557   : > { %v4410_v8 = vsel %vm8828_vm6, %v4165_v3, 0.0  ;;  %vm8834_vm9 = vmmov %vm8723_vm0 }
 0x558   : > { %v4234_v6 = vadd.f32 %v4233_v59, %v4232_v19  ;;  %v4269_v15 = vadd.f32 %v4268_v53, %v4267_v39  ;;  %v3736_v17 = vpop.permute.xlu1 %3735  ;;  %v3866_v30 = vpop.permute.xlu0 %3865  ;;  %v4481_v59 = vadd.f32 %v4480_v55, %v4479_v11  ;;  %v5593_v53 = vld [vmem:[%s5866_s17 + $0x3e0] sm:$0xff]  ;;  %v4411_v11 = vadd.f32 %v4410_v8, %v4409_v13  ;;  %v5599_v55 = vld [vmem:[%s5866_s17 + $0x2f8] sm:$0xff]  ;;  %vm8835_vm10 = vmmov %vm8723_vm0 }
 0x559   : > { %v4119_v48 = vmul.f32 %v5588_v58, %v3736_v17  ;;  %v4150_v46 = vmul.f32 %v5592_v26, %v3866_v30  ;;  %v4196_v14 = vmul.f32 %v5593_v53, %v8360_v62  ;;  %v5595_v30 = vld [vmem:[%s5866_s17 + $0x368] sm:$0xff]  ;;  %v5597_v58 = vld [vmem:[%s5866_s17 + $0x278] sm:$0xff]  ;;  %vm8837_vm6 = vmmov %vm8723_vm0 }
 0x55a   : > { %v4235_v41 = vrot.slane %v4234_v6, 1  ;;  %v4270_v27 = vrot.slane %v4269_v15, 2 }
 0x55b   : > { %v4303_v31 = vsel %vm8821_vm1, %v4119_v48, 0.0  ;;  %v4375_v38 = vsel %vm8723_vm0, %v4150_v46, 0.0  ;;  %vm8829_vm1 = vmmov %vm8723_vm0 }
 0x55c   : > { %v4236_v21 = vadd.f32 %v4235_v41, %v4234_v6  ;;  %v4271_v0 = vadd.f32 %v4270_v27, %v4269_v15  ;;  %v4304_v32 = vadd.f32 %v4303_v31, %v4302_v36  ;;  %v3996_v23 = vpop.permute.xlu1 %3995  ;;  %v3803_v50 = vpop.permute.xlu0 %3802  ;;  %v5594_v15 = vld [vmem:[%s5866_s17 + $0x2f0] sm:$0xff]  ;;  %v4482_v18 = vsel %vm8829_vm1, %v4196_v14, 0.0  ;;  %v5602_v14 = vld [vmem:[%s5866_s17 + $0x3f8] sm:$0xff] }
 0x55d   : > { %v4135_v37 = vmul.f32 %v5590_v1, %v3803_v50  ;;  %v4181_v62 = vmul.f32 %v5595_v30, %v3996_v23  ;;  %v4376_v52 = vadd.f32 %v4375_v38, %v4374_v47  ;;  %v5598_v41 = vld [vmem:[%s5866_s17 + $0x370] sm:$0xff] }
 0x55e   : > { %v4272_v4 = vrot.slane %v4271_v0, 1  ;;  %v4305_v2 = vrot.slane %v4304_v32, 4  ;;  %v4496_v19 = vpack.c.bf16 %v4236_v21, %v4236_v21  ;;  %v4483_v21 = vadd.f32 %v4482_v18, %v4481_v59  ;;  %v5601_v59 = vld [vmem:[%s5866_s17 + $0x378] sm:$0xff] }
 0x55f   : > { %v4340_v10 = vsel %vm8827_vm3, %v4135_v37, 0.0  ;;  %v4447_v60 = vsel %vm8832_vm8, %v4181_v62, 0.0  ;;  %v5600_v37 = vld [vmem:[%s5866_s17 + $0x3f0] sm:$0xff]  ;;  %vm8836_vm3 = vmmov %vm8723_vm0 }
 0x560   : > { %v4273_v39 = vadd.f32 %v4272_v4, %v4271_v0  ;;  %v4306_v22 = vadd.f32 %v4305_v2, %v4304_v32  ;;  %v3933_v45 = vpop.permute.xlu1 %3932  ;;  %v4063_v34 = vpop.permute.xlu0 %4062  ;;  %v4341_v12 = vadd.f32 %v4340_v10, %v4339_v54  ;;  %v4523_v51 = vunpack.c.l.b16 %v4496_v19 }
 0x561   : > { %v4166_v7 = vmul.f32 %v5594_v15, %v3933_v45  ;;  %v4197_v5 = vmul.f32 %v5596_v33, %v4063_v34  ;;  %v4448_v56 = vadd.f32 %v4447_v60, %v4446_v20 }
 0x562   : > { %v4497_v28 = vpack.c.bf16 %v4273_v39, %v4273_v39  ;;  %v4307_v40 = vrot.slane %v4306_v22, 2  ;;  %v4342_v6 = vrot.slane %v4341_v12, 4 }
 0x563   : > { %v4412_v24 = vsel %vm8830_vm15, %v4166_v7, 0.0 }
 0x564   : > { %v4524_v63 = vunpack.c.l.b16 %v4497_v28  ;;  %v4308_v17 = vadd.f32 %v4307_v40, %v4306_v22  ;;  %v3870_v35 = vpop.permute.xlu1 %3869  ;;  %v4000_v42 = vpop.permute.xlu0 %3999  ;;  %v4343_v16 = vadd.f32 %v4342_v6, %v4341_v12  ;;  %v4413_v4 = vadd.f32 %v4412_v24, %v4411_v11 }
 0x565   : > { %v4151_v48 = vmul.f32 %v5597_v58, %v3870_v35  ;;  %v4182_v27 = vmul.f32 %v5598_v41, %v4000_v42 }
 0x566   : > { %v4531_v36 = vsel %vm3510_vm2, %v4524_v63, %v4523_v51  ;;  %v4309_v49 = vrot.slane %v4308_v17, 1  ;;  %v4344_v43 = vrot.slane %v4343_v16, 2  ;;  %vm8833_vm2 = vmmov %vm8723_vm0 }
 0x567   : > { %v4377_v31 = vsel %vm8831_vm7, %v4151_v48, 0.0  ;;  %v4484_v44 = vsel %vm8833_vm2, %v4197_v5, 0.0  ;;  %v4449_v54 = vsel %vm8834_vm9, %v4182_v27, 0.0 }
 0x568   : > { %v4310_v0 = vadd.f32 %v4309_v49, %v4308_v17  ;;  %v4378_v32 = vadd.f32 %v4377_v31, %v4376_v52  ;;  %v3937_v23 = vpop.permute.xlu1 %3936  ;;  %v4067_v50 = vpop.permute.xlu0 %4066  ;;  %v4345_v57 = vadd.f32 %v4344_v43, %v4343_v16  ;;  %v4485_v61 = vadd.f32 %v4484_v44, %v4483_v21 }
 0x569   : > { %v4167_v1 = vmul.f32 %v5599_v55, %v3937_v23  ;;  %v4198_v9 = vmul.f32 %v5600_v37, %v4067_v50  ;;  %v4450_v13 = vadd.f32 %v4449_v54, %v4448_v56 }
 0x56a   : > { %v4498_v29 = vpack.c.bf16 %v4310_v0, %v4310_v0  ;;  %v4379_v2 = vrot.slane %v4378_v32, 4  ;;  %v4346_v3 = vrot.slane %v4345_v57, 1 }
 0x56b   : > { %v4414_v26 = vsel %vm8835_vm10, %v4167_v1, 0.0  ;;  %v4486_v46 = vsel %vm8836_vm3, %v4198_v9, 0.0 }
 0x56c   : > { %v4525_v10 = vunpack.c.l.b16 %v4498_v29  ;;  %v4380_v19 = vadd.f32 %v4379_v2, %v4378_v32  ;;  %v4415_v39 = vadd.f32 %v4414_v26, %v4413_v4  ;;  %v4004_v22 = vpop.permute.xlu1 %4003  ;;  %v4071_v45 = vpop.permute.xlu0 %4070  ;;  %v4347_v34 = vadd.f32 %v4346_v3, %v4345_v57  ;;  %v5209_v4 = vld [vmem:[%s8530_s12] sm:$0xff]  }
 0x56d   : > { %v4183_v53 = vmul.f32 %v5601_v59, %v4004_v22  ;;  %v4199_v12 = vmul.f32 %v5602_v14, %v4071_v45  ;;  %v4487_v40 = vadd.f32 %v4486_v46, %v4485_v61  ;;  %v4906_v2 = vld [vmem:[%s8529_s11] ss:$0 sm:$0xff] }
 0x56e   : > { %v4532_v47 = vsel %vm3512_vm12, %v4525_v10, %v4531_v36  ;;  %v4381_v20 = vrot.slane %v4380_v19, 2  ;;  %v4416_v28 = vrot.slane %v4415_v39, 4  ;;  %v4499_v8 = vpack.c.bf16 %v4347_v34, %v4347_v34  ;;  %vm8838_vm12 = vmmov %vm8723_vm0 }
 0x56f   : > { %v4451_v38 = vsel %vm8837_vm6, %v4183_v53, 0.0  ;;  %v4488_v6 = vsel %vm8723_vm0, %v4199_v12, 0.0 }
 0x570   : > { %v4382_v15 = vadd.f32 %v4381_v20, %v4380_v19  ;;  %v4417_v7 = vadd.f32 %v4416_v28, %v4415_v39  ;;  %v4452_v51 = vadd.f32 %v4451_v38, %v4450_v13  ;;  %v4489_v63 = vadd.f32 %v4488_v6, %v4487_v40  ;;  %v4595_v26 = vpop.permute.xlu1 %4594 }
 0x571   : > { %v4526_v17 = vunpack.c.l.b16 %v4499_v8 }
 0x572   : > { %v4383_v30 = vrot.slane %v4382_v15, 1  ;;  %v4418_v62 = vrot.slane %v4417_v7, 2  ;;  %v4453_v35 = vrot.slane %v4452_v51, 4  ;;  %v4490_v42 = vrot.slane %v4489_v63, 4 }
 0x573   : > { %v4533_v18 = vsel %vm3514_vm13, %v4526_v17, %v4532_v47  ;;  %vm8839_vm13 = vmmov 0  }
 0x574   : > { %v4384_v16 = vadd.f32 %v4383_v30, %v4382_v15  ;;  %v4419_v33 = vadd.f32 %v4418_v62, %v4417_v7  ;;  %v4454_v5 = vadd.f32 %v4453_v35, %v4452_v51  ;;  %v4491_v58 = vadd.f32 %v4490_v42, %v4489_v63 }
 0x576   : > { %v4500_v48 = vpack.c.bf16 %v4384_v16, %v4384_v16  ;;  %v4420_v36 = vrot.slane %v4419_v33, 1  ;;  %v4455_v49 = vrot.slane %v4454_v5, 2  ;;  %v4492_v52 = vrot.slane %v4491_v58, 2 }
 0x578   : > { %v4527_v41 = vunpack.c.l.b16 %v4500_v48  ;;  %v4421_v27 = vadd.f32 %v4420_v36, %v4419_v33  ;;  %v4456_v11 = vadd.f32 %v4455_v49, %v4454_v5  ;;  %v4493_v43 = vadd.f32 %v4492_v52, %v4491_v58 }
 0x57a   : > { %v4534_v24 = vsel %vm3516_vm14, %v4527_v41, %v4533_v18  ;;  %v4501_v31 = vpack.c.bf16 %v4421_v27, %v4421_v27  ;;  %v4457_v21 = vrot.slane %v4456_v11, 1  ;;  %v4494_v0 = vrot.slane %v4493_v43, 1 }
 0x57b   : > { %vm8840_vm14 = vcmask 130048  }
 0x57c   : > { %v4528_v60 = vunpack.c.l.b16 %v4501_v31  ;;  %v4458_v32 = vadd.f32 %v4457_v21, %v4456_v11  ;;  %v4495_v23 = vadd.f32 %v4494_v0, %v4493_v43 }
 0x57e   : > { %v4535_v50 = vsel %vm3518_vm11, %v4528_v60, %v4534_v24  ;;  %v4502_v57 = vpack.c.bf16 %v4458_v32, %v4458_v32  ;;  %v4503_v44 = vpack.c.bf16 %v4495_v23, %v4495_v23 }
 0x580   : > { %v4529_v55 = vunpack.c.l.b16 %v4502_v57  ;;  %v4530_v1 = vunpack.c.l.b16 %v4503_v44 }
 0x582   : > { %v4536_v37 = vsel %vm3520_vm4, %v4529_v55, %v4535_v50 }
 0x583   : > { %v4537_v9 = vsel %vm3522_vm5, %v4530_v1, %v4536_v37 }
 0x584   : > { %v4538_v29 = vpack.c.b16 %v4537_v9, %v4537_v9 }
 0x586   : > { %5139 = vmatmul.mubr.msk.bf16.vlgmr.msra.gmra.mrb[60].mxu0 %vm8838_vm12, %v4538_v29 }
 0x587   : > { %5144 = vmatprep.mubr.msk.bf16.mxu0 %vm8839_vm13, %v8722_v25  ;;  %5143 = vmatpush3.bf16.msra.mxu0 %v5209_v4 }
 0x659   : > { %v4588_v54 = vpop.f32.mrb[60].mxu0 }
 0x65a   : > { %v4589_v56 = vadd.f32 %v4906_v2, %v4588_v54  ;;  %v5140_v3 = vpop.f32.mrb[61].mxu0 }
 0x65b   : > { %v4591_v46 = vpop.f32.mrb[62].mxu0 }
 0x65c   : > { %v4597_v10 = vadd.f32 %v4595_v26, %v4589_v56  ;;  %v5141_v25 = vpop.f32.mrb[63].mxu0 }
 0x65e   : > { %5470 = vtanh.f32 %v4597_v10 }
 0x668   : > { %v5471_v61 = vpop.eup %5470 }
 0x669   : > { %v4599_v19 = vpack.c.bf16 %v5471_v61, %v5471_v61 }
 0x66b   : > { %5145 = vmatmul.mubr.msk.bf16.vlgmr.msra.gmra.mrb[64].mxu0 %vm8840_vm14, %v4599_v19 }
 0x66c   : > { %5616 = shalt.err (!%p5613_p4)
}
 0x66d   : > { %s5617_s24 = scalar_lea.hbm %s8440_s16, 128  ;;  %s5621_s1 = scalar_lea.hbm %s8532_s14, 256 }
 0x66e   : > { %p5618_p7 = scmp.ne.s32.totalorder %s8440_s16, %s5617_s24  ;;  %p5622_p10 = scmp.lt.u32.totalorder %s8440_s16, %s8532_s14 }
 0x66f   : > { %p5623_p11 = scmp.lt.u32.totalorder %s5621_s1, %s5617_s24  ;;  %p5625_p13 = scmp.lt.u32.totalorder %s5617_s24, %s8440_s16 }
 0x670   : > { %p5619_p8 = pnand %p5618_p7, %p5827_p5 }
 0x671   : > { %p5624_p12 = por %p5623_p11, %p5622_p10 }
 0x672   : > { %p5620_p9 = pneg %p5619_p8 }
 0x673   : > { %p5626_p0 = por %p5625_p13, %p5624_p12 }
 0x675   : > { %p5627_p1 = pnand %p5626_p0, %p5620_p9 }
 0x677   : > { %5630 = shalt.err (!%p5627_p1)
}
 0x678   : > { %5152 = dma.vmem_to_hbm [thread:$0]  (%p5827_p5), %s4682_s4, 128, %s8440_s16, %s4663_s18   ;;  %v4910_v22 = vld [vmem:[%s8531_s13] ss:$0 sm:$0xff] }
 0x679   : > { %s561_s17 = scalar_lea.vmem %s8521_s3, %s5856_s19  ;;  %s8841_s24 = sshll.u32 %s7821_s6, 3 }
 0x67a   : > { %v4658_v39 = vld [vmem:[%s561_s17] sm:$0xff]  ;;  %s542_s1 = scalar_lea.vmem [#allocation5], %s8841_s24  ;;  %s8842_s18 = sshll.u32 %s5810_s9, 7 }
 0x67b   : > { %s4694_s2 = sshll.u32 %s542_s1, 4  ;;  %vm4659_vm11 = vcmp.eq.s32.totalorder %v4658_v39, 0  ;;  %s8475_s0 = scalar_lea.hbm %s8533_s15, %s8842_s18  ;;  %s8477_s2 = int_to_ptr.vmem [resolvable:$true] %s4694_s2 }
 0x67c   : > { %s4668_s19 = scalar_lea.sflag [#allocation6], %s7821_s6  ;;  %s5631_s5 = scalar_lea.vmem %s8477_s2, 128 }
 0x67d   : > { %p5632_p2 = scmp.ne.s32.totalorder %s8477_s2, %s5631_s5  ;;  %s5705_s9 = smov [#allocation5]  }
 0x67e   : > { %s5635_s17 = sshll.u32 %s5705_s9, 4  ;;  %s5636_s17 = int_to_ptr.vmem [resolvable:$false] %s5635_s17 }
 0x67f   : > { %p5633_p3 = pnand %p5632_p2, %p5827_p5  ;;  %s5637_s26 = scalar_lea.vmem %s5636_s17, 256 }
 0x680   : > { %p5638_p7 = scmp.lt.s32.totalorder %s8477_s2, %s5636_s17  ;;  %p5639_p8 = scmp.lt.s32.totalorder %s5637_s26, %s5631_s5 }
 0x681   : > { %p5634_p4 = pneg %p5633_p3 }
 0x682   : > { %p5640_p9 = por %p5639_p8, %p5638_p7 }
 0x684   : > { %p5641_p10 = pnand %p5640_p9, %p5634_p4 }
 0x73e   : > { %v4652_v45 = vpop.f32.mrb[64].mxu0 }
 0x73f   : > { %v4653_v34 = vadd.f32 %v4910_v22, %v4652_v45  ;;  %v5146_v13 = vpop.f32.mrb[65].mxu0 }
 0x740   : > { %v4655_v59 = vpop.f32.mrb[66].mxu0 }
 0x741   : > { %v4660_v53 = vsel %vm4659_vm11, -inf, %v4653_v34  ;;  %v5147_v14 = vpop.f32.mrb[67].mxu0 }
 0x742   : > { %4661 = vst [vmem:[%s542_s1] sm:$0xff] %v4660_v53 }
 0x743   : > { %5644 = shalt.err (!%p5641_p10)
}
 0x744   : > { %s5645_s6 = scalar_lea.hbm %s8475_s0, 128  ;;  %s5649_s1 = scalar_lea.hbm %s8533_s15, 256 }
 0x745   : > { %p5646_p11 = scmp.ne.s32.totalorder %s8475_s0, %s5645_s6  ;;  %p5650_p0 = scmp.lt.u32.totalorder %s8475_s0, %s8533_s15 }
 0x746   : > { %p5651_p1 = scmp.lt.u32.totalorder %s5649_s1, %s5645_s6  ;;  %p5653_p3 = scmp.lt.u32.totalorder %s5645_s6, %s8475_s0 }
 0x747   : > { %p5647_p12 = pnand %p5646_p11, %p5827_p5 }
 0x748   : > { %p5652_p2 = por %p5651_p1, %p5650_p0 }
 0x749   : > { %p5648_p13 = pneg %p5647_p12 }
 0x74a   : > { %p5654_p4 = por %p5653_p3, %p5652_p2 }
 0x74c   : > { %p5655_p7 = pnand %p5654_p4, %p5648_p13 }
 0x74e   : > { %5658 = shalt.err (!%p5655_p7)
}
 0x74f   : > { %5153 = dma.vmem_to_hbm [thread:$0]  (%p5827_p5), %s8477_s2, 128, %s8475_s0, %s4668_s19  }
 0x750 PF: > { %p5163_p8 = scmp.ge.s32.totalorder %s5697_s23, 2  ;;  %s4706_s4 = sand.u32 1, %s5685_s20  }
 0x751   : > { %s4707_s5 = scalar_lea.sflag [#allocation4], %s4706_s4 }
 0x752   : > { %p5157_p9 = pnand %p5163_p8, %p5831_p6 }
 0x754   : > { %5676 = dma.done.wait (!%p5157_p9), %s4707_s5, 128  }
 0x755   : > { %5678 = vsyncadd (!%p5157_p9), %s4707_s5, 4294967168  ;;  %s4716_s9 = scalar_lea.sflag [#allocation6], %s4706_s4 }
 0x756   : > { %5680 = dma.done.wait (!%p5157_p9), %s4716_s9, 128  }
 0x757   : > { %5682 = vsyncadd (!%p5157_p9), %s4716_s9, 4294967168  ;;  %p31_p5 = scmp.ge.s32.totalorder %s5814_s25, 4   ;;  %s8843_s20 = smov %s5689_s21 }
 0x758   : > { %s8844_s21 = smov %s5693_s22  ;;  %s8845_s22 = smov %s5825_s28 }
 0x759   : > { %s8846_s23 = smov %s5814_s25  ;;  %33 = sbr.rel (!%p31_p5) target bundleno = 12 (0xc), region = 137 }
 0x760   :  { %4721 = vsyncpa [#allocation4], 1 }
 0x761   :  { %4723 = vsyncpa [#allocation4 + $0x1], 1 }
 0x762   :  { %4724 = vsyncpa [#allocation6], 1 }
 0x763   :  { %4726 = vsyncpa [#allocation6 + $0x1], 1 }

// kernel: tpu_custom_call.1
= control target key start
LH: loop header
LB: loop body
LE: loop exit
PB: predicated region body
PF: predicated region fallthrough
CT: control target
= control target key end

     0   :  { %s8518_s0 = inlined_call_operand.vmem [shape: f32[16,128,32], index: 0, kind: input, shape index: {}]   ;;  %s8519_s1 = inlined_call_operand.vmem [shape: f32[16,32], index: 1, kind: input, shape index: {}]   ;;  %s8520_s2 = inlined_call_operand.vmem [shape: s32[16,128], index: 2, kind: input, shape index: {}]   ;;  %s8521_s3 = inlined_call_operand.vmem [shape: s32[16,128], index: 3, kind: input, shape index: {}]   ;;  %s8522_s4 = inlined_call_operand.vmem [shape: bf16[32,16], index: 4, kind: input, shape index: {}]   ;;  %s8523_s5 = inlined_call_operand.vmem [shape: f32[1,16], index: 5, kind: input, shape index: {}]   ;;  %s8524_s6 = inlined_call_operand.vmem [shape: bf16[32,32], index: 6, kind: input, shape index: {}]   ;;  %s8525_s7 = inlined_call_operand.vmem [shape: f32[1,32], index: 7, kind: input, shape index: {}]   ;;  %s8526_s8 = inlined_call_operand.vmem [shape: f32[1,16], index: 8, kind: input, shape index: {}]   ;;  %s8527_s9 = inlined_call_operand.<no memory space> [shape: f32[1,1], index: 9, kind: input, shape index: {}]   ;;  %s8528_s10 = inlined_call_operand.vmem [shape: bf16[32,16], index: 10, kind: input, shape index: {}]   ;;  %s8529_s11 = inlined_call_operand.vmem [shape: f32[1,16], index: 11, kind: input, shape index: {}]   ;;  %s8530_s12 = inlined_call_operand.vmem [shape: bf16[16,128], index: 12, kind: input, shape index: {}]   ;;  %s8531_s13 = inlined_call_operand.vmem [shape: f32[1,128], index: 13, kind: input, shape index: {}]   ;;  %s8532_s14 = inlined_call_operand.hbm [shape: f32[16,128], index: 14, kind: output, shape index: {0}]   ;;  %s8533_s15 = inlined_call_operand.hbm [shape: f32[16,128], index: 15, kind: output, shape index: {1}]  }
   0x1   :  { %8554 = sst [smem:[#allocation54_spill]] %s8518_s0  ;;  %v21_v0 = vstv %s8527_s9 }
   0x2   :  { %8555 = sst [smem:[#allocation55_spill]] %s8519_s1  ;;  %22 = vst [vmem:[#allocation2] sm:$0x1] %v21_v0 }
   0x3   :  { %8556 = sst [smem:[#allocation56_spill]] %s8520_s2 }
   0x4   :  { %8557 = sst [smem:[#allocation57_spill]] %s8522_s4 }
   0x5   :  { %8558 = sst [smem:[#allocation58_spill]] %s8523_s5 }
   0x6   :  { %8559 = sst [smem:[#allocation59_spill]] %s8524_s6 }
   0x7   :  { %23 = vsyncpa [#allocation4], 0 }
   0x8   :  { %25 = vsyncpa [#allocation4 + $0x1], 0 }
   0x9   :  { %26 = vsyncpa [#allocation6], 0 }
   0xa   :  { %28 = vsyncpa [#allocation6 + $0x1], 0  ;;  %s5789_s20 = smov 0   ;;  %s5791_s21 = smov 0  }
   0xb   :  { %s5793_s22 = smov 0   ;;  %s5795_s23 = smov 0  }
   0xc LB: > { %s5810_s9 = sadd.s32 4294967295, %s5697_s23   ;;  %s4821_s24 = sadd.s32 4294967294, %s5697_s23   ;;  %s5697_s23 = sphi %s5795_s23, %s8846_s23   ;;  %s5693_s22 = sphi %s5793_s22, %s8845_s22   ;;  %s5689_s21 = sphi %s5791_s21, %s8844_s21   ;;  %s5685_s20 = sphi %s5789_s20, %s8843_s20  }
   0xd   : > { %s5814_s25 = sadd.s32 1, %s5697_s23   ;;  %s355_s26 = sadd.s32 1, %s5693_s22 }
   0xe   : > { %s352_s27 = ssub.s32 %s5697_s23, %s5814_s25  ;;  %p365_p0 = scmp.ne.s32.totalorder %s5693_s22, %s5689_s21 }
   0xf   : > { %p353_p1 = scmp.eq.s32.totalorder %s352_s27, 0  ;;  %p366_p2 = scmp.eq.s32.totalorder %s5810_s9, 1 }
  0x10   : > { %p371_p3 = scmp.ne.s32.totalorder %s5689_s21, %s5685_s20  ;;  %p372_p4 = scmp.eq.s32.totalorder %s4821_s24, 1 }
  0x11   : > { %s5825_s28 = scalar_select %p353_p1, %s5693_s22, %s355_s26  }
  0x12   : > { %p5827_p5 = por %p366_p2, %p365_p0  ;;  %p5831_p6 = por %p372_p4, %p371_p3 }
  0x13   : > { %p4824_p7 = scmp.ge.s32.totalorder %s5697_s23, 1  ;;  %p477_p8 = scmp.lt.s32.totalorder %s5697_s23, 3 }
  0x15   : > { %p478_p9 = pnand %p4824_p7, %p477_p8 }
  0x17   : > { %481 = sbr.rel (%p478_p9) target bundleno = 1872 (0x750), region = 76 }
  0x1e   : > { %s8562_s6 = sld [smem:[#allocation59_spill]]  ;;  %v8534_v2 = vmov 0.0   ;;  %s8563_s4 = sld [smem:[#allocation57_spill]]  ;;  %vm8543_vm0 = vmmov 0   ;;  %vm8544_vm1 = vcmask 261120   ;;  %v5701_v40 = vmov 0  }
  0x1f   : > { %4994 = vmatprep.subr.bf16.mxu0 %v8534_v2  ;;  %4998 = vmatprep.mubr.msk.bf16.mxu0 %vm8543_vm0, %v8534_v2  ;;  %p550_p10 = scmp.lt.s32.totalorder %s5810_s9, 1  ;;  %s4827_s18 = sshll.u32 %s5810_s9, 3  ;;  %vm8548_vm2 = vcmask 130048   ;;  %vm2857_vm3 = vcmask 130112   ;;  %vm2864_vm4 = vcmask 195712   ;;  %vm2871_vm5 = vcmask 261312  }
  0x20   : > { %p544_p11 = scmp.lt.s32.totalorder %s4827_s18, 15  ;;  %s8564_s1 = sld [smem:[#allocation55_spill]]  ;;  %5201 = vset.pattern.permute.xlu1 %v5701_v40  ;;  %5202 = vset.pattern.permute.xlu0 %v5701_v40  ;;  %vm2878_vm6 = vcmask 326912   ;;  %vm2885_vm7 = vcmask 392512   ;;  %vm2892_vm8 = vcmask 458112   ;;  %vm2899_vm9 = vcmask 523712  }
  0x21   : > { %s551_s17 = scalar_select %p550_p10, %s5810_s9, 1  ;;  %vm2906_vm10 = vcmask 589312   ;;  %vm2913_vm11 = vcmask 654912   ;;  %vm8549_vm12 = vcmask 720512   ;;  %vm8550_vm13 = vcmask 786112  }
  0x22   : > { %s8848_s18 = smov (!%p544_p11, %s4827_s18), 15  ;;  %s8565_s0 = sld [smem:[#allocation54_spill]]  ;;  %vm8551_vm14 = vcmask 851712   ;;  %vm2941_vm15 = vcmask 917312  }
  0x23   : > { %s5856_s19 = sshll.u32 %s551_s17, 3  ;;  %s4919_s27 = sshll.u32 %s8848_s18, 7 }
  0x24   : > { %v5203_v1 = vld [vmem:[%s8562_s6] sm:$0xff]   ;;  %v5205_v4 = vld [vmem:[%s8562_s6 + $0x8] sm:$0xff]   ;;  %s8569_s5 = sld [smem:[#allocation58_spill]]  ;;  %s8718_s2 = sld [smem:[#allocation56_spill]] }
  0x25   : > { %v5204_v3 = vld [vmem:[%s8563_s4] sm:$0xff]   ;;  %4995 = vmatpush3.bf16.msra.mxu0 %v5203_v1  ;;  %v5206_v5 = vld [vmem:[%s8563_s4 + $0x8] sm:$0xff]   ;;  %s5703_s26 = smov 112  }
  0x26   : > { %5148 = vmatprep.subr.bf16.mxu1 %v5204_v3  ;;  %4996 = vmatprep.subr.bf16.mxu0 %v8534_v2  ;;  %s553_s6 = scalar_lea.vmem %s8564_s1, %s5856_s19  ;;  %s5704_s1 = smov [#allocation3]  }
  0x27   : > { %5150 = vmatpush3.bf16.msra.mxu1 %v5204_v3  ;;  %v755_v6 = vld [vmem:[%s553_s6] sm:$0xff]  ;;  %s7821_s6 = sand.u32 1, %s5689_s21  }
  0x28   : > { %5149 = vmatprep.subr.bf16.mxu1 %v5206_v5  ;;  %v756_v7 = vpack.c.bf16 %v755_v6, %v755_v6  ;;  %s5866_s17 = scalar_lea.vmem %s8565_s0, %s4919_s27  ;;  %s8552_s18 = sshll.u32 %s7821_s6, 3 }
  0x29   : > { %4997 = vmatpush3.bf16.msra.mxu0 %v5205_v4  ;;  %v619_v8 = vld [vmem:[%s5866_s17 + $0x1c0] sm:$0xff]  ;;  %v620_v9 = vld [vmem:[%s5866_s17 + $0x1c8] sm:$0xff]  ;;  %v621_v10 = vld [vmem:[%s5866_s17 + $0x1d0] sm:$0xff]  ;;  %s7830_s24 = scalar_lea.vmem [#allocation3], %s8552_s18  ;;  %s4663_s18 = scalar_lea.sflag [#allocation4], %s7821_s6 }
  0x2a   : > { %5002 = vmatprep.subr.bf16.mxu0 %v5204_v3  ;;  %v719_v11 = vpack.c.bf16 %v620_v9, %v619_v8  ;;  %v622_v12 = vld [vmem:[%s5866_s17 + $0x1d8] sm:$0xff]  ;;  %v563_v13 = vld [vmem:[%s5866_s17] sm:$0xff]  ;;  %v564_v14 = vld [vmem:[%s5866_s17 + $0x8] sm:$0xff]  ;;  %s557_s4 = scalar_lea.vmem %s8718_s2, %s5856_s19  ;;  %s5607_s2 = sshll.u32 %s5704_s1, 4  ;;  %s5608_s2 = int_to_ptr.vmem [resolvable:$false] %s5607_s2 }
  0x2b   : > { %5151 = vmatpush3.bf16.msra.mxu1 %v5206_v5  ;;  %v720_v15 = vpack.c.bf16 %v622_v12, %v621_v10  ;;  %v691_v16 = vpack.c.bf16 %v564_v14, %v563_v13  ;;  %v565_v17 = vld [vmem:[%s5866_s17 + $0x10] sm:$0xff]  ;;  %v566_v18 = vld [vmem:[%s5866_s17 + $0x18] sm:$0xff]  ;;  %v623_v19 = vld [vmem:[%s5866_s17 + $0x1e0] sm:$0xff] }
  0x2c   : > { %4999 = vmatmul.mubr.msk.bf16.vlgmr.msra.gmra.mrb[0].mxu0 %vm8544_vm1, %v756_v7  ;;  %5062 = vmatprep.mubr.msk.bf16.mxu1 %vm8544_vm1, %v719_v11  ;;  %v692_v20 = vpack.c.bf16 %v566_v18, %v565_v17  ;;  %v624_v21 = vld [vmem:[%s5866_s17 + $0x1e8] sm:$0xff]  ;;  %v567_v23 = vld [vmem:[%s5866_s17 + $0x20] sm:$0xff]  ;;  %v625_v25 = vld [vmem:[%s5866_s17 + $0x1f0] sm:$0xff] }
  0x2d   : > { %5003 = vmatpush3.bf16.msra.mxu0 %v5204_v3  ;;  %v721_v22 = vpack.c.bf16 %v624_v21, %v623_v19  ;;  %v568_v24 = vld [vmem:[%s5866_s17 + $0x28] sm:$0xff]  ;;  %5006 = vmatprep.mubr.msk.bf16.mxu0 %vm8544_vm1, %v691_v16  ;;  %v626_v26 = vld [vmem:[%s5866_s17 + $0x1f8] sm:$0xff]  ;;  %v627_v28 = vld [vmem:[%s5866_s17 + $0x200] sm:$0xff] }
  0x2e   : > { %5004 = vmatprep.subr.bf16.mxu0 %v5206_v5  ;;  %5063 = vmatmul.mubr.msk.bf16.vlgmr.msra.gmra.mrb[0].mxu1 %vm8544_vm1, %v720_v15  ;;  %v693_v27 = vpack.c.bf16 %v568_v24, %v567_v23  ;;  %v628_v29 = vld [vmem:[%s5866_s17 + $0x208] sm:$0xff]  ;;  %v722_v30 = vpack.c.bf16 %v626_v26, %v625_v25  ;;  %v569_v31 = vld [vmem:[%s5866_s17 + $0x30] sm:$0xff]  ;;  %v570_v32 = vld [vmem:[%s5866_s17 + $0x38] sm:$0xff] }
  0x2f   : > { %5066 = vmatprep.mubr.msk.bf16.mxu1 %vm8544_vm1, %v721_v22  ;;  %v723_v33 = vpack.c.bf16 %v628_v29, %v627_v28  ;;  %v571_v34 = vld [vmem:[%s5866_s17 + $0x40] sm:$0xff]  ;;  %v572_v35 = vld [vmem:[%s5866_s17 + $0x48] sm:$0xff]  ;;  %v694_v36 = vpack.c.bf16 %v570_v32, %v569_v31  ;;  %v629_v38 = vld [vmem:[%s5866_s17 + $0x210] sm:$0xff] }
  0x30   : > { %v695_v37 = vpack.c.bf16 %v572_v35, %v571_v34  ;;  %v630_v39 = vld [vmem:[%s5866_s17 + $0x218] sm:$0xff]  ;;  %v631_v41 = vld [vmem:[%s5866_s17 + $0x220] sm:$0xff]  ;;  %v632_v42 = vld [vmem:[%s5866_s17 + $0x228] sm:$0xff] }
  0x31   : > { %5005 = vmatpush3.bf16.msra.mxu0 %v5206_v5  ;;  %v724_v43 = vpack.c.bf16 %v630_v39, %v629_v38  ;;  %v573_v44 = vld [vmem:[%s5866_s17 + $0x50] sm:$0xff]  ;;  %v574_v45 = vld [vmem:[%s5866_s17 + $0x58] sm:$0xff]  ;;  %v725_v46 = vpack.c.bf16 %v632_v42, %v631_v41  ;;  %v575_v47 = vld [vmem:[%s5866_s17 + $0x60] sm:$0xff] }
  0x32   : > { %5134 = vmatprep.subr.bf16.mxu0 %v8534_v2  ;;  %v576_v48 = vld [vmem:[%s5866_s17 + $0x68] sm:$0xff]  ;;  %v696_v49 = vpack.c.bf16 %v574_v45, %v573_v44  ;;  %v633_v51 = vld [vmem:[%s5866_s17 + $0x230] sm:$0xff]  ;;  %v634_v52 = vld [vmem:[%s5866_s17 + $0x238] sm:$0xff] }
  0x33   : > { %v697_v50 = vpack.c.bf16 %v576_v48, %v575_v47  ;;  %v635_v53 = vld [vmem:[%s5866_s17 + $0x240] sm:$0xff]  ;;  %v636_v54 = vld [vmem:[%s5866_s17 + $0x248] sm:$0xff]  ;;  %v726_v55 = vpack.c.bf16 %v634_v52, %v633_v51  ;;  %v577_v56 = vld [vmem:[%s5866_s17 + $0x70] sm:$0xff] }
  0x34   : > { %5007 = vmatmul.mubr.msk.bf16.vlgmr.msra.gmra.mrb[4].mxu0 %vm8544_vm1, %v692_v20  ;;  %v578_v57 = vld [vmem:[%s5866_s17 + $0x78] sm:$0xff]  ;;  %v727_v58 = vpack.c.bf16 %v636_v54, %v635_v53  ;;  %v579_v59 = vld [vmem:[%s5866_s17 + $0x80] sm:$0xff]  ;;  %v580_v60 = vld [vmem:[%s5866_s17 + $0x88] sm:$0xff] }
  0x35   : > { %5010 = vmatprep.mubr.msk.bf16.mxu0 %vm8544_vm1, %v693_v27  ;;  %v698_v61 = vpack.c.bf16 %v578_v57, %v577_v56  ;;  %v699_v62 = vpack.c.bf16 %v580_v60, %v579_v59  ;;  %v637_v63 = vld [vmem:[%s5866_s17 + $0x250] sm:$0xff]  ;;  %v638_v0 = vld [vmem:[%s5866_s17 + $0x258] sm:$0xff]  ;;  %v639_v1 = vld [vmem:[%s5866_s17 + $0x260] sm:$0xff] }
  0x36   : > { %5067 = vmatmul.mubr.msk.bf16.gmra.mrb[4].mxu1 %vm8544_vm1, %v722_v30  ;;  %v640_v3 = vld [vmem:[%s5866_s17 + $0x268] sm:$0xff]  ;;  %v728_v4 = vpack.c.bf16 %v638_v0, %v637_v63  ;;  %v581_v5 = vld [vmem:[%s5866_s17 + $0x90] sm:$0xff]  ;;  %v582_v6 = vld [vmem:[%s5866_s17 + $0x98] sm:$0xff] }
  0x37   : > { %5070 = vmatprep.mubr.msk.bf16.mxu1 %vm8544_vm1, %v723_v33  ;;  %v729_v7 = vpack.c.bf16 %v640_v3, %v639_v1  ;;  %v583_v8 = vld [vmem:[%s5866_s17 + $0xa0] sm:$0xff]  ;;  %v584_v9 = vld [vmem:[%s5866_s17 + $0xa8] sm:$0xff]  ;;  %v700_v10 = vpack.c.bf16 %v582_v6, %v581_v5  ;;  %v641_v12 = vld [vmem:[%s5866_s17 + $0x270] sm:$0xff] }
  0x38   : > { %v701_v11 = vpack.c.bf16 %v584_v9, %v583_v8  ;;  %v642_v13 = vld [vmem:[%s5866_s17 + $0x278] sm:$0xff]  ;;  %v643_v14 = vld [vmem:[%s5866_s17 + $0x280] sm:$0xff]  ;;  %v644_v15 = vld [vmem:[%s5866_s17 + $0x288] sm:$0xff] }
  0x39   : > { %v730_v16 = vpack.c.bf16 %v642_v13, %v641_v12  ;;  %v585_v17 = vld [vmem:[%s5866_s17 + $0xb0] sm:$0xff]  ;;  %v586_v18 = vld [vmem:[%s5866_s17 + $0xb8] sm:$0xff]  ;;  %v731_v19 = vpack.c.bf16 %v644_v15, %v643_v14  ;;  %v587_v20 = vld [vmem:[%s5866_s17 + $0xc0] sm:$0xff] }
  0x3a   : > { %v588_v21 = vld [vmem:[%s5866_s17 + $0xc8] sm:$0xff]  ;;  %v4905_v22 = vld [vmem:[#allocation2] ss:$0 sm:$0xff]  ;;  %v702_v23 = vpack.c.bf16 %v586_v18, %v585_v17  ;;  %v645_v25 = vld [vmem:[%s5866_s17 + $0x290] sm:$0xff] }
  0x3b   : > { %2585 = vperm.xlu1 %5201, %v4905_v22   ;;  %v703_v24 = vpack.c.bf16 %v588_v21, %v587_v20  ;;  %v646_v26 = vld [vmem:[%s5866_s17 + $0x298] sm:$0xff]  ;;  %v647_v27 = vld [vmem:[%s5866_s17 + $0x2a0] sm:$0xff]  ;;  %v648_v28 = vld [vmem:[%s5866_s17 + $0x2a8] sm:$0xff] }
  0x3c   : > { %5011 = vmatmul.mubr.msk.bf16.gmra.mrb[8].mxu0 %vm8544_vm1, %v694_v36  ;;  %v732_v29 = vpack.c.bf16 %v646_v26, %v645_v25  ;;  %v589_v30 = vld [vmem:[%s5866_s17 + $0xd0] sm:$0xff]  ;;  %v590_v31 = vld [vmem:[%s5866_s17 + $0xd8] sm:$0xff]  ;;  %v733_v32 = vpack.c.bf16 %v648_v28, %v647_v27  ;;  %v591_v33 = vld [vmem:[%s5866_s17 + $0xe0] sm:$0xff] }
  0x3d   : > { %5014 = vmatprep.mubr.msk.bf16.mxu0 %vm8544_vm1, %v695_v37  ;;  %v592_v34 = vld [vmem:[%s5866_s17 + $0xe8] sm:$0xff]  ;;  %v704_v35 = vpack.c.bf16 %v590_v31, %v589_v30  ;;  %v649_v37 = vld [vmem:[%s5866_s17 + $0x2b0] sm:$0xff]  ;;  %v650_v38 = vld [vmem:[%s5866_s17 + $0x2b8] sm:$0xff] }
  0x3e   : > { %5071 = vmatmul.mubr.msk.bf16.gmra.mrb[8].mxu1 %vm8544_vm1, %v724_v43  ;;  %v705_v36 = vpack.c.bf16 %v592_v34, %v591_v33  ;;  %v651_v39 = vld [vmem:[%s5866_s17 + $0x2c0] sm:$0xff]  ;;  %v652_v40 = vld [vmem:[%s5866_s17 + $0x2c8] sm:$0xff]  ;;  %v734_v41 = vpack.c.bf16 %v650_v38, %v649_v37  ;;  %v593_v42 = vld [vmem:[%s5866_s17 + $0xf0] sm:$0xff] }
  0x3f   : > { %5074 = vmatprep.mubr.msk.bf16.mxu1 %vm8544_vm1, %v725_v46  ;;  %v594_v43 = vld [vmem:[%s5866_s17 + $0xf8] sm:$0xff]  ;;  %v735_v44 = vpack.c.bf16 %v652_v40, %v651_v39  ;;  %v595_v45 = vld [vmem:[%s5866_s17 + $0x100] sm:$0xff]  ;;  %v596_v46 = vld [vmem:[%s5866_s17 + $0x108] sm:$0xff] }
  0x40   : > { %v706_v47 = vpack.c.bf16 %v594_v43, %v593_v42  ;;  %v707_v48 = vpack.c.bf16 %v596_v46, %v595_v45  ;;  %v655_v51 = vld [vmem:[%s5866_s17 + $0x2e0] sm:$0xff]  ;;  %v656_v52 = vld [vmem:[%s5866_s17 + $0x2e8] sm:$0xff]  ;;  %v597_v54 = vld [vmem:[%s5866_s17 + $0x110] sm:$0xff] }
  0x41   : > { %v737_v56 = vpack.c.bf16 %v656_v52, %v655_v51  ;;  %v599_v57 = vld [vmem:[%s5866_s17 + $0x120] sm:$0xff]  ;;  %v660_v0 = vld [vmem:[%s5866_s17 + $0x308] sm:$0xff]  ;;  %v601_v3 = vld [vmem:[%s5866_s17 + $0x130] sm:$0xff] }
  0x42   : > { %v659_v63 = vld [vmem:[%s5866_s17 + $0x300] sm:$0xff]  ;;  %v664_v13 = vld [vmem:[%s5866_s17 + $0x328] sm:$0xff]  ;;  %v605_v15 = vld [vmem:[%s5866_s17 + $0x150] sm:$0xff] }
  0x43   : > { %v739_v5 = vpack.c.bf16 %v660_v0, %v659_v63  ;;  %v603_v6 = vld [vmem:[%s5866_s17 + $0x140] sm:$0xff]  ;;  %v665_v22 = vld [vmem:[%s5866_s17 + $0x330] sm:$0xff]  ;;  %v668_v25 = vld [vmem:[%s5866_s17 + $0x348] sm:$0xff] }
  0x44   : > { %5015 = vmatmul.mubr.msk.bf16.gmra.mrb[12].mxu0 %vm8544_vm1, %v696_v49  ;;  %v653_v49 = vld [vmem:[%s5866_s17 + $0x2d0] sm:$0xff]  ;;  %v663_v12 = vld [vmem:[%s5866_s17 + $0x320] sm:$0xff]  ;;  %v610_v28 = vld [vmem:[%s5866_s17 + $0x178] sm:$0xff] }
  0x45   : > { %5018 = vmatprep.mubr.msk.bf16.mxu0 %vm8544_vm1, %v697_v50  ;;  %v654_v50 = vld [vmem:[%s5866_s17 + $0x2d8] sm:$0xff]  ;;  %v741_v17 = vpack.c.bf16 %v664_v13, %v663_v12  ;;  %v607_v18 = vld [vmem:[%s5866_s17 + $0x160] sm:$0xff]  ;;  %v609_v27 = vld [vmem:[%s5866_s17 + $0x170] sm:$0xff]  ;;  %v5702_v13 = vmov 1966171168  }
  0x46   : > { %5075 = vmatmul.mubr.msk.bf16.gmra.mrb[12].mxu1 %vm8544_vm1, %v726_v55  ;;  %v736_v53 = vpack.c.bf16 %v654_v50, %v653_v49  ;;  %v598_v55 = vld [vmem:[%s5866_s17 + $0x118] sm:$0xff]  ;;  %v611_v30 = vld [vmem:[%s5866_s17 + $0x180] sm:$0xff]  ;;  %v612_v31 = vld [vmem:[%s5866_s17 + $0x188] sm:$0xff] }
  0x47   : > { %5078 = vmatprep.mubr.msk.bf16.mxu1 %vm8544_vm1, %v727_v58  ;;  %v600_v58 = vld [vmem:[%s5866_s17 + $0x128] sm:$0xff]  ;;  %v708_v59 = vpack.c.bf16 %v598_v55, %v597_v54  ;;  %v715_v33 = vpack.c.bf16 %v612_v31, %v611_v30  ;;  %v669_v34 = vld [vmem:[%s5866_s17 + $0x350] sm:$0xff]  ;;  %v614_v40 = vld [vmem:[%s5866_s17 + $0x198] sm:$0xff] }
  0x48   : > { %v709_v60 = vpack.c.bf16 %v600_v58, %v599_v57  ;;  %v672_v37 = vld [vmem:[%s5866_s17 + $0x368] sm:$0xff]  ;;  %v613_v39 = vld [vmem:[%s5866_s17 + $0x190] sm:$0xff]  ;;  %v615_v42 = vld [vmem:[%s5866_s17 + $0x1a0] sm:$0xff] }
  0x49   : > { %v616_v43 = vld [vmem:[%s5866_s17 + $0x1a8] sm:$0xff]  ;;  %v673_v46 = vld [vmem:[%s5866_s17 + $0x370] sm:$0xff]  ;;  %v618_v52 = vld [vmem:[%s5866_s17 + $0x1b8] sm:$0xff] }
  0x4a   : > { %v717_v45 = vpack.c.bf16 %v616_v43, %v615_v42  ;;  %v676_v49 = vld [vmem:[%s5866_s17 + $0x388] sm:$0xff]  ;;  %v617_v51 = vld [vmem:[%s5866_s17 + $0x1b0] sm:$0xff]  ;;  %v679_v57 = vld [vmem:[%s5866_s17 + $0x3a0] sm:$0xff] }
  0x4b   : > { %v718_v54 = vpack.c.bf16 %v618_v52, %v617_v51  ;;  %v677_v55 = vld [vmem:[%s5866_s17 + $0x390] sm:$0xff]  ;;  %v680_v58 = vld [vmem:[%s5866_s17 + $0x3a8] sm:$0xff]  ;;  %v683_v63 = vld [vmem:[%s5866_s17 + $0x3c0] sm:$0xff] }
  0x4c   : > { %5019 = vmatmul.mubr.msk.bf16.gmra.mrb[16].mxu0 %vm8544_vm1, %v698_v61  ;;  %v657_v61 = vld [vmem:[%s5866_s17 + $0x2f0] sm:$0xff]  ;;  %v684_v0 = vld [vmem:[%s5866_s17 + $0x3c8] sm:$0xff] }
  0x4d   : > { %5022 = vmatprep.mubr.msk.bf16.mxu0 %vm8544_vm1, %v699_v62  ;;  %v658_v62 = vld [vmem:[%s5866_s17 + $0x2f8] sm:$0xff] }
  0x4e   : > { %5079 = vmatmul.mubr.msk.bf16.gmra.mrb[16].mxu1 %vm8544_vm1, %v728_v4  ;;  %v738_v1 = vpack.c.bf16 %v658_v62, %v657_v61  ;;  %v602_v4 = vld [vmem:[%s5866_s17 + $0x138] sm:$0xff]  ;;  %v681_v61 = vld [vmem:[%s5866_s17 + $0x3b0] sm:$0xff] }
  0x4f   : > { %5082 = vmatprep.mubr.msk.bf16.mxu1 %vm8544_vm1, %v729_v7  ;;  %v604_v7 = vld [vmem:[%s5866_s17 + $0x148] sm:$0xff]  ;;  %v710_v8 = vpack.c.bf16 %v602_v4, %v601_v3  ;;  %v682_v62 = vld [vmem:[%s5866_s17 + $0x3b8] sm:$0xff]  ;;  %v751_v3 = vpack.c.bf16 %v684_v0, %v683_v63  ;;  %v685_v4 = vld [vmem:[%s5866_s17 + $0x3d0] sm:$0xff] }
  0x50   : > { %v711_v9 = vpack.c.bf16 %v604_v7, %v603_v6  ;;  %v687_v6 = vld [vmem:[%s5866_s17 + $0x3e0] sm:$0xff]  ;;  %v688_v7 = vld [vmem:[%s5866_s17 + $0x3e8] sm:$0xff] }
  0x54   : > { %5023 = vmatmul.mubr.msk.bf16.gmra.mrb[20].mxu0 %vm8544_vm1, %v700_v10  ;;  %v661_v10 = vld [vmem:[%s5866_s17 + $0x310] sm:$0xff] }
  0x55   : > { %5026 = vmatprep.mubr.msk.bf16.mxu0 %vm8544_vm1, %v701_v11  ;;  %v662_v11 = vld [vmem:[%s5866_s17 + $0x318] sm:$0xff] }
  0x56   : > { %5083 = vmatmul.mubr.msk.bf16.gmra.mrb[20].mxu1 %vm8544_vm1, %v730_v16  ;;  %v740_v14 = vpack.c.bf16 %v662_v11, %v661_v10  ;;  %v606_v16 = vld [vmem:[%s5866_s17 + $0x158] sm:$0xff]  ;;  %v689_v10 = vld [vmem:[%s5866_s17 + $0x3f0] sm:$0xff] }
  0x57   : > { %5086 = vmatprep.mubr.msk.bf16.mxu1 %vm8544_vm1, %v731_v19  ;;  %v608_v19 = vld [vmem:[%s5866_s17 + $0x168] sm:$0xff]  ;;  %v712_v20 = vpack.c.bf16 %v606_v16, %v605_v15  ;;  %v690_v11 = vld [vmem:[%s5866_s17 + $0x3f8] sm:$0xff]  ;;  %v8536_v15 = vlaneseq }
  0x58   : > { %v713_v21 = vpack.c.bf16 %v608_v19, %v607_v18  ;;  %v754_v12 = vpack.c.bf16 %v690_v11, %v689_v10  ;;  %v4833_v18 = vld [vmem:[%s8525_s7] ss:$0 sm:$0xff] }
  0x5c   : > { %5027 = vmatmul.mubr.msk.bf16.gmra.mrb[24].mxu0 %vm8544_vm1, %v702_v23  ;;  %v666_v23 = vld [vmem:[%s5866_s17 + $0x338] sm:$0xff] }
  0x5d   : > { %5030 = vmatprep.mubr.msk.bf16.mxu0 %vm8544_vm1, %v703_v24  ;;  %v667_v24 = vld [vmem:[%s5866_s17 + $0x340] sm:$0xff]  ;;  %v742_v26 = vpack.c.bf16 %v666_v23, %v665_v22 }
  0x5e   : > { %5087 = vmatmul.mubr.msk.bf16.gmra.mrb[24].mxu1 %vm8544_vm1, %v732_v29  ;;  %v743_v29 = vpack.c.bf16 %v668_v25, %v667_v24 }
  0x5f   : > { %5090 = vmatprep.mubr.msk.bf16.mxu1 %vm8544_vm1, %v733_v32  ;;  %v714_v32 = vpack.c.bf16 %v610_v28, %v609_v27 }
  0x64   : > { %5031 = vmatmul.mubr.msk.bf16.gmra.mrb[28].mxu0 %vm8544_vm1, %v704_v35  ;;  %v670_v35 = vld [vmem:[%s5866_s17 + $0x358] sm:$0xff] }
  0x65   : > { %5034 = vmatprep.mubr.msk.bf16.mxu0 %vm8544_vm1, %v705_v36  ;;  %v671_v36 = vld [vmem:[%s5866_s17 + $0x360] sm:$0xff]  ;;  %v744_v38 = vpack.c.bf16 %v670_v35, %v669_v34 }
  0x66   : > { %5091 = vmatmul.mubr.msk.bf16.gmra.mrb[28].mxu1 %vm8544_vm1, %v734_v41  ;;  %v745_v41 = vpack.c.bf16 %v672_v37, %v671_v36  ;;  %v6085_v35 = vld [vmem:[%s8569_s5] ss:$0 sm:$0xff] }
  0x67   : > { %5094 = vmatprep.mubr.msk.bf16.mxu1 %vm8544_vm1, %v735_v44  ;;  %v716_v44 = vpack.c.bf16 %v614_v40, %v613_v39 }
  0x6c   : > { %5035 = vmatmul.mubr.msk.bf16.gmra.mrb[32].mxu0 %vm8544_vm1, %v706_v47  ;;  %v674_v47 = vld [vmem:[%s5866_s17 + $0x378] sm:$0xff] }
  0x6d   : > { %5038 = vmatprep.mubr.msk.bf16.mxu0 %vm8544_vm1, %v707_v48  ;;  %v675_v48 = vld [vmem:[%s5866_s17 + $0x380] sm:$0xff]  ;;  %v746_v50 = vpack.c.bf16 %v674_v47, %v673_v46 }
  0x6e   : > { %5095 = vmatmul.mubr.msk.bf16.gmra.mrb[32].mxu1 %vm8544_vm1, %v736_v53  ;;  %v747_v53 = vpack.c.bf16 %v676_v49, %v675_v48 }
  0x6f   : > { %5098 = vmatprep.mubr.msk.bf16.mxu1 %vm8544_vm1, %v737_v56  ;;  %v678_v56 = vld [vmem:[%s5866_s17 + $0x398] sm:$0xff] }
  0x74   : > { %5039 = vmatmul.mubr.msk.bf16.gmra.mrb[36].mxu0 %vm8544_vm1, %v708_v59  ;;  %v748_v59 = vpack.c.bf16 %v678_v56, %v677_v55 }
  0x75   : > { %5042 = vmatprep.mubr.msk.bf16.mxu0 %vm8544_vm1, %v709_v60  ;;  %v749_v60 = vpack.c.bf16 %v680_v58, %v679_v57 }
  0x76   : > { %5099 = vmatmul.mubr.msk.bf16.gmra.mrb[36].mxu1 %vm8544_vm1, %v738_v1  ;;  %v750_v1 = vpack.c.bf16 %v682_v62, %v681_v61 }
  0x77   : > { %5102 = vmatprep.mubr.msk.bf16.mxu1 %vm8544_vm1, %v739_v5  ;;  %v686_v5 = vld [vmem:[%s5866_s17 + $0x3d8] sm:$0xff] }
  0x7c   : > { %5043 = vmatmul.mubr.msk.bf16.gmra.mrb[40].mxu0 %vm8544_vm1, %v710_v8  ;;  %v752_v8 = vpack.c.bf16 %v686_v5, %v685_v4 }
  0x7d   : > { %5046 = vmatprep.mubr.msk.bf16.mxu0 %vm8544_vm1, %v711_v9  ;;  %v753_v9 = vpack.c.bf16 %v688_v7, %v687_v6 }
  0x7e   : > { %5103 = vmatmul.mubr.msk.bf16.gmra.mrb[40].mxu1 %vm8544_vm1, %v740_v14  ;;  %v1715_v14 = vunpack.c.l.s4 %v5702_v13  ;;  %v6130_v13 = vld [vmem:[%s8526_s8] ss:$0 sm:$0xff] }
  0x7f   : > { %5106 = vmatprep.mubr.msk.bf16.mxu1 %vm8544_vm1, %v741_v17  ;;  %v6064_v17 = vshrl.u32 %v8536_v15, 7 }
  0x80   : > { %v1716_v16 = vunpack.c.0.s8 %v1715_v14 }
  0x81   : > { %8566 = vst [vmem:[#allocation9_spill] sm:$0xff] %v6064_v17  ;;  %v6078_v31 = vsub.s32 0, %v6064_v17 }
  0x82   : > { %v1719_v19 = vsub.s32 %v1716_v16, %v6064_v17 }
  0x83   : > { %8568 = vst [vmem:[#allocation11_spill] sm:$0xff] %v6078_v31 }
  0x84   : > { %5047 = vmatmul.mubr.msk.bf16.gmra.mrb[44].mxu0 %vm8544_vm1, %v712_v20 }
  0x85   : > { %5050 = vmatprep.mubr.msk.bf16.mxu0 %vm8544_vm1, %v713_v21 }
  0x86   : > { %5107 = vmatmul.mubr.msk.bf16.gmra.mrb[44].mxu1 %vm8544_vm1, %v742_v26 }
  0x87   : > { %5110 = vmatprep.mubr.msk.bf16.mxu1 %vm8544_vm1, %v743_v29 }
  0x8c   : > { %5051 = vmatmul.mubr.msk.bf16.gmra.mrb[48].mxu0 %vm8544_vm1, %v714_v32 }
  0x8d   : > { %5054 = vmatprep.mubr.msk.bf16.mxu0 %vm8544_vm1, %v715_v33 }
  0x8e   : > { %5111 = vmatmul.mubr.msk.bf16.gmra.mrb[48].mxu1 %vm8544_vm1, %v744_v38 }
  0x8f   : > { %5114 = vmatprep.mubr.msk.bf16.mxu1 %vm8544_vm1, %v745_v41 }
  0x94   : > { %5055 = vmatmul.mubr.msk.bf16.gmra.mrb[52].mxu0 %vm8544_vm1, %v716_v44 }
  0x95   : > { %5058 = vmatprep.mubr.msk.bf16.mxu0 %vm8544_vm1, %v717_v45 }
  0x96   : > { %5115 = vmatmul.mubr.msk.bf16.gmra.mrb[52].mxu1 %vm8544_vm1, %v746_v50 }
  0x97   : > { %5118 = vmatprep.mubr.msk.bf16.mxu1 %vm8544_vm1, %v747_v53 }
  0x9c   : > { %5059 = vmatmul.mubr.msk.bf16.gmra.mrb[56].mxu0 %vm8544_vm1, %v718_v54 }
  0x9d   : > { %5138 = vmatprep.mubr.msk.bf16.mxu0 %vm8543_vm0, %v8534_v2  ;;  %vm2948_vm0 = vcmask 982912  }
  0x9e   : > { %5119 = vmatmul.mubr.msk.bf16.gmra.mrb[56].mxu1 %vm8544_vm1, %v748_v59 }
  0x9f   : > { %5122 = vmatprep.mubr.msk.bf16.mxu1 %vm8544_vm1, %v749_v60 }
  0xa6   : > { %5123 = vmatmul.mubr.msk.bf16.gmra.mrb[60].mxu1 %vm8544_vm1, %v750_v1 }
  0xa7   : > { %5126 = vmatprep.mubr.msk.bf16.mxu1 %vm8544_vm1, %v751_v3 }
  0xae   : > { %5127 = vmatmul.mubr.msk.bf16.gmra.mrb[64].mxu1 %vm8544_vm1, %v752_v8 }
  0xaf   : > { %5130 = vmatprep.mubr.msk.bf16.mxu1 %vm8544_vm1, %v753_v9 }
  0xb6   : > { %5131 = vmatmul.mubr.msk.bf16.gmra.mrb[68].mxu1 %vm8544_vm1, %v754_v12  ;;  %vm2955_vm1 = vcmask 1048512  }
  0xff   : > { %v818_v20 = vpop.f32.mrb[0].mxu0 }
 0x100   : > { %v6070_v21 = vadd.f32 %v4833_v18, %v818_v20  ;;  %v5000_v22 = vpop.f32.mrb[1].mxu0 }
 0x101   : > { %v821_v23 = vpop.f32.mrb[2].mxu0  ;;  %v5064_v29 = vpop.f32.mrb[0].mxu1 }
 0x102   : > { %8567 = vst [vmem:[#allocation10_spill] sm:$0xff] %v6070_v21  ;;  %v1713_v24 = vcombine.high %v6070_v21, %v6070_v21  ;;  %v1720_v25 = vrot.slane %v6070_v21, %v1719_v19  ;;  %v5001_v26 = vpop.f32.mrb[3].mxu0  ;;  %v1290_v32 = vpop.f32.mrb[1].mxu1  ;;  %v1642_v7 = vadd.f32 %v5064_v29, %v6085_v35 }
 0x103   : > { %v5065_v36 = vpop.f32.mrb[2].mxu1  ;;  %v1640_v52 = vadd.f32 %v6085_v35, %v1290_v32 }
 0x104   : > { %v1727_v27 = vrot.slane %v1713_v24, %v1719_v19  ;;  %v1728_v28 = vcombine.high %v1720_v25, %v1720_v25  ;;  %v6075_v30 = vrot.slane %v1720_v25, %v1719_v19  ;;  %v1293_v38 = vpop.f32.mrb[3].mxu1  ;;  %v1643_v25 = vadd.f32 %v5065_v36, %v6085_v35 }
 0x105   : > { %v1641_v58 = vadd.f32 %v6085_v35, %v1293_v38 }
 0x106   : > { %v1729_v33 = vcombine.high %v1727_v27, %v1727_v27  ;;  %v6080_v34 = vrot.slane %v1728_v28, %v1719_v19  ;;  %v6091_v41 = vrot.slane %v6075_v30, %v6078_v31  ;;  %v6109_v61 = vrot.slane %v1727_v27, %v1719_v19 }
 0x107   : > { %v5008_v37 = vpop.f32.mrb[4].mxu0 }
 0x108   : > { %v6087_v39 = vrot.slane %v1729_v33, %v1719_v19  ;;  %v1066_v40 = vpop.f32.mrb[5].mxu0  ;;  %v1586_v42 = vadd.f32 %v5008_v37, %v6085_v35  ;;  %v1760_v44 = vcombine.high %v6080_v34, %v6080_v34  ;;  %v6119_v6 = vrot.slane %v6109_v61, %v6078_v31 }
 0x109   : > { %v5009_v43 = vpop.f32.mrb[6].mxu0  ;;  %v1584_v47 = vadd.f32 %v6085_v35, %v1066_v40  ;;  %v5068_v48 = vpop.f32.mrb[4].mxu1  ;;  %v1758_v37 = vcombine.high %v6075_v30, %v6075_v30 }
 0x10a   : > { %v1069_v45 = vpop.f32.mrb[7].mxu0  ;;  %v1804_v46 = vadd.f32 %v6091_v41, %v1586_v42  ;;  %v1587_v49 = vadd.f32 %v5009_v43, %v6085_v35  ;;  %v1306_v50 = vpop.f32.mrb[5].mxu1  ;;  %v6100_v51 = vrot.slane %v1760_v44, %v6078_v31  ;;  %v1646_v38 = vadd.f32 %v5068_v48, %v6085_v35 }
 0x10b   : > { %v1802_v53 = vadd.f32 %v6091_v41, %v1584_v47  ;;  %v5069_v54 = vpop.f32.mrb[6].mxu1  ;;  %v1585_v40 = vadd.f32 %v6085_v35, %v1069_v45  ;;  %v1644_v30 = vadd.f32 %v6085_v35, %v1306_v50  ;;  %v6172_v50 = vrot.slane %v6080_v34, %v6078_v31 }
 0x10c   : > { %5210 = vtanh.f32 %v1804_v46  ;;  %8570 = vst [vmem:[#allocation12_spill] sm:$0xff] %v6100_v51  ;;  %v1647_v55 = vadd.f32 %v5069_v54, %v6085_v35  ;;  %v1309_v56 = vpop.f32.mrb[7].mxu1  ;;  %v1805_v59 = vadd.f32 %v6091_v41, %v1587_v49  ;;  %v1858_v63 = vadd.f32 %v6100_v51, %v1640_v52 }
 0x10d   : > { %5212 = vtanh.f32 %v1802_v53  ;;  %v1859_v4 = vadd.f32 %v6100_v51, %v1641_v58  ;;  %v1860_v22 = vadd.f32 %v6100_v51, %v1642_v7  ;;  %v1861_v49 = vadd.f32 %v6100_v51, %v1643_v25 }
 0x10e   : > { %v1865_v3 = vadd.f32 %v6100_v51, %v1647_v55  ;;  %5214 = vtanh.f32 %v1805_v59  ;;  %v1645_v52 = vadd.f32 %v6085_v35, %v1309_v56 }
 0x10f   : > { %v6105_v57 = vpop.f32.mrb[8].mxu0  ;;  %5216 = vtanh.f32 %v1858_v63  ;;  %v1864_v63 = vadd.f32 %v6100_v51, %v1646_v38 }
 0x110   : > { %v1082_v60 = vpop.f32.mrb[9].mxu0  ;;  %5218 = vtanh.f32 %v1865_v3  ;;  %v1590_v56 = vadd.f32 %v6105_v57, %v6085_v35  ;;  %v6184_v3 = vrot.slane %v6087_v39, %v6078_v31  ;;  %v1862_v57 = vadd.f32 %v6100_v51, %v1644_v30 }
 0x111   : > { %v6111_v62 = vpop.f32.mrb[10].mxu0  ;;  %v1588_v0 = vadd.f32 %v6085_v35, %v1082_v60  ;;  %v5072_v5 = vpop.f32.mrb[8].mxu1  ;;  %5220 = vtanh.f32 %v1859_v4  ;;  %v6175_v60 = vrot.slane %v1758_v37, %v6078_v31  ;;  %v1803_v4 = vadd.f32 %v6091_v41, %v1585_v40 }
 0x112   : > { %v1085_v1 = vpop.f32.mrb[11].mxu0  ;;  %v1650_v8 = vadd.f32 %v5072_v5, %v6085_v35  ;;  %v1322_v9 = vpop.f32.mrb[9].mxu1  ;;  %v1591_v38 = vadd.f32 %v6111_v62, %v6085_v35 }
 0x113   : > { %v1806_v10 = vadd.f32 %v6091_v41, %v1588_v0  ;;  %v1648_v11 = vadd.f32 %v6085_v35, %v1322_v9  ;;  %v6125_v12 = vpop.f32.mrb[10].mxu1  ;;  %v1589_v28 = vadd.f32 %v6085_v35, %v1085_v1 }
 0x114   : > { %v1868_v16 = vadd.f32 %v6119_v6, %v1650_v8  ;;  %v6133_v18 = vpop.f32.mrb[11].mxu1 }
 0x115   : > { %5222 = vtanh.f32 %v1806_v10  ;;  %v1866_v26 = vadd.f32 %v6119_v6, %v1648_v11  ;;  %v1807_v53 = vadd.f32 %v6091_v41, %v1589_v28 }
 0x116   : > { %v5211_v14 = vpop.eup %5210  ;;  %5224 = vtanh.f32 %v1868_v16 }
 0x117   : > { %v6135_v19 = vpop.f32.mrb[12].mxu0  ;;  %v2067_v24 = vmul.f32 %v5211_v14, %v6130_v13  ;;  %v5213_v33 = vpop.eup %5212  ;;  %5226 = vtanh.f32 %v1860_v22  ;;  %v1863_v14 = vadd.f32 %v6100_v51, %v1645_v52 }
 0x118   : > { %v1098_v20 = vpop.f32.mrb[13].mxu0  ;;  %v2065_v46 = vmul.f32 %v5213_v33, %v6130_v13  ;;  %v5215_v47 = vpop.eup %5214  ;;  %5228 = vtanh.f32 %v1866_v26 }
 0x119   : > { %v6138_v23 = vpop.f32.mrb[14].mxu0  ;;  %v2200_v29 = vsel %vm8548_vm2, %v2067_v24, 0.0  ;;  %v5076_v36 = vpop.f32.mrb[12].mxu1  ;;  %v1592_v42 = vadd.f32 %v6085_v35, %v1098_v20  ;;  %v2068_v7 = vmul.f32 %v5215_v47, %v6130_v13  ;;  %5230 = vtanh.f32 %v1861_v49 }
 0x11a   : > { %v1101_v27 = vpop.f32.mrb[15].mxu0  ;;  %2201 = vadd.xlane.f32.xlu0 %v2200_v29  ;;  %v6151_v43 = vpop.f32.mrb[13].mxu1  ;;  %v2194_v55 = vsel %vm8548_vm2, %v2065_v46, 0.0  ;;  %v1654_v9 = vadd.f32 %v5076_v36, %v6085_v35  ;;  %5232 = vtanh.f32 %v1807_v53  ;;  %v1808_v24 = vadd.f32 %v6091_v41, %v1590_v56 }
 0x11b   : > { %v1593_v32 = vadd.f32 %v6085_v35, %v1101_v27  ;;  %v6159_v48 = vpop.f32.mrb[14].mxu1  ;;  %v5217_v59 = vpop.eup %5216  ;;  %v1810_v34 = vadd.f32 %v6091_v41, %v1592_v42  ;;  %v2203_v16 = vsel %vm8548_vm2, %v2068_v7, 0.0  ;;  %5234 = vtanh.f32 %v1864_v63 }
 0x11c   : > { %v6165_v54 = vpop.f32.mrb[15].mxu1  ;;  %v5219_v1 = vpop.eup %5218  ;;  %v2121_v20 = vmul.f32 %v5217_v59, %v6130_v13  ;;  %v1595_v29 = vadd.f32 %v6138_v23, %v6085_v35  ;;  %v1872_v40 = vadd.f32 %v6119_v6, %v1654_v9  ;;  %v1651_v23 = vadd.f32 %v6125_v12, %v6085_v35 }
 0x11d   : > { %v6154_v44 = vadd.f32 %v6091_v41, %v1593_v32  ;;  %v5221_v8 = vpop.eup %5220  ;;  %v2128_v10 = vmul.f32 %v5219_v1, %v6130_v13  ;;  %5236 = vtanh.f32 %v1810_v34  ;;  %v1649_v53 = vadd.f32 %v6085_v35, %v6133_v18 }
 0x11e   : > { %2195 = vadd.xlane.f32.xlu0 %v2194_v55  ;;  %v2122_v37 = vmul.f32 %v5221_v8, %v6130_v13  ;;  %5238 = vtanh.f32 %v1862_v57  ;;  %v2362_v30 = vsel %vm8548_vm2, %v2121_v20, 0.0  ;;  %v1594_v55 = vadd.f32 %v6135_v19, %v6085_v35 }
 0x11f   : > { %v6168_v58 = vpop.f32.mrb[16].mxu0  ;;  %v5223_v22 = vpop.eup %5222  ;;  %v2383_v25 = vsel %vm8548_vm2, %v2128_v10, 0.0  ;;  %5240 = vtanh.f32 %v1803_v4  ;;  %v1813_v12 = vadd.f32 %v6091_v41, %v1595_v29  ;;  %v1653_v18 = vadd.f32 %v6085_v35, %v6165_v54 }
 0x120   : > { %v6180_v0 = vpop.f32.mrb[17].mxu0  ;;  %v5225_v28 = vpop.eup %5224  ;;  %2384 = vadd.xlane.f32.xlu1 %v2383_v25  ;;  %v2069_v33 = vmul.f32 %v5223_v22, %v6130_v13  ;;  %5242 = vtanh.f32 %v1863_v14  ;;  %v2365_v34 = vsel %vm8548_vm2, %v2122_v37, 0.0  ;;  %v6259_v37 = vadd.f32 %v6119_v6, %v1649_v53 }
 0x121   : > { %v6188_v5 = vpop.f32.mrb[18].mxu0  ;;  %v6199_v26 = vpop.f32.mrb[16].mxu1  ;;  %v2131_v59 = vmul.f32 %v5225_v28, %v6130_v13  ;;  %5244 = vtanh.f32 %v1872_v40  ;;  %v1598_v28 = vadd.f32 %v6168_v58, %v6085_v35  ;;  %v1871_v40 = vadd.f32 %v6119_v6, %v1653_v18 }
 0x122   : > { %v1117_v11 = vpop.f32.mrb[19].mxu0  ;;  %2204 = vadd.xlane.f32.xlu0 %v2203_v16  ;;  %v6204_v32 = vpop.f32.mrb[17].mxu1  ;;  %v2206_v49 = vsel %vm8548_vm2, %v2069_v33, 0.0  ;;  %5246 = vtanh.f32 %v1808_v24  ;;  %v1809_v16 = vadd.f32 %v6091_v41, %v1591_v38  ;;  %v6262_v38 = vadd.f32 %v6091_v41, %v1594_v55 }
 0x123   : > { %v1597_v27 = vadd.f32 %v6085_v35, %v1117_v11  ;;  %v6211_v36 = vpop.f32.mrb[18].mxu1  ;;  %v5227_v46 = vpop.eup %5226  ;;  %v2392_v54 = vsel %vm8548_vm2, %v2131_v59, 0.0  ;;  %5248 = vtanh.f32 %v1813_v12  ;;  %v1816_v18 = vadd.f32 %v6091_v41, %v1598_v28 }
 0x124   : > { %v6218_v47 = vpop.f32.mrb[19].mxu1  ;;  %v5229_v62 = vpop.eup %5228  ;;  %2207 = vadd.xlane.f32.xlu1 %v2206_v49  ;;  %v2123_v8 = vmul.f32 %v5227_v46, %v6130_v13  ;;  %5250 = vtanh.f32 %v1871_v40  ;;  %v1658_v40 = vadd.f32 %v6199_v26, %v6085_v35 }
 0x125   : > { %v6214_v42 = vadd.f32 %v6091_v41, %v1597_v27  ;;  %v2129_v11 = vmul.f32 %v5229_v62, %v6130_v13  ;;  %v5231_v14 = vpop.eup %5230  ;;  %v6251_v27 = vadd.f32 %v6119_v6, %v1651_v23  ;;  %5252 = vtanh.f32 %v1809_v16 }
 0x126   : > { %2363 = vadd.xlane.f32.xlu0 %v2362_v30  ;;  %v5233_v25 = vpop.eup %5232  ;;  %v2368_v62 = vsel %vm8548_vm2, %v2123_v8, 0.0  ;;  %v2124_v53 = vmul.f32 %v5231_v14, %v6130_v13  ;;  %5254 = vtanh.f32 %v1816_v18 }
 0x127   : > { %v5024_v52 = vpop.f32.mrb[20].mxu0  ;;  %v5235_v33 = vpop.eup %5234 }
 0x128   : > { %v1130_v63 = vpop.f32.mrb[21].mxu0  ;;  %v1602_v56 = vadd.f32 %v5024_v52, %v6085_v35  ;;  %2393 = vadd.xlane.f32.xlu1 %v2392_v54  ;;  %v5237_v49 = vpop.eup %5236  ;;  %v2386_v52 = vsel %vm8548_vm2, %v2129_v11, 0.0 }
 0x129   : > { %v1600_v1 = vadd.f32 %v6085_v35, %v1130_v63  ;;  %v5025_v4 = vpop.f32.mrb[22].mxu0  ;;  %v6245_v20 = vpop.f32.mrb[20].mxu1 }
 0x12a   : > { %v1603_v19 = vadd.f32 %v5025_v4, %v6085_v35  ;;  %v1133_v7 = vpop.f32.mrb[23].mxu0  ;;  %v6236_v57 = vadd.f32 %v6172_v50, %v1602_v56  ;;  %2366 = vadd.xlane.f32.xlu0 %v2365_v34  ;;  %v1370_v24 = vpop.f32.mrb[21].mxu1  ;;  %v2070_v56 = vmul.f32 %v5233_v25, %v6130_v13 }
 0x12b   : > { %v6239_v9 = vadd.f32 %v6172_v50, %v1600_v1  ;;  %v1601_v10 = vadd.f32 %v6085_v35, %v1133_v7  ;;  %v1660_v46 = vadd.f32 %v6085_v35, %v1370_v24  ;;  %v5085_v23 = vpop.f32.mrb[22].mxu1  ;;  %v5239_v63 = vpop.eup %5238 }
 0x12c   : > { %v6248_v22 = vadd.f32 %v6172_v50, %v1603_v19  ;;  %v1663_v58 = vadd.f32 %v5085_v23, %v6085_v35  ;;  %v1373_v30 = vpop.f32.mrb[23].mxu1  ;;  %v6276_v34 = vpop.eup %5240  ;;  %v1596_v19 = vadd.f32 %v6085_v35, %v6180_v0  ;;  %2387 = vadd.xlane.f32.xlu1 %v2386_v52  ;;  %v2073_v0 = vmul.f32 %v5237_v49, %v6130_v13 }
 0x12d   : > { %v6256_v29 = vadd.f32 %v6172_v50, %v1601_v10  ;;  %v6271_v55 = vadd.f32 %v6119_v6, %v1660_v46  ;;  %v1661_v12 = vadd.f32 %v6085_v35, %v1373_v30  ;;  %v6285_v11 = vpop.eup %5242  ;;  %v2371_v46 = vsel %vm8548_vm2, %v2124_v53, 0.0 }
 0x12e   : > { %2369 = vadd.xlane.f32.xlu0 %v2368_v62  ;;  %v6282_v7 = vadd.f32 %v6119_v6, %v1663_v58  ;;  %v5245_v58 = vpop.eup %5244  ;;  %v2209_v30 = vsel %vm8548_vm2, %v2070_v56, 0.0  ;;  %v6315_v56 = vadd.f32 %v6085_v35, %v6151_v43  ;;  %v2218_v26 = vsel %vm8548_vm2, %v2073_v0, 0.0 }
 0x12f   : > { %v5028_v59 = vpop.f32.mrb[24].mxu0  ;;  %v6288_v14 = vadd.f32 %v6119_v6, %v1661_v12  ;;  %v6311_v16 = vpop.eup %5246  ;;  %v2127_v43 = vmul.f32 %v5235_v33, %v6130_v13  ;;  %v2135_v0 = vmul.f32 %v5245_v58, %v6130_v13 }
 0x130   : > { %v1606_v1 = vadd.f32 %v5028_v59, %v6085_v35  ;;  %v1146_v4 = vpop.f32.mrb[25].mxu0  ;;  %v2125_v59 = vmul.f32 %v5239_v63, %v6130_v13  ;;  %2210 = vadd.xlane.f32.xlu1 %v2209_v30  ;;  %v5249_v18 = vpop.eup %5248 }
 0x131   : > { %v1604_v8 = vadd.f32 %v6085_v35, %v1146_v4  ;;  %v5029_v10 = vpop.f32.mrb[26].mxu0  ;;  %v5088_v52 = vpop.f32.mrb[24].mxu1 }
 0x132   : > { %v6291_v54 = vadd.f32 %v6172_v50, %v1606_v1  ;;  %v1607_v25 = vadd.f32 %v5029_v10, %v6085_v35  ;;  %v1149_v28 = vpop.f32.mrb[27].mxu0  ;;  %2372 = vadd.xlane.f32.xlu0 %v2371_v46  ;;  %v1666_v49 = vadd.f32 %v5088_v52, %v6085_v35  ;;  %v1386_v53 = vpop.f32.mrb[25].mxu1  ;;  %v1814_v1 = vadd.f32 %v6091_v41, %v1596_v19 }
 0x133   : > { %v6296_v24 = vadd.f32 %v6172_v50, %v1604_v8  ;;  %v1605_v23 = vadd.f32 %v6085_v35, %v1149_v28  ;;  %v1664_v63 = vadd.f32 %v6085_v35, %v1386_v53  ;;  %v5089_v4 = vpop.f32.mrb[26].mxu1  ;;  %v2374_v28 = vsel %vm8548_vm2, %v2125_v59, 0.0 }
 0x134   : > { %v6302_v62 = vadd.f32 %v6172_v50, %v1607_v25  ;;  %v6321_v8 = vadd.f32 %v6184_v3, %v1666_v49  ;;  %v1667_v10 = vadd.f32 %v5089_v4, %v6085_v35  ;;  %v1389_v25 = vpop.f32.mrb[27].mxu1  ;;  %v1876_v49 = vadd.f32 %v6119_v6, %v1658_v40  ;;  %2219 = vadd.xlane.f32.xlu1 %v2218_v26 }
 0x135   : > { %v6309_v12 = vadd.f32 %v6172_v50, %v1605_v23  ;;  %v6327_v23 = vadd.f32 %v6184_v3, %v1664_v63  ;;  %v1665_v19 = vadd.f32 %v6085_v35, %v1389_v25  ;;  %v1656_v53 = vadd.f32 %v6085_v35, %v6204_v32 }
 0x136   : > { %2375 = vadd.xlane.f32.xlu0 %v2374_v28  ;;  %v6336_v59 = vadd.f32 %v6184_v3, %v1667_v10  ;;  %v2076_v40 = vmul.f32 %v5249_v18, %v6130_v13  ;;  %5256 = vtanh.f32 %v1814_v1  ;;  %v2380_v26 = vsel %vm8548_vm2, %v2127_v43, 0.0  ;;  %v5251_v1 = vpop.eup %5250 }
 0x137   : > { %v5032_v46 = vpop.f32.mrb[28].mxu0  ;;  %v6340_v4 = vadd.f32 %v6184_v3, %v1665_v19  ;;  %5258 = vtanh.f32 %v6251_v27  ;;  %v2066_v18 = vmul.f32 %v6276_v34, %v6130_v13 }
 0x138   : > { %v1610_v30 = vadd.f32 %v5032_v46, %v6085_v35  ;;  %v1162_v52 = vpop.f32.mrb[29].mxu0  ;;  %v2404_v46 = vsel %vm8548_vm2, %v2135_v0, 0.0  ;;  %5260 = vtanh.f32 %v1876_v49  ;;  %v5253_v0 = vpop.eup %5252  ;;  %v2227_v49 = vsel %vm8548_vm2, %v2076_v40, 0.0 }
 0x139   : > { %v1608_v33 = vadd.f32 %v6085_v35, %v1162_v52  ;;  %v5033_v63 = vpop.f32.mrb[30].mxu0  ;;  %v5092_v19 = vpop.f32.mrb[28].mxu1  ;;  %v1599_v52 = vadd.f32 %v6188_v5, %v6085_v35  ;;  %2405 = vadd.xlane.f32.xlu1 %v2404_v46  ;;  %5262 = vtanh.f32 %v6259_v37  ;;  %v2126_v37 = vmul.f32 %v6285_v11, %v6130_v13 }
 0x13a   : > { %v6343_v58 = vadd.f32 %v6172_v50, %v1610_v30  ;;  %v1611_v25 = vadd.f32 %v5033_v63, %v6085_v35  ;;  %v1165_v28 = vpop.f32.mrb[31].mxu0  ;;  %2381 = vadd.xlane.f32.xlu0 %v2380_v26  ;;  %v1670_v43 = vadd.f32 %v5092_v19, %v6085_v35  ;;  %v1874_v63 = vadd.f32 %v6119_v6, %v1656_v53 }
 0x13b   : > { %v6348_v32 = vadd.f32 %v6172_v50, %v1608_v33  ;;  %v1609_v10 = vadd.f32 %v6085_v35, %v1165_v28  ;;  %v1402_v33 = vpop.f32.mrb[29].mxu1  ;;  %v5255_v28 = vpop.eup %5254  ;;  %v2134_v40 = vmul.f32 %v5251_v1, %v6130_v13 }
 0x13c   : > { %v6355_v30 = vadd.f32 %v6172_v50, %v1611_v25  ;;  %v1668_v25 = vadd.f32 %v6085_v35, %v1402_v33  ;;  %v5093_v34 = vpop.f32.mrb[30].mxu1  ;;  %v6370_v5 = vadd.f32 %v6184_v3, %v1670_v43  ;;  %5264 = vtanh.f32 %v1874_v63 }
 0x13d   : > { %v6363_v27 = vadd.f32 %v6172_v50, %v1609_v10  ;;  %v1671_v26 = vadd.f32 %v5093_v34, %v6085_v35  ;;  %v1405_v46 = vpop.f32.mrb[31].mxu1  ;;  %v2197_v10 = vsel %vm8548_vm2, %v2066_v18, 0.0  ;;  %v1870_v34 = vadd.f32 %v6119_v6, %v6315_v56  ;;  %2228 = vadd.xlane.f32.xlu1 %v2227_v49 }
 0x13e   : > { %v6377_v53 = vadd.f32 %v6184_v3, %v1668_v25  ;;  %v1669_v33 = vadd.f32 %v6085_v35, %v1405_v46  ;;  %2198 = vadd.xlane.f32.xlu0 %v2197_v10  ;;  %v1817_v18 = vadd.f32 %v6091_v41, %v1599_v52  ;;  %v2079_v56 = vmul.f32 %v5255_v28, %v6130_v13 }
 0x13f   : > { %v5036_v19 = vpop.f32.mrb[32].mxu0  ;;  %v6386_v15 = vadd.f32 %v6184_v3, %v1671_v26  ;;  %v2377_v52 = vsel %vm8548_vm2, %v2126_v37, 0.0  ;;  %5266 = vtanh.f32 %v6262_v38  ;;  %v2401_v49 = vsel %vm8548_vm2, %v2134_v40, 0.0 }
 0x140   : > { %v1614_v43 = vadd.f32 %v5036_v19, %v6085_v35  ;;  %v1178_v2 = vpop.f32.mrb[33].mxu0  ;;  %v6390_v46 = vadd.f32 %v6184_v3, %v1669_v33  ;;  %v2071_v28 = vmul.f32 %v6311_v16, %v6130_v13  ;;  %v5257_v63 = vpop.eup %5256  ;;  %5268 = vtanh.f32 %v1817_v18 }
 0x141   : > { %v1612_v11 = vadd.f32 %v6085_v35, %v1178_v2  ;;  %v5037_v25 = vpop.f32.mrb[34].mxu0  ;;  %v5096_v26 = vpop.f32.mrb[32].mxu1  ;;  %2402 = vadd.xlane.f32.xlu1 %v2401_v49  ;;  %5270 = vtanh.f32 %v1870_v34  ;;  %v2236_v18 = vsel %vm8548_vm2, %v2079_v56, 0.0  ;;  %v2072_v34 = vmul.f32 %v5253_v0, %v6130_v13 }
 0x142   : > { %v6393_v1 = vadd.f32 %v6172_v50, %v1614_v43  ;;  %v1615_v10 = vadd.f32 %v5037_v25, %v6085_v35  ;;  %v1181_v19 = vpop.f32.mrb[35].mxu0  ;;  %2378 = vadd.xlane.f32.xlu0 %v2377_v52  ;;  %v1659_v43 = vadd.f32 %v6211_v36, %v6085_v35  ;;  %v1674_v37 = vadd.f32 %v5096_v26, %v6085_v35  ;;  %v5259_v40 = vpop.eup %5258 }
 0x143   : > { %v6398_v41 = vadd.f32 %v6172_v50, %v1612_v11  ;;  %v1613_v2 = vadd.f32 %v6085_v35, %v1181_v19  ;;  %v1418_v11 = vpop.f32.mrb[33].mxu1  ;;  %v1655_v25 = vadd.f32 %v6159_v48, %v6085_v35  ;;  %v5261_v19 = vpop.eup %5260  ;;  %v2077_v56 = vmul.f32 %v5257_v63, %v6130_v13 }
 0x144   : > { %v6405_v33 = vadd.f32 %v6172_v50, %v1615_v10  ;;  %v1672_v10 = vadd.f32 %v6085_v35, %v1418_v11  ;;  %v5097_v16 = vpop.f32.mrb[34].mxu1  ;;  %v6420_v36 = vadd.f32 %v6184_v3, %v1674_v37  ;;  %v5263_v26 = vpop.eup %5262  ;;  %5272 = vtanh.f32 %v6214_v42 }
 0x145   : > { %v6413_v38 = vadd.f32 %v6172_v50, %v1613_v2  ;;  %v1675_v52 = vadd.f32 %v5097_v16, %v6085_v35  ;;  %v1421_v49 = vpop.f32.mrb[35].mxu1  ;;  %v2212_v50 = vsel %vm8548_vm2, %v2071_v28, 0.0  ;;  %v1877_v16 = vadd.f32 %v6119_v6, %v1659_v43  ;;  %2237 = vadd.xlane.f32.xlu1 %v2236_v18 }
 0x146   : > { %v6426_v48 = vadd.f32 %v6184_v3, %v1672_v10  ;;  %v1673_v11 = vadd.f32 %v6085_v35, %v1421_v49  ;;  %2213 = vadd.xlane.f32.xlu0 %v2212_v50  ;;  %v1657_v28 = vadd.f32 %v6085_v35, %v6218_v47  ;;  %v2139_v43 = vmul.f32 %v5261_v19, %v6130_v13 }
 0x147   : > { %v5040_v2 = vpop.f32.mrb[36].mxu0  ;;  %v6435_v21 = vadd.f32 %v6184_v3, %v1675_v52  ;;  %v2215_v18 = vsel %vm8548_vm2, %v2072_v34, 0.0  ;;  %v1873_v52 = vadd.f32 %v6119_v6, %v1655_v25  ;;  %v2132_v19 = vmul.f32 %v5259_v40, %v6130_v13 }
 0x148   : > { %v1618_v37 = vadd.f32 %v5040_v2, %v6085_v35  ;;  %v1194_v45 = vpop.f32.mrb[37].mxu0  ;;  %v6439_v49 = vadd.f32 %v6184_v3, %v1673_v11  ;;  %v2230_v11 = vsel %vm8548_vm2, %v2077_v56, 0.0  ;;  %5274 = vtanh.f32 %v1877_v16 }
 0x149   : > { %v1616_v0 = vadd.f32 %v6085_v35, %v1194_v45  ;;  %v5041_v10 = vpop.f32.mrb[38].mxu0  ;;  %v1662_v42 = vadd.f32 %v6245_v20, %v6085_v35  ;;  %2231 = vadd.xlane.f32.xlu1 %v2230_v11  ;;  %5276 = vtanh.f32 %v6154_v44  ;;  %v2416_v16 = vsel %vm8548_vm2, %v2139_v43, 0.0 }
 0x14a   : > { %8571 = vst [vmem:[#allocation13_spill] sm:$0xff] %v6439_v49  ;;  %v6442_v63 = vadd.f32 %v6175_v60, %v1618_v37  ;;  %v1619_v50 = vadd.f32 %v5041_v10, %v6085_v35  ;;  %v1197_v2 = vpop.f32.mrb[39].mxu0  ;;  %v5100_v37 = vpop.f32.mrb[36].mxu1  ;;  %2216 = vadd.xlane.f32.xlu0 %v2215_v18  ;;  %5278 = vtanh.f32 %v1873_v52 }
 0x14b   : > { %v6448_v47 = vadd.f32 %v6175_v60, %v1616_v0  ;;  %v1617_v45 = vadd.f32 %v6085_v35, %v1197_v2  ;;  %v5265_v10 = vpop.eup %5264  ;;  %v1678_v34 = vadd.f32 %v5100_v37, %v6085_v35  ;;  %v1434_v0 = vpop.f32.mrb[37].mxu1 }
 0x14c   : > { %8572 = vst [vmem:[#allocation14_spill] sm:$0xff] %v6442_v63  ;;  %v6455_v17 = vadd.f32 %v6175_v60, %v1619_v50  ;;  %v5267_v56 = vpop.eup %5266  ;;  %v1875_v50 = vadd.f32 %v6119_v6, %v1657_v28  ;;  %v1676_v2 = vadd.f32 %v6085_v35, %v1434_v0  ;;  %v5101_v40 = vpop.f32.mrb[38].mxu1  ;;  %v2137_v43 = vmul.f32 %v5265_v10, %v6130_v13 }
 0x14d   : > { %8573 = vst [vmem:[#allocation15_spill] sm:$0xff] %v6448_v47  ;;  %v6462_v25 = vadd.f32 %v6175_v60, %v1617_v45  ;;  %v5269_v18 = vpop.eup %5268  ;;  %v6469_v20 = vadd.f32 %v6184_v3, %v1678_v34  ;;  %v1679_v11 = vadd.f32 %v5101_v40, %v6085_v35  ;;  %v1437_v37 = vpop.f32.mrb[39].mxu1  ;;  %v2395_v45 = vsel %vm8548_vm2, %v2132_v19, 0.0  ;;  %2417 = vadd.xlane.f32.xlu1 %v2416_v16 }
 0x14e   : > { %v2130_v47 = vmul.f32 %v5263_v26, %v6130_v13  ;;  %v5271_v44 = vpop.eup %5270  ;;  %v6475_v28 = vadd.f32 %v6184_v3, %v1676_v2  ;;  %v1677_v0 = vadd.f32 %v6085_v35, %v1437_v37  ;;  %2396 = vadd.xlane.f32.xlu0 %v2395_v45  ;;  %v1880_v40 = vadd.f32 %v6119_v6, %v1662_v42 }
 0x14f   : > { %v5044_v51 = vpop.f32.mrb[40].mxu0  ;;  %v6482_v19 = vadd.f32 %v6184_v3, %v1679_v11  ;;  %v2080_v52 = vmul.f32 %v5269_v18, %v6130_v13  ;;  %5280 = vtanh.f32 %v1875_v50  ;;  %v2410_v16 = vsel %vm8548_vm2, %v2137_v43, 0.0  ;;  %v5273_v45 = vpop.eup %5272 }
 0x150   : > { %v1622_v34 = vadd.f32 %v5044_v51, %v6085_v35  ;;  %v1210_v63 = vpop.f32.mrb[41].mxu0  ;;  %v6486_v2 = vadd.f32 %v6184_v3, %v1677_v0  ;;  %v2389_v42 = vsel %vm8548_vm2, %v2130_v47, 0.0  ;;  %v8574_v50 = vcombine.high %v6109_v61, %v6109_v61 }
 0x151   : > { %v1620_v26 = vadd.f32 %v6085_v35, %v1210_v63  ;;  %v5045_v49 = vpop.f32.mrb[42].mxu0  ;;  %v5104_v3 = vpop.f32.mrb[40].mxu1  ;;  %5282 = vtanh.f32 %v6236_v57  ;;  %2411 = vadd.xlane.f32.xlu1 %v2410_v16 }
 0x152   : > { %v6489_v37 = vadd.f32 %v6175_v60, %v1622_v34  ;;  %v1623_v10 = vadd.f32 %v5045_v49, %v6085_v35  ;;  %v1213_v51 = vpop.f32.mrb[43].mxu0  ;;  %2390 = vadd.xlane.f32.xlu0 %v2389_v42  ;;  %v2075_v49 = vmul.f32 %v5267_v56, %v6130_v13  ;;  %v6507_v18 = vrot.slane %v8574_v50, %v6078_v31  ;;  %v1450_v0 = vpop.f32.mrb[41].mxu1 }
 0x153   : > { %v6494_v6 = vadd.f32 %v6175_v60, %v1620_v26  ;;  %v1621_v63 = vadd.f32 %v6085_v35, %v1213_v51  ;;  %v1682_v47 = vadd.f32 %v5104_v3, %v6085_v35  ;;  %5284 = vtanh.f32 %v1880_v40  ;;  %v5105_v56 = vpop.f32.mrb[42].mxu1 }
 0x154   : > { %v6500_v11 = vadd.f32 %v6175_v60, %v1623_v10  ;;  %v1680_v34 = vadd.f32 %v6085_v35, %v1450_v0  ;;  %v2239_v26 = vsel %vm8548_vm2, %v2080_v52, 0.0  ;;  %v5275_v10 = vpop.eup %5274  ;;  %v1683_v51 = vadd.f32 %v5105_v56, %v6085_v35  ;;  %v1453_v57 = vpop.f32.mrb[43].mxu1 }
 0x155   : > { %v6512_v43 = vadd.f32 %v6175_v60, %v1621_v63  ;;  %v6517_v61 = vadd.f32 %v6507_v18, %v1682_v47  ;;  %v2224_v42 = vsel %vm8548_vm2, %v2075_v49, 0.0  ;;  %v2133_v3 = vmul.f32 %v5271_v44, %v6130_v13  ;;  %v5277_v63 = vpop.eup %5276  ;;  %2240 = vadd.xlane.f32.xlu1 %v2239_v26 }
 0x156   : > { %v6523_v40 = vadd.f32 %v6507_v18, %v1680_v34  ;;  %v1681_v50 = vadd.f32 %v6085_v35, %v1453_v57  ;;  %2225 = vadd.xlane.f32.xlu0 %v2224_v42  ;;  %v2078_v52 = vmul.f32 %v5273_v45, %v6130_v13  ;;  %5286 = vtanh.f32 %v6282_v7 }
 0x157   : > { %8575 = vst [vmem:[#allocation16_spill] sm:$0xff] %v6512_v43  ;;  %8576 = vst [vmem:[#allocation17_spill] sm:$0xff] %v6517_v61  ;;  %v5048_v16 = vpop.f32.mrb[44].mxu0  ;;  %v6530_v56 = vadd.f32 %v6507_v18, %v1683_v51  ;;  %v5279_v43 = vpop.eup %5278  ;;  %5288 = vtanh.f32 %v6239_v9  ;;  %v2398_v26 = vsel %vm8548_vm2, %v2133_v3, 0.0 }
 0x158   : > { %8577 = vst [vmem:[#allocation18_spill] sm:$0xff] %v6523_v40  ;;  %v1626_v47 = vadd.f32 %v5048_v16, %v6085_v35  ;;  %v1226_v0 = vpop.f32.mrb[45].mxu0  ;;  %v6534_v34 = vadd.f32 %v6507_v18, %v1681_v50  ;;  %v2140_v16 = vmul.f32 %v5275_v10, %v6130_v13  ;;  %v2233_v50 = vsel %vm8548_vm2, %v2078_v52, 0.0 }
 0x159   : > { %v1624_v44 = vadd.f32 %v6085_v35, %v1226_v0  ;;  %v5049_v49 = vpop.f32.mrb[46].mxu0  ;;  %v5108_v0 = vpop.f32.mrb[44].mxu1  ;;  %5290 = vtanh.f32 %v6248_v22  ;;  %2234 = vadd.xlane.f32.xlu1 %v2233_v50 }
 0x15a   : > { %v6537_v57 = vadd.f32 %v6175_v60, %v1626_v47  ;;  %v1627_v45 = vadd.f32 %v5049_v49, %v6085_v35  ;;  %v1229_v42 = vpop.f32.mrb[47].mxu0  ;;  %2399 = vadd.xlane.f32.xlu0 %v2398_v26  ;;  %v2074_v49 = vmul.f32 %v5277_v63, %v6130_v13  ;;  %v5281_v10 = vpop.eup %5280  ;;  %v1686_v9 = vadd.f32 %v5108_v0, %v6085_v35 }
 0x15b   : > { %v6543_v7 = vadd.f32 %v6175_v60, %v1624_v44  ;;  %v1625_v51 = vadd.f32 %v6085_v35, %v1229_v42  ;;  %v1466_v44 = vpop.f32.mrb[45].mxu1  ;;  %5292 = vtanh.f32 %v6296_v24  ;;  %v5283_v26 = vpop.eup %5282 }
 0x15c   : > { %v6549_v47 = vadd.f32 %v6175_v60, %v1627_v45  ;;  %v1684_v52 = vadd.f32 %v6085_v35, %v1466_v44  ;;  %v5109_v42 = vpop.f32.mrb[46].mxu1  ;;  %v2419_v45 = vsel %vm8548_vm2, %v2140_v16, 0.0  ;;  %v6561_v63 = vadd.f32 %v6507_v18, %v1686_v9 }
 0x15d   : > { %8578 = vst [vmem:[#allocation19_spill] sm:$0xff] %v6543_v7  ;;  %v6555_v3 = vadd.f32 %v6175_v60, %v1625_v51  ;;  %v1687_v22 = vadd.f32 %v5109_v42, %v6085_v35  ;;  %v1469_v50 = vpop.f32.mrb[47].mxu1  ;;  %v2221_v0 = vsel %vm8548_vm2, %v2074_v49, 0.0  ;;  %v2136_v51 = vmul.f32 %v5279_v43, %v6130_v13  ;;  %2420 = vadd.xlane.f32.xlu1 %v2419_v45 }
 0x15e   : > { %v6567_v24 = vadd.f32 %v6507_v18, %v1684_v52  ;;  %v1685_v44 = vadd.f32 %v6085_v35, %v1469_v50  ;;  %2222 = vadd.xlane.f32.xlu0 %v2221_v0  ;;  %v2138_v16 = vmul.f32 %v5281_v10, %v6130_v13  ;;  %5294 = vtanh.f32 %v6327_v23 }
 0x15f   : > { %8579 = vst [vmem:[#allocation20_spill] sm:$0xff] %v6555_v3  ;;  %v5052_v7 = vpop.f32.mrb[48].mxu0  ;;  %v5285_v3 = vpop.eup %5284  ;;  %v6573_v42 = vadd.f32 %v6507_v18, %v1687_v22  ;;  %5296 = vtanh.f32 %v6271_v55 }
 0x160   : > { %8580 = vst [vmem:[#allocation21_spill] sm:$0xff] %v6567_v24  ;;  %v1630_v9 = vadd.f32 %v5052_v7, %v6085_v35  ;;  %v1242_v40 = vpop.f32.mrb[49].mxu0  ;;  %v6578_v43 = vadd.f32 %v6507_v18, %v1685_v44  ;;  %v5287_v7 = vpop.eup %5286  ;;  %v2413_v23 = vsel %vm8548_vm2, %v2138_v16, 0.0  ;;  %5298 = vtanh.f32 %v6256_v29 }
 0x161   : > { %v1628_v49 = vadd.f32 %v6085_v35, %v1242_v40  ;;  %v5053_v61 = vpop.f32.mrb[50].mxu0  ;;  %v2407_v40 = vsel %vm8548_vm2, %v2136_v51, 0.0  ;;  %v5112_v0 = vpop.f32.mrb[48].mxu1  ;;  %2414 = vadd.xlane.f32.xlu1 %v2413_v23  ;;  %5300 = vtanh.f32 %v6309_v12 }
 0x162   : > { %v6581_v52 = vadd.f32 %v6175_v60, %v1630_v9  ;;  %v1631_v10 = vadd.f32 %v5053_v61, %v6085_v35  ;;  %v1245_v50 = vpop.f32.mrb[51].mxu0  ;;  %2408 = vadd.xlane.f32.xlu0 %v2407_v40  ;;  %v2083_v61 = vmul.f32 %v5283_v26, %v6130_v13  ;;  %v2143_v9 = vmul.f32 %v5285_v3, %v6130_v13  ;;  %v5289_v24 = vpop.eup %5288 }
 0x163   : > { %v6586_v22 = vadd.f32 %v6175_v60, %v1628_v49  ;;  %v1629_v45 = vadd.f32 %v6085_v35, %v1245_v50  ;;  %v1690_v55 = vadd.f32 %v5112_v0, %v6085_v35  ;;  %v1482_v51 = vpop.f32.mrb[49].mxu1  ;;  %v5291_v50 = vpop.eup %5290  ;;  %v2144_v0 = vmul.f32 %v5287_v7, %v6130_v13 }
 0x164   : > { %v6592_v44 = vadd.f32 %v6175_v60, %v1631_v10  ;;  %v1688_v16 = vadd.f32 %v6085_v35, %v1482_v51  ;;  %v5113_v10 = vpop.f32.mrb[50].mxu1  ;;  %v2428_v29 = vsel %vm8548_vm2, %v2143_v9, 0.0  ;;  %v2248_v51 = vsel %vm8548_vm2, %v2083_v61, 0.0 }
 0x165   : > { %v6599_v49 = vadd.f32 %v6175_v60, %v1629_v45  ;;  %v6604_v26 = vadd.f32 %v6507_v18, %v1690_v55  ;;  %v1691_v3 = vadd.f32 %v5113_v10, %v6085_v35  ;;  %v1485_v40 = vpop.f32.mrb[51].mxu1  ;;  %v5293_v60 = vpop.eup %5292  ;;  %v2081_v55 = vmul.f32 %v5289_v24, %v6130_v13  ;;  %2249 = vadd.xlane.f32.xlu1 %v2248_v51 }
 0x166   : > { %v6612_v45 = vadd.f32 %v6507_v18, %v1688_v16  ;;  %v1689_v12 = vadd.f32 %v6085_v35, %v1485_v40  ;;  %2429 = vadd.xlane.f32.xlu0 %v2428_v29  ;;  %5302 = vtanh.f32 %v6343_v58  ;;  %v2431_v35 = vsel %vm8548_vm2, %v2144_v0, 0.0  ;;  %v6639_v58 = vld [vmem:[%s8569_s5] ss:$0 sm:$0xff]  ;;  %s5609_s5 = scalar_lea.vmem %s5608_s2, 256 }
 0x167   : > { %8581 = vst [vmem:[#allocation22_spill] sm:$0xff] %v6599_v49  ;;  %v6608_v23 = vpop.f32.mrb[52].mxu0  ;;  %v6620_v10 = vadd.f32 %v6507_v18, %v1691_v3  ;;  %5304 = vtanh.f32 %v6288_v14  ;;  %v2242_v61 = vsel %vm8548_vm2, %v2081_v55, 0.0  ;;  %v2084_v3 = vmul.f32 %v5291_v50, %v6130_v13 }
 0x168   : > { %v6617_v49 = vpop.f32.mrb[53].mxu0  ;;  %v6626_v7 = vadd.f32 %v6507_v18, %v1689_v12  ;;  %v5295_v24 = vpop.eup %5294  ;;  %v2085_v29 = vmul.f32 %v5293_v60, %v6130_v13  ;;  %5306 = vtanh.f32 %v6291_v54 }
 0x169   : > { %v6622_v9 = vpop.f32.mrb[54].mxu0  ;;  %v5116_v40 = vpop.f32.mrb[52].mxu1  ;;  %2243 = vadd.xlane.f32.xlu1 %v2242_v61  ;;  %5308 = vtanh.f32 %v6348_v32 }
 0x16a   : > { %8582 = vst [vmem:[#allocation23_spill] sm:$0xff] %v6622_v9  ;;  %8583 = vst [vmem:[#allocation24_spill] sm:$0xff] %v6626_v7  ;;  %v6628_v16 = vpop.f32.mrb[55].mxu0  ;;  %2432 = vadd.xlane.f32.xlu0 %v2431_v35  ;;  %v5297_v51 = vpop.eup %5296  ;;  %v1694_v14 = vadd.f32 %v6639_v58, %v5116_v40  ;;  %v2254_v61 = vsel %vm8548_vm2, %v2085_v29, 0.0  ;;  %v2145_v9 = vmul.f32 %v5295_v24, %v6130_v13  ;;  %5310 = vtanh.f32 %v6370_v5 }
 0x16b   : > { %8584 = vst [vmem:[#allocation25_spill] sm:$0xff] %v6628_v16  ;;  %v1498_v0 = vpop.f32.mrb[53].mxu1  ;;  %v5299_v50 = vpop.eup %5298  ;;  %v1761_v29 = vcombine.high %v6087_v39, %v6087_v39  ;;  %5312 = vtanh.f32 %v6321_v8 }
 0x16c   : > { %v1692_v12 = vadd.f32 %v6639_v58, %v1498_v0  ;;  %v5117_v55 = vpop.f32.mrb[54].mxu1  ;;  %v6645_v60 = vadd.f32 %v6507_v18, %v1694_v14  ;;  %v5301_v40 = vpop.eup %5300  ;;  %v2251_v0 = vsel %vm8548_vm2, %v2084_v3, 0.0  ;;  %v2141_v14 = vmul.f32 %v5297_v51, %v6130_v13 }
 0x16d   : > { %v1695_v54 = vadd.f32 %v6639_v58, %v5117_v55  ;;  %v1501_v35 = vpop.f32.mrb[55].mxu1  ;;  %2252 = vadd.xlane.f32.xlu1 %v2251_v0  ;;  %v2434_v13 = vsel %vm8548_vm2, %v2145_v9, 0.0  ;;  %5314 = vtanh.f32 %v6302_v62 }
 0x16e   : > { %8585 = vst [vmem:[#allocation26_spill] sm:$0xff] %v6645_v60  ;;  %v6653_v7 = vadd.f32 %v6507_v18, %v1692_v12  ;;  %v1693_v32 = vadd.f32 %v6639_v58, %v1501_v35  ;;  %2255 = vadd.xlane.f32.xlu0 %v2254_v61  ;;  %v2422_v39 = vsel %vm8548_vm2, %v2141_v14, 0.0  ;;  %5316 = vtanh.f32 %v6377_v53 }
 0x16f   : > { %v6649_v16 = vpop.f32.mrb[56].mxu0  ;;  %v6663_v55 = vadd.f32 %v6507_v18, %v1695_v54  ;;  %v6679_v54 = vld [vmem:[%s8526_s8] ss:$0 sm:$0xff]  ;;  %5318 = vtanh.f32 %v6355_v30 }
 0x170   : > { %v6658_v60 = vpop.f32.mrb[57].mxu0  ;;  %v6669_v12 = vadd.f32 %v6507_v18, %v1693_v32  ;;  %v5303_v51 = vpop.eup %5302  ;;  %v2082_v5 = vmul.f32 %v6679_v54, %v5299_v50  ;;  %v2086_v18 = vmul.f32 %v6679_v54, %v5301_v40  ;;  %v6684_v32 = vrot.slane %v1761_v29, %v6078_v31 }
 0x171   : > { %v6665_v24 = vpop.f32.mrb[58].mxu0  ;;  %v5120_v35 = vpop.f32.mrb[56].mxu1  ;;  %2423 = vadd.xlane.f32.xlu1 %v2422_v39  ;;  %v2091_v62 = vmul.f32 %v6679_v54, %v5303_v51  ;;  %5320 = vtanh.f32 %v6336_v59 }
 0x172   : > { %8586 = vst [vmem:[#allocation27_spill] sm:$0xff] %v6665_v24  ;;  %v6671_v3 = vpop.f32.mrb[59].mxu0  ;;  %2435 = vadd.xlane.f32.xlu0 %v2434_v13  ;;  %v5305_v61 = vpop.eup %5304  ;;  %v1698_v8 = vadd.f32 %v6639_v58, %v5120_v35  ;;  %v2257_v29 = vsel %vm8548_vm2, %v2086_v18, 0.0  ;;  %5322 = vtanh.f32 %v6340_v4 }
 0x173   : > { %v1514_v9 = vpop.f32.mrb[57].mxu1  ;;  %v5307_v13 = vpop.eup %5306  ;;  %v2142_v31 = vmul.f32 %v6679_v54, %v5305_v61  ;;  %v2272_v51 = vsel %vm8548_vm2, %v2091_v62, 0.0  ;;  %5324 = vtanh.f32 %v6363_v27 }
 0x174   : > { %v1696_v0 = vadd.f32 %v6639_v58, %v1514_v9  ;;  %v5121_v14 = vpop.f32.mrb[58].mxu1  ;;  %v6691_v50 = vadd.f32 %v6684_v32, %v1698_v8  ;;  %v5309_v39 = vpop.eup %5308  ;;  %v2245_v9 = vsel %vm8548_vm2, %v2082_v5, 0.0  ;;  %v2087_v61 = vmul.f32 %v6679_v54, %v5307_v13 }
 0x175   : > { %v1699_v40 = vadd.f32 %v6639_v58, %v5121_v14  ;;  %v1517_v24 = vpop.f32.mrb[59].mxu1  ;;  %2246 = vadd.xlane.f32.xlu1 %v2245_v9  ;;  %v2425_v5 = vsel %vm8548_vm2, %v2142_v31, 0.0  ;;  %5326 = vtanh.f32 %v6386_v15 }
 0x176   : > { %v6697_v35 = vadd.f32 %v6684_v32, %v1696_v0  ;;  %v1697_v53 = vadd.f32 %v6639_v58, %v1517_v24  ;;  %2258 = vadd.xlane.f32.xlu0 %v2257_v29  ;;  %v2089_v24 = vmul.f32 %v6679_v54, %v5309_v39  ;;  %v5311_v0 = vpop.eup %5310  ;;  %5328 = vtanh.f32 %v6469_v20 }
 0x177   : > { %v6703_v8 = vadd.f32 %v6684_v32, %v1699_v40  ;;  %v5313_v40 = vpop.eup %5312  ;;  %v2151_v4 = vmul.f32 %v6679_v54, %v5311_v0  ;;  %5330 = vtanh.f32 %v6390_v46 }
 0x178   : > { %v6707_v18 = vadd.f32 %v6684_v32, %v1697_v53  ;;  %v5315_v39 = vpop.eup %5314  ;;  %v2266_v13 = vsel %vm8548_vm2, %v2089_v24, 0.0  ;;  %5332 = vtanh.f32 %v6455_v17 }
 0x179   : > { %v5124_v14 = vpop.f32.mrb[60].mxu1  ;;  %2426 = vadd.xlane.f32.xlu1 %v2425_v5  ;;  %v2452_v0 = vsel %vm8548_vm2, %v2151_v4, 0.0  ;;  %5334 = vtanh.f32 %v6393_v1 }
 0x17a   : > { %2273 = vadd.xlane.f32.xlu0 %v2272_v51  ;;  %v1702_v30 = vadd.f32 %v6639_v58, %v5124_v14  ;;  %v1530_v29 = vpop.f32.mrb[61].mxu1  ;;  %v5317_v51 = vpop.eup %5316  ;;  %v2260_v14 = vsel %vm8548_vm2, %v2087_v61, 0.0  ;;  %5336 = vtanh.f32 %v6462_v25 }
 0x17b   : > { %v1700_v59 = vadd.f32 %v6639_v58, %v1530_v29  ;;  %v5125_v62 = vpop.f32.mrb[62].mxu1  ;;  %v2147_v29 = vmul.f32 %v6679_v54, %v5313_v40  ;;  %v2088_v40 = vmul.f32 %v6679_v54, %v5315_v39  ;;  %5338 = vtanh.f32 %v6398_v41 }
 0x17c   : > { %v6719_v53 = vadd.f32 %v6684_v32, %v1702_v30  ;;  %v1703_v31 = vadd.f32 %v6639_v58, %v5125_v62  ;;  %v1533_v9 = vpop.f32.mrb[63].mxu1  ;;  %v5319_v62 = vpop.eup %5318  ;;  %5340 = vtanh.f32 %v6486_v2 }
 0x17d   : > { %v6725_v5 = vadd.f32 %v6684_v32, %v1700_v59  ;;  %v1701_v27 = vadd.f32 %v6639_v58, %v1533_v9  ;;  %2261 = vadd.xlane.f32.xlu1 %v2260_v14  ;;  %v2149_v59 = vmul.f32 %v6679_v54, %v5317_v51  ;;  %v2440_v61 = vsel %vm8548_vm2, %v2147_v29, 0.0 }
 0x17e   : > { %2267 = vadd.xlane.f32.xlu0 %v2266_v13  ;;  %v6731_v30 = vadd.f32 %v6684_v32, %v1703_v31  ;;  %v5321_v31 = vpop.eup %5320  ;;  %v2092_v46 = vmul.f32 %v6679_v54, %v5319_v62  ;;  %5342 = vtanh.f32 %v6420_v36 }
 0x17f   : > { %v6735_v24 = vadd.f32 %v6684_v32, %v1701_v27  ;;  %v5323_v51 = vpop.eup %5322  ;;  %v2446_v39 = vsel %vm8548_vm2, %v2149_v59, 0.0  ;;  %5344 = vtanh.f32 %v6494_v6 }
 0x180   : > { %v2275_v62 = vsel %vm8548_vm2, %v2092_v46, 0.0  ;;  %5346 = vtanh.f32 %v6426_v48 }
 0x181   : > { %v5128_v9 = vpop.f32.mrb[64].mxu1  ;;  %2441 = vadd.xlane.f32.xlu1 %v2440_v61  ;;  %5348 = vtanh.f32 %v6500_v11 }
 0x182   : > { %2453 = vadd.xlane.f32.xlu0 %v2452_v0  ;;  %v1706_v15 = vadd.f32 %v6639_v58, %v5128_v9  ;;  %v1546_v13 = vpop.f32.mrb[65].mxu1  ;;  %v5325_v0 = vpop.eup %5324  ;;  %v2263_v9 = vsel %vm8548_vm2, %v2088_v40, 0.0  ;;  %5350 = vtanh.f32 %v6405_v33 }
 0x183   : > { %v1704_v20 = vadd.f32 %v6639_v58, %v1546_v13  ;;  %v5129_v4 = vpop.f32.mrb[66].mxu1  ;;  %v2148_v13 = vmul.f32 %v6679_v54, %v5321_v31  ;;  %v2146_v31 = vmul.f32 %v6679_v54, %v5323_v51  ;;  %5352 = vtanh.f32 %v6530_v56 }
 0x184   : > { %v6747_v27 = vadd.f32 %v6684_v32, %v1706_v15  ;;  %v1707_v14 = vadd.f32 %v6639_v58, %v5129_v4  ;;  %v1549_v29 = vpop.f32.mrb[67].mxu1  ;;  %v5327_v4 = vpop.eup %5326  ;;  %5354 = vtanh.f32 %v6413_v38 }
 0x185   : > { %v6753_v61 = vadd.f32 %v6684_v32, %v1704_v20  ;;  %v1705_v17 = vadd.f32 %v6639_v58, %v1549_v29  ;;  %2264 = vadd.xlane.f32.xlu1 %v2263_v9  ;;  %v2090_v20 = vmul.f32 %v6679_v54, %v5325_v0  ;;  %v2443_v40 = vsel %vm8548_vm2, %v2148_v13, 0.0 }
 0x186   : > { %2447 = vadd.xlane.f32.xlu0 %v2446_v39  ;;  %v6759_v15 = vadd.f32 %v6684_v32, %v1707_v14  ;;  %v5329_v14 = vpop.eup %5328  ;;  %v2152_v41 = vmul.f32 %v6679_v54, %v5327_v4  ;;  %5356 = vtanh.f32 %v6534_v34 }
 0x187   : > { %8587 = vst [vmem:[#allocation28_spill] sm:$0xff] %v6753_v61  ;;  %v6763_v59 = vadd.f32 %v6684_v32, %v1705_v17  ;;  %v5331_v0 = vpop.eup %5330  ;;  %v2269_v51 = vsel %vm8548_vm2, %v2090_v20, 0.0  ;;  %5358 = vtanh.f32 %v6435_v21 }
 0x188   : > { %v2455_v4 = vsel %vm8548_vm2, %v2152_v41, 0.0  ;;  %5360 = vtanh.f32 %v6537_v57 }
 0x189   : > { %8588 = vst [vmem:[#allocation29_spill] sm:$0xff] %v6763_v59  ;;  %v5132_v29 = vpop.f32.mrb[68].mxu1  ;;  %2444 = vadd.xlane.f32.xlu1 %v2443_v40 }
 0x18a   : > { %2276 = vadd.xlane.f32.xlu0 %v2275_v62  ;;  %v1710_v1 = vadd.f32 %v6639_v58, %v5132_v29  ;;  %v1562_v39 = vpop.f32.mrb[69].mxu1  ;;  %v5333_v62 = vpop.eup %5332  ;;  %v2437_v29 = vsel %vm8548_vm2, %v2146_v31, 0.0 }
 0x18b   : > { %v1708_v25 = vadd.f32 %v6639_v58, %v1562_v39  ;;  %v5133_v46 = vpop.f32.mrb[70].mxu1  ;;  %v2159_v39 = vmul.f32 %v6679_v54, %v5329_v14  ;;  %v2100_v14 = vmul.f32 %v6679_v54, %v5333_v62 }
 0x18c   : > { %v6775_v17 = vadd.f32 %v6684_v32, %v1710_v1  ;;  %v1711_v9 = vadd.f32 %v6639_v58, %v5133_v46  ;;  %v1565_v13 = vpop.f32.mrb[71].mxu1  ;;  %v5335_v46 = vpop.eup %5334 }
 0x18d   : > { %v6781_v40 = vadd.f32 %v6684_v32, %v1708_v25  ;;  %v1709_v2 = vadd.f32 %v6639_v58, %v1565_v13  ;;  %2438 = vadd.xlane.f32.xlu1 %v2437_v29  ;;  %v2150_v25 = vmul.f32 %v6679_v54, %v5331_v0  ;;  %v2476_v31 = vsel %vm8548_vm2, %v2159_v39, 0.0 }
 0x18e   : > { %8589 = vst [vmem:[#allocation30_spill] sm:$0xff] %v6775_v17  ;;  %2270 = vadd.xlane.f32.xlu0 %v2269_v51  ;;  %v6787_v1 = vadd.f32 %v6684_v32, %v1711_v9  ;;  %v5337_v9 = vpop.eup %5336  ;;  %v2095_v6 = vmul.f32 %v6679_v54, %v5335_v46  ;;  %v2299_v0 = vsel %vm8548_vm2, %v2100_v14, 0.0 }
 0x18f   : > { %v6791_v20 = vadd.f32 %v6684_v32, %v1709_v2  ;;  %v5339_v36 = vpop.eup %5338  ;;  %v2449_v32 = vsel %vm8548_vm2, %v2150_v25, 0.0  ;;  %v2098_v51 = vmul.f32 %v6679_v54, %v5337_v9 }
 0x190   : > { %v5341_v13 = vpop.eup %5340  ;;  %v2284_v48 = vsel %vm8548_vm2, %v2095_v6, 0.0  ;;  %v2093_v41 = vmul.f32 %v6679_v54, %v5339_v36 }
 0x191   : > { %8590 = vst [vmem:[#allocation31_spill] sm:$0xff] %v6791_v20  ;;  %2477 = vadd.xlane.f32.xlu1 %v2476_v31  ;;  %v5343_v11 = vpop.eup %5342  ;;  %v2293_v62 = vsel %vm8548_vm2, %v2098_v51, 0.0  ;;  %v2158_v2 = vmul.f32 %v6679_v54, %v5341_v13 }
 0x192   : > { %2456 = vadd.xlane.f32.xlu0 %v2455_v4  ;;  %v5345_v29 = vpop.eup %5344  ;;  %v2278_v33 = vsel %vm8548_vm2, %v2093_v41, 0.0  ;;  %v2155_v56 = vmul.f32 %v6679_v54, %v5343_v11  ;;  %v8592_v41 = vld [vmem:[#allocation14_spill] sm:$0xff] }
 0x193   : > { %v5347_v39 = vpop.eup %5346  ;;  %v2473_v4 = vsel %vm8548_vm2, %v2158_v2, 0.0  ;;  %v2101_v25 = vmul.f32 %v6679_v54, %v5345_v29 }
 0x194   : > { %v5349_v46 = vpop.eup %5348  ;;  %v2464_v38 = vsel %vm8548_vm2, %v2155_v56, 0.0  ;;  %v2153_v34 = vmul.f32 %v6679_v54, %v5347_v39  ;;  %v8593_v39 = vld [vmem:[#allocation15_spill] sm:$0xff] }
 0x195   : > { %2300 = vadd.xlane.f32.xlu1 %v2299_v0  ;;  %v5351_v31 = vpop.eup %5350  ;;  %v2302_v14 = vsel %vm8548_vm2, %v2101_v25, 0.0  ;;  %v2104_v9 = vmul.f32 %v6679_v54, %v5349_v46 }
 0x196   : > { %2450 = vadd.xlane.f32.xlu0 %v2449_v32  ;;  %v5353_v36 = vpop.eup %5352  ;;  %v8591_v32 = vld [vmem:[#allocation13_spill] sm:$0xff]  ;;  %v2458_v21 = vsel %vm8548_vm2, %v2153_v34, 0.0  ;;  %v2096_v57 = vmul.f32 %v6679_v54, %v5351_v31 }
 0x197   : > { %5362 = vtanh.f32 %v8591_v32  ;;  %v5355_v6 = vpop.eup %5354  ;;  %v2311_v13 = vsel %vm8548_vm2, %v2104_v9, 0.0  ;;  %v2164_v0 = vmul.f32 %v6679_v54, %v5353_v36 }
 0x198   : > { %5364 = vtanh.f32 %v6561_v63  ;;  %v5357_v51 = vpop.eup %5356  ;;  %v2287_v63 = vsel %vm8548_vm2, %v2096_v57, 0.0  ;;  %v2094_v11 = vmul.f32 %v6679_v54, %v5355_v6 }
 0x199   : > { %2294 = vadd.xlane.f32.xlu1 %v2293_v62  ;;  %5366 = vtanh.f32 %v8592_v41  ;;  %v5359_v62 = vpop.eup %5358  ;;  %v2491_v2 = vsel %vm8548_vm2, %v2164_v0, 0.0  ;;  %v2162_v29 = vmul.f32 %v6679_v54, %v5357_v51 }
 0x19a   : > { %2285 = vadd.xlane.f32.xlu0 %v2284_v48  ;;  %5368 = vtanh.f32 %v6549_v47  ;;  %v2281_v47 = vsel %vm8548_vm2, %v2094_v11, 0.0  ;;  %v2156_v25 = vmul.f32 %v6679_v54, %v5359_v62 }
 0x19b   : > { %5370 = vtanh.f32 %v8593_v39 }
 0x19c   : > { %5372 = vtanh.f32 %v6573_v42  ;;  %v2467_v42 = vsel %vm8548_vm2, %v2156_v25, 0.0 }
 0x19d   : > { %2474 = vadd.xlane.f32.xlu1 %v2473_v4  ;;  %v6839_v4 = vpop.permute.xlu1 %2585  ;;  %5374 = vtanh.f32 %v6475_v28 }
 0x19e   : > { %2279 = vadd.xlane.f32.xlu0 %v2278_v33  ;;  %v5361_v33 = vpop.eup %5360  ;;  %5376 = vtanh.f32 %v6578_v43 }
 0x19f   : > { %v2107_v34 = vmul.f32 %v6679_v54, %v5361_v33  ;;  %5378 = vtanh.f32 %v6482_v19 }
 0x1a0   : > { %5380 = vtanh.f32 %v6581_v52 }
 0x1a1   : > { %2303 = vadd.xlane.f32.xlu1 %v2302_v14  ;;  %v5363_v46 = vpop.eup %5362  ;;  %5382 = vtanh.f32 %v6489_v37 }
 0x1a2   : > { %2465 = vadd.xlane.f32.xlu0 %v2464_v38  ;;  %v2485_v38 = vsel %vm8548_vm2, %v2162_v29, 0.0  ;;  %v5365_v31 = vpop.eup %5364  ;;  %v2154_v36 = vmul.f32 %v6679_v54, %v5363_v46  ;;  %5384 = vtanh.f32 %v6586_v22  ;;  %v8598_v46 = vld [vmem:[#allocation17_spill] sm:$0xff] }
 0x1a3   : > { %v5367_v32 = vpop.eup %5366  ;;  %v2167_v57 = vmul.f32 %v6679_v54, %v5365_v31  ;;  %5386 = vtanh.f32 %v8598_v46 }
 0x1a4   : > { %v5369_v6 = vpop.eup %5368  ;;  %v2461_v43 = vsel %vm8548_vm2, %v2154_v36, 0.0  ;;  %v2099_v0 = vmul.f32 %v6679_v54, %v5367_v32  ;;  %5388 = vtanh.f32 %v6604_v26  ;;  %v8601_v26 = vld [vmem:[#allocation16_spill] sm:$0xff] }
 0x1a5   : > { %2312 = vadd.xlane.f32.xlu1 %v2311_v13  ;;  %v5371_v51 = vpop.eup %5370  ;;  %v2500_v41 = vsel %vm8548_vm2, %v2167_v57, 0.0  ;;  %5390 = vtanh.f32 %v6612_v45 }
 0x1a6   : > { %2459 = vadd.xlane.f32.xlu0 %v2458_v21  ;;  %v2320_v21 = vsel %vm8548_vm2, %v2107_v34, 0.0  ;;  %v5373_v11 = vpop.eup %5372  ;;  %v2296_v52 = vsel %vm8548_vm2, %v2099_v0, 0.0 }
 0x1a7   : > { %v6828_v48 = vpop.xlane.xlu0 %2201  ;;  %v5375_v29 = vpop.eup %5374  ;;  %v2168_v39 = vmul.f32 %v6679_v54, %v5373_v11 }
 0x1a9   : > { %2492 = vadd.xlane.f32.xlu1 %v2491_v2  ;;  %v2097_v2 = vmul.f32 %v6679_v54, %v5371_v51  ;;  %v2503_v31 = vsel %vm8548_vm2, %v2168_v39, 0.0  ;;  %v1634_v39 = vadd.f32 %v6639_v58, %v6608_v23 }
 0x1aa   : > { %2288 = vadd.xlane.f32.xlu0 %v2287_v63  ;;  %v2108_v63 = vmul.f32 %v6679_v54, %v5369_v6  ;;  %v8602_v6 = vlaneseq }
 0x1ab   : > { %v6836_v56 = vpop.xlane.xlu0 %2195  ;;  %v2290_v22 = vsel %vm8548_vm2, %v2097_v2, 0.0  ;;  %v8604_v2 = vld [vmem:[#allocation21_spill] sm:$0xff] }
 0x1ac   : > { %v2323_v33 = vsel %vm8548_vm2, %v2108_v63, 0.0  ;;  %v8603_v63 = vld [vmem:[#allocation19_spill] sm:$0xff] }
 0x1ad   : > { %2486 = vadd.xlane.f32.xlu1 %v2485_v38  ;;  %v6849_v9 = vpop.xlane.xlu1 %2384  ;;  %v2157_v38 = vmul.f32 %v6679_v54, %v5375_v29 }
 0x1ae   : > { %2282 = vadd.xlane.f32.xlu0 %v2281_v47  ;;  %8594 = vst [vmem:[#allocation13_spill] sm:$0xff] %v6849_v9  ;;  %v5377_v47 = vpop.eup %5376 }
 0x1af   : > { %v6846_v14 = vpop.xlane.xlu0 %2204  ;;  %v5379_v34 = vpop.eup %5378  ;;  %v2470_v0 = vsel %vm8548_vm2, %v2157_v38, 0.0 }
 0x1b0   : > { %v5381_v36 = vpop.eup %5380  ;;  %v2160_v51 = vmul.f32 %v6679_v54, %v5379_v34 }
 0x1b1   : > { %2321 = vadd.xlane.f32.xlu1 %v2320_v21  ;;  %v6859_v28 = vpop.xlane.xlu1 %2207  ;;  %v8600_v21 = vld [vmem:[#allocation18_spill] sm:$0xff]  ;;  %v2111_v11 = vmul.f32 %v6679_v54, %v5381_v36 }
 0x1b2   : > { %2468 = vadd.xlane.f32.xlu0 %v2467_v42  ;;  %v2166_v42 = vmul.f32 %v6679_v54, %v5377_v47  ;;  %5392 = vtanh.f32 %v8600_v21  ;;  %v1632_v47 = vadd.f32 %v6639_v58, %v6617_v49  ;;  %v2479_v38 = vsel %vm8548_vm2, %v2160_v51, 0.0  ;;  %v8607_v21 = vld [vmem:[#allocation22_spill] sm:$0xff]  ;;  %v8610_v51 = vld [vmem:[#allocation12_spill] sm:$0xff] }
 0x1b3   : > { %v6856_v13 = vpop.xlane.xlu0 %2363  ;;  %5394 = vtanh.f32 %v8601_v26 }
 0x1b4   : > { %8595 = vst [vmem:[#allocation14_spill] sm:$0xff] %v6856_v13  ;;  %5396 = vtanh.f32 %v8603_v63  ;;  %v2497_v45 = vsel %vm8548_vm2, %v2166_v42, 0.0  ;;  %v2332_v42 = vsel %vm8548_vm2, %v2111_v11, 0.0  ;;  %v6928_v63 = vadd.f32 %v8610_v51, %v1632_v47 }
 0x1b5   : > { %2501 = vadd.xlane.f32.xlu1 %v2500_v41  ;;  %v6869_v19 = vpop.xlane.xlu1 %2393  ;;  %v5383_v41 = vpop.eup %5382  ;;  %5398 = vtanh.f32 %v8604_v2  ;;  %v2588_v47 = vadd.f32 %v6839_v4, %v6836_v56 }
 0x1b6   : > { %2462 = vadd.xlane.f32.xlu0 %v2461_v43  ;;  %v6894_v43 = vand.u32 127, %v8602_v6  ;;  %v2103_v34 = vmul.f32 %v6679_v54, %v5383_v41  ;;  %v1852_v41 = vadd.f32 %v8610_v51, %v1634_v39 }
 0x1b7   : > { %v6866_v62 = vpop.xlane.xlu0 %2366 }
 0x1b8   : > { %8596 = vst [vmem:[#allocation15_spill] sm:$0xff] %v6866_v62  ;;  %v2852_v49 = vadd.s32 4294967288, %v6894_v43  ;;  %v2873_v26 = vadd.s32 4294967264, %v6894_v43  ;;  %v2880_v6 = vadd.s32 4294967256, %v6894_v43  ;;  %v2887_v17 = vadd.s32 4294967248, %v6894_v43 }
 0x1b9   : > { %2324 = vadd.xlane.f32.xlu1 %v2323_v33  ;;  %v6879_v37 = vpop.xlane.xlu1 %2387  ;;  %v8606_v33 = vld [vmem:[#allocation20_spill] sm:$0xff] }
 0x1ba   : > { %2297 = vadd.xlane.f32.xlu0 %v2296_v52  ;;  %v5385_v52 = vpop.eup %5384  ;;  %5400 = vtanh.f32 %v8606_v33  ;;  %v8612_v33 = vld [vmem:[#allocation9_spill] sm:$0xff] }
 0x1bb   : > { %v6876_v25 = vpop.xlane.xlu0 %2369  ;;  %5402 = vtanh.f32 %v6592_v44  ;;  %v2109_v23 = vmul.f32 %v6679_v54, %v5385_v52  ;;  %v2866_v44 = vadd.s32 4294967272, %v6894_v43  ;;  %v6959_v56 = vsub.s32 %v2880_v6, %v8612_v33 }
 0x1bc   : > { %8597 = vst [vmem:[#allocation32_spill] sm:$0xff] %v6876_v25  ;;  %5404 = vtanh.f32 %v6620_v10  ;;  %v8609_v10 = vld [vmem:[#allocation24_spill] sm:$0xff] }
 0x1bd   : > { %2504 = vadd.xlane.f32.xlu1 %v2503_v31  ;;  %v6890_v57 = vpop.xlane.xlu1 %2210  ;;  %v5387_v31 = vpop.eup %5386  ;;  %5406 = vtanh.f32 %v8607_v21  ;;  %v2308_v21 = vsel %vm8548_vm2, %v2103_v34, 0.0  ;;  %v6953_v34 = vsub.s32 %v2866_v44, %v8612_v33 }
 0x1be   : > { %2291 = vadd.xlane.f32.xlu0 %v2290_v22  ;;  %v2859_v22 = vadd.s32 4294967280, %v6894_v43  ;;  %v5389_v36 = vpop.eup %5388  ;;  %5408 = vtanh.f32 %v8609_v10  ;;  %v2163_v39 = vmul.f32 %v6679_v54, %v5387_v31  ;;  %v6956_v31 = vsub.s32 %v2873_v26, %v8612_v33 }
 0x1bf   : > { %v6887_v32 = vpop.xlane.xlu0 %2372  ;;  %v5391_v2 = vpop.eup %5390  ;;  %v2592_v26 = vadd.f32 %v6839_v4, %v6859_v28  ;;  %v2593_v13 = vadd.f32 %v6839_v4, %v6890_v57  ;;  %5410 = vtanh.f32 %v1852_v41 }
 0x1c0   : > { %8599 = vst [vmem:[#allocation17_spill] sm:$0xff] %v6887_v32  ;;  %v5393_v10 = vpop.eup %5392  ;;  %v2590_v32 = vadd.f32 %v6839_v4, %v6828_v48  ;;  %v2169_v44 = vmul.f32 %v6679_v54, %v5391_v2  ;;  %v2488_v6 = vsel %vm8548_vm2, %v2163_v39, 0.0  ;;  %5412 = vtanh.f32 %v6928_v63 }
 0x1c1   : > { %2498 = vadd.xlane.f32.xlu1 %v2497_v45  ;;  %v6909_v46 = vpop.xlane.xlu1 %2219  ;;  %v8611_v45 = vld [vmem:[#allocation23_spill] sm:$0xff]  ;;  %v2884_v61 = vrot.slane %v2593_v13, %v6959_v56 }
 0x1c2   : > { %2471 = vadd.xlane.f32.xlu0 %v2470_v0  ;;  %v1635_v11 = vadd.f32 %v6639_v58, %v8611_v45  ;;  %v2326_v45 = vsel %vm8548_vm2, %v2109_v23, 0.0 }
 0x1c3   : > { %v6902_v29 = vpop.xlane.xlu0 %2375 }
 0x1c4   : > { %8605 = vst [vmem:[#allocation18_spill] sm:$0xff] %v6902_v29  ;;  %v5395_v29 = vpop.eup %5394 }
 0x1c5   : > { %2333 = vadd.xlane.f32.xlu1 %v2332_v42  ;;  %v6939_v42 = vsub.s32 %v6894_v43, %v8612_v33 }
 0x1c6   : > { %2480 = vadd.xlane.f32.xlu0 %v2479_v38  ;;  %v6932_v52 = vpop.xlane.xlu1 %2405  ;;  %v6935_v38 = vsub.s32 %v2859_v22, %v8612_v33  ;;  %v2171_v22 = vmul.f32 %v6679_v54, %v5389_v36 }
 0x1c7   : > { %v6923_v0 = vpop.xlane.xlu0 %2381 }
 0x1c8   : > { %8608 = vst [vmem:[#allocation16_spill] sm:$0xff] %v6923_v0  ;;  %v6947_v0 = vsub.s32 %v2852_v49, %v8612_v33  ;;  %v2591_v49 = vadd.f32 %v6839_v4, %v6846_v14  ;;  %v2851_v14 = vrot.slane %v2588_v47, %v6939_v42  ;;  %v2512_v2 = vsel %vm8548_vm2, %v2171_v22, 0.0 }
 0x1c9   : > { %2327 = vadd.xlane.f32.xlu1 %v2326_v45  ;;  %v2161_v45 = vmul.f32 %v6679_v54, %v5393_v10  ;;  %v2863_v28 = vrot.slane %v2590_v32, %v6935_v38  ;;  %v2506_v22 = vsel %vm8548_vm2, %v2169_v44, 0.0  ;;  %v2877_v32 = vrot.slane %v2592_v26, %v6956_v31 }
 0x1ca   : > { %2309 = vadd.xlane.f32.xlu0 %v2308_v21  ;;  %v5397_v21 = vpop.eup %5396  ;;  %v6963_v36 = vpop.xlane.xlu1 %2228  ;;  %v2870_v47 = vrot.slane %v2591_v49, %v6953_v34  ;;  %v2894_v44 = vadd.s32 4294967240, %v6894_v43 }
 0x1cb   : > { %v2199_v23 = vpop.xlane.xlu0 %2198  ;;  %v6967_v25 = vpop.eup %5398 }
 0x1cc   : > { %v2589_v48 = vadd.f32 %v6839_v4, %v2199_v23  ;;  %v6973_v62 = vpop.eup %5400 }
 0x1cd   : > { %v5403_v9 = vpop.eup %5402  ;;  %2513 = vadd.xlane.f32.xlu1 %v2512_v2  ;;  %v2482_v2 = vsel %vm8548_vm2, %v2161_v45, 0.0 }
 0x1ce   : > { %v2856_v23 = vrot.slane %v2589_v48, %v6947_v0  ;;  %2489 = vadd.xlane.f32.xlu0 %v2488_v6  ;;  %v5405_v10 = vpop.eup %5404  ;;  %v6986_v20 = vpop.xlane.xlu1 %2402 }
 0x1cf   : > { %v6982_v39 = vpop.xlane.xlu0 %2378  ;;  %v5407_v48 = vpop.eup %5406 }
 0x1d0   : > { %8613 = vst [vmem:[#allocation19_spill] sm:$0xff] %v6982_v39  ;;  %v2858_v57 = vsel %vm2857_vm3, %v2856_v23, %v2851_v14  ;;  %v2102_v39 = vmul.f32 %v6679_v54, %v5395_v29  ;;  %v5409_v59 = vpop.eup %5408  ;;  %v2112_v14 = vmul.f32 %v6679_v54, %v5403_v9  ;;  %v1853_v23 = vadd.f32 %v8610_v51, %v1635_v11 }
 0x1d1   : > { %v2865_v6 = vsel %vm2864_vm4, %v2863_v28, %v2858_v57  ;;  %2507 = vadd.xlane.f32.xlu1 %v2506_v22  ;;  %v7001_v29 = vsub.s32 %v2887_v17, %v8612_v33  ;;  %v2105_v11 = vmul.f32 %v6679_v54, %v5397_v21  ;;  %v7013_v17 = vsub.s32 %v2894_v44, %v8612_v33 }
 0x1d2   : > { %v2872_v49 = vsel %vm2871_vm5, %v2870_v47, %v2865_v6  ;;  %2483 = vadd.xlane.f32.xlu0 %v2482_v2  ;;  %v7003_v13 = vpop.xlane.xlu1 %2237  ;;  %v2901_v47 = vadd.s32 4294967232, %v6894_v43  ;;  %v2305_v41 = vsel %vm8548_vm2, %v2102_v39, 0.0  ;;  %v2335_v63 = vsel %vm8548_vm2, %v2112_v14, 0.0 }
 0x1d3   : > { %v2214_v26 = vpop.xlane.xlu0 %2213  ;;  %v2879_v28 = vsel %vm2878_vm6, %v2877_v32, %v2872_v49  ;;  %v2110_v22 = vmul.f32 %v6679_v54, %v5407_v48  ;;  %v8614_v32 = vld [vmem:[#allocation26_spill] sm:$0xff]  ;;  %v2596_v39 = vadd.f32 %v6839_v4, %v6909_v46  ;;  %v1636_v2 = vadd.f32 %v6639_v58, %v6658_v60 }
 0x1d4   : > { %v2594_v45 = vadd.f32 %v6839_v4, %v2214_v26  ;;  %v2886_v9 = vsel %vm2885_vm7, %v2884_v61, %v2879_v28  ;;  %5414 = vtanh.f32 %v8614_v32  ;;  %v8615_v61 = vld [vmem:[#allocation25_spill] sm:$0xff]  ;;  %v7028_v44 = vsub.s32 %v2901_v47, %v8612_v33 }
 0x1d5   : > { %v1633_v6 = vadd.f32 %v6639_v58, %v8615_v61  ;;  %2336 = vadd.xlane.f32.xlu1 %v2335_v63  ;;  %5416 = vtanh.f32 %v1853_v23  ;;  %v2314_v26 = vsel %vm8548_vm2, %v2105_v11, 0.0  ;;  %v2165_v46 = vmul.f32 %v6679_v54, %v6967_v25  ;;  %v5411_v63 = vpop.eup %5410 }
 0x1d6   : > { %v2891_v57 = vrot.slane %v2594_v45, %v7001_v29  ;;  %2306 = vadd.xlane.f32.xlu0 %v2305_v41  ;;  %v7024_v14 = vpop.xlane.xlu1 %2231  ;;  %v2329_v28 = vsel %vm8548_vm2, %v2110_v22, 0.0  ;;  %v2172_v60 = vmul.f32 %v6679_v54, %v5405_v10  ;;  %v2905_v47 = vrot.slane %v2596_v39, %v7028_v44  ;;  %v5413_v32 = vpop.eup %5412 }
 0x1d7   : > { %v2217_v21 = vpop.xlane.xlu0 %2216  ;;  %v1851_v45 = vadd.f32 %v8610_v51, %v1633_v6  ;;  %5418 = vtanh.f32 %v6653_v7  ;;  %v1854_v25 = vadd.f32 %v8610_v51, %v1636_v2  ;;  %v2494_v10 = vsel %vm8548_vm2, %v2165_v46, 0.0 }
 0x1d8   : > { %v2893_v49 = vsel %vm2892_vm8, %v2891_v57, %v2886_v9  ;;  %v2595_v48 = vadd.f32 %v6839_v4, %v2217_v21  ;;  %v1638_v9 = vadd.f32 %v6639_v58, %v6649_v16  ;;  %5420 = vtanh.f32 %v6663_v55 }
 0x1d9   : > { %2330 = vadd.xlane.f32.xlu1 %v2329_v28  ;;  %v2106_v16 = vmul.f32 %v6679_v54, %v6973_v62  ;;  %v2652_v7 = vadd.f32 %v6839_v4, %v6879_v37  ;;  %v2515_v61 = vsel %vm8548_vm2, %v2172_v60, 0.0  ;;  %v2170_v6 = vmul.f32 %v6679_v54, %v5409_v59  ;;  %v8616_v28 = vld [vmem:[#allocation27_spill] sm:$0xff] }
 0x1da   : > { %v2898_v23 = vrot.slane %v2595_v48, %v7013_v17  ;;  %2315 = vadd.xlane.f32.xlu0 %v2314_v26  ;;  %v7043_v57 = vpop.xlane.xlu1 %2417  ;;  %5422 = vtanh.f32 %v1851_v45  ;;  %v1856_v55 = vadd.f32 %v8610_v51, %v1638_v9  ;;  %v2654_v39 = vadd.f32 %v6839_v4, %v6869_v19 }
 0x1db   : > { %v2397_v41 = vpop.xlane.xlu0 %2396  ;;  %5424 = vtanh.f32 %v6669_v12  ;;  %v1637_v21 = vadd.f32 %v6639_v58, %v6671_v3  ;;  %v2317_v48 = vsel %vm8548_vm2, %v2106_v16, 0.0  ;;  %v2115_v26 = vmul.f32 %v6679_v54, %v5411_v63 }
 0x1dc   : > { %v2900_v11 = vsel %vm2899_vm9, %v2898_v23, %v2893_v49  ;;  %v2655_v37 = vadd.f32 %v6839_v4, %v2397_v41  ;;  %5426 = vtanh.f32 %v1854_v25  ;;  %v3197_v46 = vrot.slane %v2652_v7, %v6939_v42 }
 0x1dd   : > { %v7050_v22 = vsel %vm2906_vm10, %v2905_v47, %v2900_v11  ;;  %2516 = vadd.xlane.f32.xlu1 %v2515_v61  ;;  %v2509_v23 = vsel %vm8548_vm2, %v2170_v6, 0.0  ;;  %v2113_v3 = vmul.f32 %v6679_v54, %v5413_v32  ;;  %5428 = vtanh.f32 %v1856_v55 }
 0x1de   : > { %2495 = vadd.xlane.f32.xlu0 %v2494_v10  ;;  %v7063_v2 = vpop.xlane.xlu1 %2411  ;;  %v5415_v59 = vpop.eup %5414  ;;  %v1639_v60 = vadd.f32 %v6639_v58, %v8616_v28  ;;  %v3206_v45 = vrot.slane %v2654_v39, %v6935_v38  ;;  %5430 = vtanh.f32 %v6697_v35  ;;  %v1855_v47 = vadd.f32 %v8610_v51, %v1637_v21 }
 0x1df   : > { %v2391_v62 = vpop.xlane.xlu0 %2390  ;;  %v5417_v19 = vpop.eup %5416  ;;  %v3211_v41 = vrot.slane %v2655_v37, %v6953_v34  ;;  %v2908_v63 = vadd.s32 4294967224, %v6894_v43  ;;  %v2344_v58 = vsel %vm8548_vm2, %v2115_v26, 0.0  ;;  %v2915_v7 = vadd.s32 4294967216, %v6894_v43 }
 0x1e0   : > { %v2653_v49 = vadd.f32 %v6839_v4, %v2391_v62  ;;  %v2116_v16 = vmul.f32 %v6679_v54, %v5417_v19  ;;  %v2338_v35 = vsel %vm8548_vm2, %v2113_v3, 0.0  ;;  %v2175_v6 = vmul.f32 %v6679_v54, %v5415_v59 }
 0x1e1   : > { %2510 = vadd.xlane.f32.xlu1 %v2509_v23  ;;  %v5419_v32 = vpop.eup %5418  ;;  %5432 = vtanh.f32 %v6691_v50  ;;  %v2922_v39 = vadd.s32 4294967208, %v6894_v43  ;;  %v2657_v62 = vadd.f32 %v6839_v4, %v6986_v20  ;;  %v1857_v37 = vadd.f32 %v8610_v51, %v1639_v60 }
 0x1e2   : > { %v3201_v12 = vrot.slane %v2653_v49, %v6947_v0  ;;  %2318 = vadd.xlane.f32.xlu0 %v2317_v48  ;;  %v7079_v11 = vpop.xlane.xlu1 %2240  ;;  %v5421_v55 = vpop.eup %5420  ;;  %5434 = vtanh.f32 %v1855_v47  ;;  %v2658_v49 = vadd.f32 %v6839_v4, %v6932_v52  ;;  %v7101_v50 = vsub.s32 %v2908_v63, %v8612_v33 }
 0x1e3   : > { %v2226_v9 = vpop.xlane.xlu0 %2225  ;;  %5436 = vtanh.f32 %v6759_v15  ;;  %v2347_v20 = vsel %vm8548_vm2, %v2116_v16, 0.0  ;;  %v2173_v19 = vmul.f32 %v6679_v54, %v5419_v32  ;;  %v7106_v51 = vsub.s32 %v2915_v7, %v8612_v33 }
 0x1e4   : > { %v3202_v25 = vsel %vm2857_vm3, %v3201_v12, %v3197_v46  ;;  %v5423_v26 = vpop.eup %5422  ;;  %v2524_v12 = vsel %vm8548_vm2, %v2175_v6, 0.0  ;;  %v2176_v23 = vmul.f32 %v6679_v54, %v5421_v55  ;;  %v7112_v15 = vsub.s32 %v2922_v39, %v8612_v33 }
 0x1e5   : > { %v3207_v10 = vsel %vm2864_vm4, %v3206_v45, %v3202_v25  ;;  %2339 = vadd.xlane.f32.xlu1 %v2338_v35  ;;  %v5425_v46 = vpop.eup %5424  ;;  %v3221_v28 = vrot.slane %v2657_v62, %v6959_v56  ;;  %v2598_v60 = vadd.f32 %v6839_v4, %v2226_v9  ;;  %v3226_v47 = vrot.slane %v2658_v49, %v7001_v29 }
 0x1e6   : > { %2345 = vadd.xlane.f32.xlu0 %v2344_v58  ;;  %v3212_v61 = vsel %vm2871_vm5, %v3211_v41, %v3207_v10  ;;  %v7096_v48 = vpop.xlane.xlu1 %2234  ;;  %v5427_v3 = vpop.eup %5426  ;;  %v2599_v41 = vadd.f32 %v6839_v4, %v6963_v36  ;;  %v2518_v9 = vsel %vm8548_vm2, %v2173_v19, 0.0  ;;  %v2114_v32 = vmul.f32 %v6679_v54, %v5423_v26 }
 0x1e7   : > { %v2400_v21 = vpop.xlane.xlu0 %2399  ;;  %v5429_v58 = vpop.eup %5428  ;;  %v2527_v6 = vsel %vm8548_vm2, %v2176_v23, 0.0  ;;  %v2919_v55 = vrot.slane %v2598_v60, %v7106_v51  ;;  %5438 = vtanh.f32 %v1857_v37 }
 0x1e8   : > { %v2656_v59 = vadd.f32 %v6839_v4, %v2400_v21  ;;  %v5431_v7 = vpop.eup %5430  ;;  %v2926_v62 = vrot.slane %v2599_v41, %v7112_v15  ;;  %5440 = vtanh.f32 %v6781_v40  ;;  %v2341_v19 = vsel %vm8548_vm2, %v2114_v32, 0.0 }
 0x1e9   : > { %2525 = vadd.xlane.f32.xlu1 %v2524_v12  ;;  %5442 = vtanh.f32 %v6703_v8 }
 0x1ea   : > { %v3216_v52 = vrot.slane %v2656_v59, %v6956_v31  ;;  %2348 = vadd.xlane.f32.xlu0 %v2347_v20  ;;  %v7120_v63 = vpop.xlane.xlu1 %2420  ;;  %5444 = vtanh.f32 %v6787_v1 }
 0x1eb   : > { %v2223_v45 = vpop.xlane.xlu0 %2222  ;;  %v5433_v26 = vpop.eup %5432  ;;  %5446 = vtanh.f32 %v6707_v18  ;;  %v2660_v18 = vadd.f32 %v6839_v4, %v7063_v2 }
 0x1ec   : > { %v3217_v25 = vsel %vm2878_vm6, %v3216_v52, %v3212_v61  ;;  %v2597_v10 = vadd.f32 %v6839_v4, %v2223_v45  ;;  %v2117_v61 = vmul.f32 %v6679_v54, %v5427_v3  ;;  %v2174_v52 = vmul.f32 %v6679_v54, %v5425_v46  ;;  %v5435_v12 = vpop.eup %5434  ;;  %v7147_v3 = vld [vmem:[%s8526_s8] ss:$0 sm:$0xff] }
 0x1ed   : > { %v3222_v16 = vsel %vm2885_vm7, %v3221_v28, %v3217_v25  ;;  %2528 = vadd.xlane.f32.xlu1 %v2527_v6  ;;  %v2177_v40 = vmul.f32 %v7147_v3, %v5431_v7  ;;  %v5437_v28 = vpop.eup %5436  ;;  %v2118_v25 = vmul.f32 %v7147_v3, %v5435_v12  ;;  %v2179_v1 = vmul.f32 %v7147_v3, %v5433_v26 }
 0x1ee   : > { %v2912_v35 = vrot.slane %v2597_v10, %v7101_v50  ;;  %2519 = vadd.xlane.f32.xlu0 %v2518_v9  ;;  %v3227_v36 = vsel %vm2892_vm8, %v3226_v47, %v3222_v16  ;;  %v2415_v49 = vpop.xlane.xlu1 %2414  ;;  %v2521_v45 = vsel %vm8548_vm2, %v2174_v52, 0.0  ;;  %v2119_v47 = vmul.f32 %v7147_v3, %v5429_v58 }
 0x1ef   : > { %v2409_v39 = vpop.xlane.xlu0 %2408  ;;  %v2530_v41 = vsel %vm8548_vm2, %v2177_v40, 0.0  ;;  %v2353_v32 = vsel %vm8548_vm2, %v2118_v25, 0.0  ;;  %v2188_v58 = vmul.f32 %v7147_v3, %v5437_v28  ;;  %5448 = vtanh.f32 %v6719_v53 }
 0x1f0   : > { %v2914_v21 = vsel %vm2913_vm11, %v2912_v35, %v7050_v22  ;;  %v2659_v59 = vadd.f32 %v6839_v4, %v2409_v39  ;;  %v2350_v22 = vsel %vm8548_vm2, %v2117_v61, 0.0  ;;  %v2356_v16 = vsel %vm8548_vm2, %v2119_v47, 0.0 }
 0x1f1   : > { %v2921_v20 = vsel %vm8549_vm12, %v2919_v55, %v2914_v21  ;;  %2351 = vadd.xlane.f32.xlu1 %v2350_v22  ;;  %v5439_v9 = vpop.eup %5438  ;;  %v2563_v39 = vsel %vm8548_vm2, %v2188_v58, 0.0  ;;  %v2661_v53 = vadd.f32 %v6839_v4, %v2415_v49  ;;  %5450 = vtanh.f32 %v6725_v5 }
 0x1f2   : > { %v7140_v37 = vsel %vm8550_vm13, %v2926_v62, %v2921_v20  ;;  %v3231_v23 = vrot.slane %v2659_v59, %v7013_v17  ;;  %2342 = vadd.xlane.f32.xlu0 %v2341_v19  ;;  %v7154_v46 = vpop.xlane.xlu1 %2249  ;;  %v5441_v7 = vpop.eup %5440  ;;  %v2120_v61 = vmul.f32 %v7147_v3, %v5439_v9  ;;  %v3236_v2 = vrot.slane %v2660_v18, %v7028_v44 }
 0x1f3   : > { %v7150_v60 = vpop.xlane.xlu0 %2429  ;;  %v5443_v55 = vpop.eup %5442  ;;  %v2189_v62 = vmul.f32 %v7147_v3, %v5441_v7  ;;  %v2929_v20 = vadd.s32 4294967200, %v6894_v43  ;;  %v2936_v40 = vadd.s32 4294967192, %v6894_v43  ;;  %v3241_v28 = vrot.slane %v2661_v53, %v7101_v50 }
 0x1f4   : > { %v3232_v54 = vsel %vm2899_vm9, %v3231_v23, %v3227_v36  ;;  %v2536_v36 = vsel %vm8548_vm2, %v2179_v1, 0.0  ;;  %v5445_v21 = vpop.eup %5444  ;;  %v2359_v19 = vsel %vm8548_vm2, %v2120_v61, 0.0  ;;  %v2180_v52 = vmul.f32 %v7147_v3, %v5443_v55 }
 0x1f5   : > { %2531 = vadd.xlane.f32.xlu1 %v2530_v41  ;;  %v5447_v12 = vpop.eup %5446  ;;  %v2662_v23 = vadd.f32 %v6839_v4, %v7043_v57  ;;  %v3237_v49 = vsel %vm2906_vm10, %v3236_v2, %v3232_v54  ;;  %v2566_v22 = vsel %vm8548_vm2, %v2189_v62, 0.0  ;;  %v2192_v5 = vmul.f32 %v7147_v3, %v5445_v21 }
 0x1f6   : > { %2522 = vadd.xlane.f32.xlu0 %v2521_v45  ;;  %v7164_v8 = vpop.xlane.xlu1 %2243  ;;  %5452 = vtanh.f32 %v6731_v30  ;;  %v2663_v54 = vadd.f32 %v6839_v4, %v7120_v63  ;;  %v3242_v25 = vsel %vm2913_vm11, %v3241_v28, %v3237_v49  ;;  %v2178_v1 = vmul.f32 %v7147_v3, %v5447_v12 }
 0x1f7   : > { %v7161_v10 = vpop.xlane.xlu0 %2432  ;;  %v7208_v9 = vsub.s32 %v2929_v20, %v8612_v33  ;;  %v3246_v30 = vrot.slane %v2662_v23, %v7106_v51  ;;  %v2575_v58 = vsel %vm8548_vm2, %v2192_v5, 0.0  ;;  %5454 = vtanh.f32 %v6735_v24 }
 0x1f8   : > { %v2950_v63 = vadd.s32 4294967176, %v6894_v43  ;;  %v7216_v7 = vsub.s32 %v2936_v40, %v8612_v33  ;;  %v3251_v24 = vrot.slane %v2663_v54, %v7112_v15  ;;  %v2533_v53 = vsel %vm8548_vm2, %v2178_v1, 0.0  ;;  %v8619_v54 = vld [vmem:[#allocation28_spill] sm:$0xff] }
 0x1f9   : > { %2354 = vadd.xlane.f32.xlu1 %v2353_v32  ;;  %v5449_v57 = vpop.eup %5448  ;;  %v2943_v32 = vadd.s32 4294967184, %v6894_v43  ;;  %v3247_v61 = vsel %vm8549_vm12, %v3246_v30, %v3242_v25  ;;  %v2667_v43 = vadd.f32 %v6839_v4, %v7161_v10  ;;  %5456 = vtanh.f32 %v6747_v27 }
 0x1fa   : > { %2357 = vadd.xlane.f32.xlu0 %v2356_v16  ;;  %v7175_v6 = vpop.xlane.xlu1 %2252  ;;  %v2539_v16 = vsel %vm8548_vm2, %v2180_v52, 0.0  ;;  %v2183_v62 = vmul.f32 %v7147_v3, %v5449_v57  ;;  %v3252_v20 = vsel %vm8550_vm13, %v3251_v24, %v3247_v61  ;;  %5458 = vtanh.f32 %v8619_v54 }
 0x1fb   : > { %v7171_v35 = vpop.xlane.xlu0 %2255  ;;  %v5451_v2 = vpop.eup %5450 }
 0x1fc   : > { %v2181_v5 = vmul.f32 %v7147_v3, %v5451_v2 }
 0x1fd   : > { %2564 = vadd.xlane.f32.xlu1 %v2563_v39 }
 0x1fe   : > { %2537 = vadd.xlane.f32.xlu0 %v2536_v36  ;;  %v2424_v26 = vpop.xlane.xlu1 %2423  ;;  %v2666_v36 = vadd.f32 %v6839_v4, %v7150_v60  ;;  %v7232_v60 = vsub.s32 %v2943_v32, %v8612_v33  ;;  %v2542_v1 = vsel %vm8548_vm2, %v2181_v5, 0.0 }
 0x1ff   : > { %v7182_v59 = vpop.xlane.xlu0 %2435  ;;  %v2664_v47 = vadd.f32 %v6839_v4, %v2424_v26  ;;  %v7235_v26 = vsub.s32 %v2950_v63, %v8612_v33  ;;  %v8622_v63 = vld [vmem:[#allocation29_spill] sm:$0xff] }
 0x200   : > { %v3266_v52 = vrot.slane %v2666_v36, %v7232_v60  ;;  %v5453_v40 = vpop.eup %5452  ;;  %5460 = vtanh.f32 %v8622_v63 }
 0x201   : > { %2567 = vadd.xlane.f32.xlu1 %v2566_v22  ;;  %v3256_v55 = vrot.slane %v2664_v47, %v7208_v9  ;;  %v3271_v23 = vrot.slane %v2667_v43, %v7235_v26  ;;  %v2548_v22 = vsel %vm8548_vm2, %v2183_v62, 0.0  ;;  %v2184_v32 = vmul.f32 %v7147_v3, %v5453_v40  ;;  %v8623_v62 = vld [vmem:[#allocation31_spill] sm:$0xff] }
 0x202   : > { %2360 = vadd.xlane.f32.xlu0 %v2359_v19  ;;  %v7200_v41 = vpop.xlane.xlu1 %2246  ;;  %5462 = vtanh.f32 %v8623_v62 }
 0x203   : > { %v7196_v45 = vpop.xlane.xlu0 %2258  ;;  %v3257_v12 = vsel %vm8551_vm14, %v3256_v55, %v3252_v20  ;;  %v2551_v61 = vsel %vm8548_vm2, %v2184_v32, 0.0  ;;  %v8625_v20 = vld [vmem:[#allocation30_spill] sm:$0xff] }
 0x204   : > { %5464 = vtanh.f32 %v8625_v20 }
 0x205   : > { %2576 = vadd.xlane.f32.xlu1 %v2575_v58 }
 0x206   : > { %2540 = vadd.xlane.f32.xlu0 %v2539_v16  ;;  %v2427_v39 = vpop.xlane.xlu1 %2426  ;;  %v5455_v16 = vpop.eup %5454 }
 0x207   : > { %v7218_v18 = vpop.xlane.xlu0 %2273  ;;  %v2665_v21 = vadd.f32 %v6839_v4, %v2427_v39  ;;  %v5457_v58 = vpop.eup %5456  ;;  %v2182_v55 = vmul.f32 %v7147_v3, %v5455_v16 }
 0x209   : > { %v3261_v19 = vrot.slane %v2665_v21, %v7216_v7  ;;  %v2545_v43 = vsel %vm8548_vm2, %v2182_v55, 0.0  ;;  %v2187_v21 = vmul.f32 %v7147_v3, %v5457_v58 }
 0x20a   : > { %2534 = vadd.xlane.f32.xlu0 %v2533_v53  ;;  %v7243_v27 = vpop.xlane.xlu1 %2261  ;;  %v5459_v53 = vpop.eup %5458 }
 0x20b   : > { %v7239_v10 = vpop.xlane.xlu0 %2267  ;;  %v3262_v49 = vsel %vm2941_vm15, %v3261_v19, %v3257_v12  ;;  %v2185_v12 = vmul.f32 %v7147_v3, %v5459_v53 }
 0x20c   : > { %v3267_v28 = vsel %vm2948_vm0, %v3266_v52, %v3262_v49  ;;  %v2560_v52 = vsel %vm8548_vm2, %v2187_v21, 0.0 }
 0x20d   : > { %v7253_v57 = vsel %vm2955_vm1, %v3271_v23, %v3267_v28  ;;  %v5461_v23 = vpop.eup %5460  ;;  %v2554_v5 = vsel %vm8548_vm2, %v2185_v12, 0.0 }
 0x20e   : > { %2549 = vadd.xlane.f32.xlu0 %v2548_v22  ;;  %8618 = vst [vmem:[#allocation20_spill] sm:$0xff] %v7253_v57  ;;  %v7256_v25 = vpop.xlane.xlu1 %2441  ;;  %v2186_v40 = vmul.f32 %v7147_v3, %v5461_v23  ;;  %v5463_v28 = vpop.eup %5462 }
 0x20f   : > { %v7250_v47 = vpop.xlane.xlu0 %2453  ;;  %8620 = vst [vmem:[#allocation22_spill] sm:$0xff] %v7256_v25  ;;  %v2190_v32 = vmul.f32 %v7147_v3, %v5463_v28  ;;  %v5465_v58 = vpop.eup %5464  ;;  %v8660_v25 = vld [vmem:[#allocation32_spill] sm:$0xff] }
 0x210   : > { %8617 = vst [vmem:[#allocation21_spill] sm:$0xff] %v7250_v47  ;;  %v2191_v62 = vmul.f32 %v7147_v3, %v5465_v58 }
 0x211   : > { %v2569_v55 = vsel %vm8548_vm2, %v2190_v32, 0.0 }
 0x212   : > { %2543 = vadd.xlane.f32.xlu0 %v2542_v1  ;;  %v7263_v36 = vpop.xlane.xlu1 %2264  ;;  %v2557_v1 = vsel %vm8548_vm2, %v2186_v40, 0.0  ;;  %v2572_v53 = vsel %vm8548_vm2, %v2191_v62, 0.0  ;;  %vm3510_vm2 = vcmask 1041409  }
 0x213   : > { %v7260_v30 = vpop.xlane.xlu0 %2447 }
 0x214   : > { %8621 = vst [vmem:[#allocation24_spill] sm:$0xff] %v7260_v30 }
 0x216   : > { %2552 = vadd.xlane.f32.xlu0 %v2551_v61  ;;  %v7270_v24 = vpop.xlane.xlu1 %2444 }
 0x217   : > { %v7267_v39 = vpop.xlane.xlu0 %2276  ;;  %8624 = vst [vmem:[#allocation12_spill] sm:$0xff] %v7270_v24 }
 0x21a   : > { %2546 = vadd.xlane.f32.xlu0 %v2545_v43  ;;  %v7277_v19 = vpop.xlane.xlu1 %2438 }
 0x21b   : > { %v7274_v2 = vpop.xlane.xlu0 %2270  ;;  %8626 = vst [vmem:[#allocation23_spill] sm:$0xff] %v7277_v19 }
 0x21e   : > { %2561 = vadd.xlane.f32.xlu0 %v2560_v52  ;;  %v7283_v22 = vpop.xlane.xlu1 %2477 }
 0x21f   : > { %v7281_v49 = vpop.xlane.xlu0 %2456  ;;  %8628 = vst [vmem:[#allocation25_spill] sm:$0xff] %v7283_v22 }
 0x220   : > { %8627 = vst [vmem:[#allocation26_spill] sm:$0xff] %v7281_v49 }
 0x222   : > { %2555 = vadd.xlane.f32.xlu0 %v2554_v5  ;;  %v2301_v16 = vpop.xlane.xlu1 %2300 }
 0x223   : > { %v7287_v54 = vpop.xlane.xlu0 %2450 }
 0x224   : > { %8629 = vst [vmem:[#allocation27_spill] sm:$0xff] %v7287_v54 }
 0x226   : > { %2558 = vadd.xlane.f32.xlu0 %v2557_v1  ;;  %v2295_v61 = vpop.xlane.xlu1 %2294 }
 0x227   : > { %v7291_v63 = vpop.xlane.xlu0 %2285 }
 0x228   : > { %8630 = vst [vmem:[#allocation28_spill] sm:$0xff] %v7291_v63 }
 0x22a   : > { %2570 = vadd.xlane.f32.xlu0 %v2569_v55  ;;  %v7297_v21 = vpop.xlane.xlu1 %2474 }
 0x22b   : > { %v7295_v43 = vpop.xlane.xlu0 %2279  ;;  %8631 = vst [vmem:[#allocation29_spill] sm:$0xff] %v7297_v21 }
 0x22e   : > { %2573 = vadd.xlane.f32.xlu0 %v2572_v53  ;;  %v2304_v52 = vpop.xlane.xlu1 %2303 }
 0x22f   : > { %v7300_v20 = vpop.xlane.xlu0 %2465 }
 0x230   : > { %8632 = vst [vmem:[#allocation31_spill] sm:$0xff] %v7300_v20 }
 0x232   : > { %v7304_v23 = vpop.xlane.xlu1 %2312 }
 0x233   : > { %v7302_v12 = vpop.xlane.xlu0 %2459 }
 0x234   : > { %8633 = vst [vmem:[#allocation30_spill] sm:$0xff] %v7302_v12 }
 0x236   : > { %v7308_v40 = vpop.xlane.xlu1 %2492 }
 0x237   : > { %v7306_v5 = vpop.xlane.xlu0 %2288  ;;  %8635 = vst [vmem:[#allocation34_spill] sm:$0xff] %v7308_v40 }
 0x238   : > { %8634 = vst [vmem:[#allocation33_spill] sm:$0xff] %v7306_v5 }
 0x23a   : > { %v7312_v28 = vpop.xlane.xlu1 %2486 }
 0x23b   : > { %v7310_v3 = vpop.xlane.xlu0 %2282  ;;  %8636 = vst [vmem:[#allocation35_spill] sm:$0xff] %v7312_v28 }
 0x23e   : > { %v7316_v32 = vpop.xlane.xlu1 %2321 }
 0x23f   : > { %v7314_v1 = vpop.xlane.xlu0 %2468 }
 0x240   : > { %8637 = vst [vmem:[#allocation36_spill] sm:$0xff] %v7314_v1 }
 0x242   : > { %v7320_v55 = vpop.xlane.xlu1 %2501 }
 0x243   : > { %v7318_v58 = vpop.xlane.xlu0 %2462  ;;  %8639 = vst [vmem:[#allocation38_spill] sm:$0xff] %v7320_v55 }
 0x244   : > { %8638 = vst [vmem:[#allocation37_spill] sm:$0xff] %v7318_v58 }
 0x246   : > { %v7322_v53 = vpop.xlane.xlu1 %2324 }
 0x247   : > { %v2298_v62 = vpop.xlane.xlu0 %2297 }
 0x248   : > { %v2622_v5 = vadd.f32 %v6839_v4, %v2298_v62  ;;  %v2606_v62 = vadd.f32 %v6839_v4, %v7154_v46 }
 0x24a   : > { %v7324_v21 = vpop.xlane.xlu1 %2504 }
 0x24b   : > { %v2292_v33 = vpop.xlane.xlu0 %2291  ;;  %8640 = vst [vmem:[#allocation39_spill] sm:$0xff] %v7324_v21 }
 0x24e   : > { %v7328_v20 = vpop.xlane.xlu1 %2498 }
 0x24f   : > { %v7326_v22 = vpop.xlane.xlu0 %2471  ;;  %8642 = vst [vmem:[#allocation41_spill] sm:$0xff] %v7328_v20 }
 0x250   : > { %8641 = vst [vmem:[#allocation40_spill] sm:$0xff] %v7326_v22 }
 0x252   : > { %v7332_v12 = vpop.xlane.xlu1 %2333 }
 0x253   : > { %v7330_v49 = vpop.xlane.xlu0 %2480  ;;  %8644 = vst [vmem:[#allocation43_spill] sm:$0xff] %v7332_v12 }
 0x254   : > { %8643 = vst [vmem:[#allocation42_spill] sm:$0xff] %v7330_v49  ;;  %v2620_v49 = vadd.f32 %v6839_v4, %v2292_v33  ;;  %v8655_v33 = vld [vmem:[#allocation13_spill] sm:$0xff] }
 0x256   : > { %v7334_v57 = vpop.xlane.xlu1 %2327 }
 0x257   : > { %v2310_v1 = vpop.xlane.xlu0 %2309  ;;  %8645 = vst [vmem:[#allocation44_spill] sm:$0xff] %v7334_v57  ;;  %v8662_v57 = vld [vmem:[#allocation18_spill] sm:$0xff] }
 0x258   : > { %v7410_v46 = vadd.f32 %v6839_v4, %v8662_v57 }
 0x25a   : > { %v7338_v55 = vpop.xlane.xlu1 %2513 }
 0x25b   : > { %v7336_v58 = vpop.xlane.xlu0 %2489  ;;  %8647 = vst [vmem:[#allocation46_spill] sm:$0xff] %v7338_v55  ;;  %v2605_v55 = vadd.f32 %v6839_v4, %v7200_v41  ;;  %v8658_v41 = vld [vmem:[#allocation15_spill] sm:$0xff] }
 0x25c   : > { %8646 = vst [vmem:[#allocation45_spill] sm:$0xff] %v7336_v58  ;;  %v2621_v58 = vadd.f32 %v6839_v4, %v2295_v61 }
 0x25e   : > { %v7342_v40 = vpop.xlane.xlu1 %2507  ;;  %v3043_v12 = vrot.slane %v2621_v58, %v6947_v0 }
 0x25f   : > { %v7340_v47 = vpop.xlane.xlu0 %2483  ;;  %8649 = vst [vmem:[#allocation48_spill] sm:$0xff] %v7342_v40  ;;  %v3039_v40 = vrot.slane %v2620_v49, %v6939_v42  ;;  %v7376_v49 = vadd.f32 %v6839_v4, %v8658_v41 }
 0x260   : > { %8648 = vst [vmem:[#allocation47_spill] sm:$0xff] %v7340_v47 }
 0x262   : > { %v7344_v54 = vpop.xlane.xlu1 %2336 }
 0x263   : > { %v2307_v21 = vpop.xlane.xlu0 %2306  ;;  %8650 = vst [vmem:[#allocation49_spill] sm:$0xff] %v7344_v54  ;;  %v2604_v54 = vadd.f32 %v6839_v4, %v7164_v8  ;;  %v2964_v8 = vrot.slane %v2605_v55, %v6947_v0  ;;  %v3048_v55 = vrot.slane %v2622_v5, %v6935_v38 }
 0x265   : > { %v2960_v58 = vrot.slane %v2604_v54, %v6939_v42  ;;  %v2624_v54 = vadd.f32 %v6839_v4, %v2304_v52 }
 0x266   : > { %v7348_v20 = vpop.xlane.xlu1 %2330 }
 0x267   : > { %v7346_v22 = vpop.xlane.xlu0 %2315  ;;  %8651 = vst [vmem:[#allocation50_spill] sm:$0xff] %v7348_v20  ;;  %v8661_v20 = vld [vmem:[#allocation17_spill] sm:$0xff] }
 0x268   : > { %v7392_v41 = vadd.f32 %v6839_v4, %v8661_v20  ;;  %v2607_v20 = vadd.f32 %v6839_v4, %v7175_v6  ;;  %v3058_v6 = vrot.slane %v2624_v54, %v6956_v31 }
 0x26a   : > { %v7353_v28 = vpop.xlane.xlu1 %2516  ;;  %v2974_v52 = vrot.slane %v2607_v20, %v6953_v34 }
 0x26b   : > { %v7351_v30 = vpop.xlane.xlu0 %2495  ;;  %8653 = vst [vmem:[#allocation52_spill] sm:$0xff] %v7353_v28  ;;  %v8657_v28 = vld [vmem:[#allocation14_spill] sm:$0xff] }
 0x26c   : > { %8652 = vst [vmem:[#allocation51_spill] sm:$0xff] %v7351_v30  ;;  %v7368_v30 = vadd.f32 %v6839_v4, %v8655_v33  ;;  %v7372_v61 = vadd.f32 %v6839_v4, %v8657_v28  ;;  %8659 = vst [vmem:[#allocation14_spill] sm:$0xff] %v7376_v49  ;;  %v3044_v33 = vsel %vm2857_vm3, %v3043_v12, %v3039_v40 }
 0x26d   : > { %v7388_v28 = vadd.f32 %v6839_v4, %v8660_v25  ;;  %v2625_v25 = vadd.f32 %v6839_v4, %v2307_v21  ;;  %v2965_v40 = vsel %vm2857_vm3, %v2964_v8, %v2960_v58  ;;  %v3049_v5 = vsel %vm2864_vm4, %v3048_v55, %v3044_v33  ;;  %v8664_v8 = vld [vmem:[#allocation19_spill] sm:$0xff] }
 0x26e   : > { %v7364_v24 = vpop.xlane.xlu1 %2510  ;;  %8656 = vst [vmem:[#allocation13_spill] sm:$0xff] %v7368_v30  ;;  %v8663_v30 = vld [vmem:[#allocation16_spill] sm:$0xff]  ;;  %v2969_v12 = vrot.slane %v2606_v62, %v6935_v38  ;;  %v7426_v57 = vadd.f32 %v6839_v4, %v8664_v8  ;;  %v2609_v8 = vadd.f32 %v6839_v4, %v7196_v45 }
 0x26f   : > { %v7359_v47 = vpop.xlane.xlu0 %2318  ;;  %8654 = vst [vmem:[#allocation53_spill] sm:$0xff] %v7364_v24  ;;  %v2623_v24 = vadd.f32 %v6839_v4, %v2301_v16  ;;  %v7414_v16 = vadd.f32 %v6839_v4, %v8663_v30  ;;  %v2600_v30 = vadd.f32 %v6839_v4, %v7024_v14  ;;  %v3063_v55 = vrot.slane %v2625_v25, %v6959_v56 }
 0x270   : > { %v2970_v62 = vsel %vm2864_vm4, %v2969_v12, %v2965_v40  ;;  %v2626_v14 = vadd.f32 %v6839_v4, %v2310_v1  ;;  %v2610_v12 = vadd.f32 %v6839_v4, %v7243_v27  ;;  %v2611_v25 = vadd.f32 %v6839_v4, %v7263_v36 }
 0x271   : > { %v3053_v21 = vrot.slane %v2623_v24, %v6953_v34  ;;  %v2608_v24 = vadd.f32 %v6839_v4, %v7171_v35  ;;  %v7456_v1 = vadd.f32 %v6839_v4, %v7003_v13  ;;  %v2975_v40 = vsel %vm2871_vm5, %v2974_v52, %v2970_v62 }
 0x272   : > { %v2340_v19 = vpop.xlane.xlu1 %2339  ;;  %v2601_v27 = vadd.f32 %v6839_v4, %v7096_v48  ;;  %v2933_v45 = vrot.slane %v2600_v30, %v7208_v9  ;;  %v2984_v13 = vrot.slane %v2609_v8, %v6959_v56  ;;  %v3068_v52 = vrot.slane %v2626_v14, %v7001_v29 }
 0x273   : > { %v7384_v63 = vpop.xlane.xlu0 %2345  ;;  %v3054_v58 = vsel %vm2871_vm5, %v3053_v21, %v3049_v5  ;;  %v2979_v36 = vrot.slane %v2608_v24, %v6956_v31  ;;  %v2627_v21 = vadd.f32 %v6839_v4, %v7304_v23  ;;  %v2989_v48 = vrot.slane %v2610_v12, %v7001_v29 }
 0x274   : > { %v3059_v54 = vsel %vm2878_vm6, %v3058_v6, %v3054_v58  ;;  %v2628_v6 = vadd.f32 %v6839_v4, %v7346_v22  ;;  %v2994_v24 = vrot.slane %v2611_v25, %v7013_v17  ;;  %v2629_v23 = vadd.f32 %v6839_v4, %v7359_v47 }
 0x275   : > { %v3064_v35 = vsel %vm2885_vm7, %v3063_v55, %v3059_v54  ;;  %v2980_v62 = vsel %vm2878_vm6, %v2979_v36, %v2975_v40  ;;  %v2613_v30 = vadd.f32 %v6839_v4, %v7274_v2  ;;  %v2636_v8 = vadd.f32 %v6839_v4, %v2340_v19 }
 0x276   : > { %v7430_v33 = vpop.xlane.xlu1 %2525  ;;  %v3069_v55 = vsel %vm2892_vm8, %v3068_v52, %v3064_v35  ;;  %v2940_v40 = vrot.slane %v2601_v27, %v7216_v7  ;;  %v2935_v12 = vsel %vm8551_vm14, %v2933_v45, %v7140_v37  ;;  %v2612_v25 = vadd.f32 %v6839_v4, %v7239_v10 }
 0x277   : > { %v7418_v49 = vpop.xlane.xlu0 %2348  ;;  %8665 = vst [vmem:[#allocation15_spill] sm:$0xff] %v7430_v33  ;;  %v3177_v33 = vrot.slane %v7410_v46, %v7208_v9  ;;  %v3073_v47 = vrot.slane %v2627_v21, %v7013_v17  ;;  %v2985_v54 = vsel %vm2885_vm7, %v2984_v13, %v2980_v62  ;;  %v2614_v2 = vadd.f32 %v6839_v4, %v7218_v18 }
 0x278   : > { %v3078_v19 = vrot.slane %v2628_v6, %v7028_v44  ;;  %v2990_v36 = vsel %vm2892_vm8, %v2989_v48, %v2985_v54  ;;  %v3083_v37 = vrot.slane %v2629_v23, %v7101_v50  ;;  %v2638_v10 = vadd.f32 %v6839_v4, %v7384_v63 }
 0x279   : > { %v3074_v27 = vsel %vm2899_vm9, %v3073_v47, %v3069_v55  ;;  %v2995_v21 = vsel %vm2899_vm9, %v2994_v24, %v2990_v36  ;;  %v3004_v13 = vrot.slane %v2613_v30, %v7101_v50  ;;  %v2630_v18 = vadd.f32 %v6839_v4, %v7316_v32 }
 0x27a   : > { %v7460_v5 = vpop.xlane.xlu1 %2528  ;;  %v3118_v52 = vrot.slane %v2636_v8, %v6939_v42  ;;  %v2947_v62 = vrot.slane %v7456_v1, %v7232_v60  ;;  %v7512_v48 = vadd.f32 %v6839_v4, %v7079_v11  ;;  %v2942_v63 = vsel %vm2941_vm15, %v2940_v40, %v2935_v12 }
 0x27b   : > { %v7450_v20 = vpop.xlane.xlu0 %2519  ;;  %v2999_v24 = vrot.slane %v2612_v25, %v7028_v44  ;;  %v7518_v23 = vadd.f32 %v6839_v4, %v7182_v59  ;;  %v3079_v32 = vsel %vm2906_vm10, %v3078_v19, %v3074_v27  ;;  %v2631_v11 = vadd.f32 %v6839_v4, %v7322_v53 }
 0x27c   : > { %v3084_v55 = vsel %vm2913_vm11, %v3083_v37, %v3079_v32  ;;  %v3127_v8 = vrot.slane %v2638_v10, %v6935_v38  ;;  %v3009_v59 = vrot.slane %v2614_v2, %v7106_v51  ;;  %v2615_v40 = vadd.f32 %v6839_v4, %v7267_v39  ;;  %v8668_v32 = vld [vmem:[#allocation50_spill] sm:$0xff] }
 0x27d   : > { %v3000_v1 = vsel %vm2906_vm10, %v2999_v24, %v2995_v21  ;;  %v2616_v47 = vadd.f32 %v6839_v4, %v7295_v43  ;;  %v2617_v53 = vadd.f32 %v6839_v4, %v7310_v3  ;;  %v2954_v37 = vrot.slane %v7512_v48, %v7235_v26 }
 0x27e   : > { %v2352_v14 = vpop.xlane.xlu1 %2351  ;;  %v3005_v12 = vsel %vm2913_vm11, %v3004_v13, %v3000_v1  ;;  %v2949_v43 = vsel %vm2948_vm0, %v2947_v62, %v2942_v63  ;;  %v3093_v3 = vrot.slane %v2631_v11, %v7112_v15  ;;  %v3276_v21 = vrot.slane %v7518_v23, %v6939_v42  ;;  %v8667_v13 = vld [vmem:[#allocation23_spill] sm:$0xff] }
 0x27f   : > { %v2343_v58 = vpop.xlane.xlu0 %2342  ;;  %v2640_v54 = vadd.f32 %v6839_v4, %v2352_v14  ;;  %v3019_v48 = vrot.slane %v2616_v47, %v7208_v9  ;;  %v2633_v62 = vadd.f32 %v6839_v4, %v8668_v32  ;;  %v3024_v23 = vrot.slane %v2617_v53, %v7216_v7 }
 0x280   : > { %v2637_v22 = vadd.f32 %v6839_v4, %v2343_v58  ;;  %v2639_v58 = vadd.f32 %v6839_v4, %v7418_v49  ;;  %v3088_v49 = vrot.slane %v2630_v18, %v7106_v51  ;;  %v2669_v18 = vadd.f32 %v6839_v4, %v8667_v13 }
 0x282   : > { %v3122_v35 = vrot.slane %v2637_v22, %v6947_v0  ;;  %v7506_v6 = vpop.xlane.xlu1 %2531  ;;  %v3089_v39 = vsel %vm8549_vm12, %v3088_v49, %v3084_v55  ;;  %v3132_v36 = vrot.slane %v2639_v58, %v6953_v34  ;;  %v3137_v58 = vrot.slane %v2640_v54, %v6956_v31  ;;  %v8669_v55 = vld [vmem:[#allocation22_spill] sm:$0xff] }
 0x283   : > { %v7499_v45 = vpop.xlane.xlu0 %2522  ;;  %v3094_v63 = vsel %vm8550_vm13, %v3093_v3, %v3089_v39  ;;  %v3280_v39 = vrot.slane %v2669_v18, %v6947_v0  ;;  %v8673_v3 = vld [vmem:[#allocation33_spill] sm:$0xff] }
 0x284   : > { %v3123_v30 = vsel %vm2857_vm3, %v3122_v35, %v3118_v52  ;;  %v8666_v35 = vld [vmem:[#allocation44_spill] sm:$0xff]  ;;  %v3010_v52 = vsel %vm8549_vm12, %v3009_v59, %v3005_v12 }
 0x285   : > { %v3128_v19 = vsel %vm2864_vm4, %v3127_v8, %v3123_v30  ;;  %v2632_v2 = vadd.f32 %v6839_v4, %v8666_v35  ;;  %v3014_v30 = vrot.slane %v2615_v40, %v7112_v15  ;;  %v2670_v8 = vadd.f32 %v6839_v4, %v8669_v55  ;;  %v8671_v40 = vld [vmem:[#allocation43_spill] sm:$0xff]  ;;  %v8672_v35 = vld [vmem:[#allocation12_spill] sm:$0xff] }
 0x286   : > { %v2355_v25 = vpop.xlane.xlu1 %2354  ;;  %v3133_v24 = vsel %vm2871_vm5, %v3132_v36, %v3128_v19  ;;  %v2634_v53 = vadd.f32 %v6839_v4, %v8671_v40  ;;  %v8678_v40 = vld [vmem:[#allocation14_spill] sm:$0xff] }
 0x287   : > { %v2358_v22 = vpop.xlane.xlu0 %2357  ;;  %v2641_v27 = vadd.f32 %v6839_v4, %v2355_v25  ;;  %v3098_v1 = vrot.slane %v2632_v2, %v7208_v9  ;;  %v3138_v12 = vsel %vm2878_vm6, %v3137_v58, %v3133_v24  ;;  %v3015_v47 = vsel %vm8550_vm13, %v3014_v30, %v3010_v52 }
 0x288   : > { %v2642_v14 = vadd.f32 %v6839_v4, %v2358_v22  ;;  %v8670_v22 = vld [vmem:[#allocation28_spill] sm:$0xff]  ;;  %v2671_v2 = vadd.f32 %v6839_v4, %v8672_v35  ;;  %v3020_v36 = vsel %vm8551_vm14, %v3019_v48, %v3015_v47 }
 0x289   : > { %v3142_v11 = vrot.slane %v2641_v27, %v6959_v56  ;;  %v2618_v59 = vadd.f32 %v6839_v4, %v8670_v22  ;;  %v3099_v54 = vsel %vm8551_vm14, %v3098_v1, %v3094_v63  ;;  %v3103_v27 = vrot.slane %v2633_v62, %v7216_v7  ;;  %v8674_v63 = vld [vmem:[#allocation49_spill] sm:$0xff] }
 0x28a   : > { %v3147_v49 = vrot.slane %v2642_v14, %v7001_v29  ;;  %v2619_v14 = vadd.f32 %v6839_v4, %v8673_v3  ;;  %v3025_v13 = vsel %vm2941_vm15, %v3024_v23, %v3020_v36  ;;  %v2635_v58 = vadd.f32 %v6839_v4, %v8674_v63  ;;  %v8675_v23 = vld [vmem:[#allocation47_spill] sm:$0xff] }
 0x28b   : > { %v7550_v10 = vpop.xlane.xlu0 %2537  ;;  %v3143_v52 = vsel %vm2885_vm7, %v3142_v11, %v3138_v12  ;;  %v3029_v32 = vrot.slane %v2618_v59, %v7232_v60  ;;  %v3104_v18 = vsel %vm2941_vm15, %v3103_v27, %v3099_v54  ;;  %v2956_v62 = vsel %vm2955_vm1, %v2954_v37, %v2949_v43  ;;  %v8677_v43 = vld [vmem:[#allocation35_spill] sm:$0xff] }
 0x28c   : > { %v3148_v48 = vsel %vm2892_vm8, %v3147_v49, %v3143_v52  ;;  %v3108_v1 = vrot.slane %v2634_v53, %v7232_v60  ;;  %v2684_v11 = vadd.f32 %v6839_v4, %v8675_v23  ;;  %v3285_v22 = vrot.slane %v2670_v8, %v6935_v38 }
 0x28d   : > { %v3281_v59 = vsel %vm2857_vm3, %v3280_v39, %v3276_v21  ;;  %v3030_v12 = vsel %vm2948_vm0, %v3029_v32, %v3025_v13  ;;  %v8676_v49 = vrot.slane %v7372_v61, %v7028_v44  ;;  %v3034_v37 = vrot.slane %v2619_v14, %v7235_v26  ;;  %v8680_v21 = vld [vmem:[#allocation24_spill] sm:$0xff] }
 0x28e   : > { %v2685_v47 = vadd.f32 %v6839_v4, %v8677_v43  ;;  %v8679_v53 = vrot.slane %v8678_v40, %v7101_v50  ;;  %v3109_v8 = vsel %vm2948_vm0, %v3108_v1, %v3104_v18  ;;  %v3290_v35 = vrot.slane %v2671_v2, %v6953_v34  ;;  %v8683_v2 = vld [vmem:[#allocation45_spill] sm:$0xff] }
 0x28f   : > { %v2361_v25 = vpop.xlane.xlu0 %2360  ;;  %v3113_v61 = vrot.slane %v2635_v58, %v7235_v26  ;;  %v8681_v39 = vrot.slane %v7388_v28, %v7106_v51  ;;  %v3286_v3 = vsel %vm2864_vm4, %v3285_v22, %v3281_v59  ;;  %v3035_v14 = vsel %vm2955_vm1, %v3034_v37, %v3030_v12  ;;  %v8684_v58 = vld [vmem:[#allocation27_spill] sm:$0xff]  ;;  %v8688_v59 = vld [vmem:[#allocation34_spill] sm:$0xff]  ;;  %v8691_v43 = vld [vmem:[#allocation21_spill] sm:$0xff] }
 0x290   : > { %v2643_v19 = vadd.f32 %v6839_v4, %v2361_v25  ;;  %v3355_v13 = vrot.slane %v2684_v11, %v6939_v42  ;;  %v8682_v52 = vrot.slane %v7392_v41, %v7112_v15  ;;  %v2686_v32 = vadd.f32 %v6839_v4, %v8683_v2  ;;  %v8686_v11 = vld [vmem:[#allocation51_spill] sm:$0xff] }
 0x291   : > { %v3114_v63 = vsel %vm2955_vm1, %v3113_v61, %v3109_v8  ;;  %v2673_v18 = vadd.f32 %v6839_v4, %v8684_v58  ;;  %v8685_v41 = vrot.slane %v7426_v57, %v7216_v7  ;;  %v3511_v23 = vsel %vm3510_vm2, %v3035_v14, %v2956_v62  ;;  %v8692_v8 = vld [vmem:[#allocation20_spill] sm:$0xff] }
 0x292   : > { %v3152_v24 = vrot.slane %v2643_v19, %v7013_v17  ;;  %v2672_v19 = vadd.f32 %v6839_v4, %v8680_v21  ;;  %v2688_v46 = vadd.f32 %v6839_v4, %v8686_v11  ;;  %v2687_v12 = vadd.f32 %v6839_v4, %v8688_v59 }
 0x293   : > { %v7593_v30 = vpop.xlane.xlu0 %2540  ;;  %v2700_v58 = vadd.f32 %v6839_v4, %v7506_v6 }
 0x294   : > { %v3153_v55 = vsel %vm2899_vm9, %v3152_v24, %v3148_v48  ;;  %v3359_v48 = vrot.slane %v2685_v47, %v6947_v0  ;;  %v2674_v47 = vadd.f32 %v6839_v4, %v8691_v43  ;;  %v3295_v61 = vrot.slane %v2672_v19, %v6956_v31 }
 0x295   : > { %v3158_v25 = vsel %vm2906_vm10, %v8676_v49, %v3153_v55  ;;  %v8687_v55 = vrot.slane %v7414_v16, %v7232_v60  ;;  %v8689_v49 = vld [vmem:[#allocation13_spill] sm:$0xff]  ;;  %v3364_v16 = vrot.slane %v2686_v32, %v6935_v38  ;;  %v3434_v43 = vrot.slane %v2700_v58, %v6939_v42 }
 0x296   : > { %v3163_v54 = vsel %vm2913_vm11, %v8679_v53, %v3158_v25  ;;  %v3360_v57 = vsel %vm2857_vm3, %v3359_v48, %v3355_v13  ;;  %v8690_v25 = vrot.slane %v8689_v49, %v7235_v26  ;;  %v3291_v53 = vsel %vm2871_vm5, %v3290_v35, %v3286_v3  ;;  %v8703_v58 = vld [vmem:[#allocation53_spill] sm:$0xff] }
 0x297   : > { %v3168_v36 = vsel %vm8549_vm12, %v8681_v39, %v3163_v54  ;;  %v2535_v27 = vpop.xlane.xlu0 %2534  ;;  %vm3512_vm12 = vcmask 1042434   ;;  %v3300_v54 = vrot.slane %v2673_v18, %v6959_v56  ;;  %v3365_v39 = vsel %vm2864_vm4, %v3364_v16, %v3360_v57  ;;  %v8695_v18 = vld [vmem:[#allocation26_spill] sm:$0xff] }
 0x298   : > { %v3173_v24 = vsel %vm8550_vm13, %v8682_v52, %v3168_v36  ;;  %vm3514_vm13 = vcmask 1043459   ;;  %v3513_v37 = vsel %vm3512_vm12, %v3114_v63, %v3511_v23  ;;  %v3374_v36 = vrot.slane %v2688_v46, %v6956_v31  ;;  %v8693_v52 = vld [vmem:[#allocation41_spill] sm:$0xff] }
 0x299   : > { %v3178_v28 = vsel %vm8551_vm14, %v3177_v33, %v3173_v24  ;;  %vm3516_vm14 = vcmask 1044484   ;;  %v3369_v13 = vrot.slane %v2687_v12, %v6953_v34  ;;  %v2689_v24 = vadd.f32 %v6839_v4, %v8693_v52  ;;  %v8698_v12 = vld [vmem:[#allocation31_spill] sm:$0xff] }
 0x29a   : > { %v3183_v1 = vsel %vm2941_vm15, %v8685_v41, %v3178_v28  ;;  %v2701_v35 = vadd.f32 %v6839_v4, %v2535_v27  ;;  %v3305_v3 = vrot.slane %v2674_v47, %v7001_v29  ;;  %v3296_v2 = vsel %vm2878_vm6, %v3295_v61, %v3291_v53  ;;  %v8694_v28 = vld [vmem:[#allocation30_spill] sm:$0xff] }
 0x29b   : > { %v7647_v33 = vpop.xlane.xlu0 %2549  ;;  %v3188_v22 = vsel %vm2948_vm0, %v8687_v55, %v3183_v1  ;;  %v3301_v32 = vsel %vm2885_vm7, %v3300_v54, %v3296_v2  ;;  %v2676_v19 = vadd.f32 %v6839_v4, %v8694_v28  ;;  %v3370_v63 = vsel %vm2871_vm5, %v3369_v13, %v3365_v39  ;;  %v8696_v41 = vld [vmem:[#allocation38_spill] sm:$0xff]  ;;  %v8697_v1 = vld [vmem:[#allocation37_spill] sm:$0xff]  ;;  %v8700_v39 = vld [vmem:[#allocation48_spill] sm:$0xff] }
 0x29c   : > { %v3193_v62 = vsel %vm2955_vm1, %v8690_v25, %v3188_v22  ;;  %v2675_v48 = vadd.f32 %v6839_v4, %v8695_v18  ;;  %v2690_v27 = vadd.f32 %v6839_v4, %v8696_v41  ;;  %v2677_v23 = vadd.f32 %v6839_v4, %v8697_v1  ;;  %v8699_v25 = vld [vmem:[#allocation39_spill] sm:$0xff]  ;;  %v8704_v1 = vld [vmem:[#allocation25_spill] sm:$0xff] }
 0x29d   : > { %v3515_v40 = vsel %vm3514_vm13, %v3193_v62, %v3513_v37  ;;  %v3375_v11 = vsel %vm2878_vm6, %v3374_v36, %v3370_v63  ;;  %v3379_v55 = vrot.slane %v2689_v24, %v6959_v56  ;;  %v3438_v22 = vrot.slane %v2701_v35, %v6947_v0 }
 0x29e   : > { %v7669_v21 = vsel %vm3516_vm14, %v8692_v8, %v3515_v40  ;;  %v3306_v59 = vsel %vm2892_vm8, %v3305_v3, %v3301_v32  ;;  %v2678_v6 = vadd.f32 %v6839_v4, %v8698_v12  ;;  %v2702_v57 = vadd.f32 %v6839_v4, %v7550_v10  ;;  %v8702_v3 = vld [vmem:[#allocation36_spill] sm:$0xff] }
 0x29f   : > { %v2544_v14 = vpop.xlane.xlu0 %2543  ;;  %v3315_v49 = vrot.slane %v2676_v19, %v7028_v44  ;;  %v2691_v62 = vadd.f32 %v6839_v4, %v8699_v25  ;;  %v3380_v37 = vsel %vm2885_vm7, %v3379_v55, %v3375_v11  ;;  %v3310_v47 = vrot.slane %v2675_v48, %v7013_v17  ;;  %v2565_v48 = vpop.xlane.xlu1 %2564 }
 0x2a0   : > { %v3384_v0 = vrot.slane %v2690_v27, %v7001_v29  ;;  %v3320_v16 = vrot.slane %v2677_v23, %v7101_v50  ;;  %v2704_v40 = vadd.f32 %v6839_v4, %v2544_v14  ;;  %v2703_v10 = vadd.f32 %v6839_v4, %v7593_v30  ;;  %v8701_v30 = vld [vmem:[#allocation40_spill] sm:$0xff] }
 0x2a1   : > { %v3439_v54 = vsel %vm2857_vm3, %v3438_v22, %v3434_v43  ;;  %v3311_v61 = vsel %vm2899_vm9, %v3310_v47, %v3306_v59  ;;  %v2692_v42 = vadd.f32 %v6839_v4, %v8700_v39  ;;  %v3443_v13 = vrot.slane %v2702_v57, %v6935_v38 }
 0x2a2   : > { %v3385_v36 = vsel %vm2892_vm8, %v3384_v0, %v3380_v37  ;;  %v3325_v52 = vrot.slane %v2678_v6, %v7106_v51  ;;  %v3316_v14 = vsel %vm2906_vm10, %v3315_v49, %v3311_v61  ;;  %v3389_v24 = vrot.slane %v2691_v62, %v7013_v17 }
 0x2a3   : > { %v2553_v46 = vpop.xlane.xlu0 %2552  ;;  %v2680_v35 = vadd.f32 %v6839_v4, %v8701_v30  ;;  %v2679_v2 = vadd.f32 %v6839_v4, %v8702_v3  ;;  %v3321_v32 = vsel %vm2913_vm11, %v3320_v16, %v3316_v14  ;;  %v3444_v28 = vsel %vm2864_vm4, %v3443_v13, %v3439_v54  ;;  %v8709_v16 = vld [vmem:[#allocation52_spill] sm:$0xff]  ;;  %v2568_v39 = vpop.xlane.xlu1 %2567 }
 0x2a4   : > { %v3453_v19 = vrot.slane %v2704_v40, %v6956_v31  ;;  %v3390_v38 = vsel %vm2899_vm9, %v3389_v24, %v3385_v36  ;;  %v2693_v18 = vadd.f32 %v6839_v4, %v8703_v58  ;;  %v3448_v41 = vrot.slane %v2703_v10, %v6953_v34  ;;  %v8705_v31 = vld [vmem:[#allocation29_spill] sm:$0xff] }
 0x2a5   : > { %v2682_v23 = vadd.f32 %v6839_v4, %v8704_v1  ;;  %v3394_v11 = vrot.slane %v2692_v42, %v7028_v44  ;;  %v2706_v55 = vadd.f32 %v6839_v4, %v7647_v33  ;;  %v2681_v22 = vadd.f32 %v6839_v4, %v8705_v31 }
 0x2a6   : > { %vm8706_vm3 = vcmask 720512   ;;  %v3335_v12 = vrot.slane %v2680_v35, %v7208_v9  ;;  %v3449_v6 = vsel %vm2871_vm5, %v3448_v41, %v3444_v28  ;;  %v3330_v34 = vrot.slane %v2679_v2, %v7112_v15 }
 0x2a7   : > { %v2547_v53 = vpop.xlane.xlu0 %2546  ;;  %v3326_v59 = vsel %vm8706_vm3, %v3325_v52, %v3321_v32  ;;  %v3395_v49 = vsel %vm2906_vm10, %v3394_v11, %v3390_v38  ;;  %v3454_v25 = vsel %vm2878_vm6, %v3453_v19, %v3449_v6  ;;  %v3399_v33 = vrot.slane %v2693_v18, %v7101_v50  ;;  %vm8712_vm6 = vmmov %vm8706_vm3  ;;  %v8713_v38 = vld [vmem:[#allocation15_spill] sm:$0xff]  ;;  %v2577_v11 = vpop.xlane.xlu1 %2576 }
 0x2a8   : > { %v2705_v8 = vadd.f32 %v6839_v4, %v2547_v53  ;;  %v2707_v37 = vadd.f32 %v6839_v4, %v2553_v46  ;;  %vm8708_vm4 = vcmask 786112   ;;  %v2695_v40 = vadd.f32 %v6839_v4, %v8709_v16 }
 0x2a9   : > { %v3331_v0 = vsel %vm8708_vm4, %v3330_v34, %v3326_v59  ;;  %v2696_v53 = vadd.f32 %v6839_v4, %v7450_v20  ;;  %v3463_v10 = vrot.slane %v2706_v55, %v7001_v29  ;;  %v3340_v54 = vrot.slane %v2681_v22, %v7216_v7  ;;  %v8711_v29 = vld [vmem:[#allocation42_spill] sm:$0xff] }
 0x2aa   : > { %v3458_v27 = vrot.slane %v2705_v8, %v6959_v56  ;;  %v8707_v56 = vld [vmem:[#allocation46_spill] sm:$0xff]  ;;  %vm8710_vm5 = vcmask 851712   ;;  %v3400_v46 = vsel %vm2913_vm11, %v3399_v33, %v3395_v49  ;;  %v2697_v61 = vadd.f32 %v6839_v4, %v7499_v45 }
 0x2ab   : > { %v2562_v63 = vpop.xlane.xlu0 %2561  ;;  %v2694_v57 = vadd.f32 %v6839_v4, %v8707_v56  ;;  %v3336_v8 = vsel %vm8710_vm5, %v3335_v12, %v3331_v0  ;;  %v2683_v14 = vadd.f32 %v6839_v4, %v8711_v29  ;;  %v2711_v24 = vadd.f32 %v6839_v4, %v2565_v48 }
 0x2ac   : > { %v3459_v43 = vsel %vm2885_vm7, %v3458_v27, %v3454_v25  ;;  %v2710_v13 = vadd.f32 %v6839_v4, %v2562_v63  ;;  %v3468_v30 = vrot.slane %v2707_v37, %v7013_v17  ;;  %v3341_v45 = vsel %vm2941_vm15, %v3340_v54, %v3336_v8  ;;  %vm8714_vm7 = vmmov %vm8708_vm4 }
 0x2ad   : > { %v3404_v42 = vrot.slane %v2694_v57, %v7106_v51  ;;  %v3464_v36 = vsel %vm2892_vm8, %v3463_v10, %v3459_v43  ;;  %v3409_v3 = vrot.slane %v2695_v40, %v7112_v15  ;;  %v3414_v32 = vrot.slane %v2696_v53, %v7208_v9  ;;  %vm8715_vm8 = vmmov %vm8710_vm5 }
 0x2ae   : > { %v2712_v28 = vadd.f32 %v6839_v4, %v2568_v39  ;;  %v3469_v19 = vsel %vm2899_vm9, %v3468_v30, %v3464_v36  ;;  %v3345_v17 = vrot.slane %v2682_v23, %v7232_v60  ;;  %v2698_v58 = vadd.f32 %v6839_v4, %v8713_v38  ;;  %vm8716_vm9 = vmmov %vm8706_vm3 }
 0x2af   : > { %v2556_v62 = vpop.xlane.xlu0 %2555  ;;  %v3405_v2 = vsel %vm8712_vm6, %v3404_v42, %v3400_v46  ;;  %v3483_v18 = vrot.slane %v2710_v13, %v7106_v51  ;;  %v3488_v1 = vrot.slane %v2711_v24, %v7112_v15  ;;  %v3350_v31 = vrot.slane %v2683_v14, %v7235_v26  ;;  %vm8719_vm3 = vmmov %vm8710_vm5  ;;  %v8720_v42 = vld [vmem:[#allocation9_spill] sm:$0xff]  ;;  %v8721_v13 = vld [vmem:[#allocation11_spill] sm:$0xff] }
 0x2b0   : > { %v2708_v47 = vadd.f32 %v6839_v4, %v2556_v62  ;;  %v3410_v27 = vsel %vm8714_vm7, %v3409_v3, %v3405_v2  ;;  %v3346_v23 = vsel %vm2948_vm0, %v3345_v17, %v3341_v45  ;;  %v2699_v59 = vadd.f32 %v6839_v4, %v7460_v5  ;;  %v2716_v62 = vld [vmem:[%s557_s4] sm:$0xff]  ;;  %s4681_s4 = sshll.u32 %s7830_s24, 4  ;;  %s4682_s4 = int_to_ptr.vmem [resolvable:$true] %s4681_s4 }
 0x2b1   : > { %v3415_v22 = vsel %vm8715_vm8, %v3414_v32, %v3410_v27  ;;  %v3493_v15 = vrot.slane %v2712_v28, %v7208_v9  ;;  %v3424_v34 = vrot.slane %v2698_v58, %v7232_v60  ;;  %v2715_v56 = vadd.f32 %v6839_v4, %v2577_v11  ;;  %s5603_s0 = scalar_lea.vmem %s4682_s4, 128  ;;  %p5610_p1 = scmp.lt.s32.totalorder %s4682_s4, %s5608_s2 }
 0x2b2   : > { %v3473_v20 = vrot.slane %v2708_v47, %v7028_v44  ;;  %v3419_v44 = vrot.slane %v2697_v61, %v7216_v7  ;;  %v3351_v9 = vsel %vm2955_vm1, %v3350_v31, %v3346_v23  ;;  %v3429_v37 = vrot.slane %v2699_v59, %v7235_v26  ;;  %p5604_p12 = scmp.ne.s32.totalorder %s4682_s4, %s5603_s0  ;;  %p5611_p2 = scmp.lt.s32.totalorder %s5609_s5, %s5603_s0 }
 0x2b3   : > { %v2559_v52 = vpop.xlane.xlu0 %2558  ;;  %vm3522_vm5 = vcmask 1047559   ;;  %vm2717_vm6 = vcmp.eq.s32.totalorder %v2716_v62, 1  ;;  %v3605_v36 = vsub.s32 1, %v8720_v42  ;;  %v3739_v24 = vsub.s32 3, %v8720_v42 }
 0x2b4   : > { %v2709_v35 = vadd.f32 %v6839_v4, %v2559_v52  ;;  %v3474_v48 = vsel %vm2906_vm10, %v3473_v20, %v3469_v19  ;;  %v3420_v12 = vsel %vm2941_vm15, %v3419_v44, %v3415_v22  ;;  %vm8717_vm10 = vmmov %vm8708_vm4  ;;  %vm3520_vm4 = vcmask 1046534   ;;  %p5605_p13 = pnand %p5604_p12, %p5827_p5  ;;  %p5612_p3 = por %p5611_p2, %p5610_p1 }
 0x2b5   : > { %v3425_v33 = vsel %vm2948_vm0, %v3424_v34, %v3420_v12  ;;  %v3672_v52 = vsub.s32 2, %v8720_v42  ;;  %v3806_v30 = vsub.s32 4, %v8720_v42  ;;  %v3873_v3 = vsub.s32 5, %v8720_v42 }
 0x2b6   : > { %v3478_v63 = vrot.slane %v2709_v35, %v7101_v50  ;;  %v3940_v32 = vsub.s32 6, %v8720_v42  ;;  %v4007_v28 = vsub.s32 7, %v8720_v42  ;;  %p5606_p0 = pneg %p5605_p13 }
 0x2b7   : > { %v2571_v41 = vpop.xlane.xlu0 %2570 }
 0x2b8   : > { %v3479_v55 = vsel %vm2913_vm11, %v3478_v63, %v3474_v48  ;;  %v2713_v50 = vadd.f32 %v6839_v4, %v2571_v41  ;;  %vm3518_vm11 = vcmask 1045509   ;;  %p5613_p4 = pnand %p5612_p3, %p5606_p0 }
 0x2b9   : > { %v3484_v51 = vsel %vm8716_vm9, %v3483_v18, %v3479_v55  ;;  %v3519_v47 = vsel %vm3518_vm11, %v3351_v9, %v7669_v21 }
 0x2ba   : > { %v3489_v6 = vsel %vm8717_vm10, %v3488_v1, %v3484_v51  ;;  %v3498_v57 = vrot.slane %v2713_v50, %v7216_v7  ;;  %v3508_v7 = vrot.slane %v2715_v56, %v7235_v26 }
 0x2bb   : > { %v2574_v49 = vpop.xlane.xlu0 %2573  ;;  %v3494_v5 = vsel %vm8719_vm3, %v3493_v15, %v3489_v6 }
 0x2bc   : > { %v2714_v25 = vadd.f32 %v6839_v4, %v2574_v49  ;;  %v3499_v0 = vsel %vm2941_vm15, %v3498_v57, %v3494_v5  ;;  %v3430_v4 = vsel %vm2955_vm1, %v3429_v37, %v3425_v33  ;;  %v5207_v57 = vld [vmem:[%s8528_s10] sm:$0xff]  }
 0x2bd   : > { %v3521_v53 = vsel %vm3520_vm4, %v3430_v4, %v3519_v47  ;;  %5135 = vmatpush3.bf16.msra.mxu0 %v5207_v57  ;;  %v5477_v4 = vld [vmem:[%s5866_s17 + $0x80] sm:$0xff]  ;;  %v5486_v57 = vld [vmem:[%s5866_s17 + $0x208] sm:$0xff] }
 0x2be   : > { %v3503_v43 = vrot.slane %v2714_v25, %v7232_v60  ;;  %v8722_v25 = vmov 0.0  }
 0x2bf   : > { %5136 = vmatprep.subr.bf16.mxu0 %v8722_v25 }
 0x2c0   : > { %v3504_v16 = vsel %vm2948_vm0, %v3503_v43, %v3499_v0  ;;  %v5475_v43 = vld [vmem:[%s5866_s17 + $0x8] sm:$0xff]  ;;  %vm8723_vm0 = vcmask 261120  }
 0x2c1   : > { %v3509_v40 = vsel %vm2955_vm1, %v3508_v7, %v3504_v16  ;;  %v5476_v7 = vld [vmem:[%s5866_s17] sm:$0xff]  ;;  %vm8724_vm1 = vmmov %vm8723_vm0 }
 0x2c2   : > { %v3523_v60 = vsel %vm3522_vm5, %v3509_v40, %v3521_v53  ;;  %v5478_v40 = vld [vmem:[%s5866_s17 + $0x88] sm:$0xff]  ;;  %vm8725_vm15 = vmmov %vm8723_vm0 }
 0x2c3   : > { %v3525_v10 = vsel %vm2717_vm6, -1e+30, %v3523_v60  ;;  %vm8726_vm7 = vmmov %vm8723_vm0 }
 0x2c4   : > { %3526 = vmax.xlane.f32.xlu0 %v3525_v10  ;;  %vm8727_vm8 = vmmov %vm8723_vm0 }
 0x2c5   : > { %vm8728_vm9 = vmmov %vm8723_vm0 }
 0x2c6   : > { %vm8729_vm10 = vmmov %vm8723_vm0 }
 0x2c7   : > { %vm8730_vm3 = vmmov %vm8723_vm0 }
 0x2c8   : > { %vm8731_vm6 = vmmov %vm8723_vm0 }
 0x351   : > { %v3527_v21 = vpop.xlane.xlu0 %3526 }
 0x352   : > { %v3528_v54 = vsub.f32 %v3525_v10, %v3527_v21 }
 0x354   : > { %v3529_v26 = vmul.f32 1.442695, %v3528_v54 }
 0x356   : > { %5466 = vpow2.f32 %v3529_v26  ;;  %v5479_v26 = vld [vmem:[%s5866_s17 + $0x100] sm:$0xff] }
 0x360   : > { %v5467_v8 = vpop.eup %5466 }
 0x361   : > { %3531 = vadd.xlane.f32.xlu1 %v5467_v8 }
 0x3ee   : > { %v3532_v46 = vpop.xlane.xlu1 %3531 }
 0x3ef   : > { %5468 = vrcp.f32 %v3532_v46  ;;  %v5480_v46 = vld [vmem:[%s5866_s17 + $0x108] sm:$0xff] }
 0x3f9   : > { %v5469_v61 = vpop.eup %5468 }
 0x3fa   : > { %v3534_v39 = vmul.f32 %v5469_v61, %v5467_v8 }
 0x3fc   : > { %v7826_v20 = vrot.slane %v3534_v39, %v8721_v13  ;;  %3535 = vst [vmem:[%s7830_s24] sm:$0xff] %v3534_v39  ;;  %v7836_v29 = vrot.slane %v3534_v39, %v3605_v36  ;;  %v7840_v14 = vrot.slane %v3534_v39, %v3672_v52  ;;  %v7848_v35 = vrot.slane %v3534_v39, %v3739_v24  ;;  %v5481_v36 = vld [vmem:[%s5866_s17 + $0x10] sm:$0xff] }
 0x3fd   : > { %v7852_v45 = vrot.slane %v3534_v39, %v3806_v30  ;;  %v7861_v2 = vrot.slane %v3534_v39, %v3873_v3  ;;  %v7868_v44 = vrot.slane %v3534_v39, %v3940_v32  ;;  %v7877_v19 = vrot.slane %v3534_v39, %v4007_v28  ;;  %v5482_v52 = vld [vmem:[%s5866_s17 + $0x90] sm:$0xff]  ;;  %v5483_v32 = vld [vmem:[%s5866_s17 + $0x180] sm:$0xff] }
 0x3fe   : > { %3545 = vbcast.lane.b32.xlu1 %v7826_v20, 264  ;;  %3541 = vbcast.lane.b32.xlu0 %v7826_v20, 256 }
 0x402   : > { %3608 = vbcast.lane.b32.xlu1 %v7836_v29, 256  ;;  %3612 = vbcast.lane.b32.xlu0 %v7836_v29, 264 }
 0x406   : > { %3675 = vbcast.lane.b32.xlu1 %v7840_v14, 256  ;;  %3679 = vbcast.lane.b32.xlu0 %v7840_v14, 264 }
 0x40a   : > { %3549 = vbcast.lane.b32.xlu1 %v7826_v20, 272  ;;  %3616 = vbcast.lane.b32.xlu0 %v7836_v29, 272 }
 0x40e   : > { %3742 = vbcast.lane.b32.xlu1 %v7848_v35, 256  ;;  %3746 = vbcast.lane.b32.xlu0 %v7848_v35, 264 }
 0x412   : > { %3683 = vbcast.lane.b32.xlu1 %v7840_v14, 272  ;;  %3809 = vbcast.lane.b32.xlu0 %v7852_v45, 256 }
 0x416   : > { %3813 = vbcast.lane.b32.xlu1 %v7852_v45, 264  ;;  %3553 = vbcast.lane.b32.xlu0 %v7826_v20, 280 }
 0x41a   : > { %3620 = vbcast.lane.b32.xlu1 %v7836_v29, 280  ;;  %3750 = vbcast.lane.b32.xlu0 %v7848_v35, 272 }
 0x41e   : > { %3876 = vbcast.lane.b32.xlu1 %v7861_v2, 256  ;;  %3880 = vbcast.lane.b32.xlu0 %v7861_v2, 264 }
 0x422   : > { %3687 = vbcast.lane.b32.xlu1 %v7840_v14, 280  ;;  %3817 = vbcast.lane.b32.xlu0 %v7852_v45, 272 }
 0x426   : > { %3943 = vbcast.lane.b32.xlu1 %v7868_v44, 256  ;;  %3947 = vbcast.lane.b32.xlu0 %v7868_v44, 264 }
 0x42a   : > { %3557 = vbcast.lane.b32.xlu1 %v7826_v20, 288  ;;  %3624 = vbcast.lane.b32.xlu0 %v7836_v29, 288 }
 0x42e   : > { %3754 = vbcast.lane.b32.xlu1 %v7848_v35, 280  ;;  %3884 = vbcast.lane.b32.xlu0 %v7861_v2, 272 }
 0x432   : > { %4010 = vbcast.lane.b32.xlu1 %v7877_v19, 256  ;;  %4014 = vbcast.lane.b32.xlu0 %v7877_v19, 264 }
 0x436   : > { %3691 = vbcast.lane.b32.xlu1 %v7840_v14, 288  ;;  %3821 = vbcast.lane.b32.xlu0 %v7852_v45, 280 }
 0x43a   : > { %3951 = vbcast.lane.b32.xlu1 %v7868_v44, 272  ;;  %3561 = vbcast.lane.b32.xlu0 %v7826_v20, 296 }
 0x43e   : > { %3628 = vbcast.lane.b32.xlu1 %v7836_v29, 296  ;;  %3758 = vbcast.lane.b32.xlu0 %v7848_v35, 288 }
 0x442   : > { %3888 = vbcast.lane.b32.xlu1 %v7861_v2, 280  ;;  %4018 = vbcast.lane.b32.xlu0 %v7877_v19, 272 }
 0x446   : > { %3695 = vbcast.lane.b32.xlu1 %v7840_v14, 296  ;;  %3825 = vbcast.lane.b32.xlu0 %v7852_v45, 288 }
 0x44a   : > { %3955 = vbcast.lane.b32.xlu1 %v7868_v44, 280  ;;  %3565 = vbcast.lane.b32.xlu0 %v7826_v20, 304 }
 0x44e   : > { %3632 = vbcast.lane.b32.xlu1 %v7836_v29, 304  ;;  %3762 = vbcast.lane.b32.xlu0 %v7848_v35, 296 }
 0x452   : > { %3892 = vbcast.lane.b32.xlu1 %v7861_v2, 288  ;;  %4022 = vbcast.lane.b32.xlu0 %v7877_v19, 280 }
 0x456   : > { %3699 = vbcast.lane.b32.xlu1 %v7840_v14, 304  ;;  %3829 = vbcast.lane.b32.xlu0 %v7852_v45, 296 }
 0x45a   : > { %3959 = vbcast.lane.b32.xlu1 %v7868_v44, 288  ;;  %3569 = vbcast.lane.b32.xlu0 %v7826_v20, 312 }
 0x45e   : > { %3636 = vbcast.lane.b32.xlu1 %v7836_v29, 312  ;;  %3766 = vbcast.lane.b32.xlu0 %v7848_v35, 304 }
 0x462   : > { %3896 = vbcast.lane.b32.xlu1 %v7861_v2, 296  ;;  %4026 = vbcast.lane.b32.xlu0 %v7877_v19, 288 }
 0x466   : > { %3703 = vbcast.lane.b32.xlu1 %v7840_v14, 312  ;;  %3833 = vbcast.lane.b32.xlu0 %v7852_v45, 304 }
 0x46a   : > { %3963 = vbcast.lane.b32.xlu1 %v7868_v44, 296  ;;  %3573 = vbcast.lane.b32.xlu0 %v7826_v20, 320 }
 0x46e   : > { %3640 = vbcast.lane.b32.xlu1 %v7836_v29, 320  ;;  %3770 = vbcast.lane.b32.xlu0 %v7848_v35, 312 }
 0x470   : > { %v3546_v63 = vpop.permute.xlu1 %3545  ;;  %v3542_v17 = vpop.permute.xlu0 %3541 }
 0x471   : > { %v4073_v47 = vmul.f32 %v5475_v43, %v3546_v63  ;;  %v4072_v0 = vmul.f32 %v5476_v7, %v3542_v17  ;;  %v5484_v63 = vld [vmem:[%s5866_s17 + $0x188] sm:$0xff] }
 0x472   : > { %3900 = vbcast.lane.b32.xlu1 %v7861_v2, 304  ;;  %4030 = vbcast.lane.b32.xlu0 %v7877_v19, 296 }
 0x473   : > { %v4201_v21 = vsel %vm8723_vm0, %v4073_v47, 0.0  ;;  %v4200_v54 = vsel %vm8724_vm1, %v4072_v0, 0.0  ;;  %vm8732_vm1 = vmmov %vm8723_vm0 }
 0x474   : > { %v3609_v38 = vpop.permute.xlu1 %3608  ;;  %v3613_v58 = vpop.permute.xlu0 %3612 }
 0x475   : > { %v4088_v16 = vmul.f32 %v5477_v4, %v3609_v38  ;;  %v4089_v53 = vmul.f32 %v5478_v40, %v3613_v58  ;;  %v4202_v38 = vadd.f32 %v4201_v21, %v4200_v54 }
 0x476   : > { %3707 = vbcast.lane.b32.xlu1 %v7840_v14, 320  ;;  %3837 = vbcast.lane.b32.xlu0 %v7852_v45, 312 }
 0x477   : > { %v4237_v39 = vsel %vm8725_vm15, %v4088_v16, 0.0  ;;  %v4238_v42 = vsel %vm8726_vm7, %v4089_v53, 0.0  ;;  %v5487_v16 = vld [vmem:[%s5866_s17 + $0x18] sm:$0xff]  ;;  %vm8733_vm15 = vmmov %vm8723_vm0 }
 0x478   : > { %v7915_v18 = vpop.permute.xlu1 %3675  ;;  %v7917_v48 = vpop.permute.xlu0 %3679  ;;  %v4239_v58 = vadd.f32 %v4238_v42, %v4237_v39  ;;  %v5488_v53 = vld [vmem:[%s5866_s17 + $0x98] sm:$0xff]  ;;  %v5492_v39 = vld [vmem:[%s5866_s17 + $0x288] sm:$0xff]  ;;  %vm8734_vm7 = vmmov %vm8723_vm0 }
 0x479   : > { %v4104_v8 = vmul.f32 %v5479_v26, %v7915_v18  ;;  %v4105_v61 = vmul.f32 %v5480_v46, %v7917_v48  ;;  %v5493_v42 = vld [vmem:[%s5866_s17 + $0x118] sm:$0xff] }
 0x47a   : > { %3967 = vbcast.lane.b32.xlu1 %v7868_v44, 304  ;;  %3577 = vbcast.lane.b32.xlu0 %v7826_v20, 328 }
 0x47b   : > { %v4274_v18 = vsel %vm8727_vm8, %v4104_v8, 0.0  ;;  %v4275_v48 = vsel %vm8728_vm9, %v4105_v61, 0.0  ;;  %v5491_v8 = vld [vmem:[%s5866_s17 + $0x280] sm:$0xff]  ;;  %vm8735_vm8 = vmmov %vm8723_vm0 }
 0x47c   : > { %v7921_v41 = vpop.permute.xlu1 %3549  ;;  %v7923_v27 = vpop.permute.xlu0 %3616  ;;  %v4276_v61 = vadd.f32 %v4275_v48, %v4274_v18  ;;  %vm8736_vm9 = vmmov %vm8723_vm0  ;;  %v5496_v48 = vld [vmem:[%s5866_s17 + $0xa0] sm:$0xff] }
 0x47d   : > { %v4074_v13 = vmul.f32 %v5481_v36, %v7921_v41  ;;  %v4090_v24 = vmul.f32 %v5482_v52, %v7923_v27 }
 0x47e   : > { %3644 = vbcast.lane.b32.xlu1 %v7836_v29, 328  ;;  %3774 = vbcast.lane.b32.xlu0 %v7848_v35, 320 }
 0x47f   : > { %v4203_v41 = vsel %vm8729_vm10, %v4074_v13, 0.0  ;;  %v4240_v27 = vsel %vm8730_vm3, %v4090_v24, 0.0  ;;  %vm8737_vm10 = vmmov %vm8723_vm0 }
 0x480   : > { %v7927_v1 = vpop.permute.xlu1 %3742  ;;  %v7929_v11 = vpop.permute.xlu0 %3746  ;;  %v4241_v36 = vadd.f32 %v4240_v27, %v4239_v58  ;;  %vm8738_vm3 = vmmov %vm8723_vm0 }
 0x481   : > { %v4120_v28 = vmul.f32 %v5483_v32, %v7927_v1  ;;  %v4121_v17 = vmul.f32 %v5484_v63, %v7929_v11  ;;  %v5485_v1 = vld [vmem:[%s5866_s17 + $0x110] sm:$0xff]  ;;  %v5495_v63 = vld [vmem:[%s5866_s17 + $0x20] sm:$0xff] }
 0x482   : > { %3904 = vbcast.lane.b32.xlu1 %v7861_v2, 312  ;;  %4034 = vbcast.lane.b32.xlu0 %v7877_v19, 304 }
 0x483   : > { %v4311_v0 = vsel %vm8731_vm6, %v4120_v28, 0.0  ;;  %v4312_v4 = vsel %vm8723_vm0, %v4121_v17, 0.0  ;;  %vm8739_vm6 = vmmov %vm8723_vm0 }
 0x484   : > { %v7933_v55 = vpop.permute.xlu1 %3683  ;;  %v7935_v50 = vpop.permute.xlu0 %3809 }
 0x485   : > { %v4106_v11 = vmul.f32 %v5485_v1, %v7933_v55  ;;  %v5489_v55 = vld [vmem:[%s5866_s17 + $0x200] sm:$0xff]  ;;  %v5497_v1 = vld [vmem:[%s5866_s17 + $0x198] sm:$0xff] }
 0x486   : > { %3711 = vbcast.lane.b32.xlu1 %v7840_v14, 328  ;;  %3841 = vbcast.lane.b32.xlu0 %v7852_v45, 320  ;;  %v4136_v54 = vmul.f32 %v5489_v55, %v7935_v50 }
 0x487   : > { %v4277_v13 = vsel %vm8732_vm1, %v4106_v11, 0.0  ;;  %v5498_v11 = vld [vmem:[%s5866_s17 + $0x28] sm:$0xff]  ;;  %vm8740_vm1 = vmmov %vm8723_vm0 }
 0x488   : > { %v7939_v23 = vpop.permute.xlu1 %3813  ;;  %v7941_v31 = vpop.permute.xlu0 %3553 }
 0x489   : > { %v4137_v43 = vmul.f32 %v5486_v57, %v7939_v23  ;;  %v4075_v40 = vmul.f32 %v5487_v16, %v7941_v31  ;;  %v5490_v23 = vld [vmem:[%s5866_s17 + $0x190] sm:$0xff]  ;;  %v4204_v31 = vadd.f32 %v4203_v41, %v4202_v38  ;;  %v4348_v38 = vsel %vm8736_vm9, %v4136_v54, 0.0  ;;  %vm8744_vm9 = vmmov %vm8723_vm0 }
 0x48a   : > { %3971 = vbcast.lane.b32.xlu1 %v7868_v44, 312  ;;  %3581 = vbcast.lane.b32.xlu0 %v7826_v20, 336 }
 0x48b   : > { %v4205_v32 = vsel %vm8734_vm7, %v4075_v40, 0.0  ;;  %vm8742_vm7 = vmmov %vm8723_vm0 }
 0x48c   : > { %v7945_v22 = vpop.permute.xlu1 %3620  ;;  %v7947_v51 = vpop.permute.xlu0 %3750 }
 0x48d   : > { %v4091_v21 = vmul.f32 %v5488_v53, %v7945_v22  ;;  %v4122_v26 = vmul.f32 %v5490_v23, %v7947_v51  ;;  %v4313_v51 = vadd.f32 %v4312_v4, %v4311_v0  ;;  %v4206_v4 = vadd.f32 %v4205_v32, %v4204_v31 }
 0x48e   : > { %3648 = vbcast.lane.b32.xlu1 %v7836_v29, 336  ;;  %3778 = vbcast.lane.b32.xlu0 %v7848_v35, 328 }
 0x48f   : > { %v4242_v28 = vsel %vm8735_vm8, %v4091_v21, 0.0  ;;  %v4314_v58 = vsel %vm8737_vm10, %v4122_v26, 0.0  ;;  %v5500_v26 = vld [vmem:[%s5866_s17 + $0x300] sm:$0xff]  ;;  %vm8743_vm8 = vmmov %vm8723_vm0 }
 0x490   : > { %v7951_v59 = vpop.permute.xlu1 %3876  ;;  %v7953_v12 = vpop.permute.xlu0 %3880  ;;  %v4315_v53 = vadd.f32 %v4314_v58, %v4313_v51  ;;  %vm8745_vm10 = vmmov %vm8723_vm0 }
 0x491   : > { %v4152_v46 = vmul.f32 %v5491_v8, %v7951_v59  ;;  %v4153_v22 = vmul.f32 %v5492_v39, %v7953_v12  ;;  %v4349_v59 = vsel %vm8733_vm15, %v4137_v43, 0.0  ;;  %v5494_v12 = vld [vmem:[%s5866_s17 + $0x210] sm:$0xff]  ;;  %v4278_v43 = vadd.f32 %v4277_v13, %v4276_v61  ;;  %vm8741_vm15 = vmmov %vm8723_vm0  ;;  %v5501_v39 = vld [vmem:[%s5866_s17 + $0xa8] sm:$0xff] }
 0x492   : > { %3908 = vbcast.lane.b32.xlu1 %v7861_v2, 320  ;;  %4038 = vbcast.lane.b32.xlu0 %v7877_v19, 312  ;;  %v4350_v0 = vadd.f32 %v4349_v59, %v4348_v38  ;;  %v5504_v13 = vld [vmem:[%s5866_s17 + $0x380] sm:$0xff] }
 0x493   : > { %v4385_v18 = vsel %vm8738_vm3, %v4152_v46, 0.0  ;;  %v4386_v27 = vsel %vm8739_vm6, %v4153_v22, 0.0  ;;  %v5502_v22 = vld [vmem:[%s5866_s17 + $0x1a0] sm:$0xff]  ;;  %vm8746_vm3 = vmmov %vm8723_vm0 }
 0x494   : > { %v7957_v15 = vpop.permute.xlu1 %3687  ;;  %v7959_v6 = vpop.permute.xlu0 %3817  ;;  %vm8747_vm6 = vmmov %vm8723_vm0 }
 0x495   : > { %v4107_v50 = vmul.f32 %v5493_v42, %v7957_v15  ;;  %v4138_v15 = vmul.f32 %v5494_v12, %v7959_v6 }
 0x496   : > { %3715 = vbcast.lane.b32.xlu1 %v7840_v14, 336  ;;  %3845 = vbcast.lane.b32.xlu0 %v7852_v45, 328 }
 0x497   : > { %v4279_v6 = vsel %vm8723_vm0, %v4107_v50, 0.0  ;;  %v4351_v21 = vsel %vm8740_vm1, %v4138_v15, 0.0  ;;  %v5505_v15 = vld [vmem:[%s5866_s17 + $0x388] sm:$0xff]  ;;  %vm8748_vm1 = vmmov %vm8723_vm0 }
 0x498   : > { %v7963_v34 = vpop.permute.xlu1 %3943  ;;  %v7965_v56 = vpop.permute.xlu0 %3947  ;;  %v8086_v23 = vadd.f32 %v4279_v6, %v4278_v43  ;;  %v8099_v50 = vadd.f32 %v4351_v21, %v4350_v0 }
 0x499   : > { %v4168_v8 = vmul.f32 %v5500_v26, %v7963_v34  ;;  %v5503_v34 = vld [vmem:[%s5866_s17 + $0x308] sm:$0xff] }
 0x49a   : > { %3975 = vbcast.lane.b32.xlu1 %v7868_v44, 320  ;;  %3585 = vbcast.lane.b32.xlu0 %v7826_v20, 344 }
 0x49c   : > { %v7972_v49 = vpop.permute.xlu1 %3557  ;;  %v7974_v5 = vpop.permute.xlu0 %3624 }
 0x49d   : > { %v4076_v17 = vmul.f32 %v5495_v63, %v7972_v49  ;;  %v4092_v41 = vmul.f32 %v5496_v48, %v7974_v5  ;;  %v4243_v5 = vadd.f32 %v4242_v28, %v4241_v36  ;;  %v8103_v36 = vmul.f32 %v5503_v34, %v7965_v56  ;;  %v5506_v63 = vld [vmem:[%s5866_s17 + $0x30] sm:$0xff] }
 0x49e   : > { %3652 = vbcast.lane.b32.xlu1 %v7836_v29, 344  ;;  %3782 = vbcast.lane.b32.xlu0 %v7848_v35, 336  ;;  %v8114_v56 = vsel %vm8746_vm3, %v4168_v8, 0.0  ;;  %v5513_v8 = vld [vmem:[%s5866_s17 + $0x128] sm:$0xff]  ;;  %vm8754_vm3 = vmmov %vm8723_vm0 }
 0x49f   : > { %v4207_v55 = vsel %vm8741_vm15, %v4076_v17, 0.0  ;;  %v4244_v46 = vsel %vm8742_vm7, %v4092_v41, 0.0  ;;  %v5508_v41 = vld [vmem:[%s5866_s17 + $0x390] sm:$0xff]  ;;  %vm8749_vm15 = vmmov %vm8723_vm0 }
 0x4a0   : > { %v7979_v9 = vpop.permute.xlu1 %3754  ;;  %v7981_v62 = vpop.permute.xlu0 %3884  ;;  %v4208_v51 = vadd.f32 %v4207_v55, %v4206_v4  ;;  %v4245_v12 = vadd.f32 %v4244_v46, %v4243_v5  ;;  %vm8750_vm7 = vmmov %vm8723_vm0  ;;  %v5510_v5 = vld [vmem:[%s5866_s17 + $0x218] sm:$0xff]  ;;  %v5512_v55 = vld [vmem:[%s5866_s17 + $0x1a8] sm:$0xff] }
 0x4a1   : > { %v4123_v49 = vmul.f32 %v5497_v1, %v7979_v9  ;;  %v5499_v9 = vld [vmem:[%s5866_s17 + $0x290] sm:$0xff] }
 0x4a2   : > { %3912 = vbcast.lane.b32.xlu1 %v7861_v2, 328  ;;  %4042 = vbcast.lane.b32.xlu0 %v7877_v19, 320  ;;  %v4154_v54 = vmul.f32 %v5499_v9, %v7981_v62 }
 0x4a3   : > { %v4316_v61 = vsel %vm8743_vm8, %v4123_v49, 0.0  ;;  %vm8751_vm8 = vmmov %vm8723_vm0 }
 0x4a4   : > { %v7985_v33 = vpop.permute.xlu1 %4010  ;;  %v7987_v37 = vpop.permute.xlu0 %4014  ;;  %v4317_v38 = vadd.f32 %v4316_v61, %v4315_v53 }
 0x4a5   : > { %v4184_v59 = vmul.f32 %v5504_v13, %v7985_v33 }
 0x4a6   : > { %3719 = vbcast.lane.b32.xlu1 %v7840_v14, 344  ;;  %3849 = vbcast.lane.b32.xlu0 %v7852_v45, 336 }
 0x4a7   : > { %v4459_v49 = vsel %vm8749_vm15, %v4184_v59, 0.0  ;;  %v5515_v59 = vld [vmem:[%s5866_s17 + $0x310] sm:$0xff]  ;;  %vm8757_vm15 = vmmov %vm8723_vm0 }
 0x4a8   : > { %v7995_v60 = vpop.permute.xlu1 %3691  ;;  %v7997_v10 = vpop.permute.xlu0 %3821 }
 0x4a9   : > { %v4139_v53 = vmul.f32 %v5510_v5, %v7997_v10  ;;  %v5514_v10 = vld [vmem:[%s5866_s17 + $0x220] sm:$0xff] }
 0x4aa   : > { %3979 = vbcast.lane.b32.xlu1 %v7868_v44, 328  ;;  %3589 = vbcast.lane.b32.xlu0 %v7826_v20, 352 }
 0x4ab   : > { %v4353_v13 = vsel %vm8723_vm0, %v4139_v53, 0.0 }
 0x4ac   : > { %v8013_v30 = vpop.permute.xlu1 %3951  ;;  %v8015_v3 = vpop.permute.xlu0 %3561 }
 0x4ad   : > { %v4077_v57 = vmul.f32 %v5498_v11, %v8015_v3  ;;  %v4387_v3 = vadd.f32 %v4386_v27, %v4385_v18  ;;  %v5507_v18 = vld [vmem:[%s5866_s17 + $0x298] sm:$0xff] }
 0x4ae   : > { %3656 = vbcast.lane.b32.xlu1 %v7836_v29, 352  ;;  %3786 = vbcast.lane.b32.xlu0 %v7848_v35, 344 }
 0x4af   : > { %v4209_v31 = vsel %vm8744_vm9, %v4077_v57, 0.0  ;;  %vm8752_vm9 = vmmov %vm8723_vm0 }
 0x4b0   : > { %v8031_v47 = vpop.permute.xlu1 %3628  ;;  %v8033_v7 = vpop.permute.xlu0 %3758  ;;  %v4210_v58 = vadd.f32 %v4209_v31, %v4208_v51 }
 0x4b1   : > { %v4093_v62 = vmul.f32 %v5501_v39, %v8031_v47  ;;  %v4124_v42 = vmul.f32 %v5502_v22, %v8033_v7  ;;  %v4388_v47 = vsel %vm8745_vm10, %v4154_v54, 0.0  ;;  %v4185_v7 = vmul.f32 %v5505_v15, %v7987_v37  ;;  %vm8753_vm10 = vmmov %vm8723_vm0 }
 0x4b2   : > { %3916 = vbcast.lane.b32.xlu1 %v7861_v2, 336  ;;  %4046 = vbcast.lane.b32.xlu0 %v7877_v19, 328  ;;  %v4389_v1 = vadd.f32 %v4388_v47, %v4387_v3  ;;  %v5517_v47 = vld [vmem:[%s5866_s17 + $0x398] sm:$0xff] }
 0x4b3   : > { %v4246_v48 = vsel %vm8747_vm6, %v4093_v62, 0.0  ;;  %v4318_v37 = vsel %vm8723_vm0, %v4124_v42, 0.0  ;;  %v4460_v4 = vsel %vm8750_vm7, %v4185_v7, 0.0  ;;  %vm8755_vm6 = vmmov %vm8723_vm0 }
 0x4b4   : > { %v8055_v52 = vpop.permute.xlu1 %3888  ;;  %v8057_v24 = vpop.permute.xlu0 %4018  ;;  %v4247_v54 = vadd.f32 %v4246_v48, %v4245_v12  ;;  %v4319_v3 = vadd.f32 %v4318_v37, %v4317_v38  ;;  %v4461_v62 = vadd.f32 %v4460_v4, %v4459_v49  ;;  %vm8758_vm7 = vmmov %vm8723_vm0  ;;  %v4354_v37 = vadd.f32 %v4353_v13, %v8099_v50 }
 0x4b5   : > { %v4155_v33 = vmul.f32 %v5507_v18, %v8055_v52  ;;  %v4186_v27 = vmul.f32 %v5508_v41, %v8057_v24  ;;  %v5509_v52 = vld [vmem:[%s5866_s17 + $0x120] sm:$0xff]  ;;  %v5511_v24 = vld [vmem:[%s5866_s17 + $0xb0] sm:$0xff] }
 0x4b6   : > { %3723 = vbcast.lane.b32.xlu1 %v7840_v14, 352  ;;  %3853 = vbcast.lane.b32.xlu0 %v7852_v45, 344  ;;  %v4108_v11 = vmul.f32 %v5509_v52, %v7995_v60  ;;  %v5519_v52 = vld [vmem:[%s5866_s17 + $0x130] sm:$0xff] }
 0x4b7   : > { %v4390_v26 = vsel %vm8751_vm8, %v4155_v33, 0.0  ;;  %v4462_v46 = vsel %vm8752_vm9, %v4186_v27, 0.0  ;;  %vm8759_vm8 = vmmov %vm8723_vm0 }
 0x4b8   : > { %v8078_v16 = vpop.permute.xlu1 %3695  ;;  %v8080_v40 = vpop.permute.xlu0 %3825  ;;  %v4281_v22 = vsel %vm8755_vm6, %v4108_v11, 0.0  ;;  %vm8760_vm9 = vmmov %vm8723_vm0 }
 0x4b9   : > { %v4109_v60 = vmul.f32 %v5513_v8, %v8078_v16  ;;  %v4140_v61 = vmul.f32 %v5514_v10, %v8080_v40  ;;  %v5516_v40 = vld [vmem:[%s5866_s17 + $0x2a0] sm:$0xff]  ;;  %vm8763_vm6 = vmmov %vm8723_vm0 }
 0x4ba   : > { %3983 = vbcast.lane.b32.xlu1 %v7868_v44, 336  ;;  %3593 = vbcast.lane.b32.xlu0 %v7826_v20, 360 }
 0x4bb   : > { %v4283_v38 = vsel %vm8757_vm15, %v4109_v60, 0.0  ;;  %vm8765_vm15 = vmmov %vm8723_vm0 }
 0x4bc   : > { %v8107_v32 = vpop.permute.xlu1 %3955  ;;  %v3566_v28 = vpop.permute.xlu0 %3565 }
 0x4bd   : > { %v4078_v17 = vmul.f32 %v5506_v63, %v3566_v28  ;;  %v4170_v28 = vmul.f32 %v5515_v59, %v8013_v30  ;;  %v4391_v63 = vadd.f32 %v4390_v26, %v4389_v1  ;;  %v5518_v30 = vld [vmem:[%s5866_s17 + $0x318] sm:$0xff] }
 0x4be   : > { %3660 = vbcast.lane.b32.xlu1 %v7836_v29, 360  ;;  %3790 = vbcast.lane.b32.xlu0 %v7848_v35, 352  ;;  %v4171_v18 = vmul.f32 %v5518_v30, %v8107_v32  ;;  %v5522_v26 = vld [vmem:[%s5866_s17 + $0x38] sm:$0xff] }
 0x4bf   : > { %v4211_v6 = vsel %vm8748_vm1, %v4078_v17, 0.0  ;;  %vm8756_vm1 = vmmov %vm8723_vm0  ;;  %v4463_v17 = vadd.f32 %v4462_v46, %v4461_v62 }
 0x4c0   : > { %v8128_v57 = vadd.f32 %v4211_v6, %v4210_v58  ;;  %v3633_v43 = vpop.permute.xlu1 %3632  ;;  %v3763_v0 = vpop.permute.xlu0 %3762  ;;  %v4423_v7 = vsel %vm8756_vm1, %v8103_v36, 0.0  ;;  %v4355_v58 = vsel %vm8758_vm7, %v4140_v61, 0.0  ;;  %v4282_v36 = vadd.f32 %v4281_v22, %v8086_v23  ;;  %vm8764_vm1 = vmmov %vm8723_vm0  ;;  %v5523_v22 = vld [vmem:[%s5866_s17 + $0xb8] sm:$0xff] }
 0x4c1   : > { %v4094_v21 = vmul.f32 %v5511_v24, %v3633_v43  ;;  %v4125_v9 = vmul.f32 %v5512_v55, %v3763_v0  ;;  %v5520_v43 = vld [vmem:[%s5866_s17 + $0x228] sm:$0xff]  ;;  %v4424_v32 = vadd.f32 %v4423_v7, %v8114_v56  ;;  %v4356_v5 = vadd.f32 %v4355_v58, %v4354_v37  ;;  %v5521_v56 = vld [vmem:[%s5866_s17 + $0x320] sm:$0xff]  ;;  %vm8766_vm7 = vmmov %vm8723_vm0 }
 0x4c2   : > { %3920 = vbcast.lane.b32.xlu1 %v7861_v2, 344  ;;  %4050 = vbcast.lane.b32.xlu0 %v7877_v19, 336  ;;  %v4284_v4 = vadd.f32 %v4283_v38, %v4282_v36  ;;  %v5528_v36 = vld [vmem:[%s5866_s17 + $0x230] sm:$0xff] }
 0x4c3   : > { %v4248_v31 = vsel %vm8753_vm10, %v4094_v21, 0.0  ;;  %v4320_v39 = vsel %vm8754_vm3, %v4125_v9, 0.0  ;;  %vm8761_vm10 = vmmov %vm8723_vm0 }
 0x4c4   : > { %v8146_v42 = vadd.f32 %v4248_v31, %v4247_v54  ;;  %v8148_v16 = vadd.f32 %v4320_v39, %v4319_v3  ;;  %v3893_v34 = vpop.permute.xlu1 %3892  ;;  %v4023_v51 = vpop.permute.xlu0 %4022  ;;  %v4425_v49 = vsel %vm8761_vm10, %v4170_v28, 0.0  ;;  %vm8762_vm3 = vmmov %vm8723_vm0 }
 0x4c5   : > { %v4156_v12 = vmul.f32 %v5516_v40, %v3893_v34  ;;  %v4187_v15 = vmul.f32 %v5517_v47, %v4023_v51  ;;  %v4427_v23 = vsel %vm8762_vm3, %v4171_v18, 0.0  ;;  %v4426_v24 = vadd.f32 %v4425_v49, %v4424_v32  ;;  %v5524_v51 = vld [vmem:[%s5866_s17 + $0x1b0] sm:$0xff]  ;;  %vm8769_vm10 = vmmov %vm8723_vm0 }
 0x4c6   : > { %3727 = vbcast.lane.b32.xlu1 %v7840_v14, 360  ;;  %3857 = vbcast.lane.b32.xlu0 %v7852_v45, 352  ;;  %vm8770_vm3 = vmmov %vm8723_vm0 }
 0x4c7   : > { %v4392_v33 = vsel %vm8759_vm8, %v4156_v12, 0.0  ;;  %v4464_v48 = vsel %vm8760_vm9, %v4187_v15, 0.0  ;;  %v4428_v60 = vadd.f32 %v4427_v23, %v4426_v24  ;;  %vm8767_vm8 = vmmov %vm8723_vm0  ;;  %v5525_v15 = vld [vmem:[%s5866_s17 + $0x2a8] sm:$0xff] }
 0x4c8   : > { %v4393_v41 = vadd.f32 %v4392_v33, %v4391_v63  ;;  %v4465_v27 = vadd.f32 %v4464_v48, %v4463_v17  ;;  %v3700_v6 = vpop.permute.xlu1 %3699  ;;  %v3830_v1 = vpop.permute.xlu0 %3829  ;;  %v5526_v63 = vld [vmem:[%s5866_s17 + $0x3a0] sm:$0xff]  ;;  %vm8768_vm9 = vmmov %vm8723_vm0  ;;  %v5527_v33 = vld [vmem:[%s5866_s17 + $0x138] sm:$0xff] }
 0x4c9   : > { %v4110_v11 = vmul.f32 %v5519_v52, %v3700_v6  ;;  %v4141_v0 = vmul.f32 %v5520_v43, %v3830_v1  ;;  %v5208_v24 = vld [vmem:[%s8528_s10 + $0x8] sm:$0xff]  }
 0x4ca   : > { %3987 = vbcast.lane.b32.xlu1 %v7868_v44, 344  ;;  %3597 = vbcast.lane.b32.xlu0 %v7826_v20, 368 }
 0x4cb   : > { %v4285_v50 = vsel %vm8763_vm6, %v4110_v11, 0.0  ;;  %v4357_v53 = vsel %vm8723_vm0, %v4141_v0, 0.0  ;;  %vm8771_vm6 = vmmov %vm8723_vm0  ;;  %v5529_v11 = vld [vmem:[%s5866_s17 + $0x328] sm:$0xff]  ;;  %v5530_v0 = vld [vmem:[%s5866_s17 + $0x40] sm:$0xff]  ;;  %5137 = vmatpush3.bf16.msra.mxu0 %v5208_v24 }
 0x4cc   : > { %v4286_v21 = vadd.f32 %v4285_v50, %v4284_v4  ;;  %v4358_v55 = vadd.f32 %v4357_v53, %v4356_v5  ;;  %v3960_v9 = vpop.permute.xlu1 %3959  ;;  %v3570_v54 = vpop.permute.xlu0 %3569  ;;  %5142 = vmatprep.subr.bf16.mxu0 %v8722_v25 }
 0x4cd   : > { %v4172_v3 = vmul.f32 %v5521_v56, %v3960_v9  ;;  %v4079_v8 = vmul.f32 %v5522_v26, %v3570_v54  ;;  %v5532_v9 = vld [vmem:[%s5866_s17 + $0x1b8] sm:$0xff] }
 0x4ce   : > { %3664 = vbcast.lane.b32.xlu1 %v7836_v29, 368  ;;  %3794 = vbcast.lane.b32.xlu0 %v7848_v35, 360 }
 0x4cf   : > { %v4429_v46 = vsel %vm8764_vm1, %v4172_v3, 0.0  ;;  %v4213_v10 = vsel %vm8765_vm15, %v4079_v8, 0.0  ;;  %vm8772_vm1 = vmmov %vm8723_vm0 }
 0x4d0   : > { %v4430_v61 = vadd.f32 %v4429_v46, %v4428_v60  ;;  %v4214_v31 = vadd.f32 %v4213_v10, %v8128_v57  ;;  %v3637_v39 = vpop.permute.xlu1 %3636  ;;  %v3767_v62 = vpop.permute.xlu0 %3766  ;;  %vm8773_vm15 = vmmov %vm8723_vm0  ;;  %v5533_v46 = vld [vmem:[%s5866_s17 + $0x2b0] sm:$0xff] }
 0x4d1   : > { %v4095_v34 = vmul.f32 %v5523_v22, %v3637_v39  ;;  %v4126_v13 = vmul.f32 %v5524_v51, %v3767_v62 }
 0x4d2   : > { %3924 = vbcast.lane.b32.xlu1 %v7861_v2, 352  ;;  %4054 = vbcast.lane.b32.xlu0 %v7877_v19, 344 }
 0x4d3   : > { %v4250_v59 = vsel %vm8766_vm7, %v4095_v34, 0.0  ;;  %v4322_v28 = vsel %vm8767_vm8, %v4126_v13, 0.0  ;;  %vm8774_vm7 = vmmov %vm8723_vm0 }
 0x4d4   : > { %v4251_v40 = vadd.f32 %v4250_v59, %v8146_v42  ;;  %v4323_v57 = vadd.f32 %v4322_v28, %v8148_v16  ;;  %v3897_v12 = vpop.permute.xlu1 %3896  ;;  %v4027_v47 = vpop.permute.xlu0 %4026  ;;  %vm8775_vm8 = vmmov %vm8723_vm0  ;;  %v5535_v59 = vld [vmem:[%s5866_s17 + $0x140] sm:$0xff] }
 0x4d5   : > { %v4157_v7 = vmul.f32 %v5525_v15, %v3897_v12  ;;  %v4188_v17 = vmul.f32 %v5526_v63, %v4027_v47 }
 0x4d6   : > { %3731 = vbcast.lane.b32.xlu1 %v7840_v14, 368  ;;  %3861 = vbcast.lane.b32.xlu0 %v7852_v45, 360 }
 0x4d7   : > { %v4394_v38 = vsel %vm8768_vm9, %v4157_v7, 0.0  ;;  %v4466_v58 = vsel %vm8769_vm10, %v4188_v17, 0.0  ;;  %vm8776_vm9 = vmmov %vm8723_vm0  ;;  %v5537_v17 = vld [vmem:[%s5866_s17 + $0x330] sm:$0xff] }
 0x4d8   : > { %v4395_v30 = vadd.f32 %v4394_v38, %v4393_v41  ;;  %v4467_v42 = vadd.f32 %v4466_v58, %v4465_v27  ;;  %v3704_v18 = vpop.permute.xlu1 %3703  ;;  %v3834_v16 = vpop.permute.xlu0 %3833  ;;  %vm8777_vm10 = vmmov %vm8723_vm0  ;;  %v5538_v58 = vld [vmem:[%s5866_s17 + $0x48] sm:$0xff] }
 0x4d9   : > { %v4111_v48 = vmul.f32 %v5527_v33, %v3704_v18  ;;  %v4142_v37 = vmul.f32 %v5528_v36, %v3834_v16  ;;  %v5539_v36 = vld [vmem:[%s5866_s17 + $0xc8] sm:$0xff] }
 0x4da   : > { %3991 = vbcast.lane.b32.xlu1 %v7868_v44, 352  ;;  %3601 = vbcast.lane.b32.xlu0 %v7826_v20, 376 }
 0x4db   : > { %v4287_v6 = vsel %vm8770_vm3, %v4111_v48, 0.0  ;;  %v4359_v1 = vsel %vm8771_vm6, %v4142_v37, 0.0  ;;  %vm8778_vm3 = vmmov %vm8723_vm0 }
 0x4dc   : > { %v4288_v49 = vadd.f32 %v4287_v6, %v4286_v21  ;;  %v4360_v52 = vadd.f32 %v4359_v1, %v4358_v55  ;;  %v3964_v41 = vpop.permute.xlu1 %3963  ;;  %v3574_v27 = vpop.permute.xlu0 %3573  ;;  %v5531_v21 = vld [vmem:[%s5866_s17 + $0xc0] sm:$0xff]  ;;  %vm8779_vm6 = vmmov %vm8723_vm0 }
 0x4dd   : > { %v4173_v43 = vmul.f32 %v5529_v11, %v3964_v41  ;;  %v4080_v32 = vmul.f32 %v5530_v0, %v3574_v27  ;;  %v5540_v6 = vld [vmem:[%s5866_s17 + $0x1c0] sm:$0xff]  ;;  %v5541_v0 = vld [vmem:[%s5866_s17 + $0x2b8] sm:$0xff] }
 0x4de   : > { %3668 = vbcast.lane.b32.xlu1 %v7836_v29, 376  ;;  %3798 = vbcast.lane.b32.xlu0 %v7848_v35, 368 }
 0x4df   : > { %v4431_v20 = vsel %vm8723_vm0, %v4173_v43, 0.0  ;;  %v4215_v4 = vsel %vm8772_vm1, %v4080_v32, 0.0  ;;  %vm8780_vm1 = vmmov %vm8723_vm0 }
 0x4e0   : > { %v4432_v5 = vadd.f32 %v4431_v20, %v4430_v61  ;;  %v4216_v23 = vadd.f32 %v4215_v4, %v4214_v31  ;;  %v3641_v50 = vpop.permute.xlu1 %3640  ;;  %v3771_v53 = vpop.permute.xlu0 %3770  ;;  %v5534_v61 = vld [vmem:[%s5866_s17 + $0x3a8] sm:$0xff]  ;;  %v5542_v20 = vld [vmem:[%s5866_s17 + $0x3b0] sm:$0xff] }
 0x4e1   : > { %v4096_v55 = vmul.f32 %v5531_v21, %v3641_v50  ;;  %v4127_v29 = vmul.f32 %v5532_v9, %v3771_v53  ;;  %v5543_v21 = vld [vmem:[%s5866_s17 + $0x148] sm:$0xff]  ;;  %v5544_v9 = vld [vmem:[%s5866_s17 + $0x240] sm:$0xff] }
 0x4e2   : > { %3928 = vbcast.lane.b32.xlu1 %v7861_v2, 360  ;;  %4058 = vbcast.lane.b32.xlu0 %v7877_v19, 352 }
 0x4e3   : > { %v4252_v54 = vsel %vm8773_vm15, %v4096_v55, 0.0  ;;  %v4324_v56 = vsel %vm8774_vm7, %v4127_v29, 0.0  ;;  %vm8781_vm15 = vmmov %vm8723_vm0 }
 0x4e4   : > { %v4253_v3 = vadd.f32 %v4252_v54, %v4251_v40  ;;  %v4325_v26 = vadd.f32 %v4324_v56, %v4323_v57  ;;  %v3901_v8 = vpop.permute.xlu1 %3900  ;;  %v4031_v60 = vpop.permute.xlu0 %4030  ;;  %v5536_v40 = vld [vmem:[%s5866_s17 + $0x238] sm:$0xff]  ;;  %vm8782_vm7 = vmmov %vm8723_vm0 }
 0x4e5   : > { %v4158_v10 = vmul.f32 %v5533_v46, %v3901_v8  ;;  %v4189_v31 = vmul.f32 %v5534_v61, %v4031_v60  ;;  %v5545_v60 = vld [vmem:[%s5866_s17 + $0x338] sm:$0xff] }
 0x4e6   : > { %3735 = vbcast.lane.b32.xlu1 %v7840_v14, 376  ;;  %3865 = vbcast.lane.b32.xlu0 %v7852_v45, 368 }
 0x4e7   : > { %v4396_v39 = vsel %vm8775_vm8, %v4158_v10, 0.0  ;;  %v4468_v62 = vsel %vm8776_vm9, %v4189_v31, 0.0  ;;  %vm8783_vm8 = vmmov %vm8723_vm0  ;;  %v5546_v10 = vld [vmem:[%s5866_s17 + $0x50] sm:$0xff] }
 0x4e8   : > { %v4397_v22 = vadd.f32 %v4396_v39, %v4395_v30  ;;  %v4469_v34 = vadd.f32 %v4468_v62, %v4467_v42  ;;  %v3708_v51 = vpop.permute.xlu1 %3707  ;;  %v3838_v13 = vpop.permute.xlu0 %3837  ;;  %vm8784_vm9 = vmmov %vm8723_vm0  ;;  %v8786_v31 = vld [vmem:[#allocation10_spill] sm:$0xff] }
 0x4e9   : > { %v4112_v28 = vmul.f32 %v5535_v59, %v3708_v51  ;;  %v4143_v57 = vmul.f32 %v5536_v40, %v3838_v13  ;;  %v5547_v51 = vld [vmem:[%s5866_s17 + $0xd0] sm:$0xff]  ;;  %v5548_v59 = vld [vmem:[%s5866_s17 + $0x1c8] sm:$0xff] }
 0x4ea   : > { %3995 = vbcast.lane.b32.xlu1 %v7868_v44, 360  ;;  %3802 = vbcast.lane.b32.xlu0 %v7848_v35, 376 }
 0x4eb   : > { %v4289_v14 = vsel %vm8777_vm10, %v4112_v28, 0.0  ;;  %v4361_v12 = vsel %vm8778_vm3, %v4143_v57, 0.0  ;;  %vm8785_vm10 = vmmov %vm8723_vm0 }
 0x4ec   : > { %v4290_v47 = vadd.f32 %v4289_v14, %v4288_v49  ;;  %v4362_v15 = vadd.f32 %v4361_v12, %v4360_v52  ;;  %v3968_v7 = vpop.permute.xlu1 %3967  ;;  %v3578_v63 = vpop.permute.xlu0 %3577  ;;  %vm8787_vm3 = vmmov %vm8723_vm0 }
 0x4ed   : > { %v4174_v38 = vmul.f32 %v5537_v17, %v3968_v7  ;;  %v4081_v30 = vmul.f32 %v5538_v58, %v3578_v63  ;;  %v5549_v7 = vld [vmem:[%s5866_s17 + $0x2c0] sm:$0xff]  ;;  %v5550_v17 = vld [vmem:[%s5866_s17 + $0x3b8] sm:$0xff] }
 0x4ee   : > { %3932 = vbcast.lane.b32.xlu1 %v7861_v2, 368  ;;  %4062 = vbcast.lane.b32.xlu0 %v7877_v19, 360 }
 0x4ef   : > { %v4433_v35 = vsel %vm8779_vm6, %v4174_v38, 0.0  ;;  %v4217_v42 = vsel %vm8723_vm0, %v4081_v30, 0.0  ;;  %vm8788_vm6 = vmmov %vm8723_vm0 }
 0x4f0   : > { %v4434_v18 = vadd.f32 %v4433_v35, %v4432_v5  ;;  %v4218_v16 = vadd.f32 %v4217_v42, %v4216_v23  ;;  %v3645_v33 = vpop.permute.xlu1 %3644  ;;  %v3775_v48 = vpop.permute.xlu0 %3774 }
 0x4f1   : > { %v4097_v37 = vmul.f32 %v5539_v36, %v3645_v33  ;;  %v4128_v1 = vmul.f32 %v5540_v6, %v3775_v48  ;;  %v5551_v33 = vld [vmem:[%s5866_s17 + $0x150] sm:$0xff]  ;;  %v5552_v36 = vld [vmem:[%s5866_s17 + $0x248] sm:$0xff] }
 0x4f2   : > { %3869 = vbcast.lane.b32.xlu1 %v7852_v45, 376  ;;  %3999 = vbcast.lane.b32.xlu0 %v7868_v44, 368 }
 0x4f3   : > { %v4254_v49 = vsel %vm8780_vm1, %v4097_v37, 0.0  ;;  %v4326_v52 = vsel %vm8781_vm15, %v4128_v1, 0.0  ;;  %vm8789_vm1 = vmmov %vm8723_vm0 }
 0x4f4   : > { %v4255_v41 = vadd.f32 %v4254_v49, %v4253_v3  ;;  %v4327_v27 = vadd.f32 %v4326_v52, %v4325_v26  ;;  %v3905_v11 = vpop.permute.xlu1 %3904  ;;  %v4035_v43 = vpop.permute.xlu0 %4034  ;;  %vm8790_vm15 = vmmov %vm8723_vm0 }
 0x4f5   : > { %v4159_v32 = vmul.f32 %v5541_v0, %v3905_v11  ;;  %v4190_v4 = vmul.f32 %v5542_v20, %v4035_v43  ;;  %v5553_v11 = vld [vmem:[%s5866_s17 + $0x340] sm:$0xff]  ;;  %v5554_v0 = vld [vmem:[%s5866_s17 + $0x58] sm:$0xff] }
 0x4f6   : > { %3936 = vbcast.lane.b32.xlu1 %v7861_v2, 376  ;;  %4066 = vbcast.lane.b32.xlu0 %v7877_v19, 368 }
 0x4f7   : > { %v4398_v45 = vsel %vm8782_vm7, %v4159_v32, 0.0  ;;  %v4470_v5 = vsel %vm8783_vm8, %v4190_v4, 0.0  ;;  %vm8791_vm7 = vmmov %vm8723_vm0 }
 0x4f8   : > { %v4399_v23 = vadd.f32 %v4398_v45, %v4397_v22  ;;  %v4471_v50 = vadd.f32 %v4470_v5, %v4469_v34  ;;  %v3712_v53 = vpop.permute.xlu1 %3711  ;;  %v3842_v24 = vpop.permute.xlu0 %3841  ;;  %vm8792_vm8 = vmmov %vm8723_vm0 }
 0x4f9   : > { %v4113_v55 = vmul.f32 %v5543_v21, %v3712_v53  ;;  %v4144_v29 = vmul.f32 %v5544_v9, %v3842_v24  ;;  %v5555_v53 = vld [vmem:[%s5866_s17 + $0xd8] sm:$0xff]  ;;  %v5556_v21 = vld [vmem:[%s5866_s17 + $0x1d0] sm:$0xff] }
 0x4fa   : > { %4003 = vbcast.lane.b32.xlu1 %v7868_v44, 376  ;;  %4070 = vbcast.lane.b32.xlu0 %v7877_v19, 376 }
 0x4fb   : > { %v4291_v2 = vsel %vm8784_vm9, %v4113_v55, 0.0  ;;  %v4363_v54 = vsel %vm8785_vm10, %v4144_v29, 0.0  ;;  %vm8793_vm9 = vmmov %vm8723_vm0 }
 0x4fc   : > { %v4292_v56 = vadd.f32 %v4291_v2, %v4290_v47  ;;  %v4364_v3 = vadd.f32 %v4363_v54, %v4362_v15  ;;  %v3972_v26 = vpop.permute.xlu1 %3971  ;;  %v3582_v8 = vpop.permute.xlu0 %3581  ;;  %vm8794_vm10 = vmmov %vm8723_vm0 }
 0x4fd   : > { %v4175_v46 = vmul.f32 %v5545_v60, %v3972_v26  ;;  %v4082_v61 = vmul.f32 %v5546_v10, %v3582_v8  ;;  %v5557_v26 = vld [vmem:[%s5866_s17 + $0x2c8] sm:$0xff]  ;;  %v5558_v60 = vld [vmem:[%s5866_s17 + $0x3c0] sm:$0xff] }
 0x4fe   : > { %4594 = vrot.lane.b32.xlu1 %v8786_v31, %s5703_s26  ;;  %s8553_s26 = sshll.u32 %s5810_s9, 7 }
 0x4ff   : > { %v4435_v44 = vsel %vm8787_vm3, %v4175_v46, 0.0  ;;  %v4219_v19 = vsel %vm8788_vm6, %v4082_v61, 0.0  ;;  %vm8795_vm3 = vmmov %vm8723_vm0  ;;  %s8440_s16 = scalar_lea.hbm %s8532_s14, %s8553_s26 }
 0x500   : > { %v4436_v39 = vadd.f32 %v4435_v44, %v4434_v18  ;;  %v4220_v62 = vadd.f32 %v4219_v19, %v4218_v16  ;;  %v3649_v22 = vpop.permute.xlu1 %3648  ;;  %v3779_v34 = vpop.permute.xlu0 %3778  ;;  %vm8796_vm6 = vmmov %vm8723_vm0 }
 0x501   : > { %v4098_v13 = vmul.f32 %v5547_v51, %v3649_v22  ;;  %v4129_v28 = vmul.f32 %v5548_v59, %v3779_v34  ;;  %v5560_v34 = vld [vmem:[%s5866_s17 + $0x250] sm:$0xff] }
 0x503   : > { %v4256_v40 = vsel %vm8723_vm0, %v4098_v13, 0.0  ;;  %v4328_v57 = vsel %vm8789_vm1, %v4129_v28, 0.0  ;;  %vm8797_vm1 = vmmov %vm8723_vm0 }
 0x504   : > { %v4257_v14 = vadd.f32 %v4256_v40, %v4255_v41  ;;  %v4329_v12 = vadd.f32 %v4328_v57, %v4327_v27  ;;  %v3909_v47 = vpop.permute.xlu1 %3908  ;;  %v4039_v15 = vpop.permute.xlu0 %4038 }
 0x505   : > { %v4160_v63 = vmul.f32 %v5549_v7, %v3909_v47  ;;  %v4191_v38 = vmul.f32 %v5550_v17, %v4039_v15  ;;  %v5562_v15 = vld [vmem:[%s5866_s17 + $0x60] sm:$0xff] }
 0x507   : > { %v4400_v58 = vsel %vm8790_vm15, %v4160_v63, 0.0  ;;  %v4472_v30 = vsel %vm8791_vm7, %v4191_v38, 0.0  ;;  %vm8798_vm15 = vmmov %vm8723_vm0 }
 0x508   : > { %v4401_v35 = vadd.f32 %v4400_v58, %v4399_v23  ;;  %v4473_v42 = vadd.f32 %v4472_v30, %v4471_v50  ;;  %v3716_v18 = vpop.permute.xlu1 %3715  ;;  %v3846_v16 = vpop.permute.xlu0 %3845  ;;  %vm8799_vm7 = vmmov %vm8723_vm0 }
 0x509   : > { %v4114_v48 = vmul.f32 %v5551_v33, %v3716_v18  ;;  %v4145_v37 = vmul.f32 %v5552_v36, %v3846_v16  ;;  %v5564_v16 = vld [vmem:[%s5866_s17 + $0x1d8] sm:$0xff] }
 0x50b   : > { %v4293_v6 = vsel %vm8792_vm8, %v4114_v48, 0.0  ;;  %v4365_v1 = vsel %vm8793_vm9, %v4145_v37, 0.0  ;;  %vm8800_vm8 = vmmov %vm8723_vm0 }
 0x50c   : > { %v4294_v49 = vadd.f32 %v4293_v6, %v4292_v56  ;;  %v4366_v52 = vadd.f32 %v4365_v1, %v4364_v3  ;;  %v3976_v41 = vpop.permute.xlu1 %3975  ;;  %v3586_v27 = vpop.permute.xlu0 %3585  ;;  %vm8801_vm9 = vmmov %vm8723_vm0 }
 0x50d   : > { %v4176_v43 = vmul.f32 %v5553_v11, %v3976_v41  ;;  %v4083_v32 = vmul.f32 %v5554_v0, %v3586_v27 }
 0x50f   : > { %v4437_v20 = vsel %vm8794_vm10, %v4176_v43, 0.0  ;;  %v4221_v4 = vsel %vm8795_vm3, %v4083_v32, 0.0  ;;  %vm8802_vm10 = vmmov %vm8723_vm0 }
 0x510   : > { %v4438_v45 = vadd.f32 %v4437_v20, %v4436_v39  ;;  %v4222_v5 = vadd.f32 %v4221_v4, %v4220_v62  ;;  %v3653_v23 = vpop.permute.xlu1 %3652  ;;  %v3783_v50 = vpop.permute.xlu0 %3782  ;;  %v5559_v62 = vld [vmem:[%s5866_s17 + $0x158] sm:$0xff]  ;;  %vm8803_vm3 = vmmov %vm8723_vm0 }
 0x511   : > { %v4099_v24 = vmul.f32 %v5555_v53, %v3653_v23  ;;  %v4130_v55 = vmul.f32 %v5556_v21, %v3783_v50 }
 0x513   : > { %v4258_v9 = vsel %vm8796_vm6, %v4099_v24, 0.0  ;;  %v4330_v29 = vsel %vm8723_vm0, %v4130_v55, 0.0  ;;  %vm8804_vm6 = vmmov %vm8723_vm0  ;;  %v5565_v55 = vld [vmem:[%s5866_s17 + $0x68] sm:$0xff] }
 0x514   : > { %v4259_v2 = vadd.f32 %v4258_v9, %v4257_v14  ;;  %v4331_v54 = vadd.f32 %v4330_v29, %v4329_v12  ;;  %v3913_v56 = vpop.permute.xlu1 %3912  ;;  %v4043_v3 = vpop.permute.xlu0 %4042  ;;  %v5561_v12 = vld [vmem:[%s5866_s17 + $0x348] sm:$0xff]  ;;  %v5566_v29 = vld [vmem:[%s5866_s17 + $0x70] sm:$0xff] }
 0x515   : > { %v4161_v8 = vmul.f32 %v5557_v26, %v3913_v56  ;;  %v4192_v46 = vmul.f32 %v5558_v60, %v4043_v3  ;;  %v5568_v3 = vld [vmem:[%s5866_s17 + $0x3c8] sm:$0xff] }
 0x517   : > { %v4402_v10 = vsel %vm8797_vm1, %v4161_v8, 0.0  ;;  %v4474_v61 = vsel %vm8798_vm15, %v4192_v46, 0.0  ;;  %vm8805_vm1 = vmmov %vm8723_vm0 }
 0x518   : > { %v8284_v31 = vadd.f32 %v4402_v10, %v4401_v35  ;;  %v8286_v44 = vadd.f32 %v4474_v61, %v4473_v42  ;;  %v3720_v19 = vpop.permute.xlu1 %3719  ;;  %v3850_v39 = vpop.permute.xlu0 %3849  ;;  %v5563_v42 = vld [vmem:[%s5866_s17 + $0xe0] sm:$0xff]  ;;  %v5569_v10 = vld [vmem:[%s5866_s17 + $0xe8] sm:$0xff]  ;;  %vm8806_vm15 = vmmov %vm8723_vm0 }
 0x519   : > { %v4115_v22 = vmul.f32 %v5559_v62, %v3720_v19  ;;  %v4146_v51 = vmul.f32 %v5560_v34, %v3850_v39  ;;  %v5570_v39 = vld [vmem:[%s5866_s17 + $0xf0] sm:$0xff] }
 0x51b   : > { %v4295_v13 = vsel %vm8799_vm7, %v4115_v22, 0.0  ;;  %v4367_v59 = vsel %vm8800_vm8, %v4146_v51, 0.0  ;;  %vm8807_vm7 = vmmov %vm8723_vm0  ;;  %v5571_v51 = vld [vmem:[%s5866_s17 + $0x160] sm:$0xff] }
 0x51c   : > { %v8292_v28 = vadd.f32 %v4295_v13, %v4294_v49  ;;  %v8294_v40 = vadd.f32 %v4367_v59, %v4366_v52  ;;  %v3980_v57 = vpop.permute.xlu1 %3979  ;;  %v3590_v14 = vpop.permute.xlu0 %3589  ;;  %vm8808_vm8 = vmmov %vm8723_vm0 }
 0x51d   : > { %v4177_v47 = vmul.f32 %v5561_v12, %v3980_v57  ;;  %v4084_v7 = vmul.f32 %v5562_v15, %v3590_v14  ;;  %v5572_v12 = vld [vmem:[%s5866_s17 + $0x258] sm:$0xff]  ;;  %v5573_v15 = vld [vmem:[%s5866_s17 + $0x350] sm:$0xff] }
 0x51f   : > { %v4439_v63 = vsel %vm8801_vm9, %v4177_v47, 0.0  ;;  %v4223_v17 = vsel %vm8802_vm10, %v4084_v7, 0.0  ;;  %vm8809_vm9 = vmmov %vm8723_vm0 }
 0x520   : > { %v8300_v38 = vadd.f32 %v4439_v63, %v4438_v45  ;;  %v4224_v58 = vadd.f32 %v4223_v17, %v4222_v5  ;;  %v3657_v30 = vpop.permute.xlu1 %3656  ;;  %v3787_v35 = vpop.permute.xlu0 %3786  ;;  %v5574_v17 = vld [vmem:[%s5866_s17 + $0x78] sm:$0xff]  ;;  %vm8810_vm10 = vmmov %vm8723_vm0 }
 0x521   : > { %v4100_v18 = vmul.f32 %v5563_v42, %v3657_v30  ;;  %v4131_v33 = vmul.f32 %v5564_v16, %v3787_v35  ;;  %v5575_v35 = vld [vmem:[%s5866_s17 + $0x1e0] sm:$0xff] }
 0x523   : > { %v4260_v48 = vsel %vm8803_vm3, %v4100_v18, 0.0  ;;  %v4332_v36 = vsel %vm8804_vm6, %v4131_v33, 0.0  ;;  %v5576_v33 = vld [vmem:[%s5866_s17 + $0x2d8] sm:$0xff]  ;;  %vm8811_vm3 = vmmov %vm8723_vm0 }
 0x524   : > { %v4261_v37 = vadd.f32 %v4260_v48, %v4259_v2  ;;  %v8306_v6 = vadd.f32 %v4332_v36, %v4331_v54  ;;  %v3917_v1 = vpop.permute.xlu1 %3916  ;;  %v4047_v49 = vpop.permute.xlu0 %4046  ;;  %v5567_v54 = vld [vmem:[%s5866_s17 + $0x2d0] sm:$0xff]  ;;  %vm8812_vm6 = vmmov %vm8723_vm0 }
 0x525   : > { %v4162_v56 = vmul.f32 %v5567_v54, %v3917_v1  ;;  %v4193_v26 = vmul.f32 %v5568_v3, %v4047_v49 }
 0x527   : > { %v4404_v22 = vsel %vm8806_vm15, %v4162_v56, 0.0  ;;  %v4476_v34 = vsel %vm8807_vm7, %v4193_v26, 0.0  ;;  %vm8814_vm15 = vmmov %vm8723_vm0  ;;  %v5581_v56 = vld [vmem:[%s5866_s17 + $0x170] sm:$0xff] }
 0x528   : > { %v3724_v52 = vpop.permute.xlu1 %3723  ;;  %v3854_v41 = vpop.permute.xlu0 %3853  ;;  %v4405_v16 = vadd.f32 %v4404_v22, %v8284_v31  ;;  %v8343_v1 = vadd.f32 %v4476_v34, %v8286_v44  ;;  %vm8815_vm7 = vmmov %vm8723_vm0 }
 0x529   : > { %v4116_v13 = vmul.f32 %v5571_v51, %v3724_v52  ;;  %v4147_v47 = vmul.f32 %v5572_v12, %v3854_v41  ;;  %v5577_v52 = vld [vmem:[%s5866_s17 + $0x168] sm:$0xff] }
 0x52b   : > { %v4297_v31 = vsel %vm8811_vm3, %v4116_v13, 0.0  ;;  %vm8819_vm3 = vmmov %vm8723_vm0 }
 0x52c   : > { %v3984_v27 = vpop.permute.xlu1 %3983  ;;  %v3594_v11 = vpop.permute.xlu0 %3593  ;;  %v4298_v22 = vadd.f32 %v4297_v31, %v8292_v28 }
 0x52d   : > { %v4085_v9 = vmul.f32 %v5565_v55, %v3594_v11  ;;  %v4178_v7 = vmul.f32 %v5573_v15, %v3984_v27  ;;  %v5579_v55 = vld [vmem:[%s5866_s17 + $0x3d0] sm:$0xff] }
 0x52f   : > { %v4225_v46 = vsel %vm8723_vm0, %v4085_v9, 0.0 }
 0x530   : > { %v3661_v43 = vpop.permute.xlu1 %3660  ;;  %v3791_v0 = vpop.permute.xlu0 %3790  ;;  %v4226_v59 = vadd.f32 %v4225_v46, %v4224_v58 }
 0x531   : > { %v4101_v61 = vmul.f32 %v5569_v10, %v3661_v43  ;;  %v4132_v42 = vmul.f32 %v5575_v35, %v3791_v0  ;;  %v4369_v0 = vsel %vm8812_vm6, %v4147_v47, 0.0  ;;  %v5582_v10 = vld [vmem:[%s5866_s17 + $0x1e8] sm:$0xff]  ;;  %v5583_v47 = vld [vmem:[%s5866_s17 + $0x358] sm:$0xff]  ;;  %vm8820_vm6 = vmmov %vm8723_vm0 }
 0x532   : > { %v5585_v35 = vld [vmem:[%s5866_s17 + $0x2e0] sm:$0xff] }
 0x533   : > { %v4262_v63 = vsel %vm8808_vm8, %v4101_v61, 0.0  ;;  %vm8816_vm8 = vmmov %vm8723_vm0 }
 0x534   : > { %v3921_v32 = vpop.permute.xlu1 %3920  ;;  %v4051_v20 = vpop.permute.xlu0 %4050  ;;  %v4263_v49 = vadd.f32 %v4262_v63, %v4261_v37 }
 0x535   : > { %v4163_v58 = vmul.f32 %v5576_v33, %v3921_v32  ;;  %v4441_v32 = vsel %vm8723_vm0, %v4178_v7, 0.0  ;;  %v4194_v37 = vmul.f32 %v5579_v55, %v4051_v20  ;;  %v5584_v7 = vld [vmem:[%s5866_s17 + $0x1f0] sm:$0xff]  ;;  %v5587_v33 = vld [vmem:[%s5866_s17 + $0x268] sm:$0xff] }
 0x538   : > { %v3728_v4 = vpop.permute.xlu1 %3727  ;;  %v8308_v45 = vpop.permute.xlu0 %3857 }
 0x539   : > { %v4117_v41 = vmul.f32 %v5577_v52, %v3728_v4  ;;  %v4406_v4 = vsel %vm8814_vm15, %v4163_v58, 0.0  ;;  %v5588_v58 = vld [vmem:[%s5866_s17 + $0x178] sm:$0xff]  ;;  %vm8822_vm15 = vmmov %vm8723_vm0 }
 0x53a   : > { %v4407_v51 = vadd.f32 %v4406_v4, %v4405_v16 }
 0x53b   : > { %v4299_v46 = vsel %vm8816_vm8, %v4117_v41, 0.0  ;;  %vm8824_vm8 = vmmov %vm8723_vm0 }
 0x53c   : > { %v8310_v5 = vpop.permute.xlu1 %3987  ;;  %v3598_v23 = vpop.permute.xlu0 %3597 }
 0x53d   : > { %v4086_v2 = vmul.f32 %v5566_v29, %v3598_v23  ;;  %v5578_v23 = vld [vmem:[%s5866_s17 + $0xf8] sm:$0xff]  ;;  %v4179_v28 = vmul.f32 %v5583_v47, %v8310_v5 }
 0x53f   : > { %v4227_v19 = vsel %vm8805_vm1, %v4086_v2, 0.0  ;;  %vm8813_vm1 = vmmov %vm8723_vm0  ;;  %v5580_v2 = vld [vmem:[%s5866_s17 + $0x260] sm:$0xff] }
 0x540   : > { %v3665_v50 = vpop.permute.xlu1 %3664  ;;  %v8312_v53 = vpop.permute.xlu0 %3794  ;;  %v4228_v18 = vadd.f32 %v4227_v19, %v4226_v59  ;;  %v4334_v44 = vsel %vm8813_vm1, %v4132_v42, 0.0  ;;  %v4148_v54 = vmul.f32 %v5580_v2, %v8308_v45  ;;  %v4370_v45 = vadd.f32 %v4369_v0, %v8294_v40  ;;  %vm8821_vm1 = vmmov %vm8723_vm0 }
 0x541   : > { %v4102_v62 = vmul.f32 %v5570_v39, %v3665_v50  ;;  %v4133_v61 = vmul.f32 %v5582_v10, %v8312_v53  ;;  %v4335_v34 = vadd.f32 %v4334_v44, %v8306_v6 }
 0x543   : > { %v4264_v48 = vsel %vm8809_vm9, %v4102_v62, 0.0  ;;  %vm8817_vm9 = vmmov %vm8723_vm0 }
 0x544   : > { %v8314_v24 = vpop.permute.xlu1 %3924  ;;  %v8316_v21 = vpop.permute.xlu0 %4054  ;;  %v4265_v9 = vadd.f32 %v4264_v48, %v4263_v49  ;;  %v4478_v13 = vsel %vm8817_vm9, %v4194_v37, 0.0  ;;  %v5589_v49 = vld [vmem:[%s5866_s17 + $0x360] sm:$0xff]  ;;  %vm8825_vm9 = vmmov %vm8723_vm0 }
 0x545   : > { %v4164_v42 = vmul.f32 %v5585_v35, %v8314_v24  ;;  %v4443_v24 = vsel %vm8723_vm0, %v4179_v28, 0.0 }
 0x548   : > { %v3732_v8 = vpop.permute.xlu1 %3731  ;;  %v8322_v60 = vpop.permute.xlu0 %3861 }
 0x549   : > { %v4118_v3 = vmul.f32 %v5581_v56, %v3732_v8  ;;  %v4442_v8 = vadd.f32 %v4441_v32, %v8300_v38  ;;  %v4336_v38 = vsel %vm8820_vm6, %v4133_v61, 0.0  ;;  %v4149_v5 = vmul.f32 %v5587_v33, %v8322_v60  ;;  %v5591_v56 = vld [vmem:[%s5866_s17 + $0x2e8] sm:$0xff]  ;;  %vm8828_vm6 = vmmov %vm8723_vm0 }
 0x54a   : > { %v5596_v33 = vld [vmem:[%s5866_s17 + $0x3e8] sm:$0xff] }
 0x54b   : > { %v4301_v40 = vsel %vm8819_vm3, %v4118_v3, 0.0  ;;  %vm8827_vm3 = vmmov %vm8723_vm0  ;;  %v4444_v61 = vadd.f32 %v4443_v24, %v4442_v8 }
 0x54c   : > { %v8331_v57 = vpop.permute.xlu1 %3991  ;;  %v3602_v14 = vpop.permute.xlu0 %3601 }
 0x54d   : > { %v4087_v30 = vmul.f32 %v5574_v17, %v3602_v14  ;;  %v4300_v14 = vadd.f32 %v4299_v46, %v4298_v22  ;;  %v4180_v52 = vmul.f32 %v5589_v49, %v8331_v57  ;;  %v4337_v57 = vadd.f32 %v4336_v38, %v4335_v34 }
 0x54f   : > { %v4229_v36 = vsel %vm8810_vm10, %v4087_v30, 0.0  ;;  %vm8818_vm10 = vmmov %vm8723_vm0 }
 0x550   : > { %v4230_v27 = vadd.f32 %v4229_v36, %v4228_v18  ;;  %v3669_v11 = vpop.permute.xlu1 %3668  ;;  %v3799_v43 = vpop.permute.xlu0 %3798  ;;  %v4371_v12 = vsel %vm8818_vm10, %v4148_v54, 0.0  ;;  %v5586_v18 = vld [vmem:[%s5866_s17 + $0x3d8] sm:$0xff]  ;;  %v4302_v36 = vadd.f32 %v4301_v40, %v4300_v14  ;;  %vm8826_vm10 = vmmov %vm8723_vm0 }
 0x551   : > { %v4103_v50 = vmul.f32 %v5578_v23, %v3669_v11  ;;  %v4134_v63 = vmul.f32 %v5584_v7, %v3799_v43  ;;  %v4195_v16 = vmul.f32 %v5586_v18, %v8316_v21  ;;  %v4479_v11 = vadd.f32 %v4478_v13, %v8343_v1  ;;  %v5590_v1 = vld [vmem:[%s5866_s17 + $0x1f8] sm:$0xff] }
 0x552   : > { %v4231_v29 = vrot.slane %v4230_v27, 4  ;;  %v4372_v43 = vadd.f32 %v4371_v12, %v4370_v45 }
 0x553   : > { %v4266_v26 = vsel %vm8815_vm7, %v4103_v50, 0.0  ;;  %v4338_v60 = vsel %vm8822_vm15, %v4134_v63, 0.0  ;;  %vm8823_vm7 = vmmov %vm8723_vm0  ;;  %v4480_v55 = vsel %vm8824_vm8, %v4195_v16, 0.0 }
 0x554   : > { %v4232_v19 = vadd.f32 %v4231_v29, %v4230_v27  ;;  %v4267_v39 = vadd.f32 %v4266_v26, %v4265_v9  ;;  %v3929_v20 = vpop.permute.xlu1 %3928  ;;  %v8360_v62 = vpop.permute.xlu0 %4058  ;;  %v4408_v44 = vsel %vm8823_vm7, %v4164_v42, 0.0  ;;  %v4373_v9 = vsel %vm8825_vm9, %v4149_v5, 0.0  ;;  %v5592_v26 = vld [vmem:[%s5866_s17 + $0x270] sm:$0xff]  ;;  %vm8830_vm15 = vmmov %vm8723_vm0 }
 0x555   : > { %v4445_v29 = vsel %vm8826_vm10, %v4180_v52, 0.0  ;;  %v4339_v54 = vadd.f32 %v4338_v60, %v4337_v57  ;;  %v4165_v3 = vmul.f32 %v5591_v56, %v3929_v20  ;;  %v4409_v13 = vadd.f32 %v4408_v44, %v4407_v51  ;;  %vm8831_vm7 = vmmov %vm8723_vm0 }
 0x556   : > { %v4233_v59 = vrot.slane %v4232_v19, 2  ;;  %v4268_v53 = vrot.slane %v4267_v39, 4  ;;  %v4374_v47 = vadd.f32 %v4373_v9, %v4372_v43  ;;  %v4446_v20 = vadd.f32 %v4445_v29, %v4444_v61  ;;  %vm8832_vm8 = vmmov %vm8723_vm0 }
 0x557   : > { %v4410_v8 = vsel %vm8828_vm6, %v4165_v3, 0.0  ;;  %vm8834_vm9 = vmmov %vm8723_vm0 }
 0x558   : > { %v4234_v6 = vadd.f32 %v4233_v59, %v4232_v19  ;;  %v4269_v15 = vadd.f32 %v4268_v53, %v4267_v39  ;;  %v3736_v17 = vpop.permute.xlu1 %3735  ;;  %v3866_v30 = vpop.permute.xlu0 %3865  ;;  %v4481_v59 = vadd.f32 %v4480_v55, %v4479_v11  ;;  %v5593_v53 = vld [vmem:[%s5866_s17 + $0x3e0] sm:$0xff]  ;;  %v4411_v11 = vadd.f32 %v4410_v8, %v4409_v13  ;;  %v5599_v55 = vld [vmem:[%s5866_s17 + $0x2f8] sm:$0xff]  ;;  %vm8835_vm10 = vmmov %vm8723_vm0 }
 0x559   : > { %v4119_v48 = vmul.f32 %v5588_v58, %v3736_v17  ;;  %v4150_v46 = vmul.f32 %v5592_v26, %v3866_v30  ;;  %v4196_v14 = vmul.f32 %v5593_v53, %v8360_v62  ;;  %v5595_v30 = vld [vmem:[%s5866_s17 + $0x368] sm:$0xff]  ;;  %v5597_v58 = vld [vmem:[%s5866_s17 + $0x278] sm:$0xff]  ;;  %vm8837_vm6 = vmmov %vm8723_vm0 }
 0x55a   : > { %v4235_v41 = vrot.slane %v4234_v6, 1  ;;  %v4270_v27 = vrot.slane %v4269_v15, 2 }
 0x55b   : > { %v4303_v31 = vsel %vm8821_vm1, %v4119_v48, 0.0  ;;  %v4375_v38 = vsel %vm8723_vm0, %v4150_v46, 0.0  ;;  %vm8829_vm1 = vmmov %vm8723_vm0 }
 0x55c   : > { %v4236_v21 = vadd.f32 %v4235_v41, %v4234_v6  ;;  %v4271_v0 = vadd.f32 %v4270_v27, %v4269_v15  ;;  %v4304_v32 = vadd.f32 %v4303_v31, %v4302_v36  ;;  %v3996_v23 = vpop.permute.xlu1 %3995  ;;  %v3803_v50 = vpop.permute.xlu0 %3802  ;;  %v5594_v15 = vld [vmem:[%s5866_s17 + $0x2f0] sm:$0xff]  ;;  %v4482_v18 = vsel %vm8829_vm1, %v4196_v14, 0.0  ;;  %v5602_v14 = vld [vmem:[%s5866_s17 + $0x3f8] sm:$0xff] }
 0x55d   : > { %v4135_v37 = vmul.f32 %v5590_v1, %v3803_v50  ;;  %v4181_v62 = vmul.f32 %v5595_v30, %v3996_v23  ;;  %v4376_v52 = vadd.f32 %v4375_v38, %v4374_v47  ;;  %v5598_v41 = vld [vmem:[%s5866_s17 + $0x370] sm:$0xff] }
 0x55e   : > { %v4272_v4 = vrot.slane %v4271_v0, 1  ;;  %v4305_v2 = vrot.slane %v4304_v32, 4  ;;  %v4496_v19 = vpack.c.bf16 %v4236_v21, %v4236_v21  ;;  %v4483_v21 = vadd.f32 %v4482_v18, %v4481_v59  ;;  %v5601_v59 = vld [vmem:[%s5866_s17 + $0x378] sm:$0xff] }
 0x55f   : > { %v4340_v10 = vsel %vm8827_vm3, %v4135_v37, 0.0  ;;  %v4447_v60 = vsel %vm8832_vm8, %v4181_v62, 0.0  ;;  %v5600_v37 = vld [vmem:[%s5866_s17 + $0x3f0] sm:$0xff]  ;;  %vm8836_vm3 = vmmov %vm8723_vm0 }
 0x560   : > { %v4273_v39 = vadd.f32 %v4272_v4, %v4271_v0  ;;  %v4306_v22 = vadd.f32 %v4305_v2, %v4304_v32  ;;  %v3933_v45 = vpop.permute.xlu1 %3932  ;;  %v4063_v34 = vpop.permute.xlu0 %4062  ;;  %v4341_v12 = vadd.f32 %v4340_v10, %v4339_v54  ;;  %v4523_v51 = vunpack.c.l.b16 %v4496_v19 }
 0x561   : > { %v4166_v7 = vmul.f32 %v5594_v15, %v3933_v45  ;;  %v4197_v5 = vmul.f32 %v5596_v33, %v4063_v34  ;;  %v4448_v56 = vadd.f32 %v4447_v60, %v4446_v20 }
 0x562   : > { %v4497_v28 = vpack.c.bf16 %v4273_v39, %v4273_v39  ;;  %v4307_v40 = vrot.slane %v4306_v22, 2  ;;  %v4342_v6 = vrot.slane %v4341_v12, 4 }
 0x563   : > { %v4412_v24 = vsel %vm8830_vm15, %v4166_v7, 0.0 }
 0x564   : > { %v4524_v63 = vunpack.c.l.b16 %v4497_v28  ;;  %v4308_v17 = vadd.f32 %v4307_v40, %v4306_v22  ;;  %v3870_v35 = vpop.permute.xlu1 %3869  ;;  %v4000_v42 = vpop.permute.xlu0 %3999  ;;  %v4343_v16 = vadd.f32 %v4342_v6, %v4341_v12  ;;  %v4413_v4 = vadd.f32 %v4412_v24, %v4411_v11 }
 0x565   : > { %v4151_v48 = vmul.f32 %v5597_v58, %v3870_v35  ;;  %v4182_v27 = vmul.f32 %v5598_v41, %v4000_v42 }
 0x566   : > { %v4531_v36 = vsel %vm3510_vm2, %v4524_v63, %v4523_v51  ;;  %v4309_v49 = vrot.slane %v4308_v17, 1  ;;  %v4344_v43 = vrot.slane %v4343_v16, 2  ;;  %vm8833_vm2 = vmmov %vm8723_vm0 }
 0x567   : > { %v4377_v31 = vsel %vm8831_vm7, %v4151_v48, 0.0  ;;  %v4484_v44 = vsel %vm8833_vm2, %v4197_v5, 0.0  ;;  %v4449_v54 = vsel %vm8834_vm9, %v4182_v27, 0.0 }
 0x568   : > { %v4310_v0 = vadd.f32 %v4309_v49, %v4308_v17  ;;  %v4378_v32 = vadd.f32 %v4377_v31, %v4376_v52  ;;  %v3937_v23 = vpop.permute.xlu1 %3936  ;;  %v4067_v50 = vpop.permute.xlu0 %4066  ;;  %v4345_v57 = vadd.f32 %v4344_v43, %v4343_v16  ;;  %v4485_v61 = vadd.f32 %v4484_v44, %v4483_v21 }
 0x569   : > { %v4167_v1 = vmul.f32 %v5599_v55, %v3937_v23  ;;  %v4198_v9 = vmul.f32 %v5600_v37, %v4067_v50  ;;  %v4450_v13 = vadd.f32 %v4449_v54, %v4448_v56 }
 0x56a   : > { %v4498_v29 = vpack.c.bf16 %v4310_v0, %v4310_v0  ;;  %v4379_v2 = vrot.slane %v4378_v32, 4  ;;  %v4346_v3 = vrot.slane %v4345_v57, 1 }
 0x56b   : > { %v4414_v26 = vsel %vm8835_vm10, %v4167_v1, 0.0  ;;  %v4486_v46 = vsel %vm8836_vm3, %v4198_v9, 0.0 }
 0x56c   : > { %v4525_v10 = vunpack.c.l.b16 %v4498_v29  ;;  %v4380_v19 = vadd.f32 %v4379_v2, %v4378_v32  ;;  %v4415_v39 = vadd.f32 %v4414_v26, %v4413_v4  ;;  %v4004_v22 = vpop.permute.xlu1 %4003  ;;  %v4071_v45 = vpop.permute.xlu0 %4070  ;;  %v4347_v34 = vadd.f32 %v4346_v3, %v4345_v57  ;;  %v5209_v4 = vld [vmem:[%s8530_s12] sm:$0xff]  }
 0x56d   : > { %v4183_v53 = vmul.f32 %v5601_v59, %v4004_v22  ;;  %v4199_v12 = vmul.f32 %v5602_v14, %v4071_v45  ;;  %v4487_v40 = vadd.f32 %v4486_v46, %v4485_v61  ;;  %v4906_v2 = vld [vmem:[%s8529_s11] ss:$0 sm:$0xff] }
 0x56e   : > { %v4532_v47 = vsel %vm3512_vm12, %v4525_v10, %v4531_v36  ;;  %v4381_v20 = vrot.slane %v4380_v19, 2  ;;  %v4416_v28 = vrot.slane %v4415_v39, 4  ;;  %v4499_v8 = vpack.c.bf16 %v4347_v34, %v4347_v34  ;;  %vm8838_vm12 = vmmov %vm8723_vm0 }
 0x56f   : > { %v4451_v38 = vsel %vm8837_vm6, %v4183_v53, 0.0  ;;  %v4488_v6 = vsel %vm8723_vm0, %v4199_v12, 0.0 }
 0x570   : > { %v4382_v15 = vadd.f32 %v4381_v20, %v4380_v19  ;;  %v4417_v7 = vadd.f32 %v4416_v28, %v4415_v39  ;;  %v4452_v51 = vadd.f32 %v4451_v38, %v4450_v13  ;;  %v4489_v63 = vadd.f32 %v4488_v6, %v4487_v40  ;;  %v4595_v26 = vpop.permute.xlu1 %4594 }
 0x571   : > { %v4526_v17 = vunpack.c.l.b16 %v4499_v8 }
 0x572   : > { %v4383_v30 = vrot.slane %v4382_v15, 1  ;;  %v4418_v62 = vrot.slane %v4417_v7, 2  ;;  %v4453_v35 = vrot.slane %v4452_v51, 4  ;;  %v4490_v42 = vrot.slane %v4489_v63, 4 }
 0x573   : > { %v4533_v18 = vsel %vm3514_vm13, %v4526_v17, %v4532_v47  ;;  %vm8839_vm13 = vmmov 0  }
 0x574   : > { %v4384_v16 = vadd.f32 %v4383_v30, %v4382_v15  ;;  %v4419_v33 = vadd.f32 %v4418_v62, %v4417_v7  ;;  %v4454_v5 = vadd.f32 %v4453_v35, %v4452_v51  ;;  %v4491_v58 = vadd.f32 %v4490_v42, %v4489_v63 }
 0x576   : > { %v4500_v48 = vpack.c.bf16 %v4384_v16, %v4384_v16  ;;  %v4420_v36 = vrot.slane %v4419_v33, 1  ;;  %v4455_v49 = vrot.slane %v4454_v5, 2  ;;  %v4492_v52 = vrot.slane %v4491_v58, 2 }
 0x578   : > { %v4527_v41 = vunpack.c.l.b16 %v4500_v48  ;;  %v4421_v27 = vadd.f32 %v4420_v36, %v4419_v33  ;;  %v4456_v11 = vadd.f32 %v4455_v49, %v4454_v5  ;;  %v4493_v43 = vadd.f32 %v4492_v52, %v4491_v58 }
 0x57a   : > { %v4534_v24 = vsel %vm3516_vm14, %v4527_v41, %v4533_v18  ;;  %v4501_v31 = vpack.c.bf16 %v4421_v27, %v4421_v27  ;;  %v4457_v21 = vrot.slane %v4456_v11, 1  ;;  %v4494_v0 = vrot.slane %v4493_v43, 1 }
 0x57b   : > { %vm8840_vm14 = vcmask 130048  }
 0x57c   : > { %v4528_v60 = vunpack.c.l.b16 %v4501_v31  ;;  %v4458_v32 = vadd.f32 %v4457_v21, %v4456_v11  ;;  %v4495_v23 = vadd.f32 %v4494_v0, %v4493_v43 }
 0x57e   : > { %v4535_v50 = vsel %vm3518_vm11, %v4528_v60, %v4534_v24  ;;  %v4502_v57 = vpack.c.bf16 %v4458_v32, %v4458_v32  ;;  %v4503_v44 = vpack.c.bf16 %v4495_v23, %v4495_v23 }
 0x580   : > { %v4529_v55 = vunpack.c.l.b16 %v4502_v57  ;;  %v4530_v1 = vunpack.c.l.b16 %v4503_v44 }
 0x582   : > { %v4536_v37 = vsel %vm3520_vm4, %v4529_v55, %v4535_v50 }
 0x583   : > { %v4537_v9 = vsel %vm3522_vm5, %v4530_v1, %v4536_v37 }
 0x584   : > { %v4538_v29 = vpack.c.b16 %v4537_v9, %v4537_v9 }
 0x586   : > { %5139 = vmatmul.mubr.msk.bf16.vlgmr.msra.gmra.mrb[60].mxu0 %vm8838_vm12, %v4538_v29 }
 0x587   : > { %5144 = vmatprep.mubr.msk.bf16.mxu0 %vm8839_vm13, %v8722_v25  ;;  %5143 = vmatpush3.bf16.msra.mxu0 %v5209_v4 }
 0x659   : > { %v4588_v54 = vpop.f32.mrb[60].mxu0 }
 0x65a   : > { %v4589_v56 = vadd.f32 %v4906_v2, %v4588_v54  ;;  %v5140_v3 = vpop.f32.mrb[61].mxu0 }
 0x65b   : > { %v4591_v46 = vpop.f32.mrb[62].mxu0 }
 0x65c   : > { %v4597_v10 = vadd.f32 %v4595_v26, %v4589_v56  ;;  %v5141_v25 = vpop.f32.mrb[63].mxu0 }
 0x65e   : > { %5470 = vtanh.f32 %v4597_v10 }
 0x668   : > { %v5471_v61 = vpop.eup %5470 }
 0x669   : > { %v4599_v19 = vpack.c.bf16 %v5471_v61, %v5471_v61 }
 0x66b   : > { %5145 = vmatmul.mubr.msk.bf16.vlgmr.msra.gmra.mrb[64].mxu0 %vm8840_vm14, %v4599_v19 }
 0x66c   : > { %5616 = shalt.err (!%p5613_p4)
}
 0x66d   : > { %s5617_s24 = scalar_lea.hbm %s8440_s16, 128  ;;  %s5621_s1 = scalar_lea.hbm %s8532_s14, 256 }
 0x66e   : > { %p5618_p7 = scmp.ne.s32.totalorder %s8440_s16, %s5617_s24  ;;  %p5622_p10 = scmp.lt.u32.totalorder %s8440_s16, %s8532_s14 }
 0x66f   : > { %p5623_p11 = scmp.lt.u32.totalorder %s5621_s1, %s5617_s24  ;;  %p5625_p13 = scmp.lt.u32.totalorder %s5617_s24, %s8440_s16 }
 0x670   : > { %p5619_p8 = pnand %p5618_p7, %p5827_p5 }
 0x671   : > { %p5624_p12 = por %p5623_p11, %p5622_p10 }
 0x672   : > { %p5620_p9 = pneg %p5619_p8 }
 0x673   : > { %p5626_p0 = por %p5625_p13, %p5624_p12 }
 0x675   : > { %p5627_p1 = pnand %p5626_p0, %p5620_p9 }
 0x677   : > { %5630 = shalt.err (!%p5627_p1)
}
 0x678   : > { %5152 = dma.vmem_to_hbm [thread:$0]  (%p5827_p5), %s4682_s4, 128, %s8440_s16, %s4663_s18   ;;  %v4910_v22 = vld [vmem:[%s8531_s13] ss:$0 sm:$0xff] }
 0x679   : > { %s561_s17 = scalar_lea.vmem %s8521_s3, %s5856_s19  ;;  %s8841_s24 = sshll.u32 %s7821_s6, 3 }
 0x67a   : > { %v4658_v39 = vld [vmem:[%s561_s17] sm:$0xff]  ;;  %s542_s1 = scalar_lea.vmem [#allocation5], %s8841_s24  ;;  %s8842_s18 = sshll.u32 %s5810_s9, 7 }
 0x67b   : > { %s4694_s2 = sshll.u32 %s542_s1, 4  ;;  %vm4659_vm11 = vcmp.eq.s32.totalorder %v4658_v39, 0  ;;  %s8475_s0 = scalar_lea.hbm %s8533_s15, %s8842_s18  ;;  %s8477_s2 = int_to_ptr.vmem [resolvable:$true] %s4694_s2 }
 0x67c   : > { %s4668_s19 = scalar_lea.sflag [#allocation6], %s7821_s6  ;;  %s5631_s5 = scalar_lea.vmem %s8477_s2, 128 }
 0x67d   : > { %p5632_p2 = scmp.ne.s32.totalorder %s8477_s2, %s5631_s5  ;;  %s5705_s9 = smov [#allocation5]  }
 0x67e   : > { %s5635_s17 = sshll.u32 %s5705_s9, 4  ;;  %s5636_s17 = int_to_ptr.vmem [resolvable:$false] %s5635_s17 }
 0x67f   : > { %p5633_p3 = pnand %p5632_p2, %p5827_p5  ;;  %s5637_s26 = scalar_lea.vmem %s5636_s17, 256 }
 0x680   : > { %p5638_p7 = scmp.lt.s32.totalorder %s8477_s2, %s5636_s17  ;;  %p5639_p8 = scmp.lt.s32.totalorder %s5637_s26, %s5631_s5 }
 0x681   : > { %p5634_p4 = pneg %p5633_p3 }
 0x682   : > { %p5640_p9 = por %p5639_p8, %p5638_p7 }
 0x684   : > { %p5641_p10 = pnand %p5640_p9, %p5634_p4 }
 0x73e   : > { %v4652_v45 = vpop.f32.mrb[64].mxu0 }
 0x73f   : > { %v4653_v34 = vadd.f32 %v4910_v22, %v4652_v45  ;;  %v5146_v13 = vpop.f32.mrb[65].mxu0 }
 0x740   : > { %v4655_v59 = vpop.f32.mrb[66].mxu0 }
 0x741   : > { %v4660_v53 = vsel %vm4659_vm11, -inf, %v4653_v34  ;;  %v5147_v14 = vpop.f32.mrb[67].mxu0 }
 0x742   : > { %4661 = vst [vmem:[%s542_s1] sm:$0xff] %v4660_v53 }
 0x743   : > { %5644 = shalt.err (!%p5641_p10)
}
 0x744   : > { %s5645_s6 = scalar_lea.hbm %s8475_s0, 128  ;;  %s5649_s1 = scalar_lea.hbm %s8533_s15, 256 }
 0x745   : > { %p5646_p11 = scmp.ne.s32.totalorder %s8475_s0, %s5645_s6  ;;  %p5650_p0 = scmp.lt.u32.totalorder %s8475_s0, %s8533_s15 }
 0x746   : > { %p5651_p1 = scmp.lt.u32.totalorder %s5649_s1, %s5645_s6  ;;  %p5653_p3 = scmp.lt.u32.totalorder %s5645_s6, %s8475_s0 }
 0x747   : > { %p5647_p12 = pnand %p5646_p11, %p5827_p5 }
 0x748   : > { %p5652_p2 = por %p5651_p1, %p5650_p0 }
 0x749   : > { %p5648_p13 = pneg %p5647_p12 }
 0x74a   : > { %p5654_p4 = por %p5653_p3, %p5652_p2 }
 0x74c   : > { %p5655_p7 = pnand %p5654_p4, %p5648_p13 }
 0x74e   : > { %5658 = shalt.err (!%p5655_p7)
}
 0x74f   : > { %5153 = dma.vmem_to_hbm [thread:$0]  (%p5827_p5), %s8477_s2, 128, %s8475_s0, %s4668_s19  }
 0x750 PF: > { %p5163_p8 = scmp.ge.s32.totalorder %s5697_s23, 2  ;;  %s4706_s4 = sand.u32 1, %s5685_s20  }
 0x751   : > { %s4707_s5 = scalar_lea.sflag [#allocation4], %s4706_s4 }
 0x752   : > { %p5157_p9 = pnand %p5163_p8, %p5831_p6 }
 0x754   : > { %5676 = dma.done.wait (!%p5157_p9), %s4707_s5, 128  }
 0x755   : > { %5678 = vsyncadd (!%p5157_p9), %s4707_s5, 4294967168  ;;  %s4716_s9 = scalar_lea.sflag [#allocation6], %s4706_s4 }
 0x756   : > { %5680 = dma.done.wait (!%p5157_p9), %s4716_s9, 128  }
 0x757   : > { %5682 = vsyncadd (!%p5157_p9), %s4716_s9, 4294967168  ;;  %p31_p5 = scmp.ge.s32.totalorder %s5814_s25, 4   ;;  %s8843_s20 = smov %s5689_s21 }
 0x758   : > { %s8844_s21 = smov %s5693_s22  ;;  %s8845_s22 = smov %s5825_s28 }
 0x759   : > { %s8846_s23 = smov %s5814_s25  ;;  %33 = sbr.rel (!%p31_p5) target bundleno = 12 (0xc), region = 137 }
 0x760   :  { %4721 = vsyncpa [#allocation4], 1 }
 0x761   :  { %4723 = vsyncpa [#allocation4 + $0x1], 1 }
 0x762   :  { %4724 = vsyncpa [#allocation6], 1 }
 0x763   :  { %4726 = vsyncpa [#allocation6 + $0x1], 1 }

</bundles_post_ra>
